<compile_context>
chip_gen: v5e
topology: v5e:2x2
jax: 0.10.0
libtpu: 0.0.40
codegen_flags: <defaults>
</compile_context>

<pallas_src>
import functools

import numpy as np
import jax
import jax.numpy as jnp
from jax.experimental import pallas as pl
from jax.experimental.pallas import tpu as pltpu


# ----------------------------------------------------------------------------
# Kernel  (one (C, t_tile) tile = all channels of t_tile time steps of one batch)
# ----------------------------------------------------------------------------
def transformer_block_kernel(
    x_ref,                            # (C, t)
    wqkv_ref, bqkv_ref,               # (3*JJC, C) bf16, (3*JJC, 1) f32
    r_ref,                            # (JJ, JJC)  bf16  0/1 score segment-sum
    msum_ref,                         # (JJ, JJ)   bf16  softmax-denominator broadcast
    ew_ref,                           # (JJC, JJ)  bf16  attention-weight expansion
    wp_ref, bp_ref,                   # (C, JJC) bf16, (C, 1) f32  (folded proj_out)
    w1_ref, b1_ref, w2_ref, b2_ref,   # feed-forward convs (k=1), transposed
    o_ref,                            # (C, t)
    *, jjc):
    """Fused JointAttnBlock + feed-forward for one tile of time steps."""
    mx = wqkv_ref.dtype                         # matmul / pair-product dtype (bf16)
    x_f32 = x_ref[...].astype(jnp.float32)      # residuals kept in f32
    x_mx = x_f32.astype(mx)

    # --- fused q/k/v projection, pre-expanded to (i, j, c) pair lanes ---------
    qkv = jnp.dot(wqkv_ref[...], x_mx,
                  preferred_element_type=jnp.float32) + bqkv_ref[...]
    q = qkv[:jjc].astype(mx)            # q[i,c] replicated over j   (scale folded in)
    k = qkv[jjc:2 * jjc].astype(mx)     # k[j,c] replicated over i
    v = qkv[2 * jjc:].astype(mx)        # v[i,c] replicated over j

    # --- scores[i*J + j, t] = sum_c scale*q[i,c,t] * k[j,c,t] -----------------
    p = q * k                                              # packed bf16 VALU
    scores = jnp.dot(r_ref[...], p, preferred_element_type=jnp.float32)

    # softmax over key joints j (sublanes grouped per query joint i).
    # Subtracting the per-column max is exact (same constant within each group).
    scores = scores - jnp.max(scores, axis=0, keepdims=True)
    e = jnp.exp(scores)
    denom = jnp.dot(msum_ref[...], e.astype(mx),
                    preferred_element_type=jnp.float32)
    w = (e * pl.reciprocal(denom, approx=True)).astype(mx)

    # --- attn[:, t] = sum_{i,j,c} w[i,j,t] * v[i,c,t] * wp[:, j*CJ + c] --------
    w_exp = jnp.dot(ew_ref[...], w,
                    preferred_element_type=jnp.float32).astype(mx)
    pv = w_exp * v                                         # packed bf16 VALU
    attn = jnp.dot(wp_ref[...], pv,
                   preferred_element_type=jnp.float32) + bp_ref[...]

    h1 = x_f32 + attn                           # residual after attention

    # --- feed-forward: SiLU -> conv(C, 4C) -> dropout(p=0) -> conv(4C, C) -----
    y = (h1 * jax.nn.sigmoid(h1)).astype(mx)    # SiLU (f32 EUP, bf16 matmul operand)
    y = jnp.dot(w1_ref[...], y, preferred_element_type=jnp.float32) + b1_ref[...]
    y = jnp.dot(w2_ref[...], y.astype(mx),
                preferred_element_type=jnp.float32) + b2_ref[...]

    o_ref[...] = (h1 + y).astype(o_ref.dtype)   # second residual


# ----------------------------------------------------------------------------
# Constant expansion matrices for the lane-dense joint attention
# ----------------------------------------------------------------------------
def _joint_attention_constants(J, CJ):
    """Pair lane a = i*J*CJ + j*CJ + c  (i: query joint, j: key joint)."""
    JJ, JJC, hid = J * J, J * J * CJ, J * CJ
    EQ = np.zeros((hid, JJC), np.float32)      # q[i,c]   -> lane a (for all j)
    EK = np.zeros((hid, JJC), np.float32)      # k[j,c]   -> lane a (for all i)
    R = np.zeros((JJC, JJ), np.float32)        # sum_c lane a -> score (i, j)
    EW = np.zeros((JJ, JJC), np.float32)       # w[i,j]   -> lane a (for all c)
    CONTR = np.zeros((JJC, hid), np.float32)   # lane a   -> hidden channel (j, c)
    eye = np.eye(CJ, dtype=np.float32)
    for i in range(J):
        for j in range(J):
            base = i * J * CJ + j * CJ
            EQ[i * CJ:(i + 1) * CJ, base:base + CJ] = eye
            EK[j * CJ:(j + 1) * CJ, base:base + CJ] = eye
            R[base:base + CJ, i * J + j] = 1.0
            EW[i * J + j, base:base + CJ] = 1.0
            CONTR[base:base + CJ, j * CJ:(j + 1) * CJ] = eye
    MSUM = np.kron(np.eye(J, dtype=np.float32), np.ones((J, J), np.float32))
    return EQ, EK, R, EW, CONTR, MSUM


def prepare_params(params, *, num_joints, c_per_joint,
                   matmul_dtype=jnp.bfloat16):
    """Fold expansion matrices + softmax scale into the weights, fuse q/k/v,
    and transpose everything for the time-on-lanes layout. Do once."""
    J, CJ = num_joints, c_per_joint
    EQ, EK, R, EW, CONTR, MSUM = _joint_attention_constants(J, CJ)
    f32 = jnp.float32
    scale = float(CJ) ** -0.5

    wq_e = (jnp.asarray(params['wq'], f32) * scale) @ EQ     # scale folded into q
    wk_e = jnp.asarray(params['wk'], f32) @ EK
    wv_e = jnp.asarray(params['wv'], f32) @ EQ               # EV == EQ
    bq_e = (jnp.asarray(params['bq'], f32) * scale) @ EQ
    bk_e = jnp.asarray(params['bk'], f32) @ EK
    bv_e = jnp.asarray(params['bv'], f32) @ EQ

    wqkv = jnp.concatenate([wq_e, wk_e, wv_e], axis=1)       # (C, 3*JJC)
    bqkv = jnp.concatenate([bq_e, bk_e, bv_e], axis=1)       # (1, 3*JJC)

    prep = dict(
        wqkv=wqkv.T.astype(matmul_dtype),                    # (3*JJC, C)
        bqkv=bqkv.T.astype(f32),                             # (3*JJC, 1)
        r=jnp.asarray(R.T).astype(matmul_dtype),             # (JJ, JJC) 0/1 exact
        msum=jnp.asarray(MSUM).astype(matmul_dtype),         # (JJ, JJ)  symmetric 0/1
        ew=jnp.asarray(EW.T).astype(matmul_dtype),            # (JJC, JJ) 0/1 exact
        wp=(CONTR @ jnp.asarray(params['wp'], f32)).T.astype(matmul_dtype),  # (C, JJC)
        bp=jnp.asarray(params['bp'], f32).T,                  # (C, 1)
        w1=jnp.asarray(params['w1'], f32).T.astype(matmul_dtype),   # (inner, C)
        b1=jnp.asarray(params['b1'], f32).T,                  # (inner, 1)
        w2=jnp.asarray(params['w2'], f32).T.astype(matmul_dtype),   # (C, inner)
        b2=jnp.asarray(params['b2'], f32).T,                  # (C, 1)
    )
    meta = dict(num_joints=J, c_per_joint=CJ, jj=J * J, jjc=J * J * CJ)
    return prep, meta


# ----------------------------------------------------------------------------
# Wrapper — consumes the PyTorch (B, C, T) tensor directly
# ----------------------------------------------------------------------------
def _round_up(x, m):
    return ((x + m - 1) // m) * m


def transformer_block(x_bct, prep, meta, *, max_t_tile=1024, interpret=False):
    """x_bct: (B, C, T). Returns (B, C, T)."""
    B, C, T = x_bct.shape
    jj, jjc = meta['jj'], meta['jjc']
    inner = prep['w1'].shape[0]

    # Lane-dense time tiles (multiple of 128). Keep >= 2 grid steps so v7x's
    # two TensorCores both get work (the B axis already provides that for B>=2).
    t_tile = min(max_t_tile, _round_up(T, 128))
    if B == 1:
        t_tile = min(t_tile, _round_up((T + 1) // 2, 128))
    t_tile = max(128, t_tile)

    # Ragged T: zero-pad the last tile (padded columns are bias-only, finite,
    # sliced off).  For a stack of blocks, hoist this pad to the stack level.
    T_pad = _round_up(T, t_tile)
    x_pad = x_bct if T_pad == T else jnp.pad(x_bct, ((0, 0), (0, 0), (0, T_pad - T)))
    grid = (B, T_pad // t_tile)

    kernel = functools.partial(transformer_block_kernel, jjc=jjc)

    def const_spec(arr):
        # Weights / constants: same block every grid step (stays VMEM-resident).
        return pl.BlockSpec(arr.shape, lambda b, t: (0, 0))

    n_cols = B * T_pad
    flops = 2 * n_cols * (
        C * 3 * jjc            # fused, expanded q/k/v projection
        + jjc * jj             # score segment-sum
        + jj * jj              # softmax denominator broadcast
        + jj * jjc             # attention-weight expansion
        + jjc * C              # (w*v) @ folded proj_out
        + C * inner + inner * C)   # feed-forward
    weight_bytes = sum(int(np.prod(v.shape)) * v.dtype.itemsize
                       for v in prep.values())
    cost = pl.CostEstimate(
        flops=int(flops),
        transcendentals=int(n_cols * (jj + C)),
        bytes_accessed=int(2 * n_cols * C * x_bct.dtype.itemsize + weight_bytes))

    out = pl.pallas_call(
        kernel,
        out_shape=jax.ShapeDtypeStruct((B, C, T_pad), x_bct.dtype),
        grid_spec=pltpu.PrefetchScalarGridSpec(
            num_scalar_prefetch=0,
            grid=grid,
            in_specs=[
                pl.BlockSpec((None, C, t_tile), lambda b, t: (b, 0, t)),   # x tile
                const_spec(prep['wqkv']), const_spec(prep['bqkv']),
                const_spec(prep['r']),
                const_spec(prep['msum']),
                const_spec(prep['ew']),
                const_spec(prep['wp']), const_spec(prep['bp']),
                const_spec(prep['w1']), const_spec(prep['b1']),
                const_spec(prep['w2']), const_spec(prep['b2']),
            ],
            out_specs=pl.BlockSpec((None, C, t_tile), lambda b, t: (b, 0, t)),
        ),
        compiler_params=pltpu.CompilerParams(
            dimension_semantics=("parallel", "parallel"),
            vmem_limit_bytes=32 * 1024 * 1024),
        cost_estimate=cost,
        interpret=interpret,
    )(x_pad,
      prep['wqkv'], prep['bqkv'], prep['r'], prep['msum'], prep['ew'],
      prep['wp'], prep['bp'], prep['w1'], prep['b1'], prep['w2'], prep['b2'])

    return out if T_pad == T else out[:, :, :T]


# ----------------------------------------------------------------------------
# Pure-JAX f32 reference (mirrors the PyTorch forward, NCT layout)
# ----------------------------------------------------------------------------
def reference_nct(x, p, J, CJ):
    B, C, T = x.shape
    H = J * CJ

    def conv(h, w, b):  # w stored (in, out); Conv1d kernel_size=1
        return jnp.einsum('co,bct->bot', w, h) + b.reshape(1, -1, 1)

    h = x  # norm (None) -> identity
    q = conv(h, p['wq'], p['bq'])
    k = conv(h, p['wk'], p['bk'])
    v = conv(h, p['wv'], p['bv'])

    def r_jc(z):  # 'b (j c) t -> (b t) j c'
        z = z.reshape(B, J, CJ, T)
        return jnp.transpose(z, (0, 3, 1, 2)).reshape(B * T, J, CJ)

    qr, kr, vr = r_jc(q), r_jc(k), r_jc(v)
    w = jnp.einsum('nic,njc->nij', qr, kr) * (float(CJ) ** -0.5)
    w = jax.nn.softmax(w, axis=-1)
    hcj = jnp.einsum('njc,nji->nci', vr, w)                    # (N, CJ, J)
    h2 = hcj.reshape(B, T, CJ, J)
    h2 = jnp.transpose(h2, (0, 3, 2, 1)).reshape(B, H, T)      # 'b (j c) t'
    h2 = conv(h2, p['wp'], p['bp'])
    h1 = x + h2

    y = jax.nn.silu(h1)
    y = conv(y, p['w1'], p['b1'])
    y = conv(y, p['w2'], p['b2'])
    return h1 + y


# ----------------------------------------------------------------------------
if __name__ == "__main__":
    key = jax.random.PRNGKey(0)

    # small config: in_channels=32, hidden_channels=64, num_joints=4, mult=4
    # T=500 -> padded to 512 lanes (exercises the ragged-T path), grid=(2, 1).
    B, T, C = 2, 500, 32
    J, CJ = 4, 16
    H = J * CJ
    INNER = int(C * 4)

    keys = jax.random.split(key, 13)

    def init(k, shape, scale=0.1):
        return jax.random.normal(k, shape, jnp.float32) * scale

    # Conv1d weights stored pre-transposed as (in, out); biases as (1, out).
    params = {
        'wq': init(keys[0], (C, H)),      'bq': init(keys[1], (1, H), 0.02),
        'wk': init(keys[2], (C, H)),      'bk': init(keys[3], (1, H), 0.02),
        'wv': init(keys[4], (C, H)),      'bv': init(keys[5], (1, H), 0.02),
        'wp': init(keys[6], (H, C)),      'bp': init(keys[7], (1, C), 0.02),
        'w1': init(keys[8], (C, INNER)),  'b1': init(keys[9], (1, INNER), 0.02),
        'w2': init(keys[10], (INNER, C)), 'b2': init(keys[11], (1, C), 0.02),
    }

    x = jax.random.normal(keys[12], (B, C, T), jnp.float32)   # PyTorch (b, c, t)

    prep, meta = prepare_params(params, num_joints=J, c_per_joint=CJ)
    out = transformer_block(x, prep, meta, max_t_tile=1024)
    out = jax.block_until_ready(out)

    ref = reference_nct(x, params, J, CJ)
    assert out.shape == (B, C, T)
    # Tolerance is loose because matmul operands + pair products are bf16 and
    # the softmax reciprocal is the approx EUP one; reference is pure f32.
    if not bool(jnp.allclose(out, ref, rtol=4e-2, atol=4e-2)):
        raise AssertionError(
            f"mismatch: max abs err = {float(jnp.max(jnp.abs(out - ref)))}")

    print("KERNEL_OK")
</pallas_src>

<mosaic_0001>
module attributes {stable_mosaic.version = 11 : i64} {
  func.func @transformer_block_kernel(%arg0: i32, %arg1: i32, %arg2: memref<1x32x512xf32, #tpu.memory_space<vmem>>, %arg3: memref<768x32xbf16, #tpu.memory_space<vmem>>, %arg4: memref<768x1xf32, #tpu.memory_space<vmem>>, %arg5: memref<16x256xbf16, #tpu.memory_space<vmem>>, %arg6: memref<16x16xbf16, #tpu.memory_space<vmem>>, %arg7: memref<256x16xbf16, #tpu.memory_space<vmem>>, %arg8: memref<32x256xbf16, #tpu.memory_space<vmem>>, %arg9: memref<32x1xf32, #tpu.memory_space<vmem>>, %arg10: memref<128x32xbf16, #tpu.memory_space<vmem>>, %arg11: memref<128x1xf32, #tpu.memory_space<vmem>>, %arg12: memref<32x128xbf16, #tpu.memory_space<vmem>>, %arg13: memref<32x1xf32, #tpu.memory_space<vmem>>, %arg14: memref<1x32x512xf32, #tpu.memory_space<vmem>>) attributes {dimension_semantics = [#tpu.dimension_semantics<parallel>, #tpu.dimension_semantics<parallel>], iteration_bounds = array<i64: 2, 1>, scalar_prefetch = 0 : i64, scratch_operands = 0 : i64, tpu.core_type = #tpu.core_type<tc>, window_params = [{transform_indices = @transform_0, window_bounds = array<i64: 1, 32, 512>}, {pipeline_mode = #tpu.pipeline_mode<synchronous>, transform_indices = @transform_1, window_bounds = array<i64: 768, 32>}, {pipeline_mode = #tpu.pipeline_mode<synchronous>, transform_indices = @transform_2, window_bounds = array<i64: 768, 1>}, {pipeline_mode = #tpu.pipeline_mode<synchronous>, transform_indices = @transform_3, window_bounds = array<i64: 16, 256>}, {pipeline_mode = #tpu.pipeline_mode<synchronous>, transform_indices = @transform_4, window_bounds = array<i64: 16, 16>}, {pipeline_mode = #tpu.pipeline_mode<synchronous>, transform_indices = @transform_5, window_bounds = array<i64: 256, 16>}, {pipeline_mode = #tpu.pipeline_mode<synchronous>, transform_indices = @transform_6, window_bounds = array<i64: 32, 256>}, {pipeline_mode = #tpu.pipeline_mode<synchronous>, transform_indices = @transform_7, window_bounds = array<i64: 32, 1>}, {pipeline_mode = #tpu.pipeline_mode<synchronous>, transform_indices = @transform_8, window_bounds = array<i64: 128, 32>}, {pipeline_mode = #tpu.pipeline_mode<synchronous>, transform_indices = @transform_9, window_bounds = array<i64: 128, 1>}, {pipeline_mode = #tpu.pipeline_mode<synchronous>, transform_indices = @transform_10, window_bounds = array<i64: 32, 128>}, {pipeline_mode = #tpu.pipeline_mode<synchronous>, transform_indices = @transform_11, window_bounds = array<i64: 32, 1>}, {transform_indices = @transform_12, window_bounds = array<i64: 1, 32, 512>}]} {
    %c0 = arith.constant 0 : index
    %c0_0 = arith.constant 0 : index
    %c0_1 = arith.constant 0 : index
    %0 = vector.load %arg2[%c0, %c0_0, %c0_1] : memref<1x32x512xf32, #tpu.memory_space<vmem>>, vector<1x32x512xf32>
    %1 = vector.shape_cast %0 : vector<1x32x512xf32> to vector<32x512xf32>
    %2 = arith.truncf %1 : vector<32x512xf32> to vector<32x512xbf16>
    %c0_2 = arith.constant 0 : index
    %c0_3 = arith.constant 0 : index
    %3 = vector.load %arg3[%c0_2, %c0_3] : memref<768x32xbf16, #tpu.memory_space<vmem>>, vector<768x32xbf16>
    %cst = arith.constant dense<0.000000e+00> : vector<768x512xf32>
    %4 = tpu.matmul %3, %2, %cst {dimension_numbers = #tpu.dot_dimension_numbers<[1], [0], [0], [1], [0, 0, 1, 1], [], []>} : vector<768x32xbf16>, vector<32x512xbf16>, vector<768x512xf32> -> vector<768x512xf32>
    %c0_4 = arith.constant 0 : index
    %c0_5 = arith.constant 0 : index
    %5 = vector.load %arg4[%c0_4, %c0_5] : memref<768x1xf32, #tpu.memory_space<vmem>>, vector<768x1xf32>
    %6 = vector.broadcast %5 : vector<768x1xf32> to vector<768x512xf32>
    %7 = arith.addf %4, %6 : vector<768x512xf32>
    %8 = vector.extract_strided_slice %7 {offsets = [0, 0], sizes = [256, 512], strides = [1, 1]} : vector<768x512xf32> to vector<256x512xf32>
    %9 = arith.truncf %8 : vector<256x512xf32> to vector<256x512xbf16>
    %10 = vector.extract_strided_slice %7 {offsets = [256, 0], sizes = [256, 512], strides = [1, 1]} : vector<768x512xf32> to vector<256x512xf32>
    %11 = arith.truncf %10 : vector<256x512xf32> to vector<256x512xbf16>
    %12 = vector.extract_strided_slice %7 {offsets = [512, 0], sizes = [256, 512], strides = [1, 1]} : vector<768x512xf32> to vector<256x512xf32>
    %13 = arith.truncf %12 : vector<256x512xf32> to vector<256x512xbf16>
    %14 = arith.mulf %9, %11 : vector<256x512xbf16>
    %c0_6 = arith.constant 0 : index
    %c0_7 = arith.constant 0 : index
    %15 = vector.load %arg5[%c0_6, %c0_7] : memref<16x256xbf16, #tpu.memory_space<vmem>>, vector<16x256xbf16>
    %cst_8 = arith.constant dense<0.000000e+00> : vector<16x512xf32>
    %16 = tpu.matmul %15, %14, %cst_8 {dimension_numbers = #tpu.dot_dimension_numbers<[1], [0], [0], [1], [0, 0, 1, 1], [], []>} : vector<16x256xbf16>, vector<256x512xbf16>, vector<16x512xf32> -> vector<16x512xf32>
    %cst_9 = arith.constant dense<0xFF800000> : vector<512xf32>
    %17 = vector.multi_reduction <maximumf>, %16, %cst_9 [0] : vector<16x512xf32> to vector<512xf32>
    %18 = vector.shape_cast %17 : vector<512xf32> to vector<1x512xf32>
    %19 = vector.broadcast %18 : vector<1x512xf32> to vector<16x512xf32>
    %20 = arith.subf %16, %19 : vector<16x512xf32>
    %21 = math.exp %20 : vector<16x512xf32>
    %c0_10 = arith.constant 0 : index
    %c0_11 = arith.constant 0 : index
    %22 = vector.load %arg6[%c0_10, %c0_11] : memref<16x16xbf16, #tpu.memory_space<vmem>>, vector<16x16xbf16>
    %23 = arith.truncf %21 : vector<16x512xf32> to vector<16x512xbf16>
    %cst_12 = arith.constant dense<0.000000e+00> : vector<16x512xf32>
    %24 = tpu.matmul %22, %23, %cst_12 {dimension_numbers = #tpu.dot_dimension_numbers<[1], [0], [0], [1], [0, 0, 1, 1], [], []>} : vector<16x16xbf16>, vector<16x512xbf16>, vector<16x512xf32> -> vector<16x512xf32>
    %25 = tpu.reciprocal %24 {approx = true} : vector<16x512xf32> -> vector<16x512xf32>
    %26 = arith.mulf %21, %25 : vector<16x512xf32>
    %27 = arith.truncf %26 : vector<16x512xf32> to vector<16x512xbf16>
    %c0_13 = arith.constant 0 : index
    %c0_14 = arith.constant 0 : index
    %28 = vector.load %arg7[%c0_13, %c0_14] : memref<256x16xbf16, #tpu.memory_space<vmem>>, vector<256x16xbf16>
    %cst_15 = arith.constant dense<0.000000e+00> : vector<256x512xf32>
    %29 = tpu.matmul %28, %27, %cst_15 {dimension_numbers = #tpu.dot_dimension_numbers<[1], [0], [0], [1], [0, 0, 1, 1], [], []>} : vector<256x16xbf16>, vector<16x512xbf16>, vector<256x512xf32> -> vector<256x512xf32>
    %30 = arith.truncf %29 : vector<256x512xf32> to vector<256x512xbf16>
    %31 = arith.mulf %30, %13 : vector<256x512xbf16>
    %c0_16 = arith.constant 0 : index
    %c0_17 = arith.constant 0 : index
    %32 = vector.load %arg8[%c0_16, %c0_17] : memref<32x256xbf16, #tpu.memory_space<vmem>>, vector<32x256xbf16>
    %cst_18 = arith.constant dense<0.000000e+00> : vector<32x512xf32>
    %33 = tpu.matmul %32, %31, %cst_18 {dimension_numbers = #tpu.dot_dimension_numbers<[1], [0], [0], [1], [0, 0, 1, 1], [], []>} : vector<32x256xbf16>, vector<256x512xbf16>, vector<32x512xf32> -> vector<32x512xf32>
    %c0_19 = arith.constant 0 : index
    %c0_20 = arith.constant 0 : index
    %34 = vector.load %arg9[%c0_19, %c0_20] : memref<32x1xf32, #tpu.memory_space<vmem>>, vector<32x1xf32>
    %35 = vector.broadcast %34 : vector<32x1xf32> to vector<32x512xf32>
    %36 = arith.addf %33, %35 : vector<32x512xf32>
    %37 = arith.addf %1, %36 : vector<32x512xf32>
    %38 = arith.negf %37 : vector<32x512xf32>
    %39 = math.exp %38 : vector<32x512xf32>
    %cst_21 = arith.constant 1.000000e+00 : f32
    %40 = vector.broadcast %cst_21 : f32 to vector<32x512xf32>
    %41 = arith.addf %40, %39 : vector<32x512xf32>
    %42 = arith.divf %40, %41 : vector<32x512xf32>
    %43 = arith.mulf %37, %42 : vector<32x512xf32>
    %44 = arith.truncf %43 : vector<32x512xf32> to vector<32x512xbf16>
    %c0_22 = arith.constant 0 : index
    %c0_23 = arith.constant 0 : index
    %45 = vector.load %arg10[%c0_22, %c0_23] : memref<128x32xbf16, #tpu.memory_space<vmem>>, vector<128x32xbf16>
    %cst_24 = arith.constant dense<0.000000e+00> : vector<128x512xf32>
    %46 = tpu.matmul %45, %44, %cst_24 {dimension_numbers = #tpu.dot_dimension_numbers<[1], [0], [0], [1], [0, 0, 1, 1], [], []>} : vector<128x32xbf16>, vector<32x512xbf16>, vector<128x512xf32> -> vector<128x512xf32>
    %c0_25 = arith.constant 0 : index
    %c0_26 = arith.constant 0 : index
    %47 = vector.load %arg11[%c0_25, %c0_26] : memref<128x1xf32, #tpu.memory_space<vmem>>, vector<128x1xf32>
    %48 = vector.broadcast %47 : vector<128x1xf32> to vector<128x512xf32>
    %49 = arith.addf %46, %48 : vector<128x512xf32>
    %c0_27 = arith.constant 0 : index
    %c0_28 = arith.constant 0 : index
    %50 = vector.load %arg12[%c0_27, %c0_28] : memref<32x128xbf16, #tpu.memory_space<vmem>>, vector<32x128xbf16>
    %51 = arith.truncf %49 : vector<128x512xf32> to vector<128x512xbf16>
    %cst_29 = arith.constant dense<0.000000e+00> : vector<32x512xf32>
    %52 = tpu.matmul %50, %51, %cst_29 {dimension_numbers = #tpu.dot_dimension_numbers<[1], [0], [0], [1], [0, 0, 1, 1], [], []>} : vector<32x128xbf16>, vector<128x512xbf16>, vector<32x512xf32> -> vector<32x512xf32>
    %c0_30 = arith.constant 0 : index
    %c0_31 = arith.constant 0 : index
    %53 = vector.load %arg13[%c0_30, %c0_31] : memref<32x1xf32, #tpu.memory_space<vmem>>, vector<32x1xf32>
    %54 = vector.broadcast %53 : vector<32x1xf32> to vector<32x512xf32>
    %55 = arith.addf %52, %54 : vector<32x512xf32>
    %56 = arith.addf %37, %55 : vector<32x512xf32>
    %c0_32 = arith.constant 0 : index
    %c0_33 = arith.constant 0 : index
    %c0_34 = arith.constant 0 : index
    %57 = vector.load %arg14[%c0_32, %c0_33, %c0_34] : memref<1x32x512xf32, #tpu.memory_space<vmem>>, vector<1x32x512xf32>
    %58 = vector.shape_cast %57 : vector<1x32x512xf32> to vector<32x512xf32>
    %59 = vector.shape_cast %56 : vector<32x512xf32> to vector<1x32x512xf32>
    tpu.vector_store %arg14[%c0_32, %c0_33, %c0_34], %59 {strides = array<i32>} : memref<1x32x512xf32, #tpu.memory_space<vmem>>, vector<1x32x512xf32>,
    return
  }
  func.func @transform_0(%arg0: i32, %arg1: i32) -> (i32, i32, i32) {
    %c0_i32 = arith.constant 0 : i32
    %c0_i32_0 = arith.constant 0 : i32
    return %arg0, %c0_i32, %arg1 : i32, i32, i32
  }
  func.func @transform_1(%arg0: i32, %arg1: i32) -> (i32, i32) {
    %c0_i32 = arith.constant 0 : i32
    %c0_i32_0 = arith.constant 0 : i32
    %c0_i32_1 = arith.constant 0 : i32
    return %c0_i32, %c0_i32_0 : i32, i32
  }
  func.func @transform_2(%arg0: i32, %arg1: i32) -> (i32, i32) {
    %c0_i32 = arith.constant 0 : i32
    %c0_i32_0 = arith.constant 0 : i32
    %c0_i32_1 = arith.constant 0 : i32
    return %c0_i32, %c0_i32_0 : i32, i32
  }
  func.func @transform_3(%arg0: i32, %arg1: i32) -> (i32, i32) {
    %c0_i32 = arith.constant 0 : i32
    %c0_i32_0 = arith.constant 0 : i32
    %c0_i32_1 = arith.constant 0 : i32
    return %c0_i32, %c0_i32_0 : i32, i32
  }
  func.func @transform_4(%arg0: i32, %arg1: i32) -> (i32, i32) {
    %c0_i32 = arith.constant 0 : i32
    %c0_i32_0 = arith.constant 0 : i32
    %c0_i32_1 = arith.constant 0 : i32
    return %c0_i32, %c0_i32_0 : i32, i32
  }
  func.func @transform_5(%arg0: i32, %arg1: i32) -> (i32, i32) {
    %c0_i32 = arith.constant 0 : i32
    %c0_i32_0 = arith.constant 0 : i32
    %c0_i32_1 = arith.constant 0 : i32
    return %c0_i32, %c0_i32_0 : i32, i32
  }
  func.func @transform_6(%arg0: i32, %arg1: i32) -> (i32, i32) {
    %c0_i32 = arith.constant 0 : i32
    %c0_i32_0 = arith.constant 0 : i32
    %c0_i32_1 = arith.constant 0 : i32
    return %c0_i32, %c0_i32_0 : i32, i32
  }
  func.func @transform_7(%arg0: i32, %arg1: i32) -> (i32, i32) {
    %c0_i32 = arith.constant 0 : i32
    %c0_i32_0 = arith.constant 0 : i32
    %c0_i32_1 = arith.constant 0 : i32
    return %c0_i32, %c0_i32_0 : i32, i32
  }
  func.func @transform_8(%arg0: i32, %arg1: i32) -> (i32, i32) {
    %c0_i32 = arith.constant 0 : i32
    %c0_i32_0 = arith.constant 0 : i32
    %c0_i32_1 = arith.constant 0 : i32
    return %c0_i32, %c0_i32_0 : i32, i32
  }
  func.func @transform_9(%arg0: i32, %arg1: i32) -> (i32, i32) {
    %c0_i32 = arith.constant 0 : i32
    %c0_i32_0 = arith.constant 0 : i32
    %c0_i32_1 = arith.constant 0 : i32
    return %c0_i32, %c0_i32_0 : i32, i32
  }
  func.func @transform_10(%arg0: i32, %arg1: i32) -> (i32, i32) {
    %c0_i32 = arith.constant 0 : i32
    %c0_i32_0 = arith.constant 0 : i32
    %c0_i32_1 = arith.constant 0 : i32
    return %c0_i32, %c0_i32_0 : i32, i32
  }
  func.func @transform_11(%arg0: i32, %arg1: i32) -> (i32, i32) {
    %c0_i32 = arith.constant 0 : i32
    %c0_i32_0 = arith.constant 0 : i32
    %c0_i32_1 = arith.constant 0 : i32
    return %c0_i32, %c0_i32_0 : i32, i32
  }
  func.func @transform_12(%arg0: i32, %arg1: i32) -> (i32, i32, i32) {
    %c0_i32 = arith.constant 0 : i32
    %c0_i32_0 = arith.constant 0 : i32
    return %arg0, %c0_i32, %arg1 : i32, i32, i32
  }
}

</mosaic_0001>

<bundles_post_ra>
// kernel: tpu_custom_call.1
= control target key start
LH: loop header
LB: loop body
LE: loop exit
PB: predicated region body
PF: predicated region fallthrough
CT: control target
= control target key end

     0   :  { %s10595_s0 = inlined_call_operand.vmem [shape: f32[2,32,512], index: 0, kind: input, shape index: {}]   ;;  %s10596_s1 = inlined_call_operand.vmem [shape: bf16[768,32], index: 1, kind: input, shape index: {}]   ;;  %s10597_s2 = inlined_call_operand.vmem [shape: f32[768,1], index: 2, kind: input, shape index: {}]   ;;  %s10598_s3 = inlined_call_operand.vmem [shape: bf16[16,256], index: 3, kind: input, shape index: {}]   ;;  %s10599_s4 = inlined_call_operand.vmem [shape: bf16[16,16], index: 4, kind: input, shape index: {}]   ;;  %s10600_s5 = inlined_call_operand.vmem [shape: bf16[256,16], index: 5, kind: input, shape index: {}]   ;;  %s10601_s6 = inlined_call_operand.vmem [shape: bf16[32,256], index: 6, kind: input, shape index: {}]   ;;  %s10602_s7 = inlined_call_operand.vmem [shape: f32[32,1], index: 7, kind: input, shape index: {}]   ;;  %s10603_s8 = inlined_call_operand.vmem [shape: bf16[128,32], index: 8, kind: input, shape index: {}]   ;;  %s10604_s9 = inlined_call_operand.vmem [shape: f32[128,1], index: 9, kind: input, shape index: {}]   ;;  %s10605_s10 = inlined_call_operand.vmem [shape: bf16[32,128], index: 10, kind: input, shape index: {}]   ;;  %s10606_s11 = inlined_call_operand.vmem [shape: f32[32,1], index: 11, kind: input, shape index: {}]   ;;  %s10607_s12 = inlined_call_operand.hbm [shape: f32[2,32,512], index: 12, kind: output, shape index: {}]  }
   0x1   :  { %10816 = sst [smem:[#allocation88_spill]] %s10595_s0 }
   0x2   :  { %10817 = sst [smem:[#allocation89_spill]] %s10596_s1 }
   0x3   :  { %17 = vsyncpa [#allocation3], 0 }
   0x4   :  { %19 = vsyncpa [#allocation3 + $0x1], 0  ;;  %s6698_s21 = smov 0   ;;  %s6700_s22 = smov 0  }
   0x5   :  { %s6702_s23 = smov 0   ;;  %s6704_s24 = smov 0  }
   0x6   :  { %s6706_s25 = smov 0   ;;  %s6708_s26 = smov 0  }
   0x7 LB: > { %s5649_s27 = sadd.s32 4294967295, %s6628_s26   ;;  %s5650_s28 = sadd.s32 4294967294, %s6628_s26   ;;  %s6628_s26 = sphi %s6708_s26, %s25_s26   ;;  %s6624_s25 = sphi %s6706_s25, %s11510_s25   ;;  %s6620_s24 = sphi %s6704_s24, %s11509_s24   ;;  %s6616_s23 = sphi %s6702_s23, %s11508_s23   ;;  %s6612_s22 = sphi %s6700_s22, %s11507_s22   ;;  %s6608_s21 = sphi %s6698_s21, %s11506_s21  }
   0x8   : > { %s37_s29 = sadd.s32 1, %s6624_s25  ;;  %s305_s30 = sadd.s32 1, %s6616_s23 }
   0x9   : > { %p39_p0 = scmp.ge.s32.totalorder %s37_s29, 2  ;;  %p315_p1 = scmp.ne.s32.totalorder %s6616_s23, %s6612_s22 }
   0xa   : > { %p316_p2 = scmp.eq.s32.totalorder %s5649_s27, 1  ;;  %p321_p3 = scmp.ne.s32.totalorder %s6612_s22, %s6608_s21 }
   0xb   : > { %s11512_s29 = smov (%p39_p0, %s37_s29), 0  ;;  %p322_p5 = scmp.eq.s32.totalorder %s5650_s28, 1 }
   0xc   : > { %10818 = sst [smem:[#allocation5_spill]] %s11512_s29  ;;  %p6738_p4 = por %p316_p2, %p315_p1 }
   0xd   : > { %s300_s14 = ssub.s32 %s6624_s25, %s11512_s29  ;;  %p5653_p6 = scmp.ge.s32.totalorder %s6628_s26, 1 }
   0xe   : > { %p303_p7 = scmp.eq.s32.totalorder %s300_s14, 0  ;;  %p6745_p8 = por %p322_p5, %p321_p3 }
   0xf   : > { %p386_p9 = scmp.lt.s32.totalorder %s6628_s26, 3 }
  0x10   : > { %s6751_s16 = scalar_select %p303_p7, %s6616_s23, %s305_s30  }
  0x11   : > { %p387_p10 = pnand %p5653_p6, %p386_p9 }
  0x13   : > { %390 = sbr.rel (%p387_p10) target bundleno = 2229 (0x8b5), region = 68 }
  0x18   : > { %v610_v0 = vld [vmem:[%s10597_s2 + $0x170] sm:$0xff]  ;;  %p433_p11 = scmp.lt.s32.totalorder %s6620_s24, 1  ;;  %v6630_v3 = vmov 0   ;;  %s10821_s0 = sld [smem:[#allocation88_spill]]  ;;  %v611_v7 = vld [vmem:[%s10597_s2 + $0x178] sm:$0xff]  ;;  %vm1380_vm0 = vcmask 261120  }
  0x19   : > { %v594_v1 = vld [vmem:[%s10597_s2 + $0xf0] sm:$0xff]  ;;  %6437 = vset.pattern.permute.xlu2 %v6630_v3  ;;  %6436 = vset.pattern.permute.xlu1 %v6630_v3  ;;  %v595_v12 = vld [vmem:[%s10597_s2 + $0xf8] sm:$0xff]  ;;  %s10822_s1 = sld [smem:[#allocation89_spill]]  ;;  %v576_v32 = vld [vmem:[%s10597_s2 + $0x60] sm:$0xff]  ;;  %vm3348_vm1 = vcmask 130048   ;;  %s429_s27 = sand.u32 1, %s6612_s22  }
  0x1a   : > { %v578_v2 = vld [vmem:[%s10597_s2 + $0x70] sm:$0xff]  ;;  %6435 = vset.pattern.permute.xlu0 %v6630_v3  ;;  %892 = vperm.xlu2 %6437, %v610_v0   ;;  %s434_s30 = scalar_select %p433_p11, %s6620_s24, 1  ;;  %v579_v13 = vld [vmem:[%s10597_s2 + $0x78] sm:$0xff]  ;;  %v593_v35 = vld [vmem:[%s10597_s2 + $0xe8] sm:$0xff] }
  0x1b   : > { %812 = vperm.xlu1 %6436, %v594_v1   ;;  %732 = vperm.xlu0 %6435, %v578_v2   ;;  %v627_v33 = vld [vmem:[%s10597_s2 + $0x1f8] sm:$0xff]  ;;  %v626_v34 = vld [vmem:[%s10597_s2 + $0x1f0] sm:$0xff]  ;;  %v592_v36 = vld [vmem:[%s10597_s2 + $0xe0] sm:$0xff]  ;;  %s5654_s28 = sshll.u32 %s429_s27, 7  ;;  %s6570_s17 = scalar_lea.hbm %s10607_s12, 256 }
  0x1c   : > { %s6294_s14 = sshll.u32 %s434_s30, 7  ;;  %v577_v37 = vld [vmem:[%s10597_s2 + $0x68] sm:$0xff]  ;;  %v624_v39 = vld [vmem:[%s10597_s2 + $0x1e0] sm:$0xff]  ;;  %v575_v42 = vld [vmem:[%s10597_s2 + $0x58] sm:$0xff]  ;;  %s6376_s30 = sshll.u32 %s6620_s24, 7 }
  0x1d   : > { %v609_v40 = vld [vmem:[%s10597_s2 + $0x168] sm:$0xff]  ;;  %v608_v41 = vld [vmem:[%s10597_s2 + $0x160] sm:$0xff]  ;;  %v574_v44 = vld [vmem:[%s10597_s2 + $0x50] sm:$0xff]  ;;  %s5566_s18 = scalar_lea.hbm %s10607_s12, %s6376_s30  ;;  %s5553_s24 = scalar_lea.sflag [#allocation3], %s429_s27 }
  0x1e   : > { %s6767_s29 = scalar_lea.vmem %s10821_s0, %s6294_s14  ;;  %v625_v43 = vld [vmem:[%s10597_s2 + $0x1e8] sm:$0xff]  ;;  %v606_v46 = vld [vmem:[%s10597_s2 + $0x150] sm:$0xff]  ;;  %v591_v48 = vld [vmem:[%s10597_s2 + $0xd8] sm:$0xff]  ;;  %s5569_s19 = sshll.u32 %s5566_s18, 4  ;;  %s5570_s19 = int_to_ptr.hbm [resolvable:$true] %s5569_s19 }
  0x1f   : > { %v452_v4 = vld [vmem:[%s6767_s29 + $0x40] sm:$0xff]  ;;  %v453_v6 = vld [vmem:[%s6767_s29 + $0x48] sm:$0xff]  ;;  %v454_v10 = vld [vmem:[%s6767_s29 + $0x50] sm:$0xff]  ;;  %s6564_s20 = sshra.s32 %s5570_s19, 4  ;;  %s6565_s20 = int_to_ptr.hbm [resolvable:$true] %s6564_s20 }
  0x20   : > { %v456_v5 = vld [vmem:[%s6767_s29 + $0x60] sm:$0xff]  ;;  %v457_v9 = vld [vmem:[%s6767_s29 + $0x68] sm:$0xff]  ;;  %v458_v11 = vld [vmem:[%s6767_s29 + $0x70] sm:$0xff]  ;;  %p6571_p1 = scmp.lt.s32.totalorder %s6565_s20, %s10607_s12 }
  0x21   : > { %v464_v8 = vpack.c.bf16 %v456_v5, %v452_v4  ;;  %v465_v14 = vpack.c.bf16 %v457_v9, %v453_v6  ;;  %v466_v15 = vpack.c.bf16 %v458_v11, %v454_v10  ;;  %v455_v16 = vld [vmem:[%s6767_s29 + $0x58] sm:$0xff]  ;;  %v444_v18 = vld [vmem:[%s6767_s29] sm:$0xff]  ;;  %v445_v21 = vld [vmem:[%s6767_s29 + $0x8] sm:$0xff] }
  0x22   : > { %v459_v17 = vld [vmem:[%s6767_s29 + $0x78] sm:$0xff]  ;;  %v448_v20 = vld [vmem:[%s6767_s29 + $0x20] sm:$0xff]  ;;  %v449_v22 = vld [vmem:[%s6767_s29 + $0x28] sm:$0xff]  ;;  %897 = vperm.xlu2 %6437, %v611_v7  }
  0x23   : > { %1531 = vmatpush.bf16.msra.mxu0 %v464_v8  ;;  %v467_v19 = vpack.c.bf16 %v459_v17, %v455_v16  ;;  %1780 = vmatpush.bf16.msra.mxu1 %v465_v14  ;;  %v460_v23 = vpack.c.bf16 %v448_v20, %v444_v18  ;;  %v461_v24 = vpack.c.bf16 %v449_v22, %v445_v21  ;;  %v446_v25 = vld [vmem:[%s6767_s29 + $0x10] sm:$0xff]  ;;  %v447_v27 = vld [vmem:[%s6767_s29 + $0x18] sm:$0xff]  ;;  %v6295_v31 = vld [vmem:[%s10822_s1] sm:$0xff] }
  0x24   : > { %2029 = vmatpush.bf16.msra.mxu2 %v466_v15  ;;  %v450_v26 = vld [vmem:[%s6767_s29 + $0x30] sm:$0xff]  ;;  %v451_v29 = vld [vmem:[%s6767_s29 + $0x38] sm:$0xff]  ;;  %817 = vperm.xlu1 %6436, %v595_v12   ;;  %v6296_v38 = vld [vmem:[%s10822_s1 + $0x8] sm:$0xff] }
  0x25   : > { %2278 = vmatpush.bf16.msra.mxu3 %v467_v19  ;;  %v462_v28 = vpack.c.bf16 %v450_v26, %v446_v25  ;;  %737 = vperm.xlu0 %6435, %v579_v13   ;;  %v463_v30 = vpack.c.bf16 %v451_v29, %v447_v27  ;;  %v6297_v45 = vld [vmem:[%s10822_s1 + $0x10] sm:$0xff]  ;;  %v623_v49 = vld [vmem:[%s10597_s2 + $0x1d8] sm:$0xff]  ;;  %v588_v53 = vld [vmem:[%s10597_s2 + $0xc0] sm:$0xff] }
  0x26   : > { %v590_v47 = vld [vmem:[%s10597_s2 + $0xd0] sm:$0xff]  ;;  %v607_v50 = vld [vmem:[%s10597_s2 + $0x158] sm:$0xff]  ;;  %v573_v54 = vld [vmem:[%s10597_s2 + $0x48] sm:$0xff] }
  0x27   : > { %1532 = vmatpush.bf16.msra.mxu0 %v460_v23  ;;  %1781 = vmatpush.bf16.msra.mxu1 %v461_v24  ;;  %v622_v51 = vld [vmem:[%s10597_s2 + $0x1d0] sm:$0xff]  ;;  %v6298_v52 = vld [vmem:[%s10822_s1 + $0x18] sm:$0xff]  ;;  %v572_v55 = vld [vmem:[%s10597_s2 + $0x40] sm:$0xff] }
  0x28   : > { %2030 = vmatpush.bf16.msra.mxu2 %v462_v28  ;;  %v605_v56 = vld [vmem:[%s10597_s2 + $0x148] sm:$0xff]  ;;  %v604_v57 = vld [vmem:[%s10597_s2 + $0x140] sm:$0xff]  ;;  %v570_v60 = vld [vmem:[%s10597_s2 + $0x30] sm:$0xff] }
  0x29   : > { %2279 = vmatpush.bf16.msra.mxu3 %v463_v30  ;;  %v589_v58 = vld [vmem:[%s10597_s2 + $0xc8] sm:$0xff]  ;;  %v6299_v59 = vld [vmem:[%s10822_s1 + $0x20] sm:$0xff]  ;;  %v587_v63 = vld [vmem:[%s10597_s2 + $0xb8] sm:$0xff] }
  0x2a   : > { %5849 = vmatmul.msk.bf16.vlgmr.msra.gmra.mxu0 %vm1380_vm0, %v6295_v31  ;;  %5897 = vmatmul.msk.bf16.vlgmr.msra.gmra.mxu1 %vm1380_vm0, %v6295_v31  ;;  %v621_v61 = vld [vmem:[%s10597_s2 + $0x1c8] sm:$0xff]  ;;  %v620_v62 = vld [vmem:[%s10597_s2 + $0x1c0] sm:$0xff]  ;;  %v586_v0 = vld [vmem:[%s10597_s2 + $0xb0] sm:$0xff] }
  0x2b   : > { %5945 = vmatmul.msk.bf16.vlgmr.msra.gmra.mxu2 %vm1380_vm0, %v6295_v31  ;;  %722 = vperm.xlu2 %6437, %v576_v32   ;;  %v571_v1 = vld [vmem:[%s10597_s2 + $0x38] sm:$0xff]  ;;  %v6300_v3 = vld [vmem:[%s10822_s1 + $0x28] sm:$0xff]  ;;  %v618_v4 = vld [vmem:[%s10597_s2 + $0x1b0] sm:$0xff] }
  0x2c   : > { %5993 = vmatmul.msk.bf16.vlgmr.msra.gmra.mxu3 %vm1380_vm0, %v6295_v31  ;;  %977 = vperm.xlu1 %6436, %v627_v33   ;;  %v603_v5 = vld [vmem:[%s10597_s2 + $0x138] sm:$0xff]  ;;  %v602_v6 = vld [vmem:[%s10597_s2 + $0x130] sm:$0xff]  ;;  %v569_v8 = vld [vmem:[%s10597_s2 + $0x28] sm:$0xff] }
  0x2d   : > { %972 = vperm.xlu0 %6435, %v626_v34   ;;  %v619_v9 = vld [vmem:[%s10597_s2 + $0x1b8] sm:$0xff]  ;;  %v568_v10 = vld [vmem:[%s10597_s2 + $0x20] sm:$0xff]  ;;  %v6301_v11 = vld [vmem:[%s10822_s1 + $0x30] sm:$0xff] }
  0x2e   : > { %v600_v13 = vld [vmem:[%s10597_s2 + $0x120] sm:$0xff]  ;;  %v585_v15 = vld [vmem:[%s10597_s2 + $0xa8] sm:$0xff]  ;;  %v6302_v22 = vld [vmem:[%s10822_s1 + $0x38] sm:$0xff] }
  0x2f   : > { %v584_v14 = vld [vmem:[%s10597_s2 + $0xa0] sm:$0xff]  ;;  %v617_v19 = vld [vmem:[%s10597_s2 + $0x1a8] sm:$0xff]  ;;  %v582_v26 = vld [vmem:[%s10597_s2 + $0x90] sm:$0xff] }
  0x30   : > { %v601_v20 = vld [vmem:[%s10597_s2 + $0x128] sm:$0xff]  ;;  %v616_v21 = vld [vmem:[%s10597_s2 + $0x1a0] sm:$0xff]  ;;  %v567_v27 = vld [vmem:[%s10597_s2 + $0x18] sm:$0xff] }
  0x31   : > { %v566_v28 = vld [vmem:[%s10597_s2 + $0x10] sm:$0xff]  ;;  %v599_v32 = vld [vmem:[%s10597_s2 + $0x118] sm:$0xff] }
  0x32   : > { %v583_v33 = vld [vmem:[%s10597_s2 + $0x98] sm:$0xff]  ;;  %v598_v34 = vld [vmem:[%s10597_s2 + $0x110] sm:$0xff] }
  0x33   : > { %807 = vperm.xlu2 %6437, %v593_v35   ;;  %v6303_v35 = vld [vmem:[%s10822_s1 + $0x40] sm:$0xff] }
  0x34   : > { %802 = vperm.xlu1 %6436, %v592_v36  }
  0x35   : > { %727 = vperm.xlu0 %6435, %v577_v37  }
  0x3a   : > { %5850 = vmatmul.msk.bf16.gmra.mxu0 %vm1380_vm0, %v6296_v38  ;;  %5898 = vmatmul.msk.bf16.gmra.mxu1 %vm1380_vm0, %v6296_v38 }
  0x3b   : > { %5946 = vmatmul.msk.bf16.gmra.mxu2 %vm1380_vm0, %v6296_v38  ;;  %962 = vperm.xlu2 %6437, %v624_v39  }
  0x3c   : > { %5994 = vmatmul.msk.bf16.gmra.mxu3 %vm1380_vm0, %v6296_v38  ;;  %887 = vperm.xlu1 %6436, %v609_v40  }
  0x3d   : > { %882 = vperm.xlu0 %6435, %v608_v41   ;;  %v564_v41 = vld [vmem:[%s10597_s2] sm:$0xff] }
  0x43   : > { %717 = vperm.xlu2 %6437, %v575_v42   ;;  %v614_v42 = vld [vmem:[%s10597_s2 + $0x190] sm:$0xff] }
  0x44   : > { %712 = vperm.xlu1 %6436, %v574_v44  }
  0x45   : > { %967 = vperm.xlu0 %6435, %v625_v43   ;;  %v615_v43 = vld [vmem:[%s10597_s2 + $0x198] sm:$0xff] }
  0x4a   : > { %5851 = vmatmul.msk.bf16.gmra.mxu0 %vm1380_vm0, %v6297_v45  ;;  %5899 = vmatmul.msk.bf16.gmra.mxu1 %vm1380_vm0, %v6297_v45 }
  0x4b   : > { %5947 = vmatmul.msk.bf16.gmra.mxu2 %vm1380_vm0, %v6297_v45  ;;  %872 = vperm.xlu2 %6437, %v606_v46  }
  0x4c   : > { %5995 = vmatmul.msk.bf16.gmra.mxu3 %vm1380_vm0, %v6297_v45  ;;  %797 = vperm.xlu1 %6436, %v591_v48  }
  0x4d   : > { %792 = vperm.xlu0 %6435, %v590_v47  }
  0x53   : > { %957 = vperm.xlu2 %6437, %v623_v49  }
  0x54   : > { %952 = vperm.xlu1 %6436, %v622_v51   ;;  %v581_v51 = vld [vmem:[%s10597_s2 + $0x88] sm:$0xff] }
  0x55   : > { %877 = vperm.xlu0 %6435, %v607_v50  }
  0x5a   : > { %5852 = vmatmul.msk.bf16.gmra.mxu0 %vm1380_vm0, %v6298_v52  ;;  %5900 = vmatmul.msk.bf16.gmra.mxu1 %vm1380_vm0, %v6298_v52 }
  0x5b   : > { %5948 = vmatmul.msk.bf16.gmra.mxu2 %vm1380_vm0, %v6298_v52  ;;  %782 = vperm.xlu2 %6437, %v588_v53   ;;  %v580_v53 = vld [vmem:[%s10597_s2 + $0x80] sm:$0xff] }
  0x5c   : > { %5996 = vmatmul.msk.bf16.gmra.mxu3 %vm1380_vm0, %v6298_v52  ;;  %707 = vperm.xlu1 %6436, %v573_v54   ;;  %v565_v52 = vld [vmem:[%s10597_s2 + $0x8] sm:$0xff] }
  0x5d   : > { %702 = vperm.xlu0 %6435, %v572_v55   ;;  %v6304_v55 = vld [vmem:[%s10822_s1 + $0x48] sm:$0xff] }
  0x63   : > { %867 = vperm.xlu2 %6437, %v605_v56  }
  0x64   : > { %862 = vperm.xlu1 %6436, %v604_v57  }
  0x65   : > { %787 = vperm.xlu0 %6435, %v589_v58  }
  0x6a   : > { %5853 = vmatmul.msk.bf16.gmra.mxu0 %vm1380_vm0, %v6299_v59  ;;  %5901 = vmatmul.msk.bf16.gmra.mxu1 %vm1380_vm0, %v6299_v59 }
  0x6b   : > { %5949 = vmatmul.msk.bf16.gmra.mxu2 %vm1380_vm0, %v6299_v59  ;;  %692 = vperm.xlu2 %6437, %v570_v60  }
  0x6c   : > { %5997 = vmatmul.msk.bf16.gmra.mxu3 %vm1380_vm0, %v6299_v59  ;;  %947 = vperm.xlu1 %6436, %v621_v61  }
  0x6d   : > { %942 = vperm.xlu0 %6435, %v620_v62  }
  0x73   : > { %777 = vperm.xlu2 %6437, %v587_v63  }
  0x74   : > { %772 = vperm.xlu1 %6436, %v586_v0   ;;  %v6919_v2 = vpop.permute.xlu2 %892 }
  0x75   : > { %697 = vperm.xlu0 %6435, %v571_v1   ;;  %10823 = vst [vmem:[#allocation6_spill] sm:$0xff] %v6919_v2 }
  0x7a   : > { %5854 = vmatmul.msk.bf16.gmra.mxu0 %vm1380_vm0, %v6300_v3  ;;  %5902 = vmatmul.msk.bf16.gmra.mxu1 %vm1380_vm0, %v6300_v3 }
  0x7b   : > { %5950 = vmatmul.msk.bf16.gmra.mxu2 %vm1380_vm0, %v6300_v3  ;;  %932 = vperm.xlu2 %6437, %v618_v4  }
  0x7c   : > { %5998 = vmatmul.msk.bf16.gmra.mxu3 %vm1380_vm0, %v6300_v3  ;;  %857 = vperm.xlu1 %6436, %v603_v5   ;;  %v6937_v7 = vpop.permute.xlu2 %897 }
  0x7d   : > { %852 = vperm.xlu0 %6435, %v602_v6   ;;  %10824 = vst [vmem:[#allocation7_spill] sm:$0xff] %v6937_v7 }
  0x83   : > { %687 = vperm.xlu2 %6437, %v569_v8   ;;  %v6305_v8 = vld [vmem:[%s10822_s1 + $0x50] sm:$0xff] }
  0x84   : > { %682 = vperm.xlu1 %6436, %v568_v10  }
  0x85   : > { %937 = vperm.xlu0 %6435, %v619_v9   ;;  %v6951_v12 = vpop.permute.xlu2 %722 }
  0x8a   : > { %5855 = vmatmul.msk.bf16.gmra.mxu0 %vm1380_vm0, %v6301_v11  ;;  %5903 = vmatmul.msk.bf16.gmra.mxu1 %vm1380_vm0, %v6301_v11 }
  0x8b   : > { %5951 = vmatmul.msk.bf16.gmra.mxu2 %vm1380_vm0, %v6301_v11  ;;  %842 = vperm.xlu2 %6437, %v600_v13  }
  0x8c   : > { %5999 = vmatmul.msk.bf16.gmra.mxu3 %vm1380_vm0, %v6301_v11  ;;  %767 = vperm.xlu1 %6436, %v585_v15  }
  0x8d   : > { %762 = vperm.xlu0 %6435, %v584_v14   ;;  %v6966_v16 = vpop.permute.xlu1 %812  ;;  %v6968_v17 = vpop.permute.xlu0 %732 }
  0x8e   : > { %v6970_v18 = vpop.permute.xlu2 %807 }
  0x93   : > { %927 = vperm.xlu2 %6437, %v617_v19  }
  0x94   : > { %922 = vperm.xlu1 %6436, %v616_v21  }
  0x95   : > { %847 = vperm.xlu0 %6435, %v601_v20  }
  0x96   : > { %v6984_v23 = vpop.permute.xlu1 %817  ;;  %v6988_v25 = vpop.permute.xlu2 %962 }
  0x97   : > { %v6986_v24 = vpop.permute.xlu0 %737  ;;  %10825 = vst [vmem:[#allocation8_spill] sm:$0xff] %v6988_v25 }
  0x9a   : > { %5856 = vmatmul.msk.bf16.gmra.mxu0 %vm1380_vm0, %v6302_v22  ;;  %5904 = vmatmul.msk.bf16.gmra.mxu1 %vm1380_vm0, %v6302_v22 }
  0x9b   : > { %5952 = vmatmul.msk.bf16.gmra.mxu2 %vm1380_vm0, %v6302_v22  ;;  %752 = vperm.xlu2 %6437, %v582_v26  }
  0x9c   : > { %6000 = vmatmul.msk.bf16.gmra.mxu3 %vm1380_vm0, %v6302_v22  ;;  %677 = vperm.xlu1 %6436, %v567_v27  }
  0x9d   : > { %672 = vperm.xlu0 %6435, %v566_v28  }
  0x9e   : > { %v7003_v29 = vpop.permute.xlu1 %977  ;;  %v7007_v31 = vpop.permute.xlu2 %717 }
  0x9f   : > { %10826 = vst [vmem:[#allocation9_spill] sm:$0xff] %v7003_v29  ;;  %v7005_v30 = vpop.permute.xlu0 %972 }
  0xa0   : > { %10827 = vst [vmem:[#allocation10_spill] sm:$0xff] %v7005_v30 }
  0xa3   : > { %837 = vperm.xlu2 %6437, %v599_v32  }
  0xa4   : > { %832 = vperm.xlu1 %6436, %v598_v34  }
  0xa5   : > { %757 = vperm.xlu0 %6435, %v583_v33   ;;  %v6306_v33 = vld [vmem:[%s10822_s1 + $0x58] sm:$0xff] }
  0xa6   : > { %v7023_v37 = vpop.permute.xlu1 %802  ;;  %v7027_v39 = vpop.permute.xlu2 %872 }
  0xa7   : > { %v7021_v36 = vpop.f32.mrf.mxu0  ;;  %v7025_v38 = vpop.permute.xlu0 %727  ;;  %10828 = vst [vmem:[#allocation11_spill] sm:$0xff] %v7027_v39 }
  0xa8   : > { %v7029_v40 = vpop.f32.mrf.mxu1 }
  0xaa   : > { %5857 = vmatmul.msk.bf16.gmra.mxu0 %vm1380_vm0, %v6303_v35  ;;  %5905 = vmatmul.msk.bf16.gmra.mxu1 %vm1380_vm0, %v6303_v35 }
  0xab   : > { %5953 = vmatmul.msk.bf16.gmra.mxu2 %vm1380_vm0, %v6303_v35  ;;  %662 = vperm.xlu2 %6437, %v564_v41  }
  0xac   : > { %6001 = vmatmul.msk.bf16.gmra.mxu3 %vm1380_vm0, %v6303_v35  ;;  %917 = vperm.xlu1 %6436, %v615_v43  }
  0xad   : > { %912 = vperm.xlu0 %6435, %v614_v42  }
  0xae   : > { %v7044_v44 = vpop.f32.mrf.mxu2  ;;  %v7050_v47 = vpop.permute.xlu1 %887 }
  0xaf   : > { %v7046_v45 = vpop.f32.mrf.mxu3  ;;  %v7048_v46 = vpop.f32.mrf.mxu0  ;;  %10829 = vst [vmem:[#allocation12_spill] sm:$0xff] %v7050_v47 }
  0xb0   : > { %v7052_v48 = vpop.permute.xlu0 %882  ;;  %v7054_v49 = vpop.permute.xlu2 %957 }
  0xb1   : > { %10830 = vst [vmem:[#allocation13_spill] sm:$0xff] %v7052_v48  ;;  %v7056_v50 = vpop.f32.mrf.mxu1 }
  0xb2   : > { %10831 = vst [vmem:[#allocation14_spill] sm:$0xff] %v7054_v49 }
  0xb3   : > { %747 = vperm.xlu2 %6437, %v581_v51  }
  0xb4   : > { %742 = vperm.xlu1 %6436, %v580_v53  }
  0xb5   : > { %667 = vperm.xlu0 %6435, %v565_v52  }
  0xb6   : > { %v7067_v54 = vpop.f32.mrf.mxu2  ;;  %v7078_v59 = vpop.permute.xlu1 %712 }
  0xb7   : > { %v7072_v56 = vpop.f32.mrf.mxu3  ;;  %v7074_v57 = vpop.f32.mrf.mxu0 }
  0xb8   : > { %v7076_v58 = vpop.permute.xlu0 %967  ;;  %v7080_v60 = vpop.permute.xlu2 %782 }
  0xb9   : > { %10832 = vst [vmem:[#allocation15_spill] sm:$0xff] %v7076_v58  ;;  %v7082_v61 = vpop.f32.mrf.mxu1 }
  0xba   : > { %5858 = vmatmul.msk.bf16.gmra.mxu0 %vm1380_vm0, %v6304_v55  ;;  %5906 = vmatmul.msk.bf16.gmra.mxu1 %vm1380_vm0, %v6304_v55 }
  0xbb   : > { %5954 = vmatmul.msk.bf16.gmra.mxu2 %vm1380_vm0, %v6304_v55 }
  0xbc   : > { %6002 = vmatmul.msk.bf16.gmra.mxu3 %vm1380_vm0, %v6304_v55 }
  0xbe   : > { %v7088_v62 = vpop.f32.mrf.mxu2  ;;  %v7096_v3 = vpop.permute.xlu1 %797 }
  0xbf   : > { %v7090_v63 = vpop.f32.mrf.mxu3  ;;  %v7092_v0 = vpop.f32.mrf.mxu0 }
  0xc0   : > { %v7094_v1 = vpop.permute.xlu0 %792  ;;  %v7098_v4 = vpop.permute.xlu2 %867 }
  0xc1   : > { %10833 = vst [vmem:[#allocation16_spill] sm:$0xff] %v7098_v4  ;;  %v7100_v5 = vpop.f32.mrf.mxu1 }
  0xc6   : > { %v7102_v6 = vpop.f32.mrf.mxu2  ;;  %v7113_v13 = vpop.permute.xlu1 %952 }
  0xc7   : > { %v7107_v9 = vpop.f32.mrf.mxu3  ;;  %v7109_v10 = vpop.f32.mrf.mxu0  ;;  %10835 = vst [vmem:[#allocation18_spill] sm:$0xff] %v7113_v13 }
  0xc8   : > { %v7111_v11 = vpop.permute.xlu0 %877  ;;  %v693_v14 = vpop.permute.xlu2 %692 }
  0xc9   : > { %10834 = vst [vmem:[#allocation17_spill] sm:$0xff] %v7111_v11  ;;  %v7115_v15 = vpop.f32.mrf.mxu1 }
  0xca   : > { %5859 = vmatmul.msk.bf16.gmra.mxu0 %vm1380_vm0, %v6305_v8  ;;  %5907 = vmatmul.msk.bf16.gmra.mxu1 %vm1380_vm0, %v6305_v8 }
  0xcb   : > { %5955 = vmatmul.msk.bf16.gmra.mxu2 %vm1380_vm0, %v6305_v8 }
  0xcc   : > { %6003 = vmatmul.msk.bf16.gmra.mxu3 %vm1380_vm0, %v6305_v8 }
  0xce   : > { %v7121_v19 = vpop.f32.mrf.mxu2  ;;  %v7125_v22 = vpop.permute.xlu1 %707 }
  0xcf   : > { %v7123_v20 = vpop.f32.mrf.mxu3  ;;  %v1546_v21 = vpop.f32.mrf.mxu0 }
  0xd0   : > { %v703_v26 = vpop.permute.xlu0 %702  ;;  %v7127_v27 = vpop.permute.xlu2 %777 }
  0xd1   : > { %v1795_v28 = vpop.f32.mrf.mxu1 }
  0xd6   : > { %v2044_v32 = vpop.f32.mrf.mxu2  ;;  %v7132_v41 = vpop.permute.xlu1 %862 }
  0xd7   : > { %v2293_v34 = vpop.f32.mrf.mxu3  ;;  %v1549_v35 = vpop.f32.mrf.mxu0 }
  0xd8   : > { %v7134_v42 = vpop.permute.xlu0 %787  ;;  %v1550_v43 = vadd.f32 %v1549_v35, %v693_v14  ;;  %v7136_v51 = vpop.permute.xlu2 %932 }
  0xd9   : > { %10836 = vst [vmem:[#allocation19_spill] sm:$0xff] %v7136_v51  ;;  %v1798_v52 = vpop.f32.mrf.mxu1 }
  0xda   : > { %v1799_v53 = vadd.f32 %v1798_v52, %v693_v14  ;;  %5860 = vmatmul.msk.bf16.gmra.mxu0 %vm1380_vm0, %v6306_v33  ;;  %5908 = vmatmul.msk.bf16.gmra.mxu1 %vm1380_vm0, %v6306_v33 }
  0xdb   : > { %5956 = vmatmul.msk.bf16.gmra.mxu2 %vm1380_vm0, %v6306_v33 }
  0xdc   : > { %v7141_v55 = vpack.c.bf16 %v1799_v53, %v1550_v43  ;;  %6004 = vmatmul.msk.bf16.gmra.mxu3 %vm1380_vm0, %v6306_v33 }
  0xde   : > { %v2047_v8 = vpop.f32.mrf.mxu2  ;;  %v7144_v35 = vpop.permute.xlu1 %947 }
  0xdf   : > { %v2048_v29 = vadd.f32 %v2047_v8, %v693_v14  ;;  %v2296_v30 = vpop.f32.mrf.mxu3  ;;  %v1551_v58 = vpop.f32.mrf.mxu0  ;;  %10837 = vst [vmem:[#allocation20_spill] sm:$0xff] %v7144_v35 }
  0xe0   : > { %v2297_v25 = vadd.f32 %v2296_v30, %v693_v14  ;;  %v7146_v49 = vpop.permute.xlu0 %942  ;;  %v688_v52 = vpop.permute.xlu2 %687  ;;  %v6307_v30 = vld [vmem:[%s10822_s1 + $0x60] sm:$0xff] }
  0xe1   : > { %10838 = vst [vmem:[#allocation21_spill] sm:$0xff] %v7146_v49  ;;  %v1800_v13 = vpop.f32.mrf.mxu1  ;;  %v1547_v7 = vadd.f32 %v1546_v21, %v688_v52  ;;  %v1796_v2 = vadd.f32 %v1795_v28, %v688_v52  ;;  %v2045_v47 = vadd.f32 %v2044_v32, %v688_v52  ;;  %v2294_v43 = vadd.f32 %v2293_v34, %v688_v52 }
  0xe2   : > { %v7148_v51 = vpack.c.bf16 %v2297_v25, %v2048_v29 }
  0xe3   : > { %v7150_v53 = vpack.c.bf16 %v1796_v2, %v1547_v7  ;;  %v7152_v33 = vpack.c.bf16 %v2294_v43, %v2045_v47 }
  0xe6   : > { %v2049_v8 = vpop.f32.mrf.mxu2  ;;  %v7157_v49 = vpop.permute.xlu1 %772 }
  0xe7   : > { %v2298_v14 = vpop.f32.mrf.mxu3  ;;  %v1554_v35 = vpop.f32.mrf.mxu0 }
  0xe8   : > { %v698_v48 = vpop.permute.xlu0 %697  ;;  %v1555_v25 = vadd.f32 %v1554_v35, %v703_v26 }
  0xe9   : > { %v1552_v29 = vadd.f32 %v1551_v58, %v698_v48  ;;  %v1801_v21 = vadd.f32 %v1800_v13, %v698_v48  ;;  %v2050_v28 = vadd.f32 %v2049_v8, %v698_v48  ;;  %v2299_v32 = vadd.f32 %v2298_v14, %v698_v48  ;;  %v1803_v34 = vpop.f32.mrf.mxu1 }
  0xea   : > { %v1804_v2 = vadd.f32 %v1803_v34, %v703_v26  ;;  %5861 = vmatmul.msk.bf16.gmra.mxu0 %vm1380_vm0, %v6307_v30  ;;  %5909 = vmatmul.msk.bf16.gmra.mxu1 %vm1380_vm0, %v6307_v30 }
  0xeb   : > { %v7160_v7 = vpack.c.bf16 %v2299_v32, %v2050_v28  ;;  %5957 = vmatmul.msk.bf16.gmra.mxu2 %vm1380_vm0, %v6307_v30  ;;  %v7164_v47 = vpack.c.bf16 %v1801_v21, %v1552_v29 }
  0xec   : > { %v7166_v52 = vpack.c.bf16 %v1804_v2, %v1555_v25  ;;  %6005 = vmatmul.msk.bf16.gmra.mxu3 %vm1380_vm0, %v6307_v30  ;;  %v6308_v30 = vld [vmem:[%s10822_s1 + $0x68] sm:$0xff] }
  0xed   : > { %10839 = vst [vmem:[#allocation22_spill] sm:$0xff] %v7160_v7 }
  0xee   : > { %10840 = vst [vmem:[#allocation23_spill] sm:$0xff] %v7166_v52  ;;  %v2052_v58 = vpop.f32.mrf.mxu2  ;;  %v7169_v8 = vpop.permute.xlu1 %857 }
  0xef   : > { %v2053_v13 = vadd.f32 %v2052_v58, %v703_v26  ;;  %v2301_v35 = vpop.f32.mrf.mxu3  ;;  %v1556_v48 = vpop.f32.mrf.mxu0 }
  0xf0   : > { %v2302_v43 = vadd.f32 %v2301_v35, %v703_v26  ;;  %v1557_v14 = vadd.f32 %v1556_v48, %v7125_v22 }
  0xf1   : > { %v1805_v28 = vpop.f32.mrf.mxu1 }
  0xf2   : > { %v7172_v32 = vpack.c.bf16 %v2302_v43, %v2053_v13  ;;  %v1806_v34 = vadd.f32 %v1805_v28, %v7125_v22 }
  0xf4   : > { %10841 = vst [vmem:[#allocation24_spill] sm:$0xff] %v7172_v32  ;;  %v7175_v29 = vpack.c.bf16 %v1806_v34, %v1557_v14 }
  0xf6   : > { %10842 = vst [vmem:[#allocation25_spill] sm:$0xff] %v7175_v29  ;;  %v2054_v25 = vpop.f32.mrf.mxu2  ;;  %v683_v35 = vpop.permute.xlu1 %682 }
  0xf7   : > { %v2055_v21 = vadd.f32 %v2054_v25, %v7125_v22  ;;  %v2303_v2 = vpop.f32.mrf.mxu3  ;;  %v1559_v26 = vpop.f32.mrf.mxu0  ;;  %v1545_v13 = vadd.f32 %v7109_v10, %v683_v35  ;;  %v1794_v43 = vadd.f32 %v7115_v15, %v683_v35  ;;  %v2043_v14 = vadd.f32 %v7121_v19, %v683_v35 }
  0xf8   : > { %v2304_v58 = vadd.f32 %v2303_v2, %v7125_v22  ;;  %v1560_v48 = vadd.f32 %v1559_v26, %v7078_v59  ;;  %v2292_v28 = vadd.f32 %v7123_v20, %v683_v35  ;;  %v7197_v15 = vpop.permute.xlu2 %842 }
  0xf9   : > { %v1808_v34 = vpop.f32.mrf.mxu1  ;;  %v7195_v10 = vpack.c.bf16 %v1794_v43, %v1545_v13 }
  0xfa   : > { %v7187_v11 = vpack.c.bf16 %v2304_v58, %v2055_v21  ;;  %v1809_v25 = vadd.f32 %v1808_v34, %v7078_v59  ;;  %5862 = vmatmul.msk.bf16.gmra.mxu0 %vm1380_vm0, %v6308_v30  ;;  %v7191_v39 = vpack.c.bf16 %v2292_v28, %v2043_v14  ;;  %5910 = vmatmul.msk.bf16.gmra.mxu1 %vm1380_vm0, %v6308_v30  ;;  %v6309_v34 = vld [vmem:[%s10822_s1 + $0x70] sm:$0xff] }
  0xfb   : > { %5958 = vmatmul.msk.bf16.gmra.mxu2 %vm1380_vm0, %v6308_v30 }
  0xfc   : > { %10843 = vst [vmem:[#allocation26_spill] sm:$0xff] %v7187_v11  ;;  %v7199_v19 = vpack.c.bf16 %v1809_v25, %v1560_v48  ;;  %6006 = vmatmul.msk.bf16.gmra.mxu3 %vm1380_vm0, %v6308_v30 }
  0xfe   : > { %10844 = vst [vmem:[#allocation27_spill] sm:$0xff] %v7199_v19  ;;  %v2057_v20 = vpop.f32.mrf.mxu2  ;;  %v7204_v58 = vpop.permute.xlu1 %767 }
  0xff   : > { %v2058_v22 = vadd.f32 %v2057_v20, %v7078_v59  ;;  %v2306_v21 = vpop.f32.mrf.mxu3  ;;  %v1561_v2 = vpop.f32.mrf.mxu0 }
 0x100   : > { %v2307_v26 = vadd.f32 %v2306_v21, %v7078_v59  ;;  %v1562_v35 = vadd.f32 %v1561_v2, %v7007_v31  ;;  %v7212_v28 = vpop.permute.xlu2 %927 }
 0x101   : > { %v1810_v14 = vpop.f32.mrf.mxu1  ;;  %10847 = vst [vmem:[#allocation30_spill] sm:$0xff] %v7212_v28 }
 0x102   : > { %v7207_v13 = vpack.c.bf16 %v2307_v26, %v2058_v22  ;;  %v1811_v43 = vadd.f32 %v1810_v14, %v7007_v31 }
 0x104   : > { %10845 = vst [vmem:[#allocation28_spill] sm:$0xff] %v7207_v13  ;;  %v7210_v48 = vpack.c.bf16 %v1811_v43, %v1562_v35  ;;  %v7228_v43 = vpop.permute.xlu0 %852 }
 0x106   : > { %10846 = vst [vmem:[#allocation29_spill] sm:$0xff] %v7210_v48  ;;  %v2059_v30 = vpop.f32.mrf.mxu2  ;;  %v7219_v2 = vpop.permute.xlu1 %922 }
 0x107   : > { %v2060_v59 = vadd.f32 %v2059_v30, %v7007_v31  ;;  %v2308_v25 = vpop.f32.mrf.mxu3  ;;  %v1564_v20 = vpop.f32.mrf.mxu0  ;;  %10848 = vst [vmem:[#allocation31_spill] sm:$0xff] %v7219_v2 }
 0x108   : > { %v2309_v21 = vadd.f32 %v2308_v25, %v7007_v31  ;;  %v1565_v22 = vadd.f32 %v1564_v20, %v6951_v12 }
 0x109   : > { %v1813_v26 = vpop.f32.mrf.mxu1 }
 0x10a   : > { %v7222_v35 = vpack.c.bf16 %v2309_v21, %v2060_v59  ;;  %5863 = vmatmul.msk.bf16.gmra.mxu0 %vm1380_vm0, %v6309_v34  ;;  %v1814_v14 = vadd.f32 %v1813_v26, %v6951_v12  ;;  %5911 = vmatmul.msk.bf16.gmra.mxu1 %vm1380_vm0, %v6309_v34  ;;  %v7237_v26 = vpop.permute.xlu2 %752 }
 0x10b   : > { %5959 = vmatmul.msk.bf16.gmra.mxu2 %vm1380_vm0, %v6309_v34 }
 0x10c   : > { %10849 = vst [vmem:[#allocation32_spill] sm:$0xff] %v7222_v35  ;;  %6007 = vmatmul.msk.bf16.gmra.mxu3 %vm1380_vm0, %v6309_v34  ;;  %v7231_v31 = vpack.c.bf16 %v1814_v14, %v1565_v22  ;;  %v596_v22 = vld [vmem:[%s10597_s2 + $0x100] sm:$0xff] }
 0x10d   : > { %822 = vperm.xlu0 %6435, %v596_v22  }
 0x10e   : > { %10850 = vst [vmem:[#allocation33_spill] sm:$0xff] %v7231_v31  ;;  %v2062_v30 = vpop.f32.mrf.mxu2  ;;  %v7235_v28 = vpop.permute.xlu1 %677 }
 0x10f   : > { %v2063_v25 = vadd.f32 %v2062_v30, %v6951_v12  ;;  %v2311_v20 = vpop.f32.mrf.mxu3  ;;  %v1566_v59 = vpop.f32.mrf.mxu0 }
 0x110   : > { %v2312_v21 = vadd.f32 %v2311_v20, %v6951_v12  ;;  %v1567_v2 = vadd.f32 %v1566_v59, %v7025_v38  ;;  %v7248_v30 = vpop.permute.xlu0 %937  ;;  %v6310_v20 = vld [vmem:[%s10822_s1 + $0x78] sm:$0xff] }
 0x111   : > { %v1815_v35 = vpop.f32.mrf.mxu1  ;;  %10853 = vst [vmem:[#allocation36_spill] sm:$0xff] %v7248_v30 }
 0x112   : > { %v7240_v48 = vpack.c.bf16 %v2312_v21, %v2063_v25  ;;  %v1816_v34 = vadd.f32 %v1815_v35, %v7025_v38  ;;  %v7262_v30 = vpop.permute.xlu2 %837 }
 0x114   : > { %10851 = vst [vmem:[#allocation34_spill] sm:$0xff] %v7240_v48  ;;  %v7246_v14 = vpack.c.bf16 %v1816_v34, %v1567_v2 }
 0x116   : > { %10852 = vst [vmem:[#allocation35_spill] sm:$0xff] %v7246_v14  ;;  %v2064_v12 = vpop.f32.mrf.mxu2  ;;  %v7255_v48 = vpop.permute.xlu1 %832 }
 0x117   : > { %v2065_v59 = vadd.f32 %v2064_v12, %v7025_v38  ;;  %v2313_v25 = vpop.f32.mrf.mxu3  ;;  %v1569_v21 = vpop.f32.mrf.mxu0 }
 0x118   : > { %v2314_v35 = vadd.f32 %v2313_v25, %v7025_v38  ;;  %v1570_v31 = vadd.f32 %v1569_v21, %v6968_v17 }
 0x119   : > { %v1818_v2 = vpop.f32.mrf.mxu1 }
 0x11a   : > { %v7258_v34 = vpack.c.bf16 %v2314_v35, %v2065_v59  ;;  %v1819_v22 = vadd.f32 %v1818_v2, %v6968_v17  ;;  %5864 = vmatmul.msk.bf16.gmra.mxu0 %vm1380_vm0, %v6310_v20  ;;  %5912 = vmatmul.msk.bf16.gmra.mxu1 %vm1380_vm0, %v6310_v20  ;;  %v597_v59 = vld [vmem:[%s10597_s2 + $0x108] sm:$0xff]  ;;  %v7273_v2 = vpop.permute.xlu0 %762  ;;  %v7284_v13 = vpop.permute.xlu2 %662 }
 0x11b   : > { %5960 = vmatmul.msk.bf16.gmra.mxu2 %vm1380_vm0, %v6310_v20  ;;  %827 = vperm.xlu1 %6436, %v597_v59   ;;  %v6311_v59 = vld [vmem:[%s10822_s1 + $0x80] sm:$0xff] }
 0x11c   : > { %10854 = vst [vmem:[#allocation37_spill] sm:$0xff] %v7258_v34  ;;  %v7266_v12 = vpack.c.bf16 %v1819_v22, %v1570_v31  ;;  %6008 = vmatmul.msk.bf16.gmra.mxu3 %vm1380_vm0, %v6310_v20 }
 0x11e   : > { %10855 = vst [vmem:[#allocation38_spill] sm:$0xff] %v7266_v12  ;;  %v2067_v38 = vpop.f32.mrf.mxu2  ;;  %v7276_v14 = vpop.permute.xlu1 %917 }
 0x11f   : > { %v2068_v25 = vadd.f32 %v2067_v38, %v6968_v17  ;;  %v2316_v21 = vpop.f32.mrf.mxu3  ;;  %v1571_v35 = vpop.f32.mrf.mxu0  ;;  %10856 = vst [vmem:[#allocation39_spill] sm:$0xff] %v7276_v14 }
 0x120   : > { %v2317_v34 = vadd.f32 %v2316_v21, %v6968_v17  ;;  %v1572_v31 = vadd.f32 %v1571_v35, %v6986_v24 }
 0x121   : > { %v1820_v22 = vpop.f32.mrf.mxu1 }
 0x122   : > { %v7279_v20 = vpack.c.bf16 %v2317_v34, %v2068_v25  ;;  %v1821_v12 = vadd.f32 %v1820_v22, %v6986_v24  ;;  %v7291_v25 = vpop.permute.xlu0 %847 }
 0x124   : > { %10857 = vst [vmem:[#allocation40_spill] sm:$0xff] %v7279_v20  ;;  %v7282_v19 = vpack.c.bf16 %v1821_v12, %v1572_v31 }
 0x126   : > { %10858 = vst [vmem:[#allocation41_spill] sm:$0xff] %v7282_v19  ;;  %v2069_v38 = vpop.f32.mrf.mxu2  ;;  %v743_v11 = vpop.permute.xlu1 %742 }
 0x127   : > { %v2070_v17 = vadd.f32 %v2069_v38, %v6986_v24  ;;  %v2318_v21 = vpop.f32.mrf.mxu3  ;;  %v1574_v14 = vpop.f32.mrf.mxu0 }
 0x128   : > { %v2319_v35 = vadd.f32 %v2318_v21, %v6986_v24  ;;  %v1575_v12 = vadd.f32 %v1574_v14, %v743_v11  ;;  %v748_v38 = vpop.permute.xlu2 %747 }
 0x129   : > { %v1823_v34 = vpop.f32.mrf.mxu1 }
 0x12a   : > { %v7293_v22 = vpack.c.bf16 %v2319_v35, %v2070_v17  ;;  %v1824_v31 = vadd.f32 %v1823_v34, %v743_v11  ;;  %5865 = vmatmul.msk.bf16.gmra.mxu0 %vm1380_vm0, %v6311_v59  ;;  %5913 = vmatmul.msk.bf16.gmra.mxu1 %vm1380_vm0, %v6311_v59 }
 0x12b   : > { %5961 = vmatmul.msk.bf16.gmra.mxu2 %vm1380_vm0, %v6311_v59 }
 0x12c   : > { %10859 = vst [vmem:[#allocation42_spill] sm:$0xff] %v7293_v22  ;;  %v7298_v20 = vpack.c.bf16 %v1824_v31, %v1575_v12  ;;  %6009 = vmatmul.msk.bf16.gmra.mxu3 %vm1380_vm0, %v6311_v59  ;;  %v7303_v22 = vpop.permute.xlu0 %672  ;;  %v6312_v59 = vld [vmem:[%s10822_s1 + $0x88] sm:$0xff] }
 0x12e   : > { %10860 = vst [vmem:[#allocation43_spill] sm:$0xff] %v7298_v20  ;;  %v2072_v24 = vpop.f32.mrf.mxu2 }
 0x12f   : > { %v2073_v21 = vadd.f32 %v2072_v24, %v743_v11  ;;  %v2321_v19 = vpop.f32.mrf.mxu3  ;;  %v1576_v29 = vpop.f32.mrf.mxu0 }
 0x130   : > { %v2322_v32 = vadd.f32 %v2321_v19, %v743_v11  ;;  %v1577_v17 = vadd.f32 %v1576_v29, %v748_v38 }
 0x131   : > { %v1825_v35 = vpop.f32.mrf.mxu1 }
 0x132   : > { %v7301_v14 = vpack.c.bf16 %v2322_v32, %v2073_v21  ;;  %v1826_v34 = vadd.f32 %v1825_v35, %v748_v38 }
 0x134   : > { %10861 = vst [vmem:[#allocation44_spill] sm:$0xff] %v7301_v14  ;;  %v7305_v4 = vpack.c.bf16 %v1826_v34, %v1577_v17 }
 0x136   : > { %10862 = vst [vmem:[#allocation45_spill] sm:$0xff] %v7305_v4  ;;  %v2074_v52 = vpop.f32.mrf.mxu2 }
 0x137   : > { %v2075_v12 = vadd.f32 %v2074_v52, %v748_v38  ;;  %v2323_v31 = vpop.f32.mrf.mxu3  ;;  %v1579_v24 = vpop.f32.mrf.mxu0 }
 0x138   : > { %v2324_v20 = vadd.f32 %v2323_v31, %v748_v38  ;;  %v1580_v11 = vadd.f32 %v1579_v24, %v7237_v26  ;;  %v758_v52 = vpop.permute.xlu0 %757 }
 0x139   : > { %v1828_v29 = vpop.f32.mrf.mxu1 }
 0x13a   : > { %v7311_v19 = vpack.c.bf16 %v2324_v20, %v2075_v12  ;;  %v1829_v32 = vadd.f32 %v1828_v29, %v7237_v26  ;;  %5866 = vmatmul.msk.bf16.gmra.mxu0 %vm1380_vm0, %v6312_v59  ;;  %5914 = vmatmul.msk.bf16.gmra.mxu1 %vm1380_vm0, %v6312_v59 }
 0x13b   : > { %5962 = vmatmul.msk.bf16.gmra.mxu2 %vm1380_vm0, %v6312_v59 }
 0x13c   : > { %10863 = vst [vmem:[#allocation46_spill] sm:$0xff] %v7311_v19  ;;  %v7317_v21 = vpack.c.bf16 %v1829_v32, %v1580_v11  ;;  %6010 = vmatmul.msk.bf16.gmra.mxu3 %vm1380_vm0, %v6312_v59  ;;  %v6313_v59 = vld [vmem:[%s10822_s1 + $0x90] sm:$0xff] }
 0x13e   : > { %10864 = vst [vmem:[#allocation47_spill] sm:$0xff] %v7317_v21  ;;  %v2077_v17 = vpop.f32.mrf.mxu2 }
 0x13f   : > { %v2078_v38 = vadd.f32 %v2077_v17, %v7237_v26  ;;  %v2326_v35 = vpop.f32.mrf.mxu3  ;;  %v1581_v34 = vpop.f32.mrf.mxu0 }
 0x140   : > { %v2327_v20 = vadd.f32 %v2326_v35, %v7237_v26  ;;  %v1582_v12 = vadd.f32 %v1581_v34, %v758_v52 }
 0x141   : > { %v1830_v31 = vpop.f32.mrf.mxu1 }
 0x142   : > { %v7322_v24 = vpack.c.bf16 %v2327_v20, %v2078_v38  ;;  %v1831_v29 = vadd.f32 %v1830_v31, %v758_v52 }
 0x144   : > { %v7324_v19 = vpack.c.bf16 %v1831_v29, %v1582_v12 }
 0x146   : > { %v2079_v4 = vpop.f32.mrf.mxu2 }
 0x147   : > { %v2080_v11 = vadd.f32 %v2079_v4, %v758_v52  ;;  %v2328_v32 = vpop.f32.mrf.mxu3  ;;  %v1584_v21 = vpop.f32.mrf.mxu0  ;;  %v613_v4 = vld [vmem:[%s10597_s2 + $0x188] sm:$0xff] }
 0x148   : > { %v2329_v17 = vadd.f32 %v2328_v32, %v758_v52  ;;  %v1585_v14 = vadd.f32 %v1584_v21, %v7273_v2  ;;  %907 = vperm.xlu0 %6435, %v613_v4   ;;  %v658_v32 = vld [vmem:[%s10597_s2 + $0x2f0] sm:$0xff] }
 0x149   : > { %v1833_v7 = vpop.f32.mrf.mxu1 }
 0x14a   : > { %v7330_v26 = vpack.c.bf16 %v2329_v17, %v2080_v11  ;;  %v1834_v38 = vadd.f32 %v1833_v7, %v7273_v2  ;;  %5867 = vmatmul.msk.bf16.gmra.mxu0 %vm1380_vm0, %v6313_v59  ;;  %5915 = vmatmul.msk.bf16.gmra.mxu1 %vm1380_vm0, %v6313_v59  ;;  %v642_v11 = vld [vmem:[%s10597_s2 + $0x270] sm:$0xff]  ;;  %v6314_v17 = vld [vmem:[%s10822_s1 + $0x98] sm:$0xff] }
 0x14b   : > { %5963 = vmatmul.msk.bf16.gmra.mxu2 %vm1380_vm0, %v6313_v59  ;;  %1052 = vperm.xlu1 %6436, %v642_v11  }
 0x14c   : > { %v7336_v35 = vpack.c.bf16 %v1834_v38, %v1585_v14  ;;  %6011 = vmatmul.msk.bf16.gmra.mxu3 %vm1380_vm0, %v6313_v59 }
 0x14e   : > { %v2082_v21 = vpop.f32.mrf.mxu2 }
 0x14f   : > { %v2083_v52 = vadd.f32 %v2082_v21, %v7273_v2  ;;  %v2331_v34 = vpop.f32.mrf.mxu3  ;;  %v1586_v7 = vpop.f32.mrf.mxu0 }
 0x150   : > { %v2332_v20 = vadd.f32 %v2331_v34, %v7273_v2  ;;  %v1587_v12 = vadd.f32 %v1586_v7, %v7204_v58  ;;  %1132 = vperm.xlu0 %6435, %v658_v32  }
 0x151   : > { %v1835_v31 = vpop.f32.mrf.mxu1 }
 0x152   : > { %v7345_v29 = vpack.c.bf16 %v2332_v20, %v2083_v52  ;;  %v1836_v14 = vadd.f32 %v1835_v31, %v7204_v58 }
 0x154   : > { %10865 = vst [vmem:[#allocation48_spill] sm:$0xff] %v7345_v29  ;;  %v7348_v59 = vpack.c.bf16 %v1836_v14, %v1587_v12  ;;  %v641_v14 = vld [vmem:[%s10597_s2 + $0x268] sm:$0xff] }
 0x156   : > { %10866 = vst [vmem:[#allocation49_spill] sm:$0xff] %v7348_v59  ;;  %v2084_v2 = vpop.f32.mrf.mxu2 }
 0x157   : > { %v2085_v38 = vadd.f32 %v2084_v2, %v7204_v58  ;;  %v2333_v4 = vpop.f32.mrf.mxu3  ;;  %v1589_v21 = vpop.f32.mrf.mxu0 }
 0x158   : > { %v2334_v52 = vadd.f32 %v2333_v4, %v7204_v58  ;;  %v1590_v34 = vadd.f32 %v1589_v21, %v7157_v49  ;;  %v659_v58 = vld [vmem:[%s10597_s2 + $0x2f8] sm:$0xff]  ;;  %1047 = vperm.xlu0 %6435, %v641_v14  }
 0x159   : > { %v1838_v7 = vpop.f32.mrf.mxu1  ;;  %1137 = vperm.xlu1 %6436, %v659_v58   ;;  %v638_v58 = vld [vmem:[%s10597_s2 + $0x250] sm:$0xff] }
 0x15a   : > { %v7362_v20 = vpack.c.bf16 %v2334_v52, %v2085_v38  ;;  %v1839_v12 = vadd.f32 %v1838_v7, %v7157_v49  ;;  %5868 = vmatmul.msk.bf16.gmra.mxu0 %vm1380_vm0, %v6314_v17  ;;  %5916 = vmatmul.msk.bf16.gmra.mxu1 %vm1380_vm0, %v6314_v17 }
 0x15b   : > { %5964 = vmatmul.msk.bf16.gmra.mxu2 %vm1380_vm0, %v6314_v17 }
 0x15c   : > { %10867 = vst [vmem:[#allocation50_spill] sm:$0xff] %v7362_v20  ;;  %v7368_v31 = vpack.c.bf16 %v1839_v12, %v1590_v34  ;;  %6012 = vmatmul.msk.bf16.gmra.mxu3 %vm1380_vm0, %v6314_v17  ;;  %v656_v12 = vld [vmem:[%s10597_s2 + $0x2e0] sm:$0xff] }
 0x15e   : > { %10868 = vst [vmem:[#allocation51_spill] sm:$0xff] %v7368_v31  ;;  %v2087_v11 = vpop.f32.mrf.mxu2  ;;  %v10927_v31 = vld [vmem:[#allocation35_spill] sm:$0xff] }
 0x15f   : > { %v2088_v32 = vadd.f32 %v2087_v11, %v7157_v49  ;;  %v2336_v2 = vpop.f32.mrf.mxu3  ;;  %v1591_v38 = vpop.f32.mrf.mxu0  ;;  %v6315_v11 = vld [vmem:[%s10822_s1 + $0xa0] sm:$0xff] }
 0x160   : > { %v2337_v4 = vadd.f32 %v2336_v2, %v7157_v49  ;;  %v1592_v21 = vadd.f32 %v1591_v38, %v7127_v27  ;;  %v612_v49 = vld [vmem:[%s10597_s2 + $0x180] sm:$0xff]  ;;  %1032 = vperm.xlu0 %6435, %v638_v58  }
 0x161   : > { %v1840_v17 = vpop.f32.mrf.mxu1  ;;  %1122 = vperm.xlu1 %6436, %v656_v12   ;;  %902 = vperm.xlu2 %6437, %v612_v49   ;;  %v655_v49 = vld [vmem:[%s10597_s2 + $0x2d8] sm:$0xff] }
 0x162   : > { %v7380_v52 = vpack.c.bf16 %v2337_v4, %v2088_v32  ;;  %v1841_v34 = vadd.f32 %v1840_v17, %v7127_v27 }
 0x164   : > { %10869 = vst [vmem:[#allocation52_spill] sm:$0xff] %v7380_v52  ;;  %v7383_v7 = vpack.c.bf16 %v1841_v34, %v1592_v21 }
 0x166   : > { %10870 = vst [vmem:[#allocation53_spill] sm:$0xff] %v7383_v7  ;;  %v2089_v14 = vpop.f32.mrf.mxu2 }
 0x167   : > { %v2090_v32 = vadd.f32 %v2089_v14, %v7127_v27  ;;  %v2338_v2 = vpop.f32.mrf.mxu3  ;;  %v1594_v38 = vpop.f32.mrf.mxu0  ;;  %v643_v14 = vld [vmem:[%s10597_s2 + $0x278] sm:$0xff] }
 0x168   : > { %v2339_v4 = vadd.f32 %v2338_v2, %v7127_v27  ;;  %v1595_v21 = vadd.f32 %v1594_v38, %v7080_v60  ;;  %v639_v27 = vld [vmem:[%s10597_s2 + $0x258] sm:$0xff]  ;;  %1117 = vperm.xlu0 %6435, %v655_v49  }
 0x169   : > { %v1843_v17 = vpop.f32.mrf.mxu1  ;;  %1037 = vperm.xlu1 %6436, %v639_v27   ;;  %1057 = vperm.xlu2 %6437, %v643_v14   ;;  %v652_v14 = vld [vmem:[%s10597_s2 + $0x2c0] sm:$0xff] }
 0x16a   : > { %v7400_v34 = vpack.c.bf16 %v2339_v4, %v2090_v32  ;;  %v1844_v12 = vadd.f32 %v1843_v17, %v7080_v60  ;;  %5869 = vmatmul.msk.bf16.gmra.mxu0 %vm1380_vm0, %v6315_v11  ;;  %5917 = vmatmul.msk.bf16.gmra.mxu1 %vm1380_vm0, %v6315_v11 }
 0x16b   : > { %5965 = vmatmul.msk.bf16.gmra.mxu2 %vm1380_vm0, %v6315_v11 }
 0x16c   : > { %10871 = vst [vmem:[#allocation54_spill] sm:$0xff] %v7400_v34  ;;  %v7406_v58 = vpack.c.bf16 %v1844_v12, %v1595_v21  ;;  %6013 = vmatmul.msk.bf16.gmra.mxu3 %vm1380_vm0, %v6315_v11 }
 0x16e   : > { %10872 = vst [vmem:[#allocation55_spill] sm:$0xff] %v7406_v58  ;;  %v2092_v32 = vpop.f32.mrf.mxu2  ;;  %v636_v58 = vld [vmem:[%s10597_s2 + $0x240] sm:$0xff] }
 0x16f   : > { %v2093_v2 = vadd.f32 %v2092_v32, %v7080_v60  ;;  %v2341_v38 = vpop.f32.mrf.mxu3  ;;  %v1596_v11 = vpop.f32.mrf.mxu0 }
 0x170   : > { %v2342_v4 = vadd.f32 %v2341_v38, %v7080_v60  ;;  %v1597_v21 = vadd.f32 %v1596_v11, %v7134_v42  ;;  %v640_v60 = vld [vmem:[%s10597_s2 + $0x260] sm:$0xff]  ;;  %1102 = vperm.xlu0 %6435, %v652_v14  }
 0x171   : > { %v1845_v17 = vpop.f32.mrf.mxu1  ;;  %1022 = vperm.xlu1 %6436, %v636_v58   ;;  %1042 = vperm.xlu2 %6437, %v640_v60   ;;  %v635_v60 = vld [vmem:[%s10597_s2 + $0x238] sm:$0xff] }
 0x172   : > { %v7421_v12 = vpack.c.bf16 %v2342_v4, %v2093_v2  ;;  %v1846_v27 = vadd.f32 %v1845_v17, %v7134_v42  ;;  %v6316_v2 = vld [vmem:[%s10822_s1 + $0xa8] sm:$0xff] }
 0x174   : > { %10873 = vst [vmem:[#allocation56_spill] sm:$0xff] %v7421_v12  ;;  %v7424_v49 = vpack.c.bf16 %v1846_v27, %v1597_v21 }
 0x176   : > { %10874 = vst [vmem:[#allocation57_spill] sm:$0xff] %v7424_v49  ;;  %v2094_v32 = vpop.f32.mrf.mxu2 }
 0x177   : > { %v2095_v38 = vadd.f32 %v2094_v32, %v7134_v42  ;;  %v2343_v11 = vpop.f32.mrf.mxu3  ;;  %v1599_v4 = vpop.f32.mrf.mxu0  ;;  %v657_v32 = vld [vmem:[%s10597_s2 + $0x2e8] sm:$0xff] }
 0x178   : > { %v2344_v21 = vadd.f32 %v2343_v11, %v7134_v42  ;;  %v1600_v17 = vadd.f32 %v1599_v4, %v7094_v1  ;;  %v653_v42 = vld [vmem:[%s10597_s2 + $0x2c8] sm:$0xff]  ;;  %1017 = vperm.xlu0 %6435, %v635_v60  }
 0x179   : > { %v1848_v27 = vpop.f32.mrf.mxu1  ;;  %1107 = vperm.xlu1 %6436, %v653_v42   ;;  %1127 = vperm.xlu2 %6437, %v657_v32   ;;  %v632_v32 = vld [vmem:[%s10597_s2 + $0x220] sm:$0xff] }
 0x17a   : > { %v7441_v49 = vpack.c.bf16 %v2344_v21, %v2095_v38  ;;  %v1849_v58 = vadd.f32 %v1848_v27, %v7094_v1  ;;  %5870 = vmatmul.msk.bf16.gmra.mxu0 %vm1380_vm0, %v6316_v2  ;;  %5918 = vmatmul.msk.bf16.gmra.mxu1 %vm1380_vm0, %v6316_v2 }
 0x17b   : > { %5966 = vmatmul.msk.bf16.gmra.mxu2 %vm1380_vm0, %v6316_v2 }
 0x17c   : > { %10875 = vst [vmem:[#allocation58_spill] sm:$0xff] %v7441_v49  ;;  %v7447_v14 = vpack.c.bf16 %v1849_v58, %v1600_v17  ;;  %6014 = vmatmul.msk.bf16.gmra.mxu3 %vm1380_vm0, %v6316_v2 }
 0x17e   : > { %10876 = vst [vmem:[#allocation59_spill] sm:$0xff] %v7447_v14  ;;  %v2097_v38 = vpop.f32.mrf.mxu2  ;;  %v650_v14 = vld [vmem:[%s10597_s2 + $0x2b0] sm:$0xff] }
 0x17f   : > { %v2098_v11 = vadd.f32 %v2097_v38, %v7094_v1  ;;  %v2346_v4 = vpop.f32.mrf.mxu3  ;;  %v1601_v2 = vpop.f32.mrf.mxu0 }
 0x180   : > { %v2347_v21 = vadd.f32 %v2346_v4, %v7094_v1  ;;  %v1602_v17 = vadd.f32 %v1601_v2, %v7096_v3  ;;  %v654_v1 = vld [vmem:[%s10597_s2 + $0x2d0] sm:$0xff]  ;;  %1002 = vperm.xlu0 %6435, %v632_v32  }
 0x181   : > { %v1850_v27 = vpop.f32.mrf.mxu1  ;;  %1092 = vperm.xlu1 %6436, %v650_v14   ;;  %1112 = vperm.xlu2 %6437, %v654_v1   ;;  %v649_v1 = vld [vmem:[%s10597_s2 + $0x2a8] sm:$0xff] }
 0x182   : > { %v7462_v58 = vpack.c.bf16 %v2347_v21, %v2098_v11  ;;  %v1851_v42 = vadd.f32 %v1850_v27, %v7096_v3  ;;  %v6317_v11 = vld [vmem:[%s10822_s1 + $0xb0] sm:$0xff] }
 0x184   : > { %10877 = vst [vmem:[#allocation60_spill] sm:$0xff] %v7462_v58  ;;  %v7465_v60 = vpack.c.bf16 %v1851_v42, %v1602_v17 }
 0x186   : > { %10878 = vst [vmem:[#allocation61_spill] sm:$0xff] %v7465_v60  ;;  %v2099_v38 = vpop.f32.mrf.mxu2 }
 0x187   : > { %v2100_v4 = vadd.f32 %v2099_v38, %v7096_v3  ;;  %v2348_v2 = vpop.f32.mrf.mxu3  ;;  %v1604_v21 = vpop.f32.mrf.mxu0  ;;  %v637_v38 = vld [vmem:[%s10597_s2 + $0x248] sm:$0xff] }
 0x188   : > { %v2349_v17 = vadd.f32 %v2348_v2, %v7096_v3  ;;  %v1605_v27 = vadd.f32 %v1604_v21, %v7023_v37  ;;  %v633_v3 = vld [vmem:[%s10597_s2 + $0x228] sm:$0xff]  ;;  %1087 = vperm.xlu0 %6435, %v649_v1   ;;  %v7506_v1 = vpop.permute.xlu0 %912 }
 0x189   : > { %v1853_v42 = vpop.f32.mrf.mxu1  ;;  %1007 = vperm.xlu1 %6436, %v633_v3   ;;  %1027 = vperm.xlu2 %6437, %v637_v38   ;;  %v630_v38 = vld [vmem:[%s10597_s2 + $0x210] sm:$0xff] }
 0x18a   : > { %v7482_v60 = vpack.c.bf16 %v2349_v17, %v2100_v4  ;;  %v1854_v14 = vadd.f32 %v1853_v42, %v7023_v37  ;;  %5871 = vmatmul.msk.bf16.gmra.mxu0 %vm1380_vm0, %v6317_v11  ;;  %5919 = vmatmul.msk.bf16.gmra.mxu1 %vm1380_vm0, %v6317_v11 }
 0x18b   : > { %5967 = vmatmul.msk.bf16.gmra.mxu2 %vm1380_vm0, %v6317_v11 }
 0x18c   : > { %10879 = vst [vmem:[#allocation62_spill] sm:$0xff] %v7482_v60  ;;  %v7488_v32 = vpack.c.bf16 %v1854_v14, %v1605_v27  ;;  %6015 = vmatmul.msk.bf16.gmra.mxu3 %vm1380_vm0, %v6317_v11 }
 0x18e   : > { %10880 = vst [vmem:[#allocation63_spill] sm:$0xff] %v7488_v32  ;;  %v2102_v4 = vpop.f32.mrf.mxu2 }
 0x18f   : > { %v2103_v2 = vadd.f32 %v2102_v4, %v7023_v37  ;;  %v2351_v21 = vpop.f32.mrf.mxu3  ;;  %v1606_v11 = vpop.f32.mrf.mxu0  ;;  %v646_v4 = vld [vmem:[%s10597_s2 + $0x290] sm:$0xff] }
 0x190   : > { %v2352_v17 = vadd.f32 %v2351_v21, %v7023_v37  ;;  %v1607_v27 = vadd.f32 %v1606_v11, %v6970_v18  ;;  %v634_v37 = vld [vmem:[%s10597_s2 + $0x230] sm:$0xff]  ;;  %1072 = vperm.xlu0 %6435, %v646_v4   ;;  %v6318_v21 = vld [vmem:[%s10822_s1 + $0xb8] sm:$0xff] }
 0x191   : > { %v1855_v42 = vpop.f32.mrf.mxu1  ;;  %992 = vperm.xlu1 %6436, %v630_v38   ;;  %1012 = vperm.xlu2 %6437, %v634_v37   ;;  %v629_v37 = vld [vmem:[%s10597_s2 + $0x208] sm:$0xff] }
 0x192   : > { %v7503_v14 = vpack.c.bf16 %v2352_v17, %v2103_v2  ;;  %v1856_v3 = vadd.f32 %v1855_v42, %v6970_v18 }
 0x194   : > { %10881 = vst [vmem:[#allocation64_spill] sm:$0xff] %v7503_v14  ;;  %v7508_v32 = vpack.c.bf16 %v1856_v3, %v1607_v27 }
 0x196   : > { %10882 = vst [vmem:[#allocation65_spill] sm:$0xff] %v7508_v32  ;;  %v2104_v2 = vpop.f32.mrf.mxu2 }
 0x197   : > { %v2105_v11 = vadd.f32 %v2104_v2, %v6970_v18  ;;  %v2353_v17 = vpop.f32.mrf.mxu3  ;;  %v1609_v27 = vpop.f32.mrf.mxu0 }
 0x198   : > { %v2354_v42 = vadd.f32 %v2353_v17, %v6970_v18  ;;  %v1610_v3 = vadd.f32 %v1609_v27, %v6966_v16  ;;  %v647_v18 = vld [vmem:[%s10597_s2 + $0x298] sm:$0xff]  ;;  %v668_v2 = vpop.permute.xlu0 %667  ;;  %987 = vperm.xlu0 %6435, %v629_v37  }
 0x199   : > { %v1858_v14 = vpop.f32.mrf.mxu1  ;;  %1077 = vperm.xlu1 %6436, %v647_v18   ;;  %v2035_v12 = vadd.f32 %v7067_v54, %v668_v2  ;;  %v2284_v34 = vadd.f32 %v7072_v56, %v668_v2  ;;  %v2033_v54 = vadd.f32 %v7044_v44, %v7284_v13  ;;  %v2282_v56 = vadd.f32 %v7046_v45, %v7284_v13 }
 0x19a   : > { %v7525_v32 = vpack.c.bf16 %v2354_v42, %v2105_v11  ;;  %v1859_v38 = vadd.f32 %v1858_v14, %v6966_v16  ;;  %5872 = vmatmul.msk.bf16.gmra.mxu0 %vm1380_vm0, %v6318_v21  ;;  %5920 = vmatmul.msk.bf16.gmra.mxu1 %vm1380_vm0, %v6318_v21  ;;  %v651_v14 = vld [vmem:[%s10597_s2 + $0x2b8] sm:$0xff] }
 0x19b   : > { %5968 = vmatmul.msk.bf16.gmra.mxu2 %vm1380_vm0, %v6318_v21  ;;  %1097 = vperm.xlu2 %6437, %v651_v14   ;;  %v4462_v14 = vld [vmem:[%s10602_s7 + $0x10] sm:$0xff] }
 0x19c   : > { %10883 = vst [vmem:[#allocation66_spill] sm:$0xff] %v7525_v32  ;;  %v7531_v4 = vpack.c.bf16 %v1859_v38, %v1610_v3  ;;  %6016 = vmatmul.msk.bf16.gmra.mxu3 %vm1380_vm0, %v6318_v21  ;;  %v644_v32 = vld [vmem:[%s10597_s2 + $0x280] sm:$0xff] }
 0x19e   : > { %10884 = vst [vmem:[#allocation67_spill] sm:$0xff] %v7531_v4  ;;  %v2107_v11 = vpop.f32.mrf.mxu2 }
 0x19f   : > { %v2108_v17 = vadd.f32 %v2107_v11, %v6966_v16  ;;  %v2356_v21 = vpop.f32.mrf.mxu3  ;;  %v1611_v27 = vpop.f32.mrf.mxu0 }
 0x1a0   : > { %v2357_v42 = vadd.f32 %v2356_v21, %v6966_v16  ;;  %v1612_v3 = vadd.f32 %v1611_v27, %v6984_v23  ;;  %v648_v16 = vld [vmem:[%s10597_s2 + $0x2a0] sm:$0xff]  ;;  %v823_v11 = vpop.permute.xlu0 %822  ;;  %4476 = vperm.xlu0 %6435, %v4462_v14   ;;  %v4463_v14 = vld [vmem:[%s10602_s7 + $0x18] sm:$0xff] }
 0x1a1   : > { %v1860_v38 = vpop.f32.mrf.mxu1  ;;  %1062 = vperm.xlu1 %6436, %v644_v32   ;;  %v6319_v21 = vld [vmem:[%s10822_s1 + $0xc0] sm:$0xff] }
 0x1a2   : > { %v7546_v4 = vpack.c.bf16 %v2357_v42, %v2108_v17  ;;  %v1861_v18 = vadd.f32 %v1860_v38, %v6984_v23 }
 0x1a3   : > { %1082 = vperm.xlu2 %6437, %v648_v16   ;;  %v1784_v16 = vadd.f32 %v7029_v40, %v7284_v13 }
 0x1a4   : > { %10885 = vst [vmem:[#allocation68_spill] sm:$0xff] %v7546_v4  ;;  %v7549_v37 = vpack.c.bf16 %v1861_v18, %v1612_v3 }
 0x1a6   : > { %10886 = vst [vmem:[#allocation69_spill] sm:$0xff] %v7549_v37  ;;  %v2109_v17 = vpop.f32.mrf.mxu2 }
 0x1a7   : > { %v2110_v27 = vadd.f32 %v2109_v17, %v6984_v23  ;;  %v2358_v42 = vpop.f32.mrf.mxu3  ;;  %v1614_v3 = vpop.f32.mrf.mxu0 }
 0x1a8   : > { %v2359_v38 = vadd.f32 %v2358_v42, %v6984_v23  ;;  %v1615_v18 = vadd.f32 %v1614_v3, %v823_v11  ;;  %v4461_v23 = vld [vmem:[%s10602_s7 + $0x8] sm:$0xff]  ;;  %v828_v17 = vpop.permute.xlu1 %827 }
 0x1a9   : > { %v1863_v4 = vpop.f32.mrf.mxu1  ;;  %4481 = vperm.xlu1 %6436, %v4463_v14   ;;  %4471 = vperm.xlu0 %6435, %v4461_v23  }
 0x1aa   : > { %v7565_v37 = vpack.c.bf16 %v2359_v38, %v2110_v27  ;;  %v1864_v60 = vadd.f32 %v1863_v4, %v823_v11  ;;  %5873 = vmatmul.msk.bf16.gmra.mxu0 %vm1380_vm0, %v6319_v21  ;;  %5921 = vmatmul.msk.bf16.gmra.mxu1 %vm1380_vm0, %v6319_v21  ;;  %v1535_v4 = vadd.f32 %v7021_v36, %v7284_v13 }
 0x1ab   : > { %5969 = vmatmul.msk.bf16.gmra.mxu2 %vm1380_vm0, %v6319_v21  ;;  %v1786_v27 = vadd.f32 %v7056_v50, %v668_v2 }
 0x1ac   : > { %10887 = vst [vmem:[#allocation70_spill] sm:$0xff] %v7565_v37  ;;  %v2585_v32 = vpack.c.bf16 %v1864_v60, %v1615_v18  ;;  %6017 = vmatmul.msk.bf16.gmra.mxu3 %vm1380_vm0, %v6319_v21  ;;  %v631_v60 = vld [vmem:[%s10597_s2 + $0x218] sm:$0xff]  ;;  %v1537_v21 = vadd.f32 %v7048_v46, %v668_v2  ;;  %v2521_v40 = vpack.c.bf16 %v1784_v16, %v1535_v4  ;;  %v6320_v4 = vld [vmem:[%s10822_s1 + $0xc8] sm:$0xff] }
 0x1ad   : > { %997 = vperm.xlu2 %6437, %v631_v60   ;;  %v5030_v60 = vld [vmem:[%s10604_s9 + $0x70] sm:$0xff] }
 0x1ae   : > { %v2112_v42 = vpop.f32.mrf.mxu2  ;;  %v2523_v23 = vpack.c.bf16 %v1786_v27, %v1537_v21  ;;  %v2841_v46 = vunpack.c.l.bf16 %v2585_v32  ;;  %v2842_v7 = vunpack.c.h.bf16 %v2585_v32  ;;  %v2713_v2 = vunpack.c.l.bf16 %v2521_v40 }
 0x1af   : > { %v2113_v3 = vadd.f32 %v2112_v42, %v823_v11  ;;  %v2361_v38 = vpop.f32.mrf.mxu3  ;;  %v1616_v18 = vpop.f32.mrf.mxu0 }
 0x1b0   : > { %v2362_v36 = vadd.f32 %v2361_v38, %v823_v11  ;;  %v1617_v37 = vadd.f32 %v1616_v18, %v828_v17  ;;  %v5028_v11 = vld [vmem:[%s10604_s9 + $0x60] sm:$0xff]  ;;  %v2717_v16 = vunpack.c.l.bf16 %v2523_v23  ;;  %v2718_v27 = vunpack.c.h.bf16 %v2523_v23 }
 0x1b1   : > { %v1865_v58 = vpop.f32.mrf.mxu1  ;;  %5104 = vperm.xlu1 %6436, %v5030_v60   ;;  %5094 = vperm.xlu0 %6435, %v5028_v11   ;;  %v2522_v11 = vpack.c.bf16 %v2282_v56, %v2033_v54 }
 0x1b2   : > { %v7586_v49 = vpack.c.bf16 %v2362_v36, %v2113_v3  ;;  %v1866_v14 = vadd.f32 %v1865_v58, %v828_v17  ;;  %v628_v58 = vld [vmem:[%s10597_s2 + $0x200] sm:$0xff]  ;;  %v2524_v3 = vpack.c.bf16 %v2284_v34, %v2035_v12  ;;  %v7606_v36 = vmul.f32 %v2841_v46, %v2713_v2  ;;  %v5029_v2 = vld [vmem:[%s10604_s9 + $0x68] sm:$0xff] }
 0x1b4   : > { %v2587_v50 = vpack.c.bf16 %v1866_v14, %v1617_v37  ;;  %v2714_v37 = vunpack.c.h.bf16 %v2521_v40  ;;  %v2843_v12 = vunpack.c.l.bf16 %v7586_v49  ;;  %v2719_v46 = vunpack.c.l.bf16 %v2524_v3 }
 0x1b5   : > { %982 = vperm.xlu2 %6437, %v628_v58  }
 0x1b6   : > { %v2114_v32 = vpop.f32.mrf.mxu2  ;;  %v2845_v21 = vunpack.c.l.bf16 %v2587_v50  ;;  %v2846_v42 = vunpack.c.h.bf16 %v2587_v50  ;;  %v7608_v45 = vmul.f32 %v2842_v7, %v2714_v37  ;;  %v5027_v37 = vld [vmem:[%s10604_s9 + $0x58] sm:$0xff] }
 0x1b7   : > { %v2115_v38 = vadd.f32 %v2114_v32, %v828_v17  ;;  %v2363_v44 = vpop.f32.mrf.mxu3  ;;  %v1619_v18 = vpop.f32.mrf.mxu0  ;;  %v2720_v32 = vunpack.c.h.bf16 %v2524_v3 }
 0x1b8   : > { %v2364_v13 = vadd.f32 %v2363_v44, %v828_v17  ;;  %v1620_v40 = vadd.f32 %v1619_v18, %v7255_v48  ;;  %v7611_v14 = vmul.f32 %v2845_v21, %v2717_v16  ;;  %v7613_v60 = vmul.f32 %v2846_v42, %v2718_v27 }
 0x1b9   : > { %v1868_v58 = vpop.f32.mrf.mxu1  ;;  %v2844_v17 = vunpack.c.h.bf16 %v7586_v49  ;;  %v1540_v49 = vadd.f32 %v7074_v57, %v7303_v22  ;;  %v1789_v16 = vadd.f32 %v7082_v61, %v7303_v22  ;;  %5099 = vperm.xlu1 %6436, %v5029_v2   ;;  %5089 = vperm.xlu0 %6435, %v5027_v37   ;;  %v2716_v21 = vunpack.c.h.bf16 %v2522_v11 }
 0x1ba   : > { %v2588_v52 = vpack.c.bf16 %v2364_v13, %v2115_v38  ;;  %v1869_v23 = vadd.f32 %v1868_v58, %v7255_v48  ;;  %5874 = vmatmul.msk.bf16.gmra.mxu0 %vm1380_vm0, %v6320_v4  ;;  %5922 = vmatmul.msk.bf16.gmra.mxu1 %vm1380_vm0, %v6320_v4  ;;  %v1542_v27 = vadd.f32 %v7092_v0, %v7235_v28 }
 0x1bb   : > { %5970 = vmatmul.msk.bf16.gmra.mxu2 %vm1380_vm0, %v6320_v4  ;;  %v1791_v42 = vadd.f32 %v7100_v5, %v7235_v28  ;;  %v2525_v5 = vpack.c.bf16 %v1789_v16, %v1540_v49  ;;  %v5024_v49 = vld [vmem:[%s10604_s9 + $0x40] sm:$0xff]  ;;  %v5022_v16 = vld [vmem:[%s10604_s9 + $0x30] sm:$0xff] }
 0x1bc   : > { %v2847_v50 = vunpack.c.l.bf16 %v2588_v52  ;;  %v2848_v54 = vunpack.c.h.bf16 %v2588_v52  ;;  %v2589_v56 = vpack.c.bf16 %v1869_v23, %v1620_v40  ;;  %6018 = vmatmul.msk.bf16.gmra.mxu3 %vm1380_vm0, %v6320_v4  ;;  %v645_v52 = vld [vmem:[%s10597_s2 + $0x288] sm:$0xff]  ;;  %v2715_v4 = vunpack.c.l.bf16 %v2522_v11 }
 0x1bd   : > { %1067 = vperm.xlu2 %6437, %v645_v52   ;;  %v7650_v40 = vmul.f32 %v2844_v17, %v2716_v21  ;;  %v2040_v17 = vadd.f32 %v7102_v6, %v7235_v28  ;;  %v4460_v52 = vld [vmem:[%s10602_s7] sm:$0xff]  ;;  %v2038_v6 = vadd.f32 %v7088_v62, %v7303_v22  ;;  %v6321_v21 = vld [vmem:[%s10822_s1 + $0xd0] sm:$0xff] }
 0x1be   : > { %v2117_v3 = vpop.f32.mrf.mxu2  ;;  %v7643_v57 = vmul.f32 %v2847_v50, %v2719_v46  ;;  %v7645_v38 = vmul.f32 %v2848_v54, %v2720_v32  ;;  %v7648_v13 = vmul.f32 %v2843_v12, %v2715_v4  ;;  %v2527_v12 = vpack.c.bf16 %v1791_v42, %v1542_v27 }
 0x1bf   : > { %v2118_v61 = vadd.f32 %v2117_v3, %v7255_v48  ;;  %v2366_v44 = vpop.f32.mrf.mxu3  ;;  %v1621_v18 = vpop.f32.mrf.mxu0  ;;  %10891 = vst [vmem:[#allocation74_spill] sm:$0xff] %v7650_v40  ;;  %v2849_v2 = vunpack.c.l.bf16 %v2589_v56  ;;  %v2850_v37 = vunpack.c.h.bf16 %v2589_v56  ;;  %v2722_v56 = vunpack.c.h.bf16 %v2525_v5 }
 0x1c0   : > { %10888 = vst [vmem:[#allocation71_spill] sm:$0xff] %v7643_v57  ;;  %v2367_v11 = vadd.f32 %v2366_v44, %v7255_v48  ;;  %v1622_v0 = vadd.f32 %v1621_v18, %v7262_v30  ;;  %v2289_v48 = vadd.f32 %v7107_v9, %v7235_v28  ;;  %v2287_v9 = vadd.f32 %v7090_v63, %v7303_v22 }
 0x1c1   : > { %10889 = vst [vmem:[#allocation72_spill] sm:$0xff] %v7645_v38  ;;  %v1870_v58 = vpop.f32.mrf.mxu1  ;;  %5074 = vperm.xlu1 %6436, %v5024_v49   ;;  %5064 = vperm.xlu0 %6435, %v5022_v16   ;;  %v2721_v28 = vunpack.c.l.bf16 %v2525_v5  ;;  %v2725_v27 = vunpack.c.l.bf16 %v2527_v12  ;;  %v2726_v3 = vunpack.c.h.bf16 %v2527_v12  ;;  %v7684_v22 = vmul.f32 %v2850_v37, %v2722_v56  ;;  %v5021_v56 = vld [vmem:[%s10604_s9 + $0x28] sm:$0xff] }
 0x1c2   : > { %10890 = vst [vmem:[#allocation73_spill] sm:$0xff] %v7648_v13  ;;  %v7658_v50 = vpack.c.bf16 %v2367_v11, %v2118_v61  ;;  %v1871_v54 = vadd.f32 %v1870_v58, %v7262_v30  ;;  %v2528_v44 = vpack.c.bf16 %v2289_v48, %v2040_v17  ;;  %v2526_v49 = vpack.c.bf16 %v2287_v9, %v2038_v6  ;;  %v10906_v48 = vld [vmem:[#allocation16_spill] sm:$0xff]  ;;  %v10918_v13 = vld [vmem:[#allocation29_spill] sm:$0xff] }
 0x1c3   : > { %v7682_v63 = vmul.f32 %v2849_v2, %v2721_v28  ;;  %v5023_v28 = vld [vmem:[%s10604_s9 + $0x38] sm:$0xff] }
 0x1c4   : > { %v2591_v32 = vpack.c.bf16 %v1871_v54, %v1622_v0  ;;  %v2852_v37 = vunpack.c.h.bf16 %v7658_v50  ;;  %v2727_v16 = vunpack.c.l.bf16 %v2528_v44 }
 0x1c5   : > { %4466 = vperm.xlu2 %6437, %v4460_v52  }
 0x1c6   : > { %v2119_v4 = vpop.f32.mrf.mxu2  ;;  %v2853_v42 = vunpack.c.l.bf16 %v2591_v32  ;;  %v2854_v61 = vunpack.c.h.bf16 %v2591_v32 }
 0x1c7   : > { %v2120_v62 = vadd.f32 %v2119_v4, %v7262_v30  ;;  %v2368_v18 = vpop.f32.mrf.mxu3  ;;  %v1624_v11 = vpop.f32.mrf.mxu0  ;;  %v2728_v4 = vunpack.c.h.bf16 %v2528_v44 }
 0x1c8   : > { %v2369_v0 = vadd.f32 %v2368_v18, %v7262_v30  ;;  %v1625_v58 = vadd.f32 %v1624_v11, %v7197_v15  ;;  %v7688_v5 = vmul.f32 %v2853_v42, %v2725_v27  ;;  %v7690_v54 = vmul.f32 %v2854_v61, %v2726_v3 }
 0x1c9   : > { %v1873_v12 = vpop.f32.mrf.mxu1  ;;  %v2851_v30 = vunpack.c.l.bf16 %v7658_v50  ;;  %5069 = vperm.xlu1 %6436, %v5023_v28   ;;  %5059 = vperm.xlu0 %6435, %v5021_v56   ;;  %v5031_v50 = vld [vmem:[%s10604_s9 + $0x78] sm:$0xff]  ;;  %v2729_v27 = vunpack.c.l.bf16 %v7195_v10  ;;  %v2730_v42 = vunpack.c.h.bf16 %v7195_v10  ;;  %v2724_v3 = vunpack.c.h.bf16 %v2526_v49 }
 0x1ca   : > { %v2592_v32 = vpack.c.bf16 %v2369_v0, %v2120_v62  ;;  %v1874_v17 = vadd.f32 %v1873_v12, %v7197_v15  ;;  %5875 = vmatmul.msk.bf16.gmra.mxu0 %vm1380_vm0, %v6321_v21  ;;  %5923 = vmatmul.msk.bf16.gmra.mxu1 %vm1380_vm0, %v6321_v21 }
 0x1cb   : > { %5971 = vmatmul.msk.bf16.gmra.mxu2 %vm1380_vm0, %v6321_v21 }
 0x1cc   : > { %v2855_v52 = vunpack.c.l.bf16 %v2592_v32  ;;  %v2856_v6 = vunpack.c.h.bf16 %v2592_v32  ;;  %v2593_v9 = vpack.c.bf16 %v1874_v17, %v1625_v58  ;;  %6019 = vmatmul.msk.bf16.gmra.mxu3 %vm1380_vm0, %v6321_v21  ;;  %v2723_v21 = vunpack.c.l.bf16 %v2526_v49 }
 0x1cd   : > { %5109 = vperm.xlu2 %6437, %v5031_v50   ;;  %v7721_v17 = vmul.f32 %v2852_v37, %v2724_v3  ;;  %v2731_v37 = vunpack.c.l.bf16 %v7191_v39  ;;  %v2732_v3 = vunpack.c.h.bf16 %v7191_v39 }
 0x1ce   : > { %v2857_v61 = vunpack.c.l.bf16 %v2593_v9  ;;  %v2858_v62 = vunpack.c.h.bf16 %v2593_v9  ;;  %v2122_v18 = vpop.f32.mrf.mxu2  ;;  %v7714_v11 = vmul.f32 %v2855_v52, %v2727_v16  ;;  %v7716_v0 = vmul.f32 %v2856_v6, %v2728_v4 }
 0x1cf   : > { %v2123_v44 = vadd.f32 %v2122_v18, %v7197_v15  ;;  %v2371_v58 = vpop.f32.mrf.mxu3  ;;  %v1626_v12 = vpop.f32.mrf.mxu0  ;;  %v7719_v32 = vmul.f32 %v2851_v30, %v2723_v21  ;;  %10895 = vst [vmem:[#allocation78_spill] sm:$0xff] %v7721_v17  ;;  %v5026_v21 = vld [vmem:[%s10604_s9 + $0x50] sm:$0xff] }
 0x1d0   : > { %10892 = vst [vmem:[#allocation75_spill] sm:$0xff] %v7714_v11  ;;  %v2372_v10 = vadd.f32 %v2371_v58, %v7197_v15  ;;  %v1627_v49 = vadd.f32 %v1626_v12, %v7291_v25  ;;  %v7725_v28 = vmul.f32 %v2857_v61, %v2729_v27  ;;  %v7727_v9 = vmul.f32 %v2858_v62, %v2730_v42  ;;  %v5018_v27 = vld [vmem:[%s10604_s9 + $0x10] sm:$0xff]  ;;  %v5016_v42 = vld [vmem:[%s10604_s9] sm:$0xff] }
 0x1d1   : > { %10893 = vst [vmem:[#allocation76_spill] sm:$0xff] %v7716_v0  ;;  %v1875_v16 = vpop.f32.mrf.mxu1  ;;  %5044 = vperm.xlu1 %6436, %v5018_v27   ;;  %5034 = vperm.xlu0 %6435, %v5016_v42   ;;  %v2733_v61 = vunpack.c.l.bf16 %v7150_v53  ;;  %v2734_v62 = vunpack.c.h.bf16 %v7150_v53 }
 0x1d2   : > { %10894 = vst [vmem:[#allocation77_spill] sm:$0xff] %v7719_v32  ;;  %v2594_v56 = vpack.c.bf16 %v2372_v10, %v2123_v44  ;;  %v1876_v30 = vadd.f32 %v1875_v16, %v7291_v25  ;;  %v6322_v44 = vld [vmem:[%s10822_s1 + $0xd8] sm:$0xff]  ;;  %v2757_v32 = vunpack.c.l.bf16 %v10918_v13 }
 0x1d4   : > { %v2859_v4 = vunpack.c.l.bf16 %v2594_v56  ;;  %v2860_v15 = vunpack.c.h.bf16 %v2594_v56  ;;  %v2595_v50 = vpack.c.bf16 %v1876_v30, %v1627_v49 }
 0x1d5   : > { %5084 = vperm.xlu2 %6437, %v5026_v21  }
 0x1d6   : > { %v2124_v18 = vpop.f32.mrf.mxu2  ;;  %v2861_v58 = vunpack.c.l.bf16 %v2595_v50  ;;  %v2862_v12 = vunpack.c.h.bf16 %v2595_v50  ;;  %v7750_v10 = vmul.f32 %v2859_v4, %v2731_v37  ;;  %v7752_v49 = vmul.f32 %v2860_v15, %v2732_v3 }
 0x1d7   : > { %v2125_v39 = vadd.f32 %v2124_v18, %v7291_v25  ;;  %v2373_v16 = vpop.f32.mrf.mxu3  ;;  %v1629_v56 = vpop.f32.mrf.mxu0  ;;  %v2736_v18 = vunpack.c.h.bf16 %v7152_v33 }
 0x1d8   : > { %10896 = vst [vmem:[#allocation79_spill] sm:$0xff] %v7750_v10  ;;  %v2374_v30 = vadd.f32 %v2373_v16, %v7291_v25  ;;  %v1630_v53 = vadd.f32 %v1629_v56, %v7228_v43  ;;  %v7757_v27 = vmul.f32 %v2861_v58, %v2733_v61  ;;  %v7759_v42 = vmul.f32 %v2862_v12, %v2734_v62  ;;  %v5409_v62 = vld [vmem:[%s10606_s11 + $0x8] sm:$0xff] }
 0x1d9   : > { %10897 = vst [vmem:[#allocation80_spill] sm:$0xff] %v7752_v49  ;;  %v1878_v46 = vpop.f32.mrf.mxu1  ;;  %v2735_v25 = vunpack.c.l.bf16 %v7152_v33  ;;  %v2737_v58 = vunpack.c.l.bf16 %v7141_v55  ;;  %v2738_v12 = vunpack.c.h.bf16 %v7141_v55  ;;  %5419 = vperm.xlu0 %6435, %v5409_v62  }
 0x1da   : > { %v2596_v21 = vpack.c.bf16 %v2374_v30, %v2125_v39  ;;  %v1879_v50 = vadd.f32 %v1878_v46, %v7228_v43  ;;  %5876 = vmatmul.msk.bf16.gmra.mxu0 %vm1380_vm0, %v6322_v44  ;;  %5924 = vmatmul.msk.bf16.gmra.mxu1 %vm1380_vm0, %v6322_v44  ;;  %v5017_v46 = vld [vmem:[%s10604_s9 + $0x8] sm:$0xff] }
 0x1db   : > { %5972 = vmatmul.msk.bf16.gmra.mxu2 %vm1380_vm0, %v6322_v44  ;;  %5039 = vperm.xlu1 %6436, %v5017_v46  }
 0x1dc   : > { %v2863_v15 = vunpack.c.l.bf16 %v2596_v21  ;;  %v2864_v3 = vunpack.c.h.bf16 %v2596_v21  ;;  %v2597_v61 = vpack.c.bf16 %v1879_v50, %v1630_v53  ;;  %6020 = vmatmul.msk.bf16.gmra.mxu3 %vm1380_vm0, %v6322_v44  ;;  %v5025_v44 = vld [vmem:[%s10604_s9 + $0x48] sm:$0xff] }
 0x1dd   : > { %5079 = vperm.xlu2 %6437, %v5025_v44  }
 0x1de   : > { %v2865_v39 = vunpack.c.l.bf16 %v2597_v61  ;;  %v2866_v16 = vunpack.c.h.bf16 %v2597_v61  ;;  %v2127_v56 = vpop.f32.mrf.mxu2  ;;  %v7783_v30 = vmul.f32 %v2863_v15, %v2735_v25  ;;  %v7785_v53 = vmul.f32 %v2864_v3, %v2736_v18 }
 0x1df   : > { %v2128_v33 = vadd.f32 %v2127_v56, %v7228_v43  ;;  %v2376_v21 = vpop.f32.mrf.mxu3  ;;  %v1631_v50 = vpop.f32.mrf.mxu0  ;;  %v2739_v18 = vunpack.c.l.bf16 %v7148_v51 }
 0x1e0   : > { %10898 = vst [vmem:[#allocation81_spill] sm:$0xff] %v7783_v30  ;;  %v2377_v55 = vadd.f32 %v2376_v21, %v7228_v43  ;;  %v1632_v46 = vadd.f32 %v1631_v50, %v7169_v8  ;;  %v7790_v62 = vmul.f32 %v2865_v39, %v2737_v58  ;;  %v7792_v23 = vmul.f32 %v2866_v16, %v2738_v12  ;;  %v5410_v12 = vld [vmem:[%s10606_s11 + $0x10] sm:$0xff]  ;;  %v5020_v39 = vld [vmem:[%s10604_s9 + $0x20] sm:$0xff] }
 0x1e1   : > { %10899 = vst [vmem:[#allocation82_spill] sm:$0xff] %v7785_v53  ;;  %v1880_v6 = vpop.f32.mrf.mxu1  ;;  %v2740_v43 = vunpack.c.h.bf16 %v7148_v51  ;;  %v2741_v16 = vunpack.c.l.bf16 %v7164_v47  ;;  %v6323_v51 = vld [vmem:[%s10822_s1 + $0xe0] sm:$0xff] }
 0x1e2   : > { %v2598_v15 = vpack.c.bf16 %v2377_v55, %v2128_v33  ;;  %v1881_v3 = vadd.f32 %v1880_v6, %v7169_v8  ;;  %v2742_v6 = vunpack.c.h.bf16 %v7164_v47 }
 0x1e3   : > { %5424 = vperm.xlu1 %6436, %v5410_v12  }
 0x1e4   : > { %v2867_v44 = vunpack.c.l.bf16 %v2598_v15  ;;  %v2868_v56 = vunpack.c.h.bf16 %v2598_v15  ;;  %v2599_v58 = vpack.c.bf16 %v1881_v3, %v1632_v46 }
 0x1e5   : > { %5054 = vperm.xlu2 %6437, %v5020_v39  }
 0x1e6   : > { %v2129_v33 = vpop.f32.mrf.mxu2  ;;  %v2869_v21 = vunpack.c.l.bf16 %v2599_v58  ;;  %v2870_v50 = vunpack.c.h.bf16 %v2599_v58  ;;  %v7812_v55 = vmul.f32 %v2867_v44, %v2739_v18  ;;  %v7814_v46 = vmul.f32 %v2868_v56, %v2740_v43 }
 0x1e7   : > { %v2130_v15 = vadd.f32 %v2129_v33, %v7169_v8  ;;  %v2378_v3 = vpop.f32.mrf.mxu3  ;;  %v1634_v12 = vpop.f32.mrf.mxu0  ;;  %v10903_v33 = vld [vmem:[#allocation23_spill] sm:$0xff] }
 0x1e8   : > { %10900 = vst [vmem:[#allocation83_spill] sm:$0xff] %v7812_v55  ;;  %v2379_v52 = vadd.f32 %v2378_v3, %v7169_v8  ;;  %v1635_v47 = vadd.f32 %v1634_v12, %v7132_v41  ;;  %v7819_v25 = vmul.f32 %v2869_v21, %v2741_v16  ;;  %v7821_v61 = vmul.f32 %v2870_v50, %v2742_v6  ;;  %v10902_v8 = vld [vmem:[#allocation22_spill] sm:$0xff] }
 0x1e9   : > { %10901 = vst [vmem:[#allocation84_spill] sm:$0xff] %v7814_v46  ;;  %v1883_v7 = vpop.f32.mrf.mxu1  ;;  %v2743_v44 = vunpack.c.l.bf16 %v10902_v8  ;;  %v2745_v21 = vunpack.c.l.bf16 %v10903_v33  ;;  %v2746_v50 = vunpack.c.h.bf16 %v10903_v33 }
 0x1ea   : > { %v2600_v39 = vpack.c.bf16 %v2379_v52, %v2130_v15  ;;  %v1884_v58 = vadd.f32 %v1883_v7, %v7132_v41  ;;  %5877 = vmatmul.msk.bf16.gmra.mxu0 %vm1380_vm0, %v6323_v51  ;;  %5925 = vmatmul.msk.bf16.gmra.mxu1 %vm1380_vm0, %v6323_v51  ;;  %v5019_v7 = vld [vmem:[%s10604_s9 + $0x18] sm:$0xff]  ;;  %v2744_v52 = vunpack.c.h.bf16 %v10902_v8 }
 0x1eb   : > { %5973 = vmatmul.msk.bf16.gmra.mxu2 %vm1380_vm0, %v6323_v51 }
 0x1ec   : > { %v2871_v56 = vunpack.c.l.bf16 %v2600_v39  ;;  %v2872_v16 = vunpack.c.h.bf16 %v2600_v39  ;;  %v2601_v6 = vpack.c.bf16 %v1884_v58, %v1635_v47  ;;  %6021 = vmatmul.msk.bf16.gmra.mxu3 %vm1380_vm0, %v6323_v51 }
 0x1ed   : > { %5049 = vperm.xlu2 %6437, %v5019_v7   ;;  %v10907_v7 = vld [vmem:[#allocation24_spill] sm:$0xff] }
 0x1ee   : > { %v2873_v15 = vunpack.c.l.bf16 %v2601_v6  ;;  %v2874_v3 = vunpack.c.h.bf16 %v2601_v6  ;;  %v2132_v12 = vpop.f32.mrf.mxu2  ;;  %v7839_v34 = vmul.f32 %v2871_v56, %v2743_v44  ;;  %v7841_v39 = vmul.f32 %v2872_v16, %v2744_v52 }
 0x1ef   : > { %v2133_v51 = vadd.f32 %v2132_v12, %v7132_v41  ;;  %v2381_v47 = vpop.f32.mrf.mxu3  ;;  %v1636_v58 = vpop.f32.mrf.mxu0  ;;  %v2747_v52 = vunpack.c.l.bf16 %v10907_v7 }
 0x1f0   : > { %10904 = vst [vmem:[#allocation22_spill] sm:$0xff] %v7839_v34  ;;  %v2382_v2 = vadd.f32 %v2381_v47, %v7132_v41  ;;  %v1637_v8 = vadd.f32 %v1636_v58, %v10906_v48  ;;  %v7846_v4 = vmul.f32 %v2873_v15, %v2745_v21  ;;  %v7848_v37 = vmul.f32 %v2874_v3, %v2746_v50  ;;  %v5408_v50 = vld [vmem:[%s10606_s11] sm:$0xff]  ;;  %v10908_v15 = vld [vmem:[#allocation25_spill] sm:$0xff] }
 0x1f1   : > { %10905 = vst [vmem:[#allocation23_spill] sm:$0xff] %v7841_v39  ;;  %v1885_v33 = vpop.f32.mrf.mxu1  ;;  %v2748_v41 = vunpack.c.h.bf16 %v10907_v7  ;;  %v2749_v3 = vunpack.c.l.bf16 %v10908_v15  ;;  %v2750_v58 = vunpack.c.h.bf16 %v10908_v15 }
 0x1f2   : > { %v2602_v56 = vpack.c.bf16 %v2382_v2, %v2133_v51  ;;  %v1886_v16 = vadd.f32 %v1885_v33, %v10906_v48  ;;  %v6324_v2 = vld [vmem:[%s10822_s1 + $0xe8] sm:$0xff] }
 0x1f4   : > { %v2875_v12 = vunpack.c.l.bf16 %v2602_v56  ;;  %v2876_v47 = vunpack.c.h.bf16 %v2602_v56  ;;  %v2603_v21 = vpack.c.bf16 %v1886_v16, %v1637_v8 }
 0x1f5   : > { %5414 = vperm.xlu2 %6437, %v5408_v50  }
 0x1f6   : > { %v2134_v6 = vpop.f32.mrf.mxu2  ;;  %v2877_v51 = vunpack.c.l.bf16 %v2603_v21  ;;  %v2878_v33 = vunpack.c.h.bf16 %v2603_v21  ;;  %v7865_v7 = vmul.f32 %v2875_v12, %v2747_v52  ;;  %v7867_v56 = vmul.f32 %v2876_v47, %v2748_v41  ;;  %v10911_v12 = vld [vmem:[#allocation11_spill] sm:$0xff] }
 0x1f7   : > { %v2135_v8 = vadd.f32 %v2134_v6, %v10906_v48  ;;  %v2383_v16 = vpop.f32.mrf.mxu3  ;;  %v1639_v44 = vpop.f32.mrf.mxu0 }
 0x1f8   : > { %10909 = vst [vmem:[#allocation16_spill] sm:$0xff] %v7865_v7  ;;  %v2384_v43 = vadd.f32 %v2383_v16, %v10906_v48  ;;  %v7871_v18 = vmul.f32 %v2877_v51, %v2749_v3  ;;  %v7873_v15 = vmul.f32 %v2878_v33, %v2750_v58  ;;  %v1640_v6 = vadd.f32 %v1639_v44, %v10911_v12  ;;  %v10912_v48 = vld [vmem:[#allocation26_spill] sm:$0xff]  ;;  %v5411_v58 = vld [vmem:[%s10606_s11 + $0x18] sm:$0xff] }
 0x1f9   : > { %10910 = vst [vmem:[#allocation24_spill] sm:$0xff] %v7867_v56  ;;  %v1888_v40 = vpop.f32.mrf.mxu1  ;;  %v2751_v21 = vunpack.c.l.bf16 %v10912_v48 }
 0x1fa   : > { %v2604_v38 = vpack.c.bf16 %v2384_v43, %v2135_v8  ;;  %5878 = vmatmul.msk.bf16.gmra.mxu0 %vm1380_vm0, %v6324_v2  ;;  %v1889_v47 = vadd.f32 %v1888_v40, %v10911_v12  ;;  %5926 = vmatmul.msk.bf16.gmra.mxu1 %vm1380_vm0, %v6324_v2  ;;  %v2752_v43 = vunpack.c.h.bf16 %v10912_v48 }
 0x1fb   : > { %5974 = vmatmul.msk.bf16.gmra.mxu2 %vm1380_vm0, %v6324_v2 }
 0x1fc   : > { %v2879_v50 = vunpack.c.l.bf16 %v2604_v38  ;;  %v2880_v3 = vunpack.c.h.bf16 %v2604_v38  ;;  %6022 = vmatmul.msk.bf16.gmra.mxu3 %vm1380_vm0, %v6324_v2  ;;  %v2605_v33 = vpack.c.bf16 %v1889_v47, %v1640_v6  ;;  %v10915_v38 = vld [vmem:[#allocation17_spill] sm:$0xff] }
 0x1fd   : > { %5429 = vperm.xlu2 %6437, %v5411_v58   ;;  %v2758_v58 = vunpack.c.h.bf16 %v10918_v13 }
 0x1fe   : > { %v2137_v51 = vpop.f32.mrf.mxu2  ;;  %v7890_v44 = vmul.f32 %v2879_v50, %v2751_v21  ;;  %v7892_v40 = vmul.f32 %v2880_v3, %v2752_v43  ;;  %v10916_v50 = vld [vmem:[#allocation28_spill] sm:$0xff]  ;;  %v2881_v3 = vunpack.c.l.bf16 %v2605_v33 }
 0x1ff   : > { %v2138_v8 = vadd.f32 %v2137_v51, %v10911_v12  ;;  %v2386_v16 = vpop.f32.mrf.mxu3  ;;  %v1641_v41 = vpop.f32.mrf.mxu0  ;;  %v2755_v6 = vunpack.c.l.bf16 %v10916_v50  ;;  %v2756_v47 = vunpack.c.h.bf16 %v10916_v50  ;;  %v2882_v51 = vunpack.c.h.bf16 %v2605_v33 }
 0x200   : > { %10913 = vst [vmem:[#allocation25_spill] sm:$0xff] %v7890_v44  ;;  %v2387_v48 = vadd.f32 %v2386_v16, %v10911_v12  ;;  %v1642_v52 = vadd.f32 %v1641_v41, %v10915_v38  ;;  %v10917_v41 = vld [vmem:[#allocation27_spill] sm:$0xff] }
 0x201   : > { %10914 = vst [vmem:[#allocation11_spill] sm:$0xff] %v7892_v40  ;;  %v1890_v2 = vpop.f32.mrf.mxu1  ;;  %v2753_v17 = vunpack.c.l.bf16 %v10917_v41  ;;  %v2754_v0 = vunpack.c.h.bf16 %v10917_v41 }
 0x202   : > { %v2606_v21 = vpack.c.bf16 %v2387_v48, %v2138_v8  ;;  %v1891_v43 = vadd.f32 %v1890_v2, %v10915_v38  ;;  %v6325_v48 = vld [vmem:[%s10822_s1 + $0xf0] sm:$0xff] }
 0x203   : > { %v7916_v41 = vmul.f32 %v2881_v3, %v2753_v17  ;;  %v7921_v53 = vmul.f32 %v2882_v51, %v2754_v0  ;;  %v10921_v17 = vld [vmem:[#allocation13_spill] sm:$0xff]  ;;  %v10922_v0 = vld [vmem:[#allocation32_spill] sm:$0xff] }
 0x204   : > { %v2883_v57 = vunpack.c.l.bf16 %v2606_v21  ;;  %v2884_v12 = vunpack.c.h.bf16 %v2606_v21  ;;  %v2607_v16 = vpack.c.bf16 %v1891_v43, %v1642_v52 }
 0x206   : > { %v2139_v8 = vpop.f32.mrf.mxu2  ;;  %v2885_v2 = vunpack.c.l.bf16 %v2607_v16  ;;  %v2886_v50 = vunpack.c.h.bf16 %v2607_v16  ;;  %v7911_v11 = vmul.f32 %v2883_v57, %v2755_v6  ;;  %v7913_v33 = vmul.f32 %v2884_v12, %v2756_v47  ;;  %v6326_v6 = vld [vmem:[%s10822_s1 + $0xf8] sm:$0xff] }
 0x207   : > { %v2140_v52 = vadd.f32 %v2139_v8, %v10915_v38  ;;  %v2388_v21 = vpop.f32.mrf.mxu3  ;;  %v1644_v43 = vpop.f32.mrf.mxu0 }
 0x208   : > { %10919 = vst [vmem:[#allocation26_spill] sm:$0xff] %v7911_v11  ;;  %v2389_v49 = vadd.f32 %v2388_v21, %v10915_v38  ;;  %v7919_v13 = vmul.f32 %v2885_v2, %v2757_v32  ;;  %v7923_v10 = vmul.f32 %v2886_v50, %v2758_v58  ;;  %v1645_v47 = vadd.f32 %v1644_v43, %v10921_v17 }
 0x209   : > { %10920 = vst [vmem:[#allocation17_spill] sm:$0xff] %v7913_v33  ;;  %v1893_v30 = vpop.f32.mrf.mxu1  ;;  %v2759_v32 = vunpack.c.l.bf16 %v10922_v0 }
 0x20a   : > { %v2608_v16 = vpack.c.bf16 %v2389_v49, %v2140_v52  ;;  %5879 = vmatmul.msk.bf16.gmra.mxu0 %vm1380_vm0, %v6325_v48  ;;  %v1894_v38 = vadd.f32 %v1893_v30, %v10921_v17  ;;  %5927 = vmatmul.msk.bf16.gmra.mxu1 %vm1380_vm0, %v6325_v48  ;;  %v2760_v49 = vunpack.c.h.bf16 %v10922_v0  ;;  %v10925_v52 = vld [vmem:[#allocation12_spill] sm:$0xff]  ;;  %v2765_v0 = vunpack.c.l.bf16 %v10927_v31 }
 0x20b   : > { %5975 = vmatmul.msk.bf16.gmra.mxu2 %vm1380_vm0, %v6325_v48 }
 0x20c   : > { %v2887_v58 = vunpack.c.l.bf16 %v2608_v16  ;;  %v2888_v3 = vunpack.c.h.bf16 %v2608_v16  ;;  %6023 = vmatmul.msk.bf16.gmra.mxu3 %vm1380_vm0, %v6325_v48  ;;  %v2609_v2 = vpack.c.bf16 %v1894_v38, %v1645_v47  ;;  %v10926_v38 = vld [vmem:[#allocation33_spill] sm:$0xff] }
 0x20e   : > { %v2142_v51 = vpop.f32.mrf.mxu2  ;;  %v7937_v12 = vmul.f32 %v2887_v58, %v2759_v32  ;;  %v7939_v8 = vmul.f32 %v2888_v3, %v2760_v49  ;;  %v2889_v48 = vunpack.c.l.bf16 %v2609_v2  ;;  %v2890_v58 = vunpack.c.h.bf16 %v2609_v2 }
 0x20f   : > { %v2391_v50 = vpop.f32.mrf.mxu3  ;;  %v1646_v30 = vpop.f32.mrf.mxu0  ;;  %v2143_v32 = vadd.f32 %v2142_v51, %v10921_v17  ;;  %v2761_v3 = vunpack.c.l.bf16 %v10926_v38 }
 0x210   : > { %10923 = vst [vmem:[#allocation28_spill] sm:$0xff] %v7937_v12  ;;  %v1647_v21 = vadd.f32 %v1646_v30, %v10925_v52  ;;  %v2392_v49 = vadd.f32 %v2391_v50, %v10921_v17  ;;  %v2762_v30 = vunpack.c.h.bf16 %v10926_v38 }
 0x211   : > { %10924 = vst [vmem:[#allocation27_spill] sm:$0xff] %v7939_v8  ;;  %v1895_v43 = vpop.f32.mrf.mxu1 }
 0x212   : > { %v1896_v16 = vadd.f32 %v1895_v43, %v10925_v52  ;;  %v2766_v43 = vunpack.c.h.bf16 %v10927_v31  ;;  %v2610_v51 = vpack.c.bf16 %v2392_v49, %v2143_v32  ;;  %v7962_v39 = vmul.f32 %v2890_v58, %v2762_v30  ;;  %v10928_v49 = vld [vmem:[#allocation6_spill] sm:$0xff] }
 0x213   : > { %v10930_v30 = vld [vmem:[#allocation34_spill] sm:$0xff] }
 0x214   : > { %v2611_v47 = vpack.c.bf16 %v1896_v16, %v1647_v21  ;;  %v7957_v21 = vmul.f32 %v2889_v48, %v2761_v3  ;;  %v2891_v48 = vunpack.c.l.bf16 %v2610_v51  ;;  %v2892_v32 = vunpack.c.h.bf16 %v2610_v51 }
 0x215   : > { %v2764_v51 = vunpack.c.h.bf16 %v10930_v30 }
 0x216   : > { %v2144_v57 = vpop.f32.mrf.mxu2  ;;  %v2893_v20 = vunpack.c.l.bf16 %v2611_v47  ;;  %v2894_v46 = vunpack.c.h.bf16 %v2611_v47 }
 0x217   : > { %v2145_v17 = vadd.f32 %v2144_v57, %v10925_v52  ;;  %v2393_v2 = vpop.f32.mrf.mxu3  ;;  %v1649_v50 = vpop.f32.mrf.mxu0  ;;  %v7986_v40 = vmul.f32 %v2892_v32, %v2764_v51  ;;  %v10936_v32 = vld [vmem:[#allocation38_spill] sm:$0xff] }
 0x218   : > { %v2394_v16 = vadd.f32 %v2393_v2, %v10925_v52  ;;  %v7960_v38 = vmul.f32 %v2893_v20, %v2765_v0  ;;  %v7964_v55 = vmul.f32 %v2894_v46, %v2766_v43  ;;  %v1650_v52 = vadd.f32 %v1649_v50, %v10928_v49  ;;  %v10929_v46 = vld [vmem:[#allocation37_spill] sm:$0xff] }
 0x219   : > { %v1898_v34 = vpop.f32.mrf.mxu1  ;;  %v2767_v0 = vunpack.c.l.bf16 %v10929_v46  ;;  %v2768_v58 = vunpack.c.h.bf16 %v10929_v46  ;;  %v2763_v43 = vunpack.c.l.bf16 %v10930_v30  ;;  %10934 = vst [vmem:[#allocation12_spill] sm:$0xff] %v7986_v40  ;;  %v10935_v46 = vld [vmem:[#allocation7_spill] sm:$0xff] }
 0x21a   : > { %v2612_v56 = vpack.c.bf16 %v2394_v16, %v2145_v17  ;;  %5880 = vmatmul.msk.bf16.gmra.mxu0 %vm1380_vm0, %v6326_v6  ;;  %v1899_v20 = vadd.f32 %v1898_v34, %v10928_v49  ;;  %5928 = vmatmul.msk.bf16.gmra.mxu1 %vm1380_vm0, %v6326_v6 }
 0x21b   : > { %5976 = vmatmul.msk.bf16.gmra.mxu2 %vm1380_vm0, %v6326_v6  ;;  %v7984_v31 = vmul.f32 %v2891_v48, %v2763_v43  ;;  %v903_v43 = vpop.permute.xlu2 %902 }
 0x21c   : > { %v2895_v47 = vunpack.c.l.bf16 %v2612_v56  ;;  %v2896_v3 = vunpack.c.h.bf16 %v2612_v56  ;;  %6024 = vmatmul.msk.bf16.gmra.mxu3 %vm1380_vm0, %v6326_v6  ;;  %v2613_v50 = vpack.c.bf16 %v1899_v20, %v1650_v52 }
 0x21d   : > { %10933 = vst [vmem:[#allocation32_spill] sm:$0xff] %v7984_v31  ;;  %v10938_v31 = vld [vmem:[#allocation40_spill] sm:$0xff] }
 0x21e   : > { %v2147_v17 = vpop.f32.mrf.mxu2  ;;  %v7980_v2 = vmul.f32 %v2895_v47, %v2767_v0  ;;  %v7982_v34 = vmul.f32 %v2896_v3, %v2768_v58  ;;  %v2897_v20 = vunpack.c.l.bf16 %v2613_v50  ;;  %v2898_v48 = vunpack.c.h.bf16 %v2613_v50 }
 0x21f   : > { %v2396_v16 = vpop.f32.mrf.mxu3  ;;  %v1651_v57 = vpop.f32.mrf.mxu0  ;;  %v2148_v6 = vadd.f32 %v2147_v17, %v10928_v49  ;;  %v2769_v3 = vunpack.c.l.bf16 %v10936_v32  ;;  %v10937_v17 = vld [vmem:[#allocation41_spill] sm:$0xff] }
 0x220   : > { %10931 = vst [vmem:[#allocation29_spill] sm:$0xff] %v7980_v2  ;;  %v1652_v56 = vadd.f32 %v1651_v57, %v10935_v46  ;;  %v2397_v59 = vadd.f32 %v2396_v16, %v10928_v49  ;;  %v2770_v57 = vunpack.c.h.bf16 %v10936_v32  ;;  %v6327_v49 = vld [vmem:[%s10822_s1 + $0x100] sm:$0xff]  ;;  %v2773_v16 = vunpack.c.l.bf16 %v10937_v17 }
 0x221   : > { %10932 = vst [vmem:[#allocation13_spill] sm:$0xff] %v7982_v34  ;;  %v1900_v7 = vpop.f32.mrf.mxu1  ;;  %v2774_v58 = vunpack.c.h.bf16 %v10937_v17  ;;  %v3025_v44 = vmul.f32 %v2897_v20, %v2769_v3  ;;  %v2772_v2 = vunpack.c.h.bf16 %v10938_v31  ;;  %v10939_v20 = vld [vmem:[#allocation42_spill] sm:$0xff] }
 0x222   : > { %v1901_v52 = vadd.f32 %v1900_v7, %v10935_v46  ;;  %v2614_v30 = vpack.c.bf16 %v2397_v59, %v2148_v6  ;;  %v3026_v29 = vmul.f32 %v2898_v48, %v2770_v57  ;;  %v2775_v48 = vunpack.c.l.bf16 %v10939_v20 }
 0x224   : > { %v2615_v47 = vpack.c.bf16 %v1901_v52, %v1652_v56  ;;  %v2899_v8 = vunpack.c.l.bf16 %v2614_v30  ;;  %v2900_v11 = vunpack.c.h.bf16 %v2614_v30 }
 0x226   : > { %v2149_v51 = vpop.f32.mrf.mxu2  ;;  %v2901_v0 = vunpack.c.l.bf16 %v2615_v47  ;;  %v2902_v7 = vunpack.c.h.bf16 %v2615_v47 }
 0x227   : > { %v2150_v50 = vadd.f32 %v2149_v51, %v10935_v46  ;;  %v2398_v56 = vpop.f32.mrf.mxu3  ;;  %v1654_v52 = vpop.f32.mrf.mxu0  ;;  %v2771_v51 = vunpack.c.l.bf16 %v10938_v31 }
 0x228   : > { %v2399_v59 = vadd.f32 %v2398_v56, %v10935_v46  ;;  %v1655_v6 = vadd.f32 %v1654_v52, %v903_v43  ;;  %v3029_v32 = vmul.f32 %v2901_v0, %v2773_v16  ;;  %v3030_v33 = vmul.f32 %v2902_v7, %v2774_v58  ;;  %v10940_v7 = vld [vmem:[#allocation43_spill] sm:$0xff] }
 0x229   : > { %v1903_v12 = vpop.f32.mrf.mxu1  ;;  %v2776_v46 = vunpack.c.h.bf16 %v10939_v20 }
 0x22a   : > { %v2616_v40 = vpack.c.bf16 %v2399_v59, %v2150_v50  ;;  %v1904_v34 = vadd.f32 %v1903_v12, %v903_v43  ;;  %5881 = vmatmul.msk.bf16.gmra.mxu0 %vm1380_vm0, %v6327_v49  ;;  %v3125_v17 = vpack.c.bf16 %v3029_v32, %v3025_v44  ;;  %v3126_v47 = vpack.c.bf16 %v3030_v33, %v3026_v29  ;;  %v908_v33 = vpop.permute.xlu0 %907 }
 0x22b   : > { %5929 = vmatmul.msk.bf16.gmra.mxu1 %vm1380_vm0, %v6327_v49  ;;  %5977 = vmatmul.msk.bf16.gmra.mxu2 %vm1380_vm0, %v6327_v49  ;;  %v8013_v44 = vmul.f32 %v2899_v8, %v2771_v51  ;;  %v8015_v29 = vmul.f32 %v2900_v11, %v2772_v2  ;;  %v2777_v50 = vunpack.c.l.bf16 %v10940_v7  ;;  %v10941_v11 = vpack.c.bf16 %v7960_v38, %v7957_v21  ;;  %v10943_v21 = vld [vmem:[#allocation44_spill] sm:$0xff] }
 0x22c   : > { %v2903_v0 = vunpack.c.l.bf16 %v2616_v40  ;;  %v2904_v58 = vunpack.c.h.bf16 %v2616_v40  ;;  %v2617_v3 = vpack.c.bf16 %v1904_v34, %v1655_v6  ;;  %6025 = vmatmul.msk.bf16.gmra.mxu3 %vm1380_vm0, %v6327_v49  ;;  %3173 = vmatpush.bf16.msrb.mxu0 %v3125_v17  ;;  %v2778_v40 = vunpack.c.h.bf16 %v10940_v7 }
 0x22d   : > { %3201 = vmatpush.bf16.msrb.mxu2 %v3126_v47  ;;  %v10942_v6 = vpack.c.bf16 %v7964_v55, %v7962_v39  ;;  %v2779_v38 = vunpack.c.l.bf16 %v10943_v21  ;;  %v2780_v20 = vunpack.c.h.bf16 %v10943_v21  ;;  %v10945_v55 = vpack.c.bf16 %v7923_v10, %v7921_v53  ;;  %v10946_v39 = vld [vmem:[#allocation45_spill] sm:$0xff] }
 0x22e   : > { %v8017_v12 = vmul.f32 %v2903_v0, %v2775_v48  ;;  %v8019_v31 = vmul.f32 %v2904_v58, %v2776_v46  ;;  %v2905_v57 = vunpack.c.l.bf16 %v2617_v3  ;;  %v2906_v30 = vunpack.c.h.bf16 %v2617_v3  ;;  %v2152_v16 = vpop.f32.mrf.mxu2 }
 0x22f   : > { %v2153_v34 = vadd.f32 %v2152_v16, %v903_v43  ;;  %v2401_v49 = vpop.f32.mrf.mxu3  ;;  %v1656_v56 = vpop.f32.mrf.mxu0  ;;  %v10944_v58 = vpack.c.bf16 %v7919_v13, %v7916_v41  ;;  %v2781_v3 = vunpack.c.l.bf16 %v10946_v39  ;;  %v6328_v16 = vld [vmem:[%s10822_s1 + $0x108] sm:$0xff]  ;;  %v10949_v53 = vpack.c.bf16 %v7871_v18, %v7846_v4 }
 0x230   : > { %v2402_v8 = vadd.f32 %v2401_v49, %v903_v43  ;;  %3174 = vmatpush.bf16.msrb.mxu0 %v10941_v11  ;;  %v1657_v2 = vadd.f32 %v1656_v56, %v908_v33  ;;  %v3127_v52 = vpack.c.bf16 %v8017_v12, %v8013_v44  ;;  %v3128_v59 = vpack.c.bf16 %v8019_v31, %v8015_v29  ;;  %v8152_v44 = vpop.permute.xlu2 %1057 }
 0x231   : > { %3202 = vmatpush.bf16.msrb.mxu2 %v10942_v6  ;;  %v1905_v32 = vpop.f32.mrf.mxu1  ;;  %v8033_v17 = vmul.f32 %v2905_v57, %v2777_v50  ;;  %v8035_v47 = vmul.f32 %v2906_v30, %v2778_v40  ;;  %v2782_v57 = vunpack.c.h.bf16 %v10946_v39  ;;  %10967 = vst [vmem:[#allocation38_spill] sm:$0xff] %v8152_v44 }
 0x232   : > { %v2618_v43 = vpack.c.bf16 %v2402_v8, %v2153_v34  ;;  %v1906_v51 = vadd.f32 %v1905_v32, %v908_v33 }
 0x234   : > { %v2907_v48 = vunpack.c.l.bf16 %v2618_v43  ;;  %v2908_v46 = vunpack.c.h.bf16 %v2618_v43  ;;  %v2619_v0 = vpack.c.bf16 %v1906_v51, %v1657_v2  ;;  %3175 = vmatpush.bf16.msrb.mxu0 %v10944_v58  ;;  %v10950_v2 = vpack.c.bf16 %v7873_v15, %v7848_v37 }
 0x235   : > { %3203 = vmatpush.bf16.msrb.mxu2 %v10945_v55  ;;  %v10954_v58 = vpack.c.bf16 %v7821_v61, %v7792_v23 }
 0x236   : > { %v2154_v30 = vpop.f32.mrf.mxu2  ;;  %v2909_v7 = vunpack.c.l.bf16 %v2619_v0  ;;  %v2910_v50 = vunpack.c.h.bf16 %v2619_v0  ;;  %v8050_v40 = vmul.f32 %v2907_v48, %v2779_v38  ;;  %v8052_v34 = vmul.f32 %v2908_v46, %v2780_v20  ;;  %v10953_v48 = vld [vmem:[#allocation47_spill] sm:$0xff] }
 0x237   : > { %v2155_v41 = vadd.f32 %v2154_v30, %v908_v33  ;;  %v2403_v13 = vpop.f32.mrf.mxu3  ;;  %v1659_v49 = vpop.f32.mrf.mxu0  ;;  %v10952_v20 = vpack.c.bf16 %v7819_v25, %v7790_v62  ;;  %v2785_v46 = vunpack.c.l.bf16 %v10953_v48  ;;  %v2786_v0 = vunpack.c.h.bf16 %v10953_v48  ;;  %v10965_v48 = vld [vmem:[#allocation31_spill] sm:$0xff] }
 0x238   : > { %10947 = vst [vmem:[#allocation33_spill] sm:$0xff] %v8050_v40  ;;  %v2404_v10 = vadd.f32 %v2403_v13, %v908_v33  ;;  %3176 = vmatpush.bf16.msrb.mxu0 %v10949_v53  ;;  %v1660_v56 = vadd.f32 %v1659_v49, %v7506_v1  ;;  %v8058_v8 = vmul.f32 %v2909_v7, %v2781_v3  ;;  %v10951_v33 = vld [vmem:[#allocation46_spill] sm:$0xff] }
 0x239   : > { %10948 = vst [vmem:[#allocation35_spill] sm:$0xff] %v8052_v34  ;;  %v8060_v11 = vmul.f32 %v2910_v50, %v2782_v57  ;;  %3204 = vmatpush.bf16.msrb.mxu2 %v10950_v2  ;;  %v1908_v6 = vpop.f32.mrf.mxu1  ;;  %v2783_v51 = vunpack.c.l.bf16 %v10951_v33  ;;  %v2784_v37 = vunpack.c.h.bf16 %v10951_v33  ;;  %v10957_v50 = vpack.c.bf16 %v7757_v27, %v7725_v28 }
 0x23a   : > { %v2620_v32 = vpack.c.bf16 %v2404_v10, %v2155_v41  ;;  %v1909_v43 = vadd.f32 %v1908_v6, %v7506_v1  ;;  %5882 = vmatmul.msk.bf16.gmra.mxu0 %vm1380_vm0, %v6328_v16  ;;  %v10958_v41 = vld [vmem:[#allocation39_spill] sm:$0xff]  ;;  %v10959_v49 = vpack.c.bf16 %v7759_v42, %v7727_v9  ;;  %v2787_v27 = vunpack.c.l.bf16 %v7322_v24 }
 0x23b   : > { %5930 = vmatmul.msk.bf16.gmra.mxu1 %vm1380_vm0, %v6328_v16  ;;  %5978 = vmatmul.msk.bf16.gmra.mxu2 %vm1380_vm0, %v6328_v16  ;;  %v2788_v2 = vunpack.c.h.bf16 %v7322_v24  ;;  %v10960_v9 = vpack.c.bf16 %v7688_v5, %v7682_v63  ;;  %v10961_v42 = vpack.c.bf16 %v7690_v54, %v7684_v22  ;;  %v2789_v33 = vunpack.c.l.bf16 %v7324_v19  ;;  %v6329_v24 = vld [vmem:[%s10822_s1 + $0x110] sm:$0xff] }
 0x23c   : > { %v2911_v15 = vunpack.c.l.bf16 %v2620_v32  ;;  %v2912_v21 = vunpack.c.h.bf16 %v2620_v32  ;;  %v2621_v38 = vpack.c.bf16 %v1909_v43, %v1660_v56  ;;  %6026 = vmatmul.msk.bf16.gmra.mxu3 %vm1380_vm0, %v6328_v16  ;;  %3177 = vmatpush.bf16.msrb.mxu0 %v10952_v20 }
 0x23d   : > { %3205 = vmatpush.bf16.msrb.mxu2 %v10954_v58 }
 0x23e   : > { %v2913_v55 = vunpack.c.l.bf16 %v2621_v38  ;;  %v2914_v39 = vunpack.c.h.bf16 %v2621_v38  ;;  %v2157_v3 = vpop.f32.mrf.mxu2  ;;  %v8084_v57 = vmul.f32 %v2911_v15, %v2783_v51  ;;  %v8086_v30 = vmul.f32 %v2912_v21, %v2784_v37 }
 0x23f   : > { %v2158_v16 = vadd.f32 %v2157_v3, %v7506_v1  ;;  %v2406_v7 = vpop.f32.mrf.mxu3  ;;  %v1661_v62 = vpop.f32.mrf.mxu0  ;;  %v2790_v51 = vunpack.c.h.bf16 %v7324_v19  ;;  %v10964_v19 = vpack.c.bf16 %v7611_v14, %v7606_v36 }
 0x240   : > { %10955 = vst [vmem:[#allocation6_spill] sm:$0xff] %v8084_v57  ;;  %v2407_v25 = vadd.f32 %v2406_v7, %v7506_v1  ;;  %3178 = vmatpush.bf16.msrb.mxu0 %v10957_v50  ;;  %v1662_v23 = vadd.f32 %v1661_v62, %v10958_v41  ;;  %v8094_v61 = vmul.f32 %v2913_v55, %v2785_v46  ;;  %v10968_v7 = vld [vmem:[#allocation29_spill] sm:$0xff]  ;;  %v10969_v62 = vld [vmem:[#allocation32_spill] sm:$0xff] }
 0x241   : > { %10956 = vst [vmem:[#allocation37_spill] sm:$0xff] %v8086_v30  ;;  %v8096_v13 = vmul.f32 %v2914_v39, %v2786_v0  ;;  %3206 = vmatpush.bf16.msrb.mxu2 %v10959_v49  ;;  %v1910_v10 = vpop.f32.mrf.mxu1  ;;  %v10966_v55 = vpack.c.bf16 %v7613_v60, %v7608_v45  ;;  %v2791_v45 = vunpack.c.l.bf16 %v7330_v26  ;;  %v2792_v60 = vunpack.c.h.bf16 %v7330_v26  ;;  %v10972_v49 = vld [vmem:[#allocation12_spill] sm:$0xff] }
 0x242   : > { %v2622_v56 = vpack.c.bf16 %v2407_v25, %v2158_v16  ;;  %v1911_v28 = vadd.f32 %v1910_v10, %v10958_v41  ;;  %v10970_v25 = vpack.c.bf16 %v10968_v7, %v10969_v62  ;;  %v8194_v7 = vpop.permute.xlu2 %1042  ;;  %v10990_v62 = vld [vmem:[#allocation11_spill] sm:$0xff] }
 0x243   : > { %10989 = vst [vmem:[#allocation43_spill] sm:$0xff] %v8194_v7 }
 0x244   : > { %v2915_v6 = vunpack.c.l.bf16 %v2622_v56  ;;  %v2916_v32 = vunpack.c.h.bf16 %v2622_v56  ;;  %v2623_v43 = vpack.c.bf16 %v1911_v28, %v1662_v23  ;;  %3179 = vmatpush.bf16.msrb.mxu0 %v10960_v9  ;;  %v10971_v23 = vld [vmem:[#allocation13_spill] sm:$0xff] }
 0x245   : > { %3207 = vmatpush.bf16.msrb.mxu2 %v10961_v42  ;;  %v10973_v26 = vpack.c.bf16 %v10971_v23, %v10972_v49  ;;  %v6330_v23 = vld [vmem:[%s10822_s1 + $0x118] sm:$0xff] }
 0x246   : > { %v2159_v37 = vpop.f32.mrf.mxu2  ;;  %v2917_v15 = vunpack.c.l.bf16 %v2623_v43  ;;  %v2918_v21 = vunpack.c.h.bf16 %v2623_v43  ;;  %v8119_v38 = vmul.f32 %v2915_v6, %v2787_v27  ;;  %v8121_v20 = vmul.f32 %v2916_v32, %v2788_v2  ;;  %v10976_v32 = vld [vmem:[#allocation30_spill] sm:$0xff] }
 0x247   : > { %v2160_v63 = vadd.f32 %v2159_v37, %v10958_v41  ;;  %v2408_v5 = vpop.f32.mrf.mxu3  ;;  %v1664_v22 = vpop.f32.mrf.mxu0  ;;  %v10978_v37 = vld [vmem:[#allocation26_spill] sm:$0xff] }
 0x248   : > { %10962 = vst [vmem:[#allocation34_spill] sm:$0xff] %v8119_v38  ;;  %v2409_v54 = vadd.f32 %v2408_v5, %v10958_v41  ;;  %3180 = vmatpush.bf16.msrb.mxu0 %v10964_v19  ;;  %v1665_v46 = vadd.f32 %v1664_v22, %v10965_v48  ;;  %v8129_v0 = vmul.f32 %v2917_v15, %v2789_v33  ;;  %v10980_v22 = vld [vmem:[#allocation27_spill] sm:$0xff] }
 0x249   : > { %10963 = vst [vmem:[#allocation7_spill] sm:$0xff] %v8121_v20  ;;  %v8131_v58 = vmul.f32 %v2918_v21, %v2790_v51  ;;  %3208 = vmatpush.bf16.msrb.mxu2 %v10966_v55  ;;  %v1913_v39 = vpop.f32.mrf.mxu1  ;;  %v10977_v51 = vld [vmem:[#allocation28_spill] sm:$0xff] }
 0x24a   : > { %v2624_v3 = vpack.c.bf16 %v2409_v54, %v2160_v63  ;;  %v1914_v16 = vadd.f32 %v1913_v39, %v10965_v48  ;;  %5883 = vmatmul.msk.bf16.gmra.mxu0 %vm1380_vm0, %v6329_v24  ;;  %v10981_v54 = vld [vmem:[#allocation17_spill] sm:$0xff]  ;;  %v8187_v39 = vpop.permute.xlu0 %1132 }
 0x24b   : > { %5931 = vmatmul.msk.bf16.gmra.mxu1 %vm1380_vm0, %v6329_v24  ;;  %5979 = vmatmul.msk.bf16.gmra.mxu2 %vm1380_vm0, %v6329_v24  ;;  %v10982_v19 = vpack.c.bf16 %v10980_v22, %v10981_v54  ;;  %10984 = vst [vmem:[#allocation42_spill] sm:$0xff] %v8187_v39  ;;  %v10997_v22 = vld [vmem:[#allocation83_spill] sm:$0xff]  ;;  %v11054_v39 = vld [vmem:[#allocation14_spill] sm:$0xff] }
 0x24c   : > { %3229 = vmatpush.bf16.msra.mxu0 %v3127_v52  ;;  %v2919_v29 = vunpack.c.l.bf16 %v2624_v3  ;;  %v2920_v12 = vunpack.c.h.bf16 %v2624_v3  ;;  %v2625_v31 = vpack.c.bf16 %v1914_v16, %v1665_v46  ;;  %6027 = vmatmul.msk.bf16.gmra.mxu3 %vm1380_vm0, %v6329_v24  ;;  %v2793_v52 = vunpack.c.l.bf16 %v7336_v35 }
 0x24d   : > { %3257 = vmatpush.bf16.msra.mxu2 %v3128_v59  ;;  %v2794_v59 = vunpack.c.h.bf16 %v7336_v35  ;;  %v10979_v24 = vpack.c.bf16 %v10977_v51, %v10978_v37 }
 0x24e   : > { %v2921_v50 = vunpack.c.l.bf16 %v2625_v31  ;;  %v2922_v41 = vunpack.c.h.bf16 %v2625_v31  ;;  %v2162_v10 = vpop.f32.mrf.mxu2  ;;  %v8163_v56 = vmul.f32 %v2919_v29, %v2791_v45  ;;  %v8165_v28 = vmul.f32 %v2920_v12, %v2792_v60  ;;  %v10985_v60 = vld [vmem:[#allocation25_spill] sm:$0xff]  ;;  %v10986_v29 = vld [vmem:[#allocation16_spill] sm:$0xff] }
 0x24f   : > { %v2163_v27 = vadd.f32 %v2162_v10, %v10965_v48  ;;  %v2411_v2 = vpop.f32.mrf.mxu3  ;;  %v1666_v6 = vpop.f32.mrf.mxu0  ;;  %v10987_v12 = vpack.c.bf16 %v10985_v60, %v10986_v29  ;;  %v10988_v31 = vld [vmem:[#allocation49_spill] sm:$0xff]  ;;  %v11042_v60 = vld [vmem:[#allocation56_spill] sm:$0xff] }
 0x250   : > { %3230 = vmatpush.bf16.msra.mxu0 %v10970_v25  ;;  %10974 = vst [vmem:[#allocation41_spill] sm:$0xff] %v8163_v56  ;;  %v2412_v35 = vadd.f32 %v2411_v2, %v10965_v48  ;;  %v1667_v43 = vadd.f32 %v1666_v6, %v10976_v32  ;;  %v8170_v9 = vmul.f32 %v2921_v50, %v2793_v52  ;;  %v10983_v48 = vld [vmem:[#allocation48_spill] sm:$0xff]  ;;  %v2797_v52 = vunpack.c.l.bf16 %v10988_v31 }
 0x251   : > { %3258 = vmatpush.bf16.msra.mxu2 %v10973_v26  ;;  %10975 = vst [vmem:[#allocation40_spill] sm:$0xff] %v8165_v28  ;;  %v8172_v42 = vmul.f32 %v2922_v41, %v2794_v59  ;;  %v1915_v33 = vpop.f32.mrf.mxu1  ;;  %v2795_v46 = vunpack.c.l.bf16 %v10983_v48  ;;  %v2796_v55 = vunpack.c.h.bf16 %v10983_v48  ;;  %v2798_v59 = vunpack.c.h.bf16 %v10988_v31  ;;  %v10991_v25 = vld [vmem:[#allocation24_spill] sm:$0xff] }
 0x252   : > { %v2626_v63 = vpack.c.bf16 %v2412_v35, %v2163_v27  ;;  %v1916_v5 = vadd.f32 %v1915_v33, %v10976_v32  ;;  %v10992_v50 = vpack.c.bf16 %v10990_v62, %v10991_v25  ;;  %v10995_v33 = vld [vmem:[#allocation19_spill] sm:$0xff] }
 0x254   : > { %3231 = vmatpush.bf16.msra.mxu0 %v10979_v24  ;;  %v2923_v3 = vunpack.c.l.bf16 %v2626_v63  ;;  %v2924_v16 = vunpack.c.h.bf16 %v2626_v63  ;;  %v2627_v45 = vpack.c.bf16 %v1916_v5, %v1667_v43  ;;  %v10996_v5 = vld [vmem:[#allocation22_spill] sm:$0xff] }
 0x255   : > { %3259 = vmatpush.bf16.msra.mxu2 %v10982_v19  ;;  %v10998_v54 = vpack.c.bf16 %v10996_v5, %v10997_v22 }
 0x256   : > { %v2164_v41 = vpop.f32.mrf.mxu2  ;;  %v2925_v49 = vunpack.c.l.bf16 %v2627_v45  ;;  %v2926_v26 = vunpack.c.h.bf16 %v2627_v45  ;;  %v8202_v10 = vmul.f32 %v2923_v3, %v2795_v46  ;;  %v8204_v27 = vmul.f32 %v2924_v16, %v2796_v55  ;;  %v10999_v46 = vld [vmem:[#allocation23_spill] sm:$0xff]  ;;  %v11000_v55 = vld [vmem:[#allocation84_spill] sm:$0xff]  ;;  %v11002_v16 = vld [vmem:[#allocation50_spill] sm:$0xff] }
 0x257   : > { %v2165_v2 = vadd.f32 %v2164_v41, %v10976_v32  ;;  %v2413_v6 = vpop.f32.mrf.mxu3  ;;  %v1669_v35 = vpop.f32.mrf.mxu0  ;;  %v11001_v3 = vpack.c.bf16 %v10999_v46, %v11000_v55  ;;  %v2799_v45 = vunpack.c.l.bf16 %v11002_v16  ;;  %v2800_v29 = vunpack.c.h.bf16 %v11002_v16  ;;  %v11005_v41 = vld [vmem:[#allocation79_spill] sm:$0xff]  ;;  %v11014_v55 = vld [vmem:[#allocation36_spill] sm:$0xff] }
 0x258   : > { %3232 = vmatpush.bf16.msra.mxu0 %v10987_v12  ;;  %10993 = vst [vmem:[#allocation44_spill] sm:$0xff] %v8202_v10  ;;  %v2414_v43 = vadd.f32 %v2413_v6, %v10976_v32  ;;  %v1670_v51 = vadd.f32 %v1669_v35, %v10995_v33  ;;  %v8209_v37 = vmul.f32 %v2925_v49, %v2797_v52  ;;  %v11008_v35 = vld [vmem:[#allocation82_spill] sm:$0xff] }
 0x259   : > { %3260 = vmatpush.bf16.msra.mxu2 %v10992_v50  ;;  %10994 = vst [vmem:[#allocation45_spill] sm:$0xff] %v8204_v27  ;;  %v8211_v24 = vmul.f32 %v2926_v26, %v2798_v59  ;;  %v1918_v63 = vpop.f32.mrf.mxu1  ;;  %v11003_v59 = vld [vmem:[#allocation51_spill] sm:$0xff]  ;;  %v11004_v50 = vld [vmem:[#allocation81_spill] sm:$0xff]  ;;  %v8235_v26 = vpop.permute.xlu0 %1047 }
 0x25a   : > { %v2628_v19 = vpack.c.bf16 %v2414_v43, %v2165_v2  ;;  %v1919_v48 = vadd.f32 %v1918_v63, %v10995_v33  ;;  %5884 = vmatmul.msk.bf16.gmra.mxu0 %vm1380_vm0, %v6330_v23  ;;  %v2801_v62 = vunpack.c.l.bf16 %v11003_v59  ;;  %v2802_v25 = vunpack.c.h.bf16 %v11003_v59  ;;  %11007 = vst [vmem:[#allocation46_spill] sm:$0xff] %v8235_v26  ;;  %v11009_v43 = vld [vmem:[#allocation80_spill] sm:$0xff] }
 0x25b   : > { %5932 = vmatmul.msk.bf16.gmra.mxu1 %vm1380_vm0, %v6330_v23  ;;  %5980 = vmatmul.msk.bf16.gmra.mxu2 %vm1380_vm0, %v6330_v23  ;;  %v11006_v49 = vpack.c.bf16 %v11004_v50, %v11005_v41  ;;  %v11010_v63 = vpack.c.bf16 %v11008_v35, %v11009_v43  ;;  %v11015_v50 = vld [vmem:[#allocation75_spill] sm:$0xff]  ;;  %v11019_v35 = vld [vmem:[#allocation78_spill] sm:$0xff] }
 0x25c   : > { %3233 = vmatpush.bf16.msra.mxu0 %v10998_v54  ;;  %v2927_v12 = vunpack.c.l.bf16 %v2628_v19  ;;  %v2928_v31 = vunpack.c.h.bf16 %v2628_v19  ;;  %v2629_v52 = vpack.c.bf16 %v1919_v48, %v1670_v51  ;;  %6028 = vmatmul.msk.bf16.gmra.mxu3 %vm1380_vm0, %v6330_v23  ;;  %v8245_v48 = vpop.permute.xlu2 %1127 }
 0x25d   : > { %3261 = vmatpush.bf16.msra.mxu2 %v11001_v3  ;;  %11013 = vst [vmem:[#allocation31_spill] sm:$0xff] %v8245_v48 }
 0x25e   : > { %v2929_v2 = vunpack.c.l.bf16 %v2629_v52  ;;  %v2930_v6 = vunpack.c.h.bf16 %v2629_v52  ;;  %v2167_v5 = vpop.f32.mrf.mxu2  ;;  %v8240_v51 = vmul.f32 %v2927_v12, %v2799_v45  ;;  %v8242_v23 = vmul.f32 %v2928_v31, %v2800_v29  ;;  %v11016_v45 = vld [vmem:[#allocation77_spill] sm:$0xff] }
 0x25f   : > { %v2168_v22 = vadd.f32 %v2167_v5, %v10995_v33  ;;  %v2416_v54 = vpop.f32.mrf.mxu3  ;;  %v1671_v19 = vpop.f32.mrf.mxu0  ;;  %v11017_v12 = vpack.c.bf16 %v11015_v50, %v11016_v45  ;;  %v11025_v45 = vld [vmem:[#allocation53_spill] sm:$0xff] }
 0x260   : > { %3234 = vmatpush.bf16.msra.mxu0 %v11006_v49  ;;  %11011 = vst [vmem:[#allocation47_spill] sm:$0xff] %v8240_v51  ;;  %v2417_v46 = vadd.f32 %v2416_v54, %v10995_v33  ;;  %v1672_v3 = vadd.f32 %v1671_v19, %v11014_v55  ;;  %v8249_v16 = vmul.f32 %v2929_v2, %v2801_v62  ;;  %v11018_v49 = vld [vmem:[#allocation76_spill] sm:$0xff]  ;;  %v11022_v54 = vld [vmem:[#allocation71_spill] sm:$0xff]  ;;  %v11023_v19 = vld [vmem:[#allocation73_spill] sm:$0xff] }
 0x261   : > { %3262 = vmatpush.bf16.msra.mxu2 %v11010_v63  ;;  %11012 = vst [vmem:[#allocation39_spill] sm:$0xff] %v8242_v23  ;;  %v8251_v52 = vmul.f32 %v2930_v6, %v2802_v25  ;;  %v1920_v59 = vpop.f32.mrf.mxu1  ;;  %v11020_v62 = vpack.c.bf16 %v11018_v49, %v11019_v35  ;;  %v11021_v25 = vld [vmem:[#allocation52_spill] sm:$0xff]  ;;  %v11024_v50 = vpack.c.bf16 %v11022_v54, %v11023_v19  ;;  %v11028_v49 = vld [vmem:[#allocation74_spill] sm:$0xff]  ;;  %v8284_v1 = vpop.permute.xlu0 %1032 }
 0x262   : > { %v2630_v41 = vpack.c.bf16 %v2417_v46, %v2168_v22  ;;  %v1921_v33 = vadd.f32 %v1920_v59, %v11014_v55  ;;  %v2803_v2 = vunpack.c.l.bf16 %v11021_v25  ;;  %v2804_v6 = vunpack.c.h.bf16 %v11021_v25  ;;  %v8271_v46 = vpop.permute.xlu1 %1052  ;;  %v11027_v59 = vld [vmem:[#allocation72_spill] sm:$0xff]  ;;  %11032 = vst [vmem:[#allocation12_spill] sm:$0xff] %v8284_v1  ;;  %v11058_v1 = vld [vmem:[#allocation61_spill] sm:$0xff] }
 0x263   : > { %v2806_v22 = vunpack.c.h.bf16 %v11025_v45  ;;  %11026 = vst [vmem:[#allocation29_spill] sm:$0xff] %v8271_v46  ;;  %v11029_v35 = vpack.c.bf16 %v11027_v59, %v11028_v49  ;;  %v11033_v49 = vld [vmem:[#allocation21_spill] sm:$0xff]  ;;  %v11057_v46 = vld [vmem:[#allocation59_spill] sm:$0xff] }
 0x264   : > { %3235 = vmatpush.bf16.msra.mxu0 %v11017_v12  ;;  %v2931_v43 = vunpack.c.l.bf16 %v2630_v41  ;;  %v2932_v63 = vunpack.c.h.bf16 %v2630_v41  ;;  %v2631_v5 = vpack.c.bf16 %v1921_v33, %v1672_v3  ;;  %v2805_v12 = vunpack.c.l.bf16 %v11025_v45  ;;  %v6331_v41 = vld [vmem:[%s10822_s1 + $0x120] sm:$0xff] }
 0x265   : > { %3263 = vmatpush.bf16.msra.mxu2 %v11020_v62  ;;  %v2817_v7 = vunpack.c.l.bf16 %v11057_v46 }
 0x266   : > { %v2169_v62 = vpop.f32.mrf.mxu2  ;;  %v2933_v3 = vunpack.c.l.bf16 %v2631_v5  ;;  %v2934_v33 = vunpack.c.h.bf16 %v2631_v5  ;;  %v8279_v25 = vmul.f32 %v2931_v43, %v2803_v2  ;;  %v8281_v54 = vmul.f32 %v2932_v63, %v2804_v6  ;;  %v8292_v5 = vpop.permute.xlu2 %1112  ;;  %v11035_v63 = vld [vmem:[#allocation54_spill] sm:$0xff] }
 0x267   : > { %v2170_v19 = vadd.f32 %v2169_v62, %v11014_v55  ;;  %v1674_v45 = vpop.f32.mrf.mxu0  ;;  %11034 = vst [vmem:[#allocation30_spill] sm:$0xff] %v8292_v5  ;;  %v2807_v62 = vunpack.c.l.bf16 %v11035_v63 }
 0x268   : > { %3236 = vmatpush.bf16.msra.mxu0 %v11024_v50  ;;  %11030 = vst [vmem:[#allocation32_spill] sm:$0xff] %v8279_v25  ;;  %v2418_v50 = vpop.f32.mrf.mxu3  ;;  %v8288_v53 = vmul.f32 %v2933_v3, %v2805_v12  ;;  %v8290_v21 = vmul.f32 %v2934_v33, %v2806_v22  ;;  %v2808_v12 = vunpack.c.h.bf16 %v11035_v63 }
 0x269   : > { %3264 = vmatpush.bf16.msra.mxu2 %v11029_v35  ;;  %11031 = vst [vmem:[#allocation13_spill] sm:$0xff] %v8281_v54  ;;  %v2419_v59 = vadd.f32 %v2418_v50, %v11014_v55  ;;  %v1675_v35 = vadd.f32 %v1674_v45, %v11033_v49  ;;  %v1923_v15 = vpop.f32.mrf.mxu1 }
 0x26a   : > { %v1924_v6 = vadd.f32 %v1923_v15, %v11033_v49  ;;  %5885 = vmatmul.msk.bf16.gmra.mxu0 %vm1380_vm0, %v6331_v41  ;;  %v11036_v15 = vld [vmem:[#allocation55_spill] sm:$0xff]  ;;  %v8312_v36 = vpop.permute.xlu1 %1137 }
 0x26b   : > { %v2632_v2 = vpack.c.bf16 %v2419_v59, %v2170_v19  ;;  %5933 = vmatmul.msk.bf16.gmra.mxu1 %vm1380_vm0, %v6331_v41  ;;  %5981 = vmatmul.msk.bf16.gmra.mxu2 %vm1380_vm0, %v6331_v41  ;;  %v2809_v19 = vunpack.c.l.bf16 %v11036_v15  ;;  %v2810_v50 = vunpack.c.h.bf16 %v11036_v15  ;;  %11039 = vst [vmem:[#allocation27_spill] sm:$0xff] %v8312_v36 }
 0x26c   : > { %v2633_v33 = vpack.c.bf16 %v1924_v6, %v1675_v35  ;;  %6029 = vmatmul.msk.bf16.gmra.mxu3 %vm1380_vm0, %v6331_v41  ;;  %v11040_v41 = vld [vmem:[#allocation20_spill] sm:$0xff] }
 0x26d   : > { %v2935_v22 = vunpack.c.l.bf16 %v2632_v2  ;;  %v2936_v3 = vunpack.c.h.bf16 %v2632_v2 }
 0x26e   : > { %v2937_v45 = vunpack.c.l.bf16 %v2633_v33  ;;  %v2938_v59 = vunpack.c.h.bf16 %v2633_v33  ;;  %v2172_v31 = vpop.f32.mrf.mxu2 }
 0x26f   : > { %v8307_v29 = vmul.f32 %v2935_v22, %v2807_v62  ;;  %v8309_v18 = vmul.f32 %v2936_v3, %v2808_v12  ;;  %v2173_v4 = vadd.f32 %v2172_v31, %v11033_v49  ;;  %v1676_v63 = vpop.f32.mrf.mxu0  ;;  %v8324_v31 = vpop.permute.xlu0 %1117 }
 0x270   : > { %v2421_v14 = vpop.f32.mrf.mxu3  ;;  %v1677_v2 = vadd.f32 %v1676_v63, %v11040_v41  ;;  %v8316_v6 = vmul.f32 %v2937_v45, %v2809_v19  ;;  %v8318_v15 = vmul.f32 %v2938_v59, %v2810_v50  ;;  %11041 = vst [vmem:[#allocation17_spill] sm:$0xff] %v8324_v31  ;;  %v8329_v19 = vpop.permute.xlu2 %1027  ;;  %v11044_v63 = vld [vmem:[#allocation57_spill] sm:$0xff] }
 0x271   : > { %11037 = vst [vmem:[#allocation28_spill] sm:$0xff] %v8307_v29  ;;  %v2422_v35 = vadd.f32 %v2421_v14, %v11033_v49  ;;  %v1925_v33 = vpop.f32.mrf.mxu1  ;;  %v2811_v14 = vunpack.c.l.bf16 %v11042_v60  ;;  %v2812_v49 = vunpack.c.h.bf16 %v11042_v60  ;;  %v2813_v32 = vunpack.c.l.bf16 %v11044_v63 }
 0x272   : > { %11038 = vst [vmem:[#allocation26_spill] sm:$0xff] %v8309_v18  ;;  %v1926_v3 = vadd.f32 %v1925_v33, %v11040_v41  ;;  %v2814_v62 = vunpack.c.h.bf16 %v11044_v63  ;;  %v8346_v48 = vpop.permute.xlu1 %1122  ;;  %v11078_v18 = vld [vmem:[#allocation9_spill] sm:$0xff] }
 0x273   : > { %v2634_v22 = vpack.c.bf16 %v2422_v35, %v2173_v4  ;;  %11043 = vst [vmem:[#allocation48_spill] sm:$0xff] %v8329_v19  ;;  %v6332_v4 = vld [vmem:[%s10822_s1 + $0x128] sm:$0xff] }
 0x274   : > { %v2635_v59 = vpack.c.bf16 %v1926_v3, %v1677_v2  ;;  %11047 = vst [vmem:[#allocation49_spill] sm:$0xff] %v8346_v48 }
 0x275   : > { %v2939_v50 = vunpack.c.l.bf16 %v2634_v22  ;;  %v2940_v45 = vunpack.c.h.bf16 %v2634_v22 }
 0x276   : > { %v2174_v55 = vpop.f32.mrf.mxu2  ;;  %v2941_v35 = vunpack.c.l.bf16 %v2635_v59  ;;  %v2942_v33 = vunpack.c.h.bf16 %v2635_v59 }
 0x277   : > { %v8336_v12 = vmul.f32 %v2939_v50, %v2811_v14  ;;  %v8338_v43 = vmul.f32 %v2940_v45, %v2812_v49  ;;  %v2175_v60 = vadd.f32 %v2174_v55, %v11040_v41  ;;  %v1679_v22 = vpop.f32.mrf.mxu0  ;;  %v11048_v49 = vld [vmem:[#allocation18_spill] sm:$0xff]  ;;  %v8359_v45 = vpop.permute.xlu0 %1102 }
 0x278   : > { %v2423_v31 = vpop.f32.mrf.mxu3  ;;  %v8342_v3 = vmul.f32 %v2941_v35, %v2813_v32  ;;  %v8344_v63 = vmul.f32 %v2942_v33, %v2814_v62  ;;  %v1680_v50 = vadd.f32 %v1679_v22, %v11048_v49  ;;  %v11049_v32 = vld [vmem:[#allocation58_spill] sm:$0xff]  ;;  %11050 = vst [vmem:[#allocation11_spill] sm:$0xff] %v8359_v45  ;;  %v8362_v33 = vpop.permute.xlu2 %1012 }
 0x279   : > { %11045 = vst [vmem:[#allocation25_spill] sm:$0xff] %v8336_v12  ;;  %v2424_v2 = vadd.f32 %v2423_v31, %v11040_v41  ;;  %v1928_v36 = vpop.f32.mrf.mxu1  ;;  %v2815_v62 = vunpack.c.l.bf16 %v11049_v32  ;;  %v2816_v31 = vunpack.c.h.bf16 %v11049_v32 }
 0x27a   : > { %11046 = vst [vmem:[#allocation16_spill] sm:$0xff] %v8338_v43  ;;  %5886 = vmatmul.msk.bf16.gmra.mxu0 %vm1380_vm0, %v6332_v4  ;;  %v1929_v41 = vadd.f32 %v1928_v36, %v11048_v49 }
 0x27b   : > { %v2636_v44 = vpack.c.bf16 %v2424_v2, %v2175_v60  ;;  %5934 = vmatmul.msk.bf16.gmra.mxu1 %vm1380_vm0, %v6332_v4  ;;  %5982 = vmatmul.msk.bf16.gmra.mxu2 %vm1380_vm0, %v6332_v4  ;;  %11051 = vst [vmem:[#allocation24_spill] sm:$0xff] %v8362_v33 }
 0x27c   : > { %6030 = vmatmul.msk.bf16.gmra.mxu3 %vm1380_vm0, %v6332_v4  ;;  %v2637_v2 = vpack.c.bf16 %v1929_v41, %v1680_v50  ;;  %v2821_v4 = vunpack.c.l.bf16 %v11058_v1 }
 0x27d   : > { %v2943_v59 = vunpack.c.l.bf16 %v2636_v44  ;;  %v2944_v35 = vunpack.c.h.bf16 %v2636_v44  ;;  %v2818_v44 = vunpack.c.h.bf16 %v11057_v46 }
 0x27e   : > { %v2177_v60 = vpop.f32.mrf.mxu2 }
 0x27f   : > { %v8364_v22 = vmul.f32 %v2943_v59, %v2815_v62  ;;  %v8366_v36 = vmul.f32 %v2944_v35, %v2816_v31  ;;  %v2178_v55 = vadd.f32 %v2177_v60, %v11048_v49  ;;  %v1681_v26 = vpop.f32.mrf.mxu0  ;;  %v11055_v59 = vld [vmem:[#allocation60_spill] sm:$0xff]  ;;  %v2945_v35 = vunpack.c.l.bf16 %v2637_v2  ;;  %v8378_v60 = vpop.permute.xlu1 %1037 }
 0x280   : > { %v2426_v14 = vpop.f32.mrf.mxu3  ;;  %v1682_v48 = vadd.f32 %v1681_v26, %v11054_v39  ;;  %v2819_v50 = vunpack.c.l.bf16 %v11055_v59  ;;  %v2820_v41 = vunpack.c.h.bf16 %v11055_v59  ;;  %11056 = vst [vmem:[#allocation83_spill] sm:$0xff] %v8378_v60  ;;  %v6333_v59 = vld [vmem:[%s10822_s1 + $0x130] sm:$0xff] }
 0x281   : > { %11052 = vst [vmem:[#allocation19_spill] sm:$0xff] %v8364_v22  ;;  %v2427_v32 = vadd.f32 %v2426_v14, %v11048_v49  ;;  %v1930_v5 = vpop.f32.mrf.mxu1  ;;  %v2946_v14 = vunpack.c.h.bf16 %v2637_v2  ;;  %v8394_v34 = vmul.f32 %v2945_v35, %v2817_v7  ;;  %v11063_v35 = vld [vmem:[#allocation8_spill] sm:$0xff]  ;;  %v11068_v7 = vld [vmem:[#allocation15_spill] sm:$0xff] }
 0x282   : > { %11053 = vst [vmem:[#allocation22_spill] sm:$0xff] %v8366_v36  ;;  %v1931_v31 = vadd.f32 %v1930_v5, %v11054_v39  ;;  %v8384_v5 = vpop.permute.xlu0 %1017 }
 0x283   : > { %v2638_v62 = vpack.c.bf16 %v2427_v32, %v2178_v55  ;;  %v2822_v55 = vunpack.c.h.bf16 %v11058_v1  ;;  %11059 = vst [vmem:[#allocation23_spill] sm:$0xff] %v8384_v5  ;;  %v8396_v1 = vpop.permute.xlu2 %1097  ;;  %v8401_v57 = vmul.f32 %v2946_v14, %v2818_v44  ;;  %v11064_v44 = vld [vmem:[#allocation62_spill] sm:$0xff] }
 0x284   : > { %v2639_v45 = vpack.c.bf16 %v1931_v31, %v1682_v48  ;;  %11062 = vst [vmem:[#allocation51_spill] sm:$0xff] %v8396_v1 }
 0x285   : > { %v2947_v49 = vunpack.c.l.bf16 %v2638_v62  ;;  %v2948_v26 = vunpack.c.h.bf16 %v2638_v62 }
 0x286   : > { %v2179_v32 = vpop.f32.mrf.mxu2  ;;  %v2949_v60 = vunpack.c.l.bf16 %v2639_v45  ;;  %v2950_v2 = vunpack.c.h.bf16 %v2639_v45 }
 0x287   : > { %v8389_v19 = vmul.f32 %v2947_v49, %v2819_v50  ;;  %v8391_v48 = vmul.f32 %v2948_v26, %v2820_v41  ;;  %v2180_v62 = vadd.f32 %v2179_v32, %v11054_v39  ;;  %v1684_v31 = vpop.f32.mrf.mxu0  ;;  %v8417_v26 = vpop.permute.xlu1 %1022 }
 0x288   : > { %v2428_v46 = vpop.f32.mrf.mxu3  ;;  %v8399_v40 = vmul.f32 %v2949_v60, %v2821_v4  ;;  %v8403_v20 = vmul.f32 %v2950_v2, %v2822_v55  ;;  %v1685_v49 = vadd.f32 %v1684_v31, %v11063_v35  ;;  %v2823_v4 = vunpack.c.l.bf16 %v11064_v44  ;;  %11065 = vst [vmem:[#allocation81_spill] sm:$0xff] %v8417_v26  ;;  %v11070_v26 = vld [vmem:[#allocation63_spill] sm:$0xff] }
 0x289   : > { %11060 = vst [vmem:[#allocation84_spill] sm:$0xff] %v8389_v19  ;;  %v2429_v30 = vadd.f32 %v2428_v46, %v11054_v39  ;;  %v1933_v45 = vpop.f32.mrf.mxu1  ;;  %v2826_v28 = vunpack.c.h.bf16 %v11070_v26 }
 0x28a   : > { %11061 = vst [vmem:[#allocation50_spill] sm:$0xff] %v8391_v48  ;;  %5887 = vmatmul.msk.bf16.gmra.mxu0 %vm1380_vm0, %v6333_v59  ;;  %v1934_v39 = vadd.f32 %v1933_v45, %v11063_v35  ;;  %v8423_v45 = vpop.permute.xlu0 %1002 }
 0x28b   : > { %v2640_v50 = vpack.c.bf16 %v2429_v30, %v2180_v62  ;;  %5935 = vmatmul.msk.bf16.gmra.mxu1 %vm1380_vm0, %v6333_v59  ;;  %5983 = vmatmul.msk.bf16.gmra.mxu2 %vm1380_vm0, %v6333_v59  ;;  %v2824_v30 = vunpack.c.h.bf16 %v11064_v44  ;;  %v8430_v44 = vpop.permute.xlu2 %1082 }
 0x28c   : > { %6031 = vmatmul.msk.bf16.gmra.mxu3 %vm1380_vm0, %v6333_v59  ;;  %v2641_v62 = vpack.c.bf16 %v1934_v39, %v1685_v49  ;;  %11069 = vst [vmem:[#allocation80_spill] sm:$0xff] %v8430_v44  ;;  %v6334_v59 = vld [vmem:[%s10822_s1 + $0x138] sm:$0xff] }
 0x28d   : > { %v2951_v60 = vunpack.c.l.bf16 %v2640_v50  ;;  %v2952_v14 = vunpack.c.h.bf16 %v2640_v50  ;;  %v11071_v50 = vld [vmem:[#allocation65_spill] sm:$0xff] }
 0x28e   : > { %v2182_v55 = vpop.f32.mrf.mxu2  ;;  %v2829_v44 = vunpack.c.l.bf16 %v11071_v50 }
 0x28f   : > { %v8419_v32 = vmul.f32 %v2951_v60, %v2823_v4  ;;  %v8421_v2 = vmul.f32 %v2952_v14, %v2824_v30  ;;  %v1686_v31 = vpop.f32.mrf.mxu0  ;;  %v2953_v30 = vunpack.c.l.bf16 %v2641_v62  ;;  %v2183_v49 = vadd.f32 %v2182_v55, %v11063_v35 }
 0x290   : > { %v2431_v46 = vpop.f32.mrf.mxu3  ;;  %v1687_v41 = vadd.f32 %v1686_v31, %v11068_v7  ;;  %v2954_v60 = vunpack.c.h.bf16 %v2641_v62  ;;  %v2825_v31 = vunpack.c.l.bf16 %v11070_v26 }
 0x291   : > { %11066 = vst [vmem:[#allocation79_spill] sm:$0xff] %v8419_v32  ;;  %v1935_v1 = vpop.f32.mrf.mxu1  ;;  %v2432_v39 = vadd.f32 %v2431_v46, %v11063_v35  ;;  %v11083_v32 = vld [vmem:[#allocation68_spill] sm:$0xff] }
 0x292   : > { %11067 = vst [vmem:[#allocation82_spill] sm:$0xff] %v8421_v2  ;;  %v1936_v4 = vadd.f32 %v1935_v1, %v11068_v7  ;;  %v2830_v1 = vunpack.c.h.bf16 %v11071_v50  ;;  %v8443_v46 = vmul.f32 %v2953_v30, %v2825_v31  ;;  %v8450_v23 = vmul.f32 %v2954_v60, %v2826_v28  ;;  %v8454_v50 = vpop.permute.xlu0 %1087 }
 0x293   : > { %v2642_v55 = vpack.c.bf16 %v2432_v39, %v2183_v49  ;;  %11073 = vst [vmem:[#allocation75_spill] sm:$0xff] %v8454_v50  ;;  %v8467_v31 = vpop.permute.xlu2 %997 }
 0x294   : > { %v2643_v14 = vpack.c.bf16 %v1936_v4, %v1687_v41  ;;  %v8445_v4 = vpop.permute.xlu1 %1107 }
 0x295   : > { %11072 = vst [vmem:[#allocation36_spill] sm:$0xff] %v8445_v4  ;;  %v2955_v39 = vunpack.c.l.bf16 %v2642_v55 }
 0x296   : > { %v2184_v38 = vpop.f32.mrf.mxu2  ;;  %v2957_v56 = vunpack.c.l.bf16 %v2643_v14  ;;  %v2958_v5 = vunpack.c.h.bf16 %v2643_v14 }
 0x297   : > { %v2185_v35 = vadd.f32 %v2184_v38, %v11068_v7  ;;  %v1689_v41 = vpop.f32.mrf.mxu0 }
 0x298   : > { %v2433_v62 = vpop.f32.mrf.mxu3  ;;  %v8448_v27 = vmul.f32 %v2957_v56, %v2829_v44  ;;  %v8452_v10 = vmul.f32 %v2958_v5, %v2830_v1  ;;  %v11074_v56 = vld [vmem:[#allocation10_spill] sm:$0xff] }
 0x299   : > { %v2434_v26 = vadd.f32 %v2433_v62, %v11068_v7  ;;  %v1938_v51 = vpop.f32.mrf.mxu1  ;;  %v2956_v7 = vunpack.c.h.bf16 %v2642_v55  ;;  %v1690_v44 = vadd.f32 %v1689_v41, %v11074_v56  ;;  %v11075_v5 = vld [vmem:[#allocation66_spill] sm:$0xff]  ;;  %v11076_v62 = vld [vmem:[#allocation64_spill] sm:$0xff] }
 0x29a   : > { %5888 = vmatmul.msk.bf16.gmra.mxu0 %vm1380_vm0, %v6334_v59  ;;  %v1939_v28 = vadd.f32 %v1938_v51, %v11074_v56  ;;  %v2831_v60 = vunpack.c.l.bf16 %v11075_v5  ;;  %v2832_v14 = vunpack.c.h.bf16 %v11075_v5  ;;  %v2827_v55 = vunpack.c.l.bf16 %v11076_v62 }
 0x29b   : > { %v2644_v49 = vpack.c.bf16 %v2434_v26, %v2185_v35  ;;  %5936 = vmatmul.msk.bf16.gmra.mxu1 %vm1380_vm0, %v6334_v59  ;;  %5984 = vmatmul.msk.bf16.gmra.mxu2 %vm1380_vm0, %v6334_v59  ;;  %v2828_v41 = vunpack.c.h.bf16 %v11076_v62 }
 0x29c   : > { %6032 = vmatmul.msk.bf16.gmra.mxu3 %vm1380_vm0, %v6334_v59  ;;  %v2645_v38 = vpack.c.bf16 %v1939_v28, %v1690_v44  ;;  %v8476_v54 = vmul.f32 %v2955_v39, %v2827_v55  ;;  %v8487_v44 = vpop.permute.xlu1 %1092  ;;  %v983_v55 = vpop.permute.xlu2 %982 }
 0x29d   : > { %v2959_v1 = vunpack.c.l.bf16 %v2644_v49  ;;  %v2960_v35 = vunpack.c.h.bf16 %v2644_v49  ;;  %v8478_v5 = vmul.f32 %v2956_v7, %v2828_v41  ;;  %11079 = vst [vmem:[#allocation76_spill] sm:$0xff] %v8487_v44 }
 0x29e   : > { %v2187_v26 = vpop.f32.mrf.mxu2  ;;  %v2961_v28 = vunpack.c.l.bf16 %v2645_v38  ;;  %v2962_v7 = vunpack.c.h.bf16 %v2645_v38 }
 0x29f   : > { %v8472_v51 = vmul.f32 %v2959_v1, %v2831_v60  ;;  %v8474_v30 = vmul.f32 %v2960_v35, %v2832_v14  ;;  %v1691_v4 = vpop.f32.mrf.mxu0  ;;  %11077 = vst [vmem:[#allocation77_spill] sm:$0xff] %v8478_v5  ;;  %v2188_v59 = vadd.f32 %v2187_v26, %v11074_v56  ;;  %v8490_v1 = vpop.permute.xlu0 %1072  ;;  %v11081_v35 = vld [vmem:[#allocation67_spill] sm:$0xff]  ;;  %v6335_v26 = vld [vmem:[%s10822_s1 + $0x140] sm:$0xff]  ;;  %v11082_v14 = vld [vmem:[#allocation69_spill] sm:$0xff]  ;;  %v2836_v5 = vunpack.c.h.bf16 %v11083_v32 }
 0x2a0   : > { %v2436_v50 = vpop.f32.mrf.mxu3  ;;  %v1692_v49 = vadd.f32 %v1691_v4, %v11078_v18  ;;  %11080 = vst [vmem:[#allocation78_spill] sm:$0xff] %v8490_v1  ;;  %v2833_v62 = vunpack.c.l.bf16 %v11081_v35  ;;  %v2837_v60 = vunpack.c.l.bf16 %v11082_v14 }
 0x2a1   : > { %v2437_v25 = vadd.f32 %v2436_v50, %v11074_v56  ;;  %v1940_v29 = vpop.f32.mrf.mxu1  ;;  %v2834_v50 = vunpack.c.h.bf16 %v11081_v35 }
 0x2a2   : > { %v1941_v39 = vadd.f32 %v1940_v29, %v11078_v18  ;;  %v2838_v29 = vunpack.c.h.bf16 %v11082_v14  ;;  %v3089_v33 = vmul.f32 %v2961_v28, %v2833_v62  ;;  %v11084_v28 = vld [vmem:[#allocation70_spill] sm:$0xff] }
 0x2a3   : > { %v2646_v56 = vpack.c.bf16 %v2437_v25, %v2188_v59  ;;  %v3090_v43 = vmul.f32 %v2962_v7, %v2834_v50  ;;  %v2839_v7 = vunpack.c.l.bf16 %v11084_v28 }
 0x2a4   : > { %v2647_v4 = vpack.c.bf16 %v1941_v39, %v1692_v49 }
 0x2a5   : > { %v2963_v12 = vunpack.c.l.bf16 %v2646_v56  ;;  %v2964_v22 = vunpack.c.h.bf16 %v2646_v56 }
 0x2a6   : > { %v2189_v41 = vpop.f32.mrf.mxu2  ;;  %v2965_v44 = vunpack.c.l.bf16 %v2647_v4  ;;  %v2966_v38 = vunpack.c.h.bf16 %v2647_v4 }
 0x2a7   : > { %v2190_v1 = vadd.f32 %v2189_v41, %v11078_v18  ;;  %v1694_v39 = vpop.f32.mrf.mxu0  ;;  %v2835_v41 = vunpack.c.l.bf16 %v11083_v32 }
 0x2a8   : > { %v2438_v49 = vpop.f32.mrf.mxu3  ;;  %v1695_v59 = vadd.f32 %v1694_v39, %v983_v55  ;;  %v3093_v35 = vmul.f32 %v2965_v44, %v2837_v60  ;;  %v3094_v36 = vmul.f32 %v2966_v38, %v2838_v29  ;;  %v8508_v60 = vpop.permute.xlu1 %1007 }
 0x2a9   : > { %v2439_v25 = vadd.f32 %v2438_v49, %v11078_v18  ;;  %v1943_v48 = vpop.f32.mrf.mxu1  ;;  %v2840_v18 = vunpack.c.h.bf16 %v11084_v28  ;;  %v11089_v28 = vpack.c.bf16 %v8342_v3, %v8316_v6  ;;  %v11091_v6 = vpack.c.bf16 %v8288_v53, %v8249_v16 }
 0x2aa   : > { %v1944_v19 = vadd.f32 %v1943_v48, %v983_v55  ;;  %5889 = vmatmul.msk.bf16.gmra.mxu0 %vm1380_vm0, %v6335_v26  ;;  %v3157_v14 = vpack.c.bf16 %v3093_v35, %v3089_v33  ;;  %v3158_v4 = vpack.c.bf16 %v3094_v36, %v3090_v43  ;;  %v988_v43 = vpop.permute.xlu0 %987  ;;  %v8513_v33 = vmul.f32 %v2963_v12, %v2835_v41 }
 0x2ab   : > { %v2648_v2 = vpack.c.bf16 %v2439_v25, %v2190_v1  ;;  %5937 = vmatmul.msk.bf16.gmra.mxu1 %vm1380_vm0, %v6335_v26  ;;  %5985 = vmatmul.msk.bf16.gmra.mxu2 %vm1380_vm0, %v6335_v26  ;;  %v8515_v36 = vmul.f32 %v2964_v22, %v2836_v5  ;;  %v11086_v22 = vpack.c.bf16 %v8452_v10, %v8450_v23  ;;  %v6336_v10 = vld [vmem:[%s10822_s1 + $0x148] sm:$0xff] }
 0x2ac   : > { %v8510_v1 = vpack.c.bf16 %v1944_v19, %v1695_v59  ;;  %6033 = vmatmul.msk.bf16.gmra.mxu3 %vm1380_vm0, %v6335_v26  ;;  %3187 = vmatpush.bf16.msrb.mxu1 %v3157_v14  ;;  %v11085_v19 = vpack.c.bf16 %v8448_v27, %v8443_v46  ;;  %v11087_v27 = vpack.c.bf16 %v8399_v40, %v8394_v34 }
 0x2ad   : > { %v2967_v44 = vunpack.c.l.bf16 %v2648_v2  ;;  %v2968_v48 = vunpack.c.h.bf16 %v2648_v2  ;;  %3215 = vmatpush.bf16.msrb.mxu3 %v3158_v4  ;;  %v11088_v46 = vpack.c.bf16 %v8403_v20, %v8401_v57  ;;  %v11090_v34 = vpack.c.bf16 %v8344_v63, %v8318_v15 }
 0x2ae   : > { %v2192_v50 = vpop.f32.mrf.mxu2  ;;  %v11092_v15 = vpack.c.bf16 %v8290_v21, %v8251_v52 }
 0x2af   : > { %v3095_v32 = vmul.f32 %v2967_v44, %v2839_v7  ;;  %v8517_v62 = vmul.f32 %v2968_v48, %v2840_v18  ;;  %v2193_v56 = vadd.f32 %v2192_v50, %v983_v55  ;;  %v1696_v38 = vpop.f32.mrf.mxu0 }
 0x2b0   : > { %v2441_v29 = vpop.f32.mrf.mxu3  ;;  %3188 = vmatpush.bf16.msrb.mxu1 %v11085_v19  ;;  %v1697_v2 = vadd.f32 %v1696_v38, %v988_v43  ;;  %v11097_v38 = vpack.c.bf16 %v8058_v8, %v8033_v17  ;;  %v11100_v8 = vld [vmem:[#allocation77_spill] sm:$0xff] }
 0x2b1   : > { %v2442_v49 = vadd.f32 %v2441_v29, %v983_v55  ;;  %v3159_v26 = vpack.c.bf16 %v3095_v32, %v8513_v33  ;;  %v3160_v12 = vpack.c.bf16 %v8517_v62, %v8515_v36  ;;  %3216 = vmatpush.bf16.msrb.mxu3 %v11086_v22  ;;  %v1945_v5 = vpop.f32.mrf.mxu1  ;;  %v993_v55 = vpop.permute.xlu1 %992  ;;  %v11093_v33 = vpack.c.bf16 %v8209_v37, %v8170_v9 }
 0x2b2   : > { %v1946_v25 = vadd.f32 %v1945_v5, %v988_v43  ;;  %v11094_v32 = vpack.c.bf16 %v8211_v24, %v8172_v42  ;;  %v11095_v62 = vpack.c.bf16 %v8129_v0, %v8094_v61  ;;  %v11096_v9 = vpack.c.bf16 %v8131_v58, %v8096_v13  ;;  %v6337_v42 = vld [vmem:[%s10822_s1 + $0x150] sm:$0xff] }
 0x2b3   : > { %v8528_v39 = vpack.c.bf16 %v2442_v49, %v2193_v56  ;;  %v11098_v13 = vpack.c.bf16 %v8060_v11, %v8035_v47  ;;  %v11099_v47 = vpack.c.bf16 %v8472_v51, %v8476_v54  ;;  %v11101_v11 = vpack.c.bf16 %v8474_v30, %v11100_v8  ;;  %v11105_v30 = vld [vmem:[#allocation82_spill] sm:$0xff] }
 0x2b4   : > { %v8530_v59 = vpack.c.bf16 %v1946_v25, %v1697_v2  ;;  %3189 = vmatpush.bf16.msrb.mxu1 %v11087_v27  ;;  %v11102_v25 = vld [vmem:[#allocation79_spill] sm:$0xff]  ;;  %v11103_v27 = vld [vmem:[#allocation84_spill] sm:$0xff] }
 0x2b5   : > { %3217 = vmatpush.bf16.msrb.mxu3 %v11088_v46  ;;  %v11104_v46 = vpack.c.bf16 %v11102_v25, %v11103_v27  ;;  %v11134_v27 = vld [vmem:[#allocation6_spill] sm:$0xff] }
 0x2b6   : > { %v2194_v35 = vpop.f32.mrf.mxu2 }
 0x2b7   : > { %v2195_v23 = vadd.f32 %v2194_v35, %v988_v43  ;;  %v1699_v4 = vpop.f32.mrf.mxu0 }
 0x2b8   : > { %v2443_v14 = vpop.f32.mrf.mxu3  ;;  %3190 = vmatpush.bf16.msrb.mxu1 %v11089_v28  ;;  %v1700_v40 = vadd.f32 %v1699_v4, %v993_v55  ;;  %v11111_v4 = vld [vmem:[#allocation22_spill] sm:$0xff] }
 0x2b9   : > { %v2444_v41 = vadd.f32 %v2443_v14, %v988_v43  ;;  %3218 = vmatpush.bf16.msrb.mxu3 %v11090_v34  ;;  %v1948_v57 = vpop.f32.mrf.mxu1  ;;  %v11109_v14 = vld [vmem:[#allocation25_spill] sm:$0xff] }
 0x2ba   : > { %v1949_v7 = vadd.f32 %v1948_v57, %v993_v55  ;;  %5890 = vmatmul.msk.bf16.gmra.mxu0 %vm1380_vm0, %v6336_v10  ;;  %v6338_v34 = vld [vmem:[%s10822_s1 + $0x158] sm:$0xff] }
 0x2bb   : > { %v8547_v20 = vpack.c.bf16 %v2444_v41, %v2195_v23  ;;  %5938 = vmatmul.msk.bf16.gmra.mxu1 %vm1380_vm0, %v6336_v10  ;;  %5986 = vmatmul.msk.bf16.gmra.mxu2 %vm1380_vm0, %v6336_v10  ;;  %v11108_v23 = vld [vmem:[#allocation19_spill] sm:$0xff]  ;;  %v11112_v41 = vld [vmem:[#allocation16_spill] sm:$0xff] }
 0x2bc   : > { %v8552_v18 = vpack.c.bf16 %v1949_v7, %v1700_v40  ;;  %6034 = vmatmul.msk.bf16.gmra.mxu3 %vm1380_vm0, %v6336_v10  ;;  %3191 = vmatpush.bf16.msrb.mxu1 %v11091_v6  ;;  %v11113_v28 = vpack.c.bf16 %v11111_v4, %v11112_v41 }
 0x2bd   : > { %3219 = vmatpush.bf16.msrb.mxu3 %v11092_v15 }
 0x2be   : > { %v2197_v3 = vpop.f32.mrf.mxu2 }
 0x2bf   : > { %v2198_v63 = vadd.f32 %v2197_v3, %v993_v55  ;;  %v1701_v48 = vpop.f32.mrf.mxu0  ;;  %v11114_v3 = vld [vmem:[#allocation24_spill] sm:$0xff] }
 0x2c0   : > { %v2446_v44 = vpop.f32.mrf.mxu3  ;;  %3192 = vmatpush.bf16.msrb.mxu1 %v11093_v33  ;;  %v1702_v36 = vadd.f32 %v1701_v48, %v8467_v31  ;;  %v11115_v48 = vld [vmem:[#allocation28_spill] sm:$0xff] }
 0x2c1   : > { %v2447_v43 = vadd.f32 %v2446_v44, %v993_v55  ;;  %3220 = vmatpush.bf16.msrb.mxu3 %v11094_v32  ;;  %v1950_v53 = vpop.f32.mrf.mxu1  ;;  %v11106_v55 = vld [vmem:[#allocation50_spill] sm:$0xff] }
 0x2c2   : > { %v1951_v21 = vadd.f32 %v1950_v53, %v8467_v31  ;;  %v11107_v35 = vpack.c.bf16 %v11105_v30, %v11106_v55  ;;  %v11118_v53 = vld [vmem:[#allocation26_spill] sm:$0xff]  ;;  %v11137_v30 = vld [vmem:[#allocation37_spill] sm:$0xff]  ;;  %v11138_v55 = vld [vmem:[#allocation35_spill] sm:$0xff] }
 0x2c3   : > { %v8568_v16 = vpack.c.bf16 %v2447_v43, %v2198_v63  ;;  %v11116_v43 = vld [vmem:[#allocation32_spill] sm:$0xff] }
 0x2c4   : > { %v8571_v52 = vpack.c.bf16 %v1951_v21, %v1702_v36  ;;  %3193 = vmatpush.bf16.msrb.mxu1 %v11095_v62  ;;  %v11117_v33 = vpack.c.bf16 %v11115_v48, %v11116_v43  ;;  %v11119_v21 = vld [vmem:[#allocation13_spill] sm:$0xff] }
 0x2c5   : > { %3221 = vmatpush.bf16.msrb.mxu3 %v11096_v9  ;;  %v11120_v62 = vpack.c.bf16 %v11118_v53, %v11119_v21  ;;  %v11121_v9 = vld [vmem:[#allocation47_spill] sm:$0xff] }
 0x2c6   : > { %v2199_v37 = vpop.f32.mrf.mxu2 }
 0x2c7   : > { %v2200_v24 = vadd.f32 %v2199_v37, %v8467_v31  ;;  %v1704_v56 = vpop.f32.mrf.mxu0  ;;  %v11122_v37 = vld [vmem:[#allocation44_spill] sm:$0xff] }
 0x2c8   : > { %v2448_v50 = vpop.f32.mrf.mxu3  ;;  %3194 = vmatpush.bf16.msrb.mxu1 %v11097_v38  ;;  %v1705_v61 = vadd.f32 %v1704_v56, %v8423_v45 }
 0x2c9   : > { %v2449_v29 = vadd.f32 %v2448_v50, %v8467_v31  ;;  %3222 = vmatpush.bf16.msrb.mxu3 %v11098_v13  ;;  %v1953_v0 = vpop.f32.mrf.mxu1  ;;  %v11125_v50 = vld [vmem:[#allocation45_spill] sm:$0xff] }
 0x2ca   : > { %v1954_v49 = vadd.f32 %v1953_v0, %v8423_v45  ;;  %5891 = vmatmul.msk.bf16.gmra.mxu0 %vm1380_vm0, %v6337_v42 }
 0x2cb   : > { %v8591_v58 = vpack.c.bf16 %v2449_v29, %v2200_v24  ;;  %5939 = vmatmul.msk.bf16.gmra.mxu1 %vm1380_vm0, %v6337_v42  ;;  %5987 = vmatmul.msk.bf16.gmra.mxu2 %vm1380_vm0, %v6337_v42  ;;  %v11124_v24 = vld [vmem:[#allocation39_spill] sm:$0xff] }
 0x2cc   : > { %3243 = vmatpush.bf16.msra.mxu1 %v3159_v26  ;;  %v8597_v17 = vpack.c.bf16 %v1954_v49, %v1705_v61  ;;  %6035 = vmatmul.msk.bf16.gmra.mxu3 %vm1380_vm0, %v6337_v42  ;;  %v11123_v42 = vpack.c.bf16 %v11121_v9, %v11122_v37  ;;  %v11126_v56 = vpack.c.bf16 %v11124_v24, %v11125_v50  ;;  %v11127_v49 = vld [vmem:[#allocation23_spill] sm:$0xff] }
 0x2cd   : > { %3271 = vmatpush.bf16.msra.mxu3 %v3160_v12 }
 0x2ce   : > { %v2202_v31 = vpop.f32.mrf.mxu2 }
 0x2cf   : > { %v2203_v19 = vadd.f32 %v2202_v31, %v8423_v45  ;;  %v1706_v26 = vpop.f32.mrf.mxu0  ;;  %v11129_v31 = vld [vmem:[#allocation34_spill] sm:$0xff] }
 0x2d0   : > { %3244 = vmatpush.bf16.msra.mxu1 %v11099_v47  ;;  %v2451_v2 = vpop.f32.mrf.mxu3  ;;  %v1707_v22 = vadd.f32 %v1706_v26, %v8508_v60 }
 0x2d1   : > { %3272 = vmatpush.bf16.msra.mxu3 %v11101_v11  ;;  %v2452_v12 = vadd.f32 %v2451_v2, %v8423_v45  ;;  %v1955_v5 = vpop.f32.mrf.mxu1  ;;  %v11110_v45 = vpack.c.bf16 %v11108_v23, %v11109_v14  ;;  %v11128_v11 = vld [vmem:[#allocation41_spill] sm:$0xff]  ;;  %v6339_v14 = vld [vmem:[%s10822_s1 + $0x160] sm:$0xff] }
 0x2d2   : > { %v1956_v51 = vadd.f32 %v1955_v5, %v8508_v60 }
 0x2d3   : > { %v8612_v54 = vpack.c.bf16 %v2452_v12, %v2203_v19  ;;  %v11130_v19 = vpack.c.bf16 %v11128_v11, %v11129_v31  ;;  %v11131_v12 = vld [vmem:[#allocation40_spill] sm:$0xff] }
 0x2d4   : > { %3245 = vmatpush.bf16.msra.mxu1 %v11104_v46  ;;  %v8618_v10 = vpack.c.bf16 %v1956_v51, %v1707_v22  ;;  %v11132_v22 = vld [vmem:[#allocation7_spill] sm:$0xff]  ;;  %v11135_v46 = vld [vmem:[#allocation33_spill] sm:$0xff] }
 0x2d5   : > { %3273 = vmatpush.bf16.msra.mxu3 %v11107_v35  ;;  %v11133_v5 = vpack.c.bf16 %v11131_v12, %v11132_v22  ;;  %v11136_v51 = vpack.c.bf16 %v11134_v27, %v11135_v46  ;;  %v11139_v35 = vpack.c.bf16 %v11137_v30, %v11138_v55  ;;  %v11143_v12 = vld [vmem:[#allocation83_spill] sm:$0xff]  ;;  %v6341_v55 = vld [vmem:[%s10822_s1 + $0x170] sm:$0xff] }
 0x2d6   : > { %v2204_v40 = vpop.f32.mrf.mxu2 }
 0x2d7   : > { %v2205_v57 = vadd.f32 %v2204_v40, %v8508_v60  ;;  %v1709_v6 = vpop.f32.mrf.mxu0  ;;  %v11140_v40 = vld [vmem:[#allocation81_spill] sm:$0xff] }
 0x2d8   : > { %3246 = vmatpush.bf16.msra.mxu1 %v11110_v45  ;;  %v2453_v7 = vpop.f32.mrf.mxu3  ;;  %v1710_v63 = vadd.f32 %v1709_v6, %v11114_v3 }
 0x2d9   : > { %3274 = vmatpush.bf16.msra.mxu3 %v11113_v28  ;;  %v2454_v15 = vadd.f32 %v2453_v7, %v8508_v60  ;;  %v1958_v44 = vpop.f32.mrf.mxu1 }
 0x2da   : > { %v1959_v32 = vadd.f32 %v1958_v44, %v11114_v3  ;;  %5892 = vmatmul.msk.bf16.gmra.mxu0 %vm1380_vm0, %v6338_v34 }
 0x2db   : > { %v8635_v36 = vpack.c.bf16 %v2454_v15, %v2205_v57  ;;  %5940 = vmatmul.msk.bf16.gmra.mxu1 %vm1380_vm0, %v6338_v34  ;;  %5988 = vmatmul.msk.bf16.gmra.mxu2 %vm1380_vm0, %v6338_v34 }
 0x2dc   : > { %3247 = vmatpush.bf16.msra.mxu1 %v11117_v33  ;;  %v8644_v60 = vpack.c.bf16 %v1959_v32, %v1710_v63  ;;  %6036 = vmatmul.msk.bf16.gmra.mxu3 %vm1380_vm0, %v6338_v34  ;;  %v11141_v33 = vld [vmem:[#allocation48_spill] sm:$0xff] }
 0x2dd   : > { %3275 = vmatpush.bf16.msra.mxu3 %v11120_v62 }
 0x2de   : > { %v2207_v29 = vpop.f32.mrf.mxu2 }
 0x2df   : > { %v2208_v38 = vadd.f32 %v2207_v29, %v11114_v3  ;;  %v1711_v13 = vpop.f32.mrf.mxu0 }
 0x2e0   : > { %3248 = vmatpush.bf16.msra.mxu1 %v11123_v42  ;;  %v2456_v61 = vpop.f32.mrf.mxu3  ;;  %v1712_v47 = vadd.f32 %v1711_v13, %v11127_v49  ;;  %v6340_v42 = vld [vmem:[%s10822_s1 + $0x168] sm:$0xff] }
 0x2e1   : > { %3276 = vmatpush.bf16.msra.mxu3 %v11126_v56  ;;  %v2457_v0 = vadd.f32 %v2456_v61, %v11114_v3  ;;  %v1960_v8 = vpop.f32.mrf.mxu1 }
 0x2e2   : > { %v1961_v26 = vadd.f32 %v1960_v8, %v11127_v49 }
 0x2e3   : > { %v8659_v2 = vpack.c.bf16 %v2457_v0, %v2208_v38  ;;  %v11142_v38 = vld [vmem:[#allocation12_spill] sm:$0xff] }
 0x2e4   : > { %3249 = vmatpush.bf16.msra.mxu1 %v11130_v19  ;;  %v8665_v25 = vpack.c.bf16 %v1961_v26, %v1712_v47 }
 0x2e5   : > { %3277 = vmatpush.bf16.msra.mxu3 %v11133_v5 }
 0x2e6   : > { %v2209_v23 = vpop.f32.mrf.mxu2 }
 0x2e7   : > { %v2210_v45 = vadd.f32 %v2209_v23, %v11127_v49  ;;  %v1714_v41 = vpop.f32.mrf.mxu0 }
 0x2e8   : > { %3250 = vmatpush.bf16.msra.mxu1 %v11136_v51  ;;  %v2458_v4 = vpop.f32.mrf.mxu3  ;;  %v1715_v34 = vadd.f32 %v1714_v41, %v11140_v40 }
 0x2e9   : > { %3278 = vmatpush.bf16.msra.mxu3 %v11139_v35  ;;  %v2459_v28 = vadd.f32 %v2458_v4, %v11127_v49  ;;  %v1963_v57 = vpop.f32.mrf.mxu1  ;;  %v11144_v4 = vld [vmem:[#allocation43_spill] sm:$0xff] }
 0x2ea   : > { %v1964_v6 = vadd.f32 %v1963_v57, %v11140_v40  ;;  %5893 = vmatmul.msk.bf16.gmra.mxu0 %vm1380_vm0, %v6339_v14 }
 0x2eb   : > { %v8679_v7 = vpack.c.bf16 %v2459_v28, %v2210_v45  ;;  %5941 = vmatmul.msk.bf16.gmra.mxu1 %vm1380_vm0, %v6339_v14  ;;  %5989 = vmatmul.msk.bf16.gmra.mxu2 %vm1380_vm0, %v6339_v14 }
 0x2ec   : > { %v8685_v15 = vpack.c.bf16 %v1964_v6, %v1715_v34  ;;  %6037 = vmatmul.msk.bf16.gmra.mxu3 %vm1380_vm0, %v6339_v14 }
 0x2ee   : > { %v2212_v3 = vpop.f32.mrf.mxu2 }
 0x2ef   : > { %v2213_v63 = vadd.f32 %v2212_v3, %v11140_v40  ;;  %v1716_v48 = vpop.f32.mrf.mxu0 }
 0x2f0   : > { %v2461_v44 = vpop.f32.mrf.mxu3  ;;  %v1717_v32 = vadd.f32 %v1716_v48, %v11141_v33 }
 0x2f1   : > { %v2462_v43 = vadd.f32 %v2461_v44, %v11140_v40  ;;  %v1965_v53 = vpop.f32.mrf.mxu1 }
 0x2f2   : > { %v1966_v62 = vadd.f32 %v1965_v53, %v11141_v33  ;;  %v6342_v53 = vld [vmem:[%s10822_s1 + $0x178] sm:$0xff] }
 0x2f3   : > { %v8691_v21 = vpack.c.bf16 %v2462_v43, %v2213_v63 }
 0x2f4   : > { %v8694_v9 = vpack.c.bf16 %v1966_v62, %v1717_v32 }
 0x2f6   : > { %v2214_v37 = vpop.f32.mrf.mxu2 }
 0x2f7   : > { %v2215_v24 = vadd.f32 %v2214_v37, %v11141_v33  ;;  %v1719_v56 = vpop.f32.mrf.mxu0 }
 0x2f8   : > { %v2463_v50 = vpop.f32.mrf.mxu3  ;;  %v1720_v61 = vadd.f32 %v1719_v56, %v11142_v38 }
 0x2f9   : > { %v2464_v29 = vadd.f32 %v2463_v50, %v11141_v33  ;;  %v1968_v13 = vpop.f32.mrf.mxu1 }
 0x2fa   : > { %v1969_v49 = vadd.f32 %v1968_v13, %v11142_v38  ;;  %5894 = vmatmul.msk.bf16.gmra.mxu0 %vm1380_vm0, %v6340_v42 }
 0x2fb   : > { %v8702_v0 = vpack.c.bf16 %v2464_v29, %v2215_v24  ;;  %5942 = vmatmul.msk.bf16.gmra.mxu1 %vm1380_vm0, %v6340_v42  ;;  %5990 = vmatmul.msk.bf16.gmra.mxu2 %vm1380_vm0, %v6340_v42  ;;  %v8754_v29 = vpop.permute.xlu1 %1077 }
 0x2fc   : > { %v8708_v47 = vpack.c.bf16 %v1969_v49, %v1720_v61  ;;  %6038 = vmatmul.msk.bf16.gmra.mxu3 %vm1380_vm0, %v6340_v42  ;;  %v11145_v42 = vld [vmem:[#allocation29_spill] sm:$0xff]  ;;  %11146 = vst [vmem:[#allocation52_spill] sm:$0xff] %v8754_v29 }
 0x2fe   : > { %v2217_v8 = vpop.f32.mrf.mxu2 }
 0x2ff   : > { %v2218_v11 = vadd.f32 %v2217_v8, %v11142_v38  ;;  %v1721_v19 = vpop.f32.mrf.mxu0 }
 0x300   : > { %v2466_v31 = vpop.f32.mrf.mxu3  ;;  %v1722_v22 = vadd.f32 %v1721_v19, %v11143_v12 }
 0x301   : > { %v2467_v26 = vadd.f32 %v2466_v31, %v11142_v38  ;;  %v1970_v5 = vpop.f32.mrf.mxu1 }
 0x302   : > { %v1971_v46 = vadd.f32 %v1970_v5, %v11143_v12  ;;  %v6045_v5 = vld [vmem:[%s10598_s3 + $0x8] sm:$0xf0] }
 0x303   : > { %v8714_v27 = vpack.c.bf16 %v2467_v26, %v2218_v11  ;;  %v6043_v26 = vld [vmem:[%s10598_s3] sm:$0xf] }
 0x304   : > { %v8717_v51 = vpack.c.bf16 %v1971_v46, %v1722_v22  ;;  %v6343_v22 = vld [vmem:[%s10598_s3 + $0x4] sm:$0xf]  ;;  %v1063_v46 = vpop.permute.xlu1 %1062 }
 0x306   : > { %v2219_v30 = vpop.f32.mrf.mxu2 }
 0x307   : > { %v2220_v35 = vadd.f32 %v2219_v30, %v11143_v12  ;;  %v1724_v14 = vpop.f32.mrf.mxu0 }
 0x308   : > { %v2468_v23 = vpop.f32.mrf.mxu3  ;;  %v1725_v41 = vadd.f32 %v1724_v14, %v11144_v4  ;;  %v6048_v14 = vor.u32 %v6343_v22, %v6045_v5 }
 0x309   : > { %v2469_v45 = vadd.f32 %v2468_v23, %v11143_v12  ;;  %v1973_v28 = vpop.f32.mrf.mxu1  ;;  %v6344_v12 = vld [vmem:[%s10598_s3 + $0x4] sm:$0xf0] }
 0x30a   : > { %v1974_v34 = vadd.f32 %v1973_v28, %v11144_v4  ;;  %5895 = vmatmul.msk.bf16.gmra.mxu0 %vm1380_vm0, %v6341_v55 }
 0x30b   : > { %v8725_v40 = vpack.c.bf16 %v2469_v45, %v2220_v35  ;;  %5943 = vmatmul.msk.bf16.gmra.mxu1 %vm1380_vm0, %v6341_v55  ;;  %5991 = vmatmul.msk.bf16.gmra.mxu2 %vm1380_vm0, %v6341_v55 }
 0x30c   : > { %v8731_v57 = vpack.c.bf16 %v1974_v34, %v1725_v41  ;;  %6039 = vmatmul.msk.bf16.gmra.mxu3 %vm1380_vm0, %v6341_v55  ;;  %v6044_v55 = vor.u32 %v6344_v12, %v6043_v26 }
 0x30e   : > { %v2222_v6 = vpop.f32.mrf.mxu2 }
 0x30f   : > { %v2223_v3 = vadd.f32 %v2222_v6, %v11144_v4  ;;  %v8735_v44 = vpop.f32.mrf.mxu0 }
 0x310   : > { %v2471_v63 = vpop.f32.mrf.mxu3 }
 0x311   : > { %v2472_v48 = vadd.f32 %v2471_v63, %v11144_v4  ;;  %v8738_v43 = vpop.f32.mrf.mxu1 }
 0x313   : > { %v8740_v33 = vpack.c.bf16 %v2472_v48, %v2223_v3 }
 0x316   : > { %v8742_v32 = vpop.f32.mrf.mxu2 }
 0x317   : > { %v1729_v37 = vpop.f32.mrf.mxu0 }
 0x318   : > { %v8747_v62 = vpop.f32.mrf.mxu3  ;;  %v1730_v24 = vadd.f32 %v1729_v37, %v11145_v42 }
 0x319   : > { %v1978_v50 = vpop.f32.mrf.mxu1 }
 0x31a   : > { %v1979_v56 = vadd.f32 %v1978_v50, %v11145_v42  ;;  %5896 = vmatmul.msk.bf16.gmra.mxu0 %vm1380_vm0, %v6342_v53 }
 0x31b   : > { %5944 = vmatmul.msk.bf16.gmra.mxu1 %vm1380_vm0, %v6342_v53  ;;  %5992 = vmatmul.msk.bf16.gmra.mxu2 %vm1380_vm0, %v6342_v53 }
 0x31c   : > { %v8756_v38 = vpack.c.bf16 %v1979_v56, %v1730_v24  ;;  %6040 = vmatmul.msk.bf16.gmra.mxu3 %vm1380_vm0, %v6342_v53  ;;  %v11155_v56 = vld [vmem:[#allocation78_spill] sm:$0xff] }
 0x31e   : > { %v2227_v61 = vpop.f32.mrf.mxu2 }
 0x31f   : > { %v2228_v13 = vadd.f32 %v2227_v61, %v11145_v42  ;;  %v8760_v8 = vpop.f32.mrf.mxu0 }
 0x320   : > { %v2476_v49 = vpop.f32.mrf.mxu3 }
 0x321   : > { %v2477_v11 = vadd.f32 %v2476_v49, %v11145_v42  ;;  %v8763_v31 = vpop.f32.mrf.mxu1 }
 0x323   : > { %v8765_v19 = vpack.c.bf16 %v2477_v11, %v2228_v13 }
 0x325   : > { %11147 = vst [vmem:[#allocation71_spill] sm:$0xff] %v8765_v19 }
 0x326   : > { %v8779_v30 = vpop.f32.mrf.mxu2 }
 0x327   : > { %11148 = vst [vmem:[#allocation73_spill] sm:$0xff] %v8779_v30  ;;  %v1734_v23 = vpop.f32.mrf.mxu0 }
 0x328   : > { %v8781_v35 = vpop.f32.mrf.mxu3  ;;  %v1735_v45 = vadd.f32 %v1734_v23, %v1063_v46 }
 0x329   : > { %11149 = vst [vmem:[#allocation53_spill] sm:$0xff] %v8781_v35  ;;  %v1983_v4 = vpop.f32.mrf.mxu1 }
 0x32a   : > { %v1984_v41 = vadd.f32 %v1983_v4, %v1063_v46  ;;  %3181 = vmatmul.bf16.vlgmr.msrb.gmra.mxu0 %v6044_v55 }
 0x32b   : > { %3209 = vmatmul.bf16.vlgmr.msrb.gmra.mxu2 %v6044_v55  ;;  %3195 = vmatmul.bf16.vlgmr.msrb.gmra.mxu1 %v6048_v14 }
 0x32c   : > { %v8783_v28 = vpack.c.bf16 %v1984_v41, %v1735_v45  ;;  %3223 = vmatmul.bf16.vlgmr.msrb.gmra.mxu3 %v6048_v14 }
 0x32e   : > { %v2232_v34 = vpop.f32.mrf.mxu2 }
 0x32f   : > { %v2233_v6 = vadd.f32 %v2232_v34, %v1063_v46  ;;  %v8785_v63 = vpop.f32.mrf.mxu0  ;;  %v11162_v34 = vld [vmem:[#allocation80_spill] sm:$0xff] }
 0x330   : > { %v2481_v3 = vpop.f32.mrf.mxu3  ;;  %11150 = vst [vmem:[#allocation72_spill] sm:$0xff] %v8785_v63 }
 0x331   : > { %v2482_v48 = vadd.f32 %v2481_v3, %v1063_v46  ;;  %v8787_v53 = vpop.f32.mrf.mxu1 }
 0x332   : > { %11151 = vst [vmem:[#allocation74_spill] sm:$0xff] %v8787_v53 }
 0x333   : > { %v8789_v37 = vpack.c.bf16 %v2482_v48, %v2233_v6 }
 0x335   : > { %11152 = vst [vmem:[#allocation21_spill] sm:$0xff] %v8789_v37 }
 0x336   : > { %v8791_v42 = vpop.f32.mrf.mxu2 }
 0x337   : > { %11153 = vst [vmem:[#allocation54_spill] sm:$0xff] %v8791_v42  ;;  %v1739_v50 = vpop.f32.mrf.mxu0 }
 0x338   : > { %v8793_v24 = vpop.f32.mrf.mxu3  ;;  %v1740_v61 = vadd.f32 %v1739_v50, %v11155_v56 }
 0x339   : > { %11154 = vst [vmem:[#allocation55_spill] sm:$0xff] %v8793_v24  ;;  %v1988_v13 = vpop.f32.mrf.mxu1 }
 0x33a   : > { %v1989_v49 = vadd.f32 %v1988_v13, %v11155_v56  ;;  %3237 = vmatmul.bf16.vlgmr.msra.gmra.mxu0 %v6044_v55 }
 0x33b   : > { %3265 = vmatmul.bf16.vlgmr.msra.gmra.mxu2 %v6044_v55  ;;  %3251 = vmatmul.bf16.vlgmr.msra.gmra.mxu1 %v6048_v14 }
 0x33c   : > { %v8797_v11 = vpack.c.bf16 %v1989_v49, %v1740_v61  ;;  %3279 = vmatmul.bf16.vlgmr.msra.gmra.mxu3 %v6048_v14 }
 0x33e   : > { %11156 = vst [vmem:[#allocation20_spill] sm:$0xff] %v8797_v11  ;;  %v2237_v26 = vpop.f32.mrf.mxu2 }
 0x33f   : > { %v2238_v12 = vadd.f32 %v2237_v26, %v11155_v56  ;;  %v8800_v5 = vpop.f32.mrf.mxu0 }
 0x340   : > { %v2486_v22 = vpop.f32.mrf.mxu3  ;;  %11157 = vst [vmem:[#allocation56_spill] sm:$0xff] %v8800_v5 }
 0x341   : > { %v2487_v46 = vadd.f32 %v2486_v22, %v11155_v56  ;;  %v8803_v23 = vpop.f32.mrf.mxu1 }
 0x342   : > { %11158 = vst [vmem:[#allocation57_spill] sm:$0xff] %v8803_v23 }
 0x343   : > { %v8805_v45 = vpack.c.bf16 %v2487_v46, %v2238_v12 }
 0x345   : > { %11159 = vst [vmem:[#allocation18_spill] sm:$0xff] %v8805_v45 }
 0x346   : > { %v8807_v4 = vpop.f32.mrf.mxu2 }
 0x347   : > { %11160 = vst [vmem:[#allocation58_spill] sm:$0xff] %v8807_v4  ;;  %v1744_v55 = vpop.f32.mrf.mxu0 }
 0x348   : > { %v8809_v41 = vpop.f32.mrf.mxu3  ;;  %v1745_v6 = vadd.f32 %v1744_v55, %v11162_v34 }
 0x349   : > { %11161 = vst [vmem:[#allocation14_spill] sm:$0xff] %v8809_v41  ;;  %v1993_v14 = vpop.f32.mrf.mxu1 }
 0x34a   : > { %v1994_v3 = vadd.f32 %v1993_v14, %v11162_v34  ;;  %v11169_v14 = vld [vmem:[#allocation76_spill] sm:$0xff] }
 0x34c   : > { %v8813_v48 = vpack.c.bf16 %v1994_v3, %v1745_v6 }
 0x34e   : > { %11163 = vst [vmem:[#allocation60_spill] sm:$0xff] %v8813_v48  ;;  %v2242_v50 = vpop.f32.mrf.mxu2 }
 0x34f   : > { %v2243_v61 = vadd.f32 %v2242_v50, %v11162_v34  ;;  %v8816_v13 = vpop.f32.mrf.mxu0 }
 0x350   : > { %v2491_v56 = vpop.f32.mrf.mxu3  ;;  %11164 = vst [vmem:[#allocation59_spill] sm:$0xff] %v8816_v13 }
 0x351   : > { %v2492_v49 = vadd.f32 %v2491_v56, %v11162_v34  ;;  %v8819_v26 = vpop.f32.mrf.mxu1 }
 0x352   : > { %11165 = vst [vmem:[#allocation61_spill] sm:$0xff] %v8819_v26 }
 0x353   : > { %v8821_v12 = vpack.c.bf16 %v2492_v49, %v2243_v61 }
 0x355   : > { %11166 = vst [vmem:[#allocation8_spill] sm:$0xff] %v8821_v12 }
 0x356   : > { %v8823_v22 = vpop.f32.mrf.mxu2 }
 0x357   : > { %11167 = vst [vmem:[#allocation62_spill] sm:$0xff] %v8823_v22  ;;  %v1749_v55 = vpop.f32.mrf.mxu0 }
 0x358   : > { %v8825_v46 = vpop.f32.mrf.mxu3  ;;  %v1750_v6 = vadd.f32 %v1749_v55, %v11169_v14 }
 0x359   : > { %11168 = vst [vmem:[#allocation15_spill] sm:$0xff] %v8825_v46  ;;  %v1998_v3 = vpop.f32.mrf.mxu1 }
 0x35a   : > { %v1999_v24 = vadd.f32 %v1998_v3, %v11169_v14  ;;  %v11176_v3 = vld [vmem:[#allocation11_spill] sm:$0xff] }
 0x35c   : > { %v8829_v50 = vpack.c.bf16 %v1999_v24, %v1750_v6 }
 0x35e   : > { %11170 = vst [vmem:[#allocation63_spill] sm:$0xff] %v8829_v50  ;;  %v2247_v42 = vpop.f32.mrf.mxu2 }
 0x35f   : > { %v2248_v41 = vadd.f32 %v2247_v42, %v11169_v14  ;;  %v8832_v56 = vpop.f32.mrf.mxu0 }
 0x360   : > { %v2496_v34 = vpop.f32.mrf.mxu3  ;;  %11171 = vst [vmem:[#allocation65_spill] sm:$0xff] %v8832_v56 }
 0x361   : > { %v2497_v61 = vadd.f32 %v2496_v34, %v11169_v14  ;;  %v8835_v49 = vpop.f32.mrf.mxu1 }
 0x362   : > { %11172 = vst [vmem:[#allocation10_spill] sm:$0xff] %v8835_v49 }
 0x363   : > { %v8837_v4 = vpack.c.bf16 %v2497_v61, %v2248_v41 }
 0x365   : > { %11173 = vst [vmem:[#allocation66_spill] sm:$0xff] %v8837_v4 }
 0x366   : > { %v8839_v46 = vpop.f32.mrf.mxu2 }
 0x367   : > { %11174 = vst [vmem:[#allocation64_spill] sm:$0xff] %v8839_v46  ;;  %v1754_v22 = vpop.f32.mrf.mxu0 }
 0x368   : > { %v8841_v55 = vpop.f32.mrf.mxu3  ;;  %v1755_v24 = vadd.f32 %v1754_v22, %v11176_v3 }
 0x369   : > { %11175 = vst [vmem:[#allocation9_spill] sm:$0xff] %v8841_v55  ;;  %v2003_v6 = vpop.f32.mrf.mxu1 }
 0x36a   : > { %v2004_v26 = vadd.f32 %v2003_v6, %v11176_v3  ;;  %v11183_v6 = vld [vmem:[#allocation30_spill] sm:$0xff] }
 0x36c   : > { %v8845_v42 = vpack.c.bf16 %v2004_v26, %v1755_v24 }
 0x36e   : > { %11177 = vst [vmem:[#allocation67_spill] sm:$0xff] %v8845_v42  ;;  %v2252_v13 = vpop.f32.mrf.mxu2 }
 0x36f   : > { %v2253_v23 = vadd.f32 %v2252_v13, %v11176_v3  ;;  %v8848_v34 = vpop.f32.mrf.mxu0 }
 0x370   : > { %v2501_v14 = vpop.f32.mrf.mxu3  ;;  %11178 = vst [vmem:[#allocation69_spill] sm:$0xff] %v8848_v34 }
 0x371   : > { %v2502_v41 = vadd.f32 %v2501_v14, %v11176_v3  ;;  %v8851_v61 = vpop.f32.mrf.mxu1 }
 0x372   : > { %11179 = vst [vmem:[#allocation68_spill] sm:$0xff] %v8851_v61 }
 0x373   : > { %v8853_v46 = vpack.c.bf16 %v2502_v41, %v2253_v23 }
 0x375   : > { %11180 = vst [vmem:[#allocation70_spill] sm:$0xff] %v8853_v46 }
 0x376   : > { %v8855_v55 = vpop.f32.mrf.mxu2 }
 0x377   : > { %11181 = vst [vmem:[#allocation77_spill] sm:$0xff] %v8855_v55  ;;  %v1759_v49 = vpop.f32.mrf.mxu0 }
 0x378   : > { %v8857_v22 = vpop.f32.mrf.mxu3  ;;  %v1760_v26 = vadd.f32 %v1759_v49, %v11183_v6 }
 0x379   : > { %11182 = vst [vmem:[#allocation79_spill] sm:$0xff] %v8857_v22  ;;  %v2008_v24 = vpop.f32.mrf.mxu1 }
 0x37a   : > { %v2009_v56 = vadd.f32 %v2008_v24, %v11183_v6  ;;  %v11190_v24 = vld [vmem:[#allocation49_spill] sm:$0xff] }
 0x37c   : > { %v8861_v13 = vpack.c.bf16 %v2009_v56, %v1760_v26 }
 0x37e   : > { %11184 = vst [vmem:[#allocation84_spill] sm:$0xff] %v8861_v13  ;;  %v2257_v5 = vpop.f32.mrf.mxu2 }
 0x37f   : > { %v2258_v34 = vadd.f32 %v2257_v5, %v11183_v6  ;;  %v8864_v14 = vpop.f32.mrf.mxu0 }
 0x380   : > { %v2506_v3 = vpop.f32.mrf.mxu3  ;;  %11185 = vst [vmem:[#allocation82_spill] sm:$0xff] %v8864_v14 }
 0x381   : > { %v2507_v23 = vadd.f32 %v2506_v3, %v11183_v6  ;;  %v8867_v41 = vpop.f32.mrf.mxu1 }
 0x382   : > { %11186 = vst [vmem:[#allocation50_spill] sm:$0xff] %v8867_v41 }
 0x383   : > { %v8869_v55 = vpack.c.bf16 %v2507_v23, %v2258_v34 }
 0x385   : > { %11187 = vst [vmem:[#allocation19_spill] sm:$0xff] %v8869_v55 }
 0x386   : > { %v8871_v22 = vpop.f32.mrf.mxu2 }
 0x387   : > { %11188 = vst [vmem:[#allocation25_spill] sm:$0xff] %v8871_v22  ;;  %v1764_v61 = vpop.f32.mrf.mxu0 }
 0x388   : > { %v8873_v49 = vpop.f32.mrf.mxu3  ;;  %v1765_v56 = vadd.f32 %v1764_v61, %v11190_v24 }
 0x389   : > { %11189 = vst [vmem:[#allocation22_spill] sm:$0xff] %v8873_v49  ;;  %v2013_v26 = vpop.f32.mrf.mxu1 }
 0x38a   : > { %v2014_v13 = vadd.f32 %v2013_v26, %v11190_v24  ;;  %v11197_v26 = vld [vmem:[#allocation42_spill] sm:$0xff] }
 0x38c   : > { %v8877_v5 = vpack.c.bf16 %v2014_v13, %v1765_v56 }
 0x38e   : > { %11191 = vst [vmem:[#allocation16_spill] sm:$0xff] %v8877_v5  ;;  %v2262_v29 = vpop.f32.mrf.mxu2 }
 0x38f   : > { %v2263_v14 = vadd.f32 %v2262_v29, %v11190_v24  ;;  %v8880_v3 = vpop.f32.mrf.mxu0 }
 0x390   : > { %v2511_v6 = vpop.f32.mrf.mxu3  ;;  %11192 = vst [vmem:[#allocation24_spill] sm:$0xff] %v8880_v3 }
 0x391   : > { %v2512_v34 = vadd.f32 %v2511_v6, %v11190_v24  ;;  %v8883_v23 = vpop.f32.mrf.mxu1 }
 0x392   : > { %11193 = vst [vmem:[#allocation28_spill] sm:$0xff] %v8883_v23 }
 0x393   : > { %v8885_v55 = vpack.c.bf16 %v2512_v34, %v2263_v14 }
 0x395   : > { %11194 = vst [vmem:[#allocation32_spill] sm:$0xff] %v8885_v55 }
 0x396   : > { %v8887_v49 = vpop.f32.mrf.mxu2 }
 0x397   : > { %11195 = vst [vmem:[#allocation26_spill] sm:$0xff] %v8887_v49  ;;  %v1769_v22 = vpop.f32.mrf.mxu0 }
 0x398   : > { %v8889_v61 = vpop.f32.mrf.mxu3  ;;  %v1770_v13 = vadd.f32 %v1769_v22, %v11197_v26 }
 0x399   : > { %11196 = vst [vmem:[#allocation13_spill] sm:$0xff] %v8889_v61  ;;  %v2018_v56 = vpop.f32.mrf.mxu1 }
 0x39a   : > { %v2019_v5 = vadd.f32 %v2018_v56, %v11197_v26 }
 0x39c   : > { %v8893_v29 = vpack.c.bf16 %v2019_v5, %v1770_v13 }
 0x39e   : > { %11198 = vst [vmem:[#allocation47_spill] sm:$0xff] %v8893_v29  ;;  %v2267_v41 = vpop.f32.mrf.mxu2 }
 0x39f   : > { %v2268_v53 = vadd.f32 %v2267_v41, %v11197_v26  ;;  %v8896_v6 = vpop.f32.mrf.mxu0 }
 0x3a0   : > { %v2516_v24 = vpop.f32.mrf.mxu3  ;;  %11199 = vst [vmem:[#allocation44_spill] sm:$0xff] %v8896_v6 }
 0x3a1   : > { %v2517_v14 = vadd.f32 %v2516_v24, %v11197_v26  ;;  %v8899_v34 = vpop.f32.mrf.mxu1 }
 0x3a2   : > { %11200 = vst [vmem:[#allocation39_spill] sm:$0xff] %v8899_v34 }
 0x3a3   : > { %v8901_v55 = vpack.c.bf16 %v2517_v14, %v2268_v53 }
 0x3a5   : > { %11201 = vst [vmem:[#allocation45_spill] sm:$0xff] %v8901_v55 }
 0x3a6   : > { %v8903_v61 = vpop.f32.mrf.mxu2 }
 0x3a7   : > { %11202 = vst [vmem:[#allocation23_spill] sm:$0xff] %v8903_v61  ;;  %v3182_v49 = vpop.f32.mrf.mxu0 }
 0x3a8   : > { %v8905_v22 = vpop.f32.mrf.mxu3 }
 0x3a9   : > { %11203 = vst [vmem:[#allocation41_spill] sm:$0xff] %v8905_v22  ;;  %v3196_v56 = vpop.f32.mrf.mxu1 }
 0x3aa   : > { %v3197_v41 = vadd.f32 %v3196_v56, %v3182_v49 }
 0x3ae   : > { %v3210_v5 = vpop.f32.mrf.mxu2 }
 0x3af   : > { %v3184_v29 = vpop.f32.mrf.mxu0 }
 0x3b0   : > { %v3224_v13 = vpop.f32.mrf.mxu3 }
 0x3b1   : > { %v3198_v63 = vpop.f32.mrf.mxu1  ;;  %v3225_v34 = vadd.f32 %v3224_v13, %v3210_v5 }
 0x3b2   : > { %v3199_v23 = vadd.f32 %v3198_v63, %v3184_v29 }
 0x3b4   : > { %v3285_v3 = vmax.f32 %v3197_v41, %v3199_v23 }
 0x3b6   : > { %v3286_v6 = vrot.slane %v3285_v3, 4  ;;  %v3212_v46 = vpop.f32.mrf.mxu2 }
 0x3b7   : > { %v3238_v24 = vpop.f32.mrf.mxu0 }
 0x3b8   : > { %v3226_v26 = vpop.f32.mrf.mxu3  ;;  %v3287_v53 = vmax.f32 %v3285_v3, %v3286_v6 }
 0x3b9   : > { %v3227_v14 = vadd.f32 %v3226_v26, %v3212_v46  ;;  %v3252_v55 = vpop.f32.mrf.mxu1 }
 0x3ba   : > { %v3288_v61 = vrot.slane %v3287_v53, 2  ;;  %v3253_v29 = vadd.f32 %v3252_v55, %v3238_v24 }
 0x3bb   : > { %v3292_v4 = vmax.f32 %v3225_v34, %v3227_v14 }
 0x3bc   : > { %v3289_v22 = vmax.f32 %v3287_v53, %v3288_v61 }
 0x3bd   : > { %v3293_v42 = vrot.slane %v3292_v4, 4 }
 0x3be   : > { %v3290_v12 = vrot.slane %v3289_v22, 1  ;;  %v3266_v45 = vpop.f32.mrf.mxu2 }
 0x3bf   : > { %v3294_v50 = vmax.f32 %v3292_v4, %v3293_v42  ;;  %v3240_v37 = vpop.f32.mrf.mxu0 }
 0x3c0   : > { %v3280_v48 = vpop.f32.mrf.mxu3  ;;  %v3291_v49 = vmax.f32 %v3289_v22, %v3290_v12 }
 0x3c1   : > { %v3295_v63 = vrot.slane %v3294_v50, 2  ;;  %v3254_v56 = vpop.f32.mrf.mxu1  ;;  %v3281_v4 = vadd.f32 %v3280_v48, %v3266_v45  ;;  %v6345_v45 = vld [vmem:[%s10599_s4] sm:$0xff] }
 0x3c2   : > { %v3313_v19 = vsub.f32 %v3197_v41, %v3291_v49  ;;  %v3317_v11 = vsub.f32 %v3199_v23, %v3291_v49  ;;  %v3255_v5 = vadd.f32 %v3254_v56, %v3240_v37 }
 0x3c3   : > { %v3296_v35 = vmax.f32 %v3294_v50, %v3295_v63 }
 0x3c4   : > { %v3321_v3 = vmul.f32 1.442695, %v3313_v19  ;;  %v3329_v46 = vmul.f32 1.442695, %v3317_v11  ;;  %v3299_v13 = vmax.f32 %v3253_v29, %v3255_v5 }
 0x3c5   : > { %v3297_v6 = vrot.slane %v3296_v35, 1 }
 0x3c6   : > { %6438 = vpow2.f32 %v3321_v3  ;;  %v3300_v26 = vrot.slane %v3299_v13, 4  ;;  %v3268_v53 = vpop.f32.mrf.mxu2 }
 0x3c7   : > { %v3298_v61 = vmax.f32 %v3296_v35, %v3297_v6  ;;  %6440 = vpow2.f32 %v3329_v46 }
 0x3c8   : > { %v3282_v42 = vpop.f32.mrf.mxu3  ;;  %v3301_v22 = vmax.f32 %v3299_v13, %v3300_v26 }
 0x3c9   : > { %v3314_v30 = vsub.f32 %v3225_v34, %v3298_v61  ;;  %v3318_v12 = vsub.f32 %v3227_v14, %v3298_v61  ;;  %v3283_v55 = vadd.f32 %v3282_v42, %v3268_v53 }
 0x3ca   : > { %v3302_v23 = vrot.slane %v3301_v22, 2 }
 0x3cb   : > { %v3323_v24 = vmul.f32 1.442695, %v3314_v30  ;;  %v3331_v41 = vmul.f32 1.442695, %v3318_v12  ;;  %v3306_v50 = vmax.f32 %v3281_v4, %v3283_v55 }
 0x3cc   : > { %v6439_v37 = vpop.eup %6438  ;;  %v3303_v19 = vmax.f32 %v3301_v22, %v3302_v23 }
 0x3cd   : > { %6442 = vpow2.f32 %v3323_v24  ;;  %v3307_v11 = vrot.slane %v3306_v50, 4  ;;  %v6441_v49 = vpop.eup %6440 }
 0x3ce   : > { %6444 = vpow2.f32 %v3331_v41  ;;  %v3304_v35 = vrot.slane %v3303_v19, 1  ;;  %v3339_v56 = vpack.c.bf16 %v6441_v49, %v6439_v37 }
 0x3cf   : > { %v3308_v63 = vmax.f32 %v3306_v50, %v3307_v11 }
 0x3d0   : > { %v3305_v48 = vmax.f32 %v3303_v19, %v3304_v35  ;;  %3359 = vmatpush.bf16.msrb.mxu0 %v3339_v56 }
 0x3d1   : > { %v3309_v34 = vrot.slane %v3308_v63, 2 }
 0x3d2   : > { %v3315_v14 = vsub.f32 %v3253_v29, %v3305_v48  ;;  %v3319_v3 = vsub.f32 %v3255_v5, %v3305_v48 }
 0x3d3   : > { %v6443_v30 = vpop.eup %6442  ;;  %v3310_v46 = vmax.f32 %v3308_v63, %v3309_v34  ;;  %6053 = vmatmul.msk.bf16.vlgmr.msrb.gmra.mxu0 %vm3348_vm1, %v6345_v45 }
 0x3d4   : > { %v6445_v6 = vpop.eup %6444  ;;  %v3325_v13 = vmul.f32 1.442695, %v3315_v14  ;;  %v3333_v61 = vmul.f32 1.442695, %v3319_v3 }
 0x3d5   : > { %v3311_v26 = vrot.slane %v3310_v46, 1  ;;  %v3340_v53 = vpack.c.bf16 %v6445_v6, %v6443_v30 }
 0x3d6   : > { %6446 = vpow2.f32 %v3325_v13  ;;  %v6346_v13 = vld [vmem:[%s10600_s5] sm:$0xff] }
 0x3d7   : > { %v3312_v42 = vmax.f32 %v3310_v46, %v3311_v26  ;;  %3373 = vmatpush.bf16.msrb.mxu1 %v3340_v53  ;;  %6448 = vpow2.f32 %v3333_v61 }
 0x3d9   : > { %v3316_v12 = vsub.f32 %v3281_v4, %v3312_v42  ;;  %v3320_v22 = vsub.f32 %v3283_v55, %v3312_v42 }
 0x3da   : > { %6054 = vmatmul.msk.bf16.vlgmr.msrb.gmra.mxu1 %vm3348_vm1, %v6345_v45 }
 0x3db   : > { %v3327_v24 = vmul.f32 1.442695, %v3316_v12  ;;  %v3335_v41 = vmul.f32 1.442695, %v3320_v22  ;;  %v6347_v22 = vld [vmem:[%s10600_s5 + $0x8] sm:$0xff] }
 0x3dc   : > { %v6447_v29 = vpop.eup %6446 }
 0x3dd   : > { %6450 = vpow2.f32 %v3327_v24  ;;  %v6449_v5 = vpop.eup %6448 }
 0x3de   : > { %6452 = vpow2.f32 %v3335_v41  ;;  %v3341_v23 = vpack.c.bf16 %v6449_v5, %v6447_v29 }
 0x3e0   : > { %3387 = vmatpush.bf16.msrb.mxu2 %v3341_v23 }
 0x3e3   : > { %v6451_v50 = vpop.eup %6450  ;;  %6055 = vmatmul.msk.bf16.vlgmr.msrb.gmra.mxu2 %vm3348_vm1, %v6345_v45 }
 0x3e4   : > { %v6453_v19 = vpop.eup %6452 }
 0x3e5   : > { %v3342_v11 = vpack.c.bf16 %v6453_v19, %v6451_v50 }
 0x3e7   : > { %3401 = vmatpush.bf16.msrb.mxu3 %v3342_v11 }
 0x3ea   : > { %6056 = vmatmul.msk.bf16.vlgmr.msrb.gmra.mxu3 %vm3348_vm1, %v6345_v45 }
 0x450   : > { %v3361_v4 = vpop.f32.mrf.mxu0 }
 0x451   : > { %6454 = vrcp.f32 %v3361_v4 }
 0x457   : > { %v3375_v55 = vpop.f32.mrf.mxu1  ;;  %v6455_v63 = vpop.eup %6454 }
 0x458   : > { %v3363_v35 = vpop.f32.mrf.mxu0  ;;  %v3416_v34 = vmul.f32 %v6455_v63, %v6439_v37 }
 0x459   : > { %6456 = vrcp.f32 %v3363_v35 }
 0x45a   : > { %6458 = vrcp.f32 %v3375_v55 }
 0x45f   : > { %v3377_v56 = vpop.f32.mrf.mxu1  ;;  %v6457_v48 = vpop.eup %6456 }
 0x460   : > { %6460 = vrcp.f32 %v3377_v56  ;;  %v3420_v14 = vmul.f32 %v6457_v48, %v6441_v49  ;;  %v6459_v46 = vpop.eup %6458  ;;  %v6352_v56 = vld [vmem:[%s10600_s5 + $0x30] sm:$0xff]  ;;  %v6353_v48 = vld [vmem:[%s10600_s5 + $0x38] sm:$0xff] }
 0x461   : > { %v3417_v61 = vmul.f32 %v6459_v46, %v6443_v30 }
 0x462   : > { %v3424_v3 = vpack.c.bf16 %v3420_v14, %v3416_v34  ;;  %v6354_v34 = vld [vmem:[%s10600_s5 + $0x40] sm:$0xff] }
 0x464   : > { %3595 = vmatpush.bf16.msra.mxu0 %v3424_v3 }
 0x466   : > { %v6461_v45 = vpop.eup %6460  ;;  %v3389_v53 = vpop.f32.mrf.mxu2 }
 0x467   : > { %v3421_v26 = vmul.f32 %v6461_v45, %v6445_v6  ;;  %6121 = vmatmul.msk.bf16.vlgmr.msra.gmra.mxu0 %vm3348_vm1, %v6346_v13  ;;  %6462 = vrcp.f32 %v3389_v53  ;;  %v4136_v45 = vunpack.c.l.bf16 %v8510_v1 }
 0x469   : > { %v3425_v42 = vpack.c.bf16 %v3421_v26, %v3417_v61  ;;  %v4137_v61 = vunpack.c.h.bf16 %v8510_v1 }
 0x46b   : > { %3684 = vmatpush.bf16.msra.mxu1 %v3425_v42 }
 0x46d   : > { %v3403_v12 = vpop.f32.mrf.mxu3  ;;  %v6463_v49 = vpop.eup %6462 }
 0x46e   : > { %6137 = vmatmul.msk.bf16.vlgmr.msra.gmra.mxu1 %vm3348_vm1, %v6346_v13  ;;  %v3391_v37 = vpop.f32.mrf.mxu2  ;;  %v3418_v6 = vmul.f32 %v6463_v49, %v6447_v29  ;;  %v6348_v29 = vld [vmem:[%s10600_s5 + $0x10] sm:$0xff] }
 0x46f   : > { %6464 = vrcp.f32 %v3391_v37 }
 0x470   : > { %6466 = vrcp.f32 %v3403_v12 }
 0x475   : > { %v3405_v24 = vpop.f32.mrf.mxu3  ;;  %v6465_v30 = vpop.eup %6464 }
 0x476   : > { %6468 = vrcp.f32 %v3405_v24  ;;  %v3422_v41 = vmul.f32 %v6465_v30, %v6449_v5  ;;  %v6467_v11 = vpop.eup %6466  ;;  %v6349_v5 = vld [vmem:[%s10600_s5 + $0x18] sm:$0xff]  ;;  %v4140_v24 = vunpack.c.l.bf16 %v8530_v59  ;;  %v4141_v30 = vunpack.c.h.bf16 %v8530_v59 }
 0x477   : > { %6122 = vmatmul.msk.bf16.gmra.mxu0 %vm3348_vm1, %v6347_v22  ;;  %v3419_v55 = vmul.f32 %v6467_v11, %v6451_v50  ;;  %v6350_v50 = vld [vmem:[%s10600_s5 + $0x20] sm:$0xff]  ;;  %v4144_v59 = vunpack.c.l.bf16 %v8552_v18 }
 0x478   : > { %v3426_v23 = vpack.c.bf16 %v3422_v41, %v3418_v6 }
 0x47a   : > { %3773 = vmatpush.bf16.msra.mxu2 %v3426_v23 }
 0x47c   : > { %v6469_v4 = vpop.eup %6468 }
 0x47d   : > { %v3423_v35 = vmul.f32 %v6469_v4, %v6453_v19  ;;  %6153 = vmatmul.msk.bf16.vlgmr.msra.gmra.mxu2 %vm3348_vm1, %v6346_v13  ;;  %v6351_v19 = vld [vmem:[%s10600_s5 + $0x28] sm:$0xff] }
 0x47e   : > { %6138 = vmatmul.msk.bf16.gmra.mxu1 %vm3348_vm1, %v6347_v22 }
 0x47f   : > { %v3427_v63 = vpack.c.bf16 %v3423_v35, %v3419_v55 }
 0x481   : > { %3862 = vmatpush.bf16.msra.mxu3 %v3427_v63 }
 0x484   : > { %6169 = vmatmul.msk.bf16.vlgmr.msra.gmra.mxu3 %vm3348_vm1, %v6346_v13 }
 0x487   : > { %6123 = vmatmul.msk.bf16.gmra.mxu0 %vm3348_vm1, %v6348_v29 }
 0x48d   : > { %6154 = vmatmul.msk.bf16.gmra.mxu2 %vm3348_vm1, %v6347_v22 }
 0x48e   : > { %6139 = vmatmul.msk.bf16.gmra.mxu1 %vm3348_vm1, %v6348_v29 }
 0x494   : > { %6170 = vmatmul.msk.bf16.gmra.mxu3 %vm3348_vm1, %v6347_v22  ;;  %v8984_v22 = vld [vmem:[%s10600_s5 + $0x48] sm:$0xff] }
 0x497   : > { %6124 = vmatmul.msk.bf16.gmra.mxu0 %vm3348_vm1, %v6349_v5 }
 0x49d   : > { %6155 = vmatmul.msk.bf16.gmra.mxu2 %vm3348_vm1, %v6348_v29 }
 0x49e   : > { %6140 = vmatmul.msk.bf16.gmra.mxu1 %vm3348_vm1, %v6349_v5 }
 0x4a4   : > { %6171 = vmatmul.msk.bf16.gmra.mxu3 %vm3348_vm1, %v6348_v29 }
 0x4a7   : > { %6125 = vmatmul.msk.bf16.gmra.mxu0 %vm3348_vm1, %v6350_v50 }
 0x4ad   : > { %6156 = vmatmul.msk.bf16.gmra.mxu2 %vm3348_vm1, %v6349_v5 }
 0x4ae   : > { %6141 = vmatmul.msk.bf16.gmra.mxu1 %vm3348_vm1, %v6350_v50 }
 0x4b4   : > { %6172 = vmatmul.msk.bf16.gmra.mxu3 %vm3348_vm1, %v6349_v5  ;;  %v4145_v5 = vunpack.c.h.bf16 %v8552_v18  ;;  %v9011_v18 = vld [vmem:[%s10600_s5 + $0x50] sm:$0xff] }
 0x4b7   : > { %6126 = vmatmul.msk.bf16.gmra.mxu0 %vm3348_vm1, %v6351_v19 }
 0x4bd   : > { %6157 = vmatmul.msk.bf16.gmra.mxu2 %vm3348_vm1, %v6350_v50 }
 0x4be   : > { %6142 = vmatmul.msk.bf16.gmra.mxu1 %vm3348_vm1, %v6351_v19 }
 0x4c4   : > { %6173 = vmatmul.msk.bf16.gmra.mxu3 %vm3348_vm1, %v6350_v50 }
 0x4c7   : > { %6127 = vmatmul.msk.bf16.gmra.mxu0 %vm3348_vm1, %v6352_v56 }
 0x4cd   : > { %6158 = vmatmul.msk.bf16.gmra.mxu2 %vm3348_vm1, %v6351_v19 }
 0x4ce   : > { %6143 = vmatmul.msk.bf16.gmra.mxu1 %vm3348_vm1, %v6352_v56 }
 0x4d4   : > { %6174 = vmatmul.msk.bf16.gmra.mxu3 %vm3348_vm1, %v6351_v19 }
 0x4d7   : > { %6128 = vmatmul.msk.bf16.gmra.mxu0 %vm3348_vm1, %v6353_v48 }
 0x4dd   : > { %6159 = vmatmul.msk.bf16.gmra.mxu2 %vm3348_vm1, %v6352_v56 }
 0x4de   : > { %6144 = vmatmul.msk.bf16.gmra.mxu1 %vm3348_vm1, %v6353_v48 }
 0x4e4   : > { %6175 = vmatmul.msk.bf16.gmra.mxu3 %vm3348_vm1, %v6352_v56  ;;  %v3597_v14 = vpop.f32.mrf.mxu0 }
 0x4e7   : > { %6129 = vmatmul.msk.bf16.gmra.mxu0 %vm3348_vm1, %v6354_v34 }
 0x4eb   : > { %v3686_v3 = vpop.f32.mrf.mxu1 }
 0x4ec   : > { %v3944_v46 = vpack.c.bf16 %v3686_v3, %v3597_v14  ;;  %v3599_v13 = vpop.f32.mrf.mxu0 }
 0x4ed   : > { %6160 = vmatmul.msk.bf16.gmra.mxu2 %vm3348_vm1, %v6353_v48 }
 0x4ee   : > { %v4008_v26 = vunpack.c.l.bf16 %v3944_v46  ;;  %v4009_v53 = vunpack.c.h.bf16 %v3944_v46  ;;  %6145 = vmatmul.msk.bf16.gmra.mxu1 %vm3348_vm1, %v6354_v34 }
 0x4f0   : > { %v8976_v42 = vmul.f32 %v4136_v45, %v4008_v26  ;;  %v8978_v12 = vmul.f32 %v4137_v61, %v4009_v53  ;;  %v4148_v45 = vunpack.c.l.bf16 %v8571_v52  ;;  %v4149_v61 = vunpack.c.h.bf16 %v8571_v52 }
 0x4f2   : > { %11204 = vst [vmem:[#allocation34_spill] sm:$0xff] %v8978_v12 }
 0x4f3   : > { %v3688_v37 = vpop.f32.mrf.mxu1 }
 0x4f4   : > { %v3946_v49 = vpack.c.bf16 %v3688_v37, %v3599_v13  ;;  %6176 = vmatmul.msk.bf16.gmra.mxu3 %vm3348_vm1, %v6353_v48  ;;  %v3602_v1 = vpop.f32.mrf.mxu0 }
 0x4f6   : > { %v4012_v6 = vunpack.c.l.bf16 %v3946_v49  ;;  %v4013_v41 = vunpack.c.h.bf16 %v3946_v49 }
 0x4f7   : > { %6130 = vmatmul.msk.bf16.gmra.mxu0 %vm3348_vm1, %v8984_v22 }
 0x4f8   : > { %v8988_v23 = vmul.f32 %v4140_v24, %v4012_v6  ;;  %v8990_v11 = vmul.f32 %v4141_v30, %v4013_v41  ;;  %v4139_v30 = vunpack.c.h.bf16 %v8528_v39 }
 0x4fa   : > { %11205 = vst [vmem:[#allocation40_spill] sm:$0xff] %v8990_v11 }
 0x4fb   : > { %v3691_v35 = vpop.f32.mrf.mxu1 }
 0x4fc   : > { %v3948_v63 = vpack.c.bf16 %v3691_v35, %v3602_v1  ;;  %v3604_v29 = vpop.f32.mrf.mxu0 }
 0x4fd   : > { %6161 = vmatmul.msk.bf16.gmra.mxu2 %vm3348_vm1, %v6354_v34 }
 0x4fe   : > { %v4016_v50 = vunpack.c.l.bf16 %v3948_v63  ;;  %v4017_v19 = vunpack.c.h.bf16 %v3948_v63  ;;  %6146 = vmatmul.msk.bf16.gmra.mxu1 %vm3348_vm1, %v8984_v22 }
 0x500   : > { %v9003_v56 = vmul.f32 %v4144_v59, %v4016_v50  ;;  %v9005_v48 = vmul.f32 %v4145_v5, %v4017_v19  ;;  %v3775_v14 = vpop.f32.mrf.mxu2 }
 0x503   : > { %v3693_v3 = vpop.f32.mrf.mxu1 }
 0x504   : > { %v3950_v46 = vpack.c.bf16 %v3693_v3, %v3604_v29  ;;  %6177 = vmatmul.msk.bf16.gmra.mxu3 %vm3348_vm1, %v6354_v34  ;;  %v3607_v13 = vpop.f32.mrf.mxu0  ;;  %v4138_v34 = vunpack.c.l.bf16 %v8528_v39  ;;  %v4153_v39 = vunpack.c.h.bf16 %v8597_v17 }
 0x506   : > { %v4020_v26 = vunpack.c.l.bf16 %v3950_v46  ;;  %v4021_v53 = vunpack.c.h.bf16 %v3950_v46 }
 0x507   : > { %v3864_v37 = vpop.f32.mrf.mxu3  ;;  %6131 = vmatmul.msk.bf16.gmra.mxu0 %vm3348_vm1, %v9011_v18 }
 0x508   : > { %v9015_v49 = vmul.f32 %v4148_v45, %v4020_v26  ;;  %v9017_v1 = vmul.f32 %v4149_v61, %v4021_v53  ;;  %v3945_v24 = vpack.c.bf16 %v3864_v37, %v3775_v14  ;;  %v3777_v6 = vpop.f32.mrf.mxu2  ;;  %v4152_v14 = vunpack.c.l.bf16 %v8597_v17 }
 0x509   : > { %v4142_v37 = vunpack.c.l.bf16 %v8547_v20 }
 0x50a   : > { %v4010_v41 = vunpack.c.l.bf16 %v3945_v24  ;;  %v4011_v35 = vunpack.c.h.bf16 %v3945_v24  ;;  %v4143_v24 = vunpack.c.h.bf16 %v8547_v20  ;;  %v4157_v20 = vunpack.c.h.bf16 %v8618_v10 }
 0x50b   : > { %v3696_v29 = vpop.f32.mrf.mxu1 }
 0x50c   : > { %v9027_v59 = vmul.f32 %v4138_v34, %v4010_v41  ;;  %v9029_v5 = vmul.f32 %v4139_v30, %v4011_v35  ;;  %v3952_v50 = vpack.c.bf16 %v3696_v29, %v3607_v13  ;;  %v3609_v19 = vpop.f32.mrf.mxu0 }
 0x50d   : > { %6162 = vmatmul.msk.bf16.gmra.mxu2 %vm3348_vm1, %v8984_v22 }
 0x50e   : > { %11206 = vst [vmem:[#allocation7_spill] sm:$0xff] %v9027_v59  ;;  %v4024_v3 = vunpack.c.l.bf16 %v3952_v50  ;;  %v4025_v46 = vunpack.c.h.bf16 %v3952_v50  ;;  %6147 = vmatmul.msk.bf16.gmra.mxu1 %vm3348_vm1, %v9011_v18  ;;  %v4156_v50 = vunpack.c.l.bf16 %v8618_v10  ;;  %v4146_v10 = vunpack.c.l.bf16 %v8568_v16 }
 0x50f   : > { %11207 = vst [vmem:[#allocation6_spill] sm:$0xff] %v9029_v5  ;;  %v3866_v45 = vpop.f32.mrf.mxu3 }
 0x510   : > { %v9037_v61 = vmul.f32 %v4152_v14, %v4024_v3  ;;  %v9039_v26 = vmul.f32 %v4153_v39, %v4025_v46  ;;  %v3947_v53 = vpack.c.bf16 %v3866_v45, %v3777_v6  ;;  %v3780_v13 = vpop.f32.mrf.mxu2  ;;  %v9052_v6 = vld [vmem:[%s10600_s5 + $0x58] sm:$0xff] }
 0x512   : > { %v4014_v17 = vunpack.c.l.bf16 %v3947_v53  ;;  %v4015_v34 = vunpack.c.h.bf16 %v3947_v53 }
 0x513   : > { %v3698_v30 = vpop.f32.mrf.mxu1 }
 0x514   : > { %v9043_v41 = vmul.f32 %v4142_v37, %v4014_v17  ;;  %v9045_v35 = vmul.f32 %v4143_v24, %v4015_v34  ;;  %v3954_v29 = vpack.c.bf16 %v3698_v30, %v3609_v19  ;;  %6178 = vmatmul.msk.bf16.gmra.mxu3 %vm3348_vm1, %v8984_v22  ;;  %v3612_v14 = vpop.f32.mrf.mxu0  ;;  %v4147_v24 = vunpack.c.h.bf16 %v8568_v16 }
 0x515   : > { %v4160_v19 = vunpack.c.l.bf16 %v8644_v60  ;;  %v4161_v16 = vunpack.c.h.bf16 %v8644_v60 }
 0x516   : > { %11208 = vst [vmem:[#allocation33_spill] sm:$0xff] %v9043_v41  ;;  %v4028_v39 = vunpack.c.l.bf16 %v3954_v29  ;;  %v4029_v3 = vunpack.c.h.bf16 %v3954_v29 }
 0x517   : > { %11209 = vst [vmem:[#allocation37_spill] sm:$0xff] %v9045_v35  ;;  %v3869_v45 = vpop.f32.mrf.mxu3  ;;  %6132 = vmatmul.msk.bf16.gmra.mxu0 %vm3348_vm1, %v9052_v6 }
 0x518   : > { %v9060_v22 = vmul.f32 %v4156_v50, %v4028_v39  ;;  %v9062_v53 = vmul.f32 %v4157_v20, %v4029_v3  ;;  %v3949_v37 = vpack.c.bf16 %v3869_v45, %v3780_v13  ;;  %v3782_v17 = vpop.f32.mrf.mxu2 }
 0x51a   : > { %v4018_v34 = vunpack.c.l.bf16 %v3949_v37  ;;  %v4019_v30 = vunpack.c.h.bf16 %v3949_v37 }
 0x51b   : > { %v3701_v39 = vpop.f32.mrf.mxu1 }
 0x51c   : > { %v9072_v20 = vmul.f32 %v4146_v10, %v4018_v34  ;;  %v9074_v13 = vmul.f32 %v4147_v24, %v4019_v30  ;;  %v3956_v3 = vpack.c.bf16 %v3701_v39, %v3612_v14  ;;  %v3614_v45 = vpop.f32.mrf.mxu0  ;;  %v4150_v34 = vunpack.c.l.bf16 %v8591_v58 }
 0x51d   : > { %6163 = vmatmul.msk.bf16.gmra.mxu2 %vm3348_vm1, %v9011_v18  ;;  %v4151_v30 = vunpack.c.h.bf16 %v8591_v58  ;;  %v4165_v58 = vunpack.c.h.bf16 %v8665_v25 }
 0x51e   : > { %11210 = vst [vmem:[#allocation35_spill] sm:$0xff] %v9072_v20  ;;  %v4032_v46 = vunpack.c.l.bf16 %v3956_v3  ;;  %v4033_v55 = vunpack.c.h.bf16 %v3956_v3  ;;  %6148 = vmatmul.msk.bf16.gmra.mxu1 %vm3348_vm1, %v9052_v6 }
 0x51f   : > { %11211 = vst [vmem:[#allocation81_spill] sm:$0xff] %v9074_v13  ;;  %v3871_v37 = vpop.f32.mrf.mxu3 }
 0x520   : > { %v9082_v4 = vmul.f32 %v4160_v19, %v4032_v46  ;;  %v9084_v10 = vmul.f32 %v4161_v16, %v4033_v55  ;;  %v3951_v24 = vpack.c.bf16 %v3871_v37, %v3782_v17  ;;  %v3785_v14 = vpop.f32.mrf.mxu2  ;;  %v9097_v55 = vld [vmem:[%s10600_s5 + $0x60] sm:$0xff]  ;;  %v4164_v46 = vunpack.c.l.bf16 %v8665_v25 }
 0x521   : > { %v4154_v25 = vunpack.c.l.bf16 %v8612_v54 }
 0x522   : > { %v4022_v60 = vunpack.c.l.bf16 %v3951_v24  ;;  %v4023_v39 = vunpack.c.h.bf16 %v3951_v24 }
 0x523   : > { %v3703_v3 = vpop.f32.mrf.mxu1 }
 0x524   : > { %v9088_v63 = vmul.f32 %v4150_v34, %v4022_v60  ;;  %v9090_v52 = vmul.f32 %v4151_v30, %v4023_v39  ;;  %v3958_v50 = vpack.c.bf16 %v3703_v3, %v3614_v45  ;;  %6179 = vmatmul.msk.bf16.gmra.mxu3 %vm3348_vm1, %v9011_v18  ;;  %v3617_v19 = vpop.f32.mrf.mxu0  ;;  %v4155_v60 = vunpack.c.h.bf16 %v8612_v54 }
 0x525   : > { %v4168_v45 = vunpack.c.l.bf16 %v8685_v15  ;;  %v4169_v54 = vunpack.c.h.bf16 %v8685_v15 }
 0x526   : > { %11212 = vst [vmem:[#allocation48_spill] sm:$0xff] %v9088_v63  ;;  %v4036_v17 = vunpack.c.l.bf16 %v3958_v50  ;;  %v4037_v16 = vunpack.c.h.bf16 %v3958_v50 }
 0x527   : > { %11213 = vst [vmem:[#allocation12_spill] sm:$0xff] %v9090_v52  ;;  %v3874_v24 = vpop.f32.mrf.mxu3  ;;  %6133 = vmatmul.msk.bf16.gmra.mxu0 %vm3348_vm1, %v9097_v55 }
 0x528   : > { %v9105_v18 = vmul.f32 %v4164_v46, %v4036_v17  ;;  %v9107_v34 = vmul.f32 %v4165_v58, %v4037_v16  ;;  %v3953_v30 = vpack.c.bf16 %v3874_v24, %v3785_v14  ;;  %v3787_v50 = vpop.f32.mrf.mxu2 }
 0x52a   : > { %v4026_v39 = vunpack.c.l.bf16 %v3953_v30  ;;  %v4027_v3 = vunpack.c.h.bf16 %v3953_v30 }
 0x52b   : > { %v3706_v17 = vpop.f32.mrf.mxu1 }
 0x52c   : > { %v9117_v58 = vmul.f32 %v4154_v25, %v4026_v39  ;;  %v9119_v14 = vmul.f32 %v4155_v60, %v4027_v3  ;;  %v3960_v16 = vpack.c.bf16 %v3706_v17, %v3617_v19  ;;  %v3619_v24 = vpop.f32.mrf.mxu0  ;;  %v4158_v39 = vunpack.c.l.bf16 %v8635_v36 }
 0x52d   : > { %6164 = vmatmul.msk.bf16.gmra.mxu2 %vm3348_vm1, %v9052_v6  ;;  %v4159_v3 = vunpack.c.h.bf16 %v8635_v36  ;;  %v4173_v36 = vunpack.c.h.bf16 %v8694_v9 }
 0x52e   : > { %11214 = vst [vmem:[#allocation83_spill] sm:$0xff] %v9117_v58  ;;  %v4040_v29 = vunpack.c.l.bf16 %v3960_v16  ;;  %v4041_v5 = vunpack.c.h.bf16 %v3960_v16  ;;  %6149 = vmatmul.msk.bf16.gmra.mxu1 %vm3348_vm1, %v9097_v55 }
 0x52f   : > { %11215 = vst [vmem:[#allocation43_spill] sm:$0xff] %v9119_v14  ;;  %v3876_v30 = vpop.f32.mrf.mxu3 }
 0x530   : > { %v9127_v46 = vmul.f32 %v4168_v45, %v4040_v29  ;;  %v9129_v25 = vmul.f32 %v4169_v54, %v4041_v5  ;;  %v3955_v60 = vpack.c.bf16 %v3876_v30, %v3787_v50  ;;  %v3790_v19 = vpop.f32.mrf.mxu2  ;;  %v9142_v5 = vld [vmem:[%s10600_s5 + $0x68] sm:$0xff]  ;;  %v4172_v29 = vunpack.c.l.bf16 %v8694_v9 }
 0x531   : > { %v4162_v9 = vunpack.c.l.bf16 %v8659_v2  ;;  %v4166_v30 = vunpack.c.l.bf16 %v8679_v7 }
 0x532   : > { %v4030_v15 = vunpack.c.l.bf16 %v3955_v60  ;;  %v4031_v17 = vunpack.c.h.bf16 %v3955_v60 }
 0x533   : > { %v3708_v16 = vpop.f32.mrf.mxu1 }
 0x534   : > { %v9133_v37 = vmul.f32 %v4158_v39, %v4030_v15  ;;  %v9135_v35 = vmul.f32 %v4159_v3, %v4031_v17  ;;  %v3962_v59 = vpack.c.bf16 %v3708_v16, %v3619_v24  ;;  %6180 = vmatmul.msk.bf16.gmra.mxu3 %vm3348_vm1, %v9052_v6  ;;  %v3622_v45 = vpop.f32.mrf.mxu0  ;;  %v4163_v15 = vunpack.c.h.bf16 %v8659_v2 }
 0x536   : > { %11216 = vst [vmem:[#allocation29_spill] sm:$0xff] %v9133_v37  ;;  %v4044_v50 = vunpack.c.l.bf16 %v3962_v59  ;;  %v4045_v54 = vunpack.c.h.bf16 %v3962_v59 }
 0x537   : > { %11217 = vst [vmem:[#allocation78_spill] sm:$0xff] %v9135_v35  ;;  %v3879_v60 = vpop.f32.mrf.mxu3  ;;  %6134 = vmatmul.msk.bf16.gmra.mxu0 %vm3348_vm1, %v9142_v5  ;;  %v11227_v35 = vld [vmem:[#allocation38_spill] sm:$0xff] }
 0x538   : > { %v9150_v6 = vmul.f32 %v4172_v29, %v4044_v50  ;;  %v9152_v39 = vmul.f32 %v4173_v36, %v4045_v54  ;;  %v3957_v3 = vpack.c.bf16 %v3879_v60, %v3790_v19  ;;  %v3792_v59 = vpop.f32.mrf.mxu2  ;;  %v4167_v29 = vunpack.c.h.bf16 %v8679_v7 }
 0x539   : > { %v4176_v7 = vunpack.c.l.bf16 %v8708_v47  ;;  %v1732_v58 = vadd.f32 %v8760_v8, %v11227_v35  ;;  %v4182_v8 = vunpack.c.l.bf16 %v8725_v40 }
 0x53a   : > { %v4034_v17 = vunpack.c.l.bf16 %v3957_v3  ;;  %v4035_v16 = vunpack.c.h.bf16 %v3957_v3 }
 0x53b   : > { %v3711_v50 = vpop.f32.mrf.mxu1 }
 0x53c   : > { %v9162_v36 = vmul.f32 %v4162_v9, %v4034_v17  ;;  %v9164_v19 = vmul.f32 %v4163_v15, %v4035_v16  ;;  %v3624_v54 = vpop.f32.mrf.mxu0  ;;  %v3964_v2 = vpack.c.bf16 %v3711_v50, %v3622_v45  ;;  %v9181_v45 = vld [vmem:[%s10600_s5 + $0x70] sm:$0xff]  ;;  %v4180_v50 = vunpack.c.l.bf16 %v8717_v51 }
 0x53d   : > { %6165 = vmatmul.msk.bf16.gmra.mxu2 %vm3348_vm1, %v9097_v55 }
 0x53e   : > { %11218 = vst [vmem:[#allocation80_spill] sm:$0xff] %v9162_v36  ;;  %6150 = vmatmul.msk.bf16.gmra.mxu1 %vm3348_vm1, %v9142_v5  ;;  %v4048_v17 = vunpack.c.l.bf16 %v3964_v2  ;;  %v4049_v16 = vunpack.c.h.bf16 %v3964_v2 }
 0x53f   : > { %11219 = vst [vmem:[#allocation76_spill] sm:$0xff] %v9164_v19  ;;  %v3881_v60 = vpop.f32.mrf.mxu3  ;;  %v4178_v19 = vunpack.c.l.bf16 %v8714_v27 }
 0x540   : > { %v3959_v3 = vpack.c.bf16 %v3881_v60, %v3792_v59  ;;  %v3795_v24 = vpop.f32.mrf.mxu2  ;;  %v4177_v59 = vunpack.c.h.bf16 %v8708_v47  ;;  %v9193_v60 = vmul.f32 %v4176_v7, %v4048_v17 }
 0x542   : > { %v4038_v41 = vunpack.c.l.bf16 %v3959_v3  ;;  %v4039_v9 = vunpack.c.h.bf16 %v3959_v3 }
 0x543   : > { %v3713_v15 = vpop.f32.mrf.mxu1 }
 0x544   : > { %v9172_v13 = vmul.f32 %v4166_v30, %v4038_v41  ;;  %v9174_v52 = vmul.f32 %v4167_v29, %v4039_v9  ;;  %v3966_v20 = vpack.c.bf16 %v3713_v15, %v3624_v54  ;;  %6181 = vmatmul.msk.bf16.gmra.mxu3 %vm3348_vm1, %v9097_v55  ;;  %v4181_v41 = vunpack.c.h.bf16 %v8717_v51  ;;  %v9187_v30 = vpop.f32.mrf.mxu0 }
 0x545   : > { %v9195_v9 = vmul.f32 %v4177_v59, %v4049_v16  ;;  %v4171_v55 = vunpack.c.h.bf16 %v8691_v21 }
 0x546   : > { %11220 = vst [vmem:[#allocation11_spill] sm:$0xff] %v9172_v13  ;;  %v4052_v29 = vunpack.c.l.bf16 %v3966_v20  ;;  %v4053_v54 = vunpack.c.h.bf16 %v3966_v20  ;;  %v4170_v20 = vunpack.c.l.bf16 %v8691_v21 }
 0x547   : > { %11221 = vst [vmem:[#allocation30_spill] sm:$0xff] %v9174_v52  ;;  %v3884_v3 = vpop.f32.mrf.mxu3  ;;  %6135 = vmatmul.msk.bf16.gmra.mxu0 %vm3348_vm1, %v9181_v45 }
 0x548   : > { %v9197_v47 = vmul.f32 %v4180_v50, %v4052_v29  ;;  %v9199_v15 = vmul.f32 %v4181_v41, %v4053_v54  ;;  %v3961_v51 = vpack.c.bf16 %v3884_v3, %v3795_v24  ;;  %v3797_v63 = vpop.f32.mrf.mxu2  ;;  %v4174_v54 = vunpack.c.l.bf16 %v8702_v0 }
 0x549   : > { %v4175_v3 = vunpack.c.h.bf16 %v8702_v0 }
 0x54a   : > { %v4042_v14 = vunpack.c.l.bf16 %v3961_v51  ;;  %v4043_v2 = vunpack.c.h.bf16 %v3961_v51 }
 0x54b   : > { %v3716_v7 = vpop.f32.mrf.mxu1 }
 0x54c   : > { %v9209_v59 = vmul.f32 %v4170_v20, %v4042_v14  ;;  %v9211_v24 = vmul.f32 %v4171_v55, %v4043_v2  ;;  %v3629_v50 = vpop.f32.mrf.mxu0  ;;  %v9228_v2 = vld [vmem:[%s10600_s5 + $0x78] sm:$0xff] }
 0x54d   : > { %6166 = vmatmul.msk.bf16.gmra.mxu2 %vm3348_vm1, %v9142_v5 }
 0x54e   : > { %11222 = vst [vmem:[#allocation49_spill] sm:$0xff] %v9209_v59  ;;  %6151 = vmatmul.msk.bf16.gmra.mxu1 %vm3348_vm1, %v9181_v45  ;;  %v4192_v59 = vunpack.c.l.bf16 %v8756_v38 }
 0x54f   : > { %11223 = vst [vmem:[#allocation42_spill] sm:$0xff] %v9211_v24  ;;  %v3886_v21 = vpop.f32.mrf.mxu3 }
 0x550   : > { %v3963_v41 = vpack.c.bf16 %v3886_v21, %v3797_v63  ;;  %v3800_v29 = vpop.f32.mrf.mxu2  ;;  %v1981_v21 = vadd.f32 %v8763_v31, %v11227_v35  ;;  %v4183_v31 = vunpack.c.h.bf16 %v8725_v40 }
 0x552   : > { %v4046_v51 = vunpack.c.l.bf16 %v3963_v41  ;;  %v4047_v16 = vunpack.c.h.bf16 %v3963_v41  ;;  %v2679_v13 = vpack.c.bf16 %v1981_v21, %v1732_v58 }
 0x553   : > { %v3718_v14 = vpop.f32.mrf.mxu1 }
 0x554   : > { %v9219_v20 = vmul.f32 %v4174_v54, %v4046_v51  ;;  %v9221_v55 = vmul.f32 %v4175_v3, %v4047_v16  ;;  %6182 = vmatmul.msk.bf16.gmra.mxu3 %vm3348_vm1, %v9142_v5  ;;  %v3632_v63 = vpop.f32.mrf.mxu0  ;;  %v11226_v5 = vld [vmem:[#allocation46_spill] sm:$0xff]  ;;  %v3970_v24 = vpack.c.bf16 %v3718_v14, %v3629_v50  ;;  %v4197_v50 = vunpack.c.h.bf16 %v2679_v13 }
 0x555   : > { %v1727_v51 = vadd.f32 %v8735_v44, %v11226_v5  ;;  %v1976_v17 = vadd.f32 %v8738_v43, %v11226_v5  ;;  %v4179_v43 = vunpack.c.h.bf16 %v8714_v27 }
 0x556   : > { %11224 = vst [vmem:[#allocation85_spill] sm:$0xff] %v9219_v20  ;;  %v4193_v20 = vunpack.c.h.bf16 %v8756_v38  ;;  %v4196_v38 = vunpack.c.l.bf16 %v2679_v13  ;;  %v4061_v14 = vunpack.c.h.bf16 %v3970_v24 }
 0x557   : > { %11225 = vst [vmem:[#allocation86_spill] sm:$0xff] %v9221_v55  ;;  %v3889_v41 = vpop.f32.mrf.mxu3  ;;  %6136 = vmatmul.msk.bf16.gmra.mxu0 %vm3348_vm1, %v9228_v2  ;;  %v2675_v36 = vpack.c.bf16 %v1976_v17, %v1727_v51 }
 0x558   : > { %v3802_v16 = vpop.f32.mrf.mxu2  ;;  %v3965_v54 = vpack.c.bf16 %v3889_v41, %v3800_v29 }
 0x559   : > { %v4188_v51 = vunpack.c.l.bf16 %v2675_v36 }
 0x55a   : > { %v4050_v29 = vunpack.c.l.bf16 %v3965_v54  ;;  %v4051_v41 = vunpack.c.h.bf16 %v3965_v54 }
 0x55b   : > { %v3721_v3 = vpop.f32.mrf.mxu1 }
 0x55c   : > { %v3634_v0 = vpop.f32.mrf.mxu0  ;;  %v3972_v37 = vpack.c.bf16 %v3721_v3, %v3632_v63  ;;  %v3968_v3 = vpack.c.bf16 %v3716_v7, %v9187_v30  ;;  %v9255_v12 = vmul.f32 %v4178_v19, %v4050_v29  ;;  %v9257_v27 = vmul.f32 %v4179_v43, %v4051_v41 }
 0x55d   : > { %6167 = vmatmul.msk.bf16.gmra.mxu2 %vm3348_vm1, %v9181_v45  ;;  %v4189_v29 = vunpack.c.h.bf16 %v2675_v36 }
 0x55e   : > { %6152 = vmatmul.msk.bf16.gmra.mxu1 %vm3348_vm1, %v9228_v2  ;;  %11228 = vst [vmem:[#allocation46_spill] sm:$0xff] %v9257_v27  ;;  %v4064_v11 = vunpack.c.l.bf16 %v3972_v37  ;;  %v4056_v41 = vunpack.c.l.bf16 %v3968_v3 }
 0x55f   : > { %v3891_v44 = vpop.f32.mrf.mxu3  ;;  %v4317_v36 = vmul.f32 %v4189_v29, %v4061_v14  ;;  %v4187_v29 = vunpack.c.h.bf16 %v8740_v33 }
 0x560   : > { %v3967_v52 = vpack.c.bf16 %v3891_v44, %v3802_v16  ;;  %v3805_v55 = vpop.f32.mrf.mxu2  ;;  %v4065_v44 = vunpack.c.h.bf16 %v3972_v37 }
 0x562   : > { %v4054_v54 = vunpack.c.l.bf16 %v3967_v52  ;;  %v4055_v63 = vunpack.c.h.bf16 %v3967_v52  ;;  %v4060_v52 = vunpack.c.l.bf16 %v3970_v24  ;;  %v4184_v24 = vunpack.c.l.bf16 %v8731_v57 }
 0x563   : > { %v3723_v16 = vpop.f32.mrf.mxu1 }
 0x564   : > { %v9259_v40 = vmul.f32 %v4182_v8, %v4054_v54  ;;  %v9261_v58 = vmul.f32 %v4183_v31, %v4055_v63  ;;  %v3974_v17 = vpack.c.bf16 %v3723_v16, %v3634_v0  ;;  %6183 = vmatmul.msk.bf16.gmra.mxu3 %vm3348_vm1, %v9181_v45  ;;  %v3637_v30 = vpop.f32.mrf.mxu0  ;;  %v4057_v0 = vunpack.c.h.bf16 %v3968_v3 }
 0x565   : > { %v4320_v8 = vmul.f32 %v4192_v59, %v4064_v11  ;;  %v4321_v45 = vmul.f32 %v4193_v20, %v4065_v44  ;;  %v4185_v54 = vunpack.c.h.bf16 %v8731_v57  ;;  %v2225_v63 = vadd.f32 %v8742_v32, %v11226_v5 }
 0x566   : > { %v4068_v19 = vunpack.c.l.bf16 %v3974_v17  ;;  %v4069_v7 = vunpack.c.h.bf16 %v3974_v17  ;;  %v2474_v16 = vadd.f32 %v8747_v62, %v11226_v5  ;;  %v4316_v37 = vmul.f32 %v4188_v51, %v4060_v52 }
 0x567   : > { %v3894_v43 = vpop.f32.mrf.mxu3  ;;  %v4312_v59 = vmul.f32 %v4184_v24, %v4056_v41  ;;  %v4313_v20 = vmul.f32 %v4185_v54, %v4057_v0  ;;  %v4200_v57 = vunpack.c.l.bf16 %v8783_v28  ;;  %v4201_v32 = vunpack.c.h.bf16 %v8783_v28 }
 0x568   : > { %v4324_v31 = vmul.f32 %v4196_v38, %v4068_v19  ;;  %v4325_v13 = vmul.f32 %v4197_v50, %v4069_v7  ;;  %v3807_v17 = vpop.f32.mrf.mxu2  ;;  %v3969_v27 = vpack.c.bf16 %v3894_v43, %v3805_v55  ;;  %v2676_v38 = vpack.c.bf16 %v2474_v16, %v2225_v63 }
 0x569   : > { %v4416_v52 = vpack.c.bf16 %v4316_v37, %v4312_v59  ;;  %v4417_v14 = vpack.c.bf16 %v4317_v36, %v4313_v20  ;;  %v4186_v28 = vunpack.c.l.bf16 %v8740_v33  ;;  %v11231_v33 = vpack.c.bf16 %v9197_v47, %v9193_v60  ;;  %v11235_v47 = vld [vmem:[#allocation53_spill] sm:$0xff] }
 0x56a   : > { %v4420_v21 = vpack.c.bf16 %v4324_v31, %v4320_v8  ;;  %v4421_v3 = vpack.c.bf16 %v4325_v13, %v4321_v45  ;;  %v4058_v55 = vunpack.c.l.bf16 %v3969_v27  ;;  %v4059_v7 = vunpack.c.h.bf16 %v3969_v27 }
 0x56b   : > { %v3726_v11 = vpop.f32.mrf.mxu1  ;;  %v4190_v37 = vunpack.c.l.bf16 %v2676_v38  ;;  %v4191_v0 = vunpack.c.h.bf16 %v2676_v38  ;;  %v11232_v54 = vpack.c.bf16 %v9199_v15, %v9195_v9  ;;  %v11236_v9 = vpack.c.bf16 %v9152_v39, %v9129_v25 }
 0x56c   : > { %v3976_v44 = vpack.c.bf16 %v3726_v11, %v3637_v30  ;;  %4504 = vmatpush.bf16.msrb.mxu0 %v4420_v21  ;;  %4542 = vmatpush.bf16.msrb.mxu2 %v4421_v3  ;;  %v9277_v50 = vpop.f32.mrf.mxu0  ;;  %v9287_v45 = vmul.f32 %v4186_v28, %v4058_v55  ;;  %v9291_v27 = vmul.f32 %v4187_v29, %v4059_v7 }
 0x56d   : > { %6168 = vmatmul.msk.bf16.gmra.mxu2 %vm3348_vm1, %v9228_v2  ;;  %v11233_v3 = vpack.c.bf16 %v9150_v6, %v9127_v46  ;;  %v2479_v11 = vadd.f32 %v11235_v47, %v11227_v35  ;;  %v11237_v38 = vpack.c.bf16 %v9105_v18, %v9082_v4  ;;  %v11238_v6 = vpack.c.bf16 %v9107_v34, %v9084_v10  ;;  %v11243_v34 = vld [vmem:[#allocation71_spill] sm:$0xff] }
 0x56e   : > { %v4072_v62 = vunpack.c.l.bf16 %v3976_v44  ;;  %v4073_v5 = vunpack.c.h.bf16 %v3976_v44  ;;  %v11242_v10 = vpack.c.bf16 %v9060_v22, %v9037_v61  ;;  %v4195_v7 = vunpack.c.h.bf16 %v11243_v34 }
 0x56f   : > { %v3896_v19 = vpop.f32.mrf.mxu3  ;;  %v11245_v22 = vpack.c.bf16 %v9015_v49, %v9003_v56  ;;  %v11247_v49 = vpack.c.bf16 %v8988_v23, %v8976_v42 }
 0x570   : > { %v9281_v30 = vmul.f32 %v4200_v57, %v4072_v62  ;;  %v9283_v21 = vmul.f32 %v4201_v32, %v4073_v5  ;;  %v3971_v51 = vpack.c.bf16 %v3896_v19, %v3807_v17  ;;  %4505 = vmatpush.bf16.msrb.mxu0 %v4416_v52  ;;  %4543 = vmatpush.bf16.msrb.mxu2 %v4417_v14  ;;  %v3810_v41 = vpop.f32.mrf.mxu2  ;;  %v4194_v19 = vunpack.c.l.bf16 %v11243_v34 }
 0x572   : > { %11229 = vst [vmem:[#allocation38_spill] sm:$0xff] %v9281_v30  ;;  %v4062_v43 = vunpack.c.l.bf16 %v3971_v51  ;;  %v4063_v8 = vunpack.c.h.bf16 %v3971_v51  ;;  %v11244_v51 = vpack.c.bf16 %v9062_v53, %v9039_v26  ;;  %v6187_v26 = vld [vmem:[%s10601_s6] sm:$0xf]  ;;  %v6363_v53 = vld [vmem:[%s10601_s6 + $0x4] sm:$0xf0] }
 0x573   : > { %11230 = vst [vmem:[#allocation87_spill] sm:$0xff] %v9283_v21  ;;  %v9289_v31 = vpop.f32.mrf.mxu1  ;;  %v9355_v47 = vor.u32 %v6363_v53, %v6187_v26 }
 0x574   : > { %v9293_v13 = vmul.f32 %v4190_v37, %v4062_v43  ;;  %v9295_v24 = vmul.f32 %v4191_v0, %v4063_v8  ;;  %6184 = vmatmul.msk.bf16.gmra.mxu3 %vm3348_vm1, %v9228_v2  ;;  %4506 = vmatpush.bf16.msrb.mxu0 %v11231_v33  ;;  %v3642_v63 = vpop.f32.mrf.mxu0  ;;  %v11234_v2 = vld [vmem:[#allocation73_spill] sm:$0xff] }
 0x575   : > { %4544 = vmatpush.bf16.msrb.mxu2 %v11232_v54  ;;  %v2230_v60 = vadd.f32 %v11234_v2, %v11227_v35  ;;  %v11239_v35 = vld [vmem:[#allocation20_spill] sm:$0xff] }
 0x576   : > { %v4418_v16 = vpack.c.bf16 %v9293_v13, %v9287_v45  ;;  %v4419_v17 = vpack.c.bf16 %v9295_v24, %v9291_v27  ;;  %v4208_v32 = vunpack.c.l.bf16 %v11239_v35  ;;  %v4209_v25 = vunpack.c.h.bf16 %v11239_v35  ;;  %v6195_v27 = vld [vmem:[%s10601_s6 + $0x10] sm:$0xf]  ;;  %v6365_v24 = vld [vmem:[%s10601_s6 + $0x14] sm:$0xf0] }
 0x577   : > { %v3899_v36 = vpop.f32.mrf.mxu3  ;;  %v2680_v46 = vpack.c.bf16 %v2479_v11, %v2230_v60  ;;  %v11248_v11 = vld [vmem:[#allocation40_spill] sm:$0xff]  ;;  %v11257_v45 = vpack.c.bf16 %v9259_v40, %v9255_v12  ;;  %v11263_v40 = vld [vmem:[#allocation86_spill] sm:$0xff] }
 0x578   : > { %4507 = vmatpush.bf16.msrb.mxu0 %v11233_v3  ;;  %v3812_v15 = vpop.f32.mrf.mxu2  ;;  %v3973_v59 = vpack.c.bf16 %v3899_v36, %v3810_v41 }
 0x579   : > { %4545 = vmatpush.bf16.msrb.mxu2 %v11236_v9  ;;  %v4198_v29 = vunpack.c.l.bf16 %v2680_v46  ;;  %v4199_v41 = vunpack.c.h.bf16 %v2680_v46  ;;  %v11249_v9 = vld [vmem:[#allocation34_spill] sm:$0xff] }
 0x57a   : > { %v4066_v5 = vunpack.c.l.bf16 %v3973_v59  ;;  %v4067_v14 = vunpack.c.h.bf16 %v3973_v59 }
 0x57b   : > { %v3731_v20 = vpop.f32.mrf.mxu1 }
 0x57c   : > { %v3980_v44 = vpack.c.bf16 %v3731_v20, %v3642_v63  ;;  %4508 = vmatpush.bf16.msrb.mxu0 %v11237_v38  ;;  %v9325_v57 = vpop.f32.mrf.mxu0  ;;  %v4322_v8 = vmul.f32 %v4194_v19, %v4066_v5  ;;  %v4323_v33 = vmul.f32 %v4195_v7, %v4067_v14  ;;  %v11246_v63 = vpack.c.bf16 %v9017_v1, %v9005_v48  ;;  %v11252_v48 = vld [vmem:[#allocation21_spill] sm:$0xff] }
 0x57d   : > { %4546 = vmatpush.bf16.msrb.mxu2 %v11238_v6  ;;  %v4202_v1 = vunpack.c.l.bf16 %v11252_v48  ;;  %v4203_v20 = vunpack.c.h.bf16 %v11252_v48  ;;  %v11261_v19 = vld [vmem:[#allocation49_spill] sm:$0xff] }
 0x57e   : > { %v4080_v39 = vunpack.c.l.bf16 %v3980_v44  ;;  %v4081_v62 = vunpack.c.h.bf16 %v3980_v44 }
 0x57f   : > { %v3901_v52 = vpop.f32.mrf.mxu3 }
 0x580   : > { %v9329_v55 = vmul.f32 %v4208_v32, %v4080_v39  ;;  %v9331_v4 = vmul.f32 %v4209_v25, %v4081_v62  ;;  %v3975_v18 = vpack.c.bf16 %v3901_v52, %v3812_v15  ;;  %4509 = vmatpush.bf16.msrb.mxu0 %v11242_v10  ;;  %v3815_v28 = vpop.f32.mrf.mxu2  ;;  %v11250_v15 = vpack.c.bf16 %v11248_v11, %v11249_v9  ;;  %v11255_v32 = vld [vmem:[#allocation60_spill] sm:$0xff]  ;;  %v11276_v11 = vld [vmem:[#allocation29_spill] sm:$0xff]  ;;  %v11277_v9 = vld [vmem:[#allocation83_spill] sm:$0xff] }
 0x581   : > { %4547 = vmatpush.bf16.msrb.mxu2 %v11244_v51  ;;  %v4216_v25 = vunpack.c.l.bf16 %v11255_v32  ;;  %v4217_v39 = vunpack.c.h.bf16 %v11255_v32  ;;  %v11264_v51 = vld [vmem:[#allocation42_spill] sm:$0xff]  ;;  %v11281_v32 = vld [vmem:[#allocation43_spill] sm:$0xff] }
 0x582   : > { %11240 = vst [vmem:[#allocation73_spill] sm:$0xff] %v9329_v55  ;;  %v4070_v37 = vunpack.c.l.bf16 %v3975_v18  ;;  %v4071_v0 = vunpack.c.h.bf16 %v3975_v18 }
 0x583   : > { %11241 = vst [vmem:[#allocation53_spill] sm:$0xff] %v9331_v4  ;;  %v9341_v43 = vpop.f32.mrf.mxu1 }
 0x584   : > { %v4326_v54 = vmul.f32 %v4198_v29, %v4070_v37  ;;  %v4327_v61 = vmul.f32 %v4199_v41, %v4071_v0  ;;  %4510 = vmatpush.bf16.msrb.mxu0 %v11245_v22  ;;  %v3647_v36 = vpop.f32.mrf.mxu0  ;;  %v9409_v29 = vor.u32 %v6365_v24, %v6195_v27  ;;  %v11266_v37 = vld [vmem:[#allocation11_spill] sm:$0xff]  ;;  %v11267_v0 = vld [vmem:[#allocation80_spill] sm:$0xff]  ;;  %v11288_v24 = vld [vmem:[#allocation81_spill] sm:$0xff] }
 0x585   : > { %4548 = vmatpush.bf16.msrb.mxu2 %v11246_v63  ;;  %v11271_v63 = vld [vmem:[#allocation30_spill] sm:$0xff]  ;;  %v11287_v27 = vld [vmem:[#allocation12_spill] sm:$0xff] }
 0x586   : > { %v4422_v3 = vpack.c.bf16 %v4326_v54, %v4322_v8  ;;  %v4423_v2 = vpack.c.bf16 %v4327_v61, %v4323_v33  ;;  %v11268_v8 = vpack.c.bf16 %v11266_v37, %v11267_v0  ;;  %v11270_v54 = vld [vmem:[#allocation18_spill] sm:$0xff] }
 0x587   : > { %v3904_v60 = vpop.f32.mrf.mxu3  ;;  %v4210_v61 = vunpack.c.l.bf16 %v11270_v54  ;;  %v4211_v22 = vunpack.c.h.bf16 %v11270_v54  ;;  %v11297_v54 = vld [vmem:[#allocation8_spill] sm:$0xff] }
 0x588   : > { %v3977_v56 = vpack.c.bf16 %v3904_v60, %v3815_v28  ;;  %4511 = vmatpush.bf16.msrb.mxu0 %v11247_v49  ;;  %v9363_v59 = vpop.f32.mrf.mxu2  ;;  %v11265_v28 = vpack.c.bf16 %v11263_v40, %v11264_v51 }
 0x589   : > { %4549 = vmatpush.bf16.msrb.mxu2 %v11250_v15  ;;  %11251 = vst [vmem:[#allocation20_spill] sm:$0xff] %v9363_v59  ;;  %v11278_v15 = vpack.c.bf16 %v11276_v11, %v11277_v9  ;;  %v11300_v11 = vld [vmem:[#allocation67_spill] sm:$0xff] }
 0x58a   : > { %v4074_v44 = vunpack.c.l.bf16 %v3977_v56  ;;  %v4075_v38 = vunpack.c.h.bf16 %v3977_v56  ;;  %v4232_v9 = vunpack.c.l.bf16 %v11300_v11 }
 0x58b   : > { %v3736_v46 = vpop.f32.mrf.mxu1  ;;  %4512 = vmatmul.bf16.vlgmr.msrb.gmra.mxu0 %v9355_v47 }
 0x58c   : > { %4580 = vmatpush.bf16.msra.mxu0 %v4422_v3  ;;  %v9368_v6 = vmul.f32 %v4202_v1, %v4074_v44  ;;  %v9370_v42 = vmul.f32 %v4203_v20, %v4075_v38  ;;  %v3984_v23 = vpack.c.bf16 %v3736_v46, %v3647_v36  ;;  %4550 = vmatmul.bf16.vlgmr.msrb.gmra.mxu2 %v9355_v47  ;;  %v9376_v35 = vpop.f32.mrf.mxu0  ;;  %v11272_v36 = vld [vmem:[#allocation76_spill] sm:$0xff]  ;;  %v11279_v1 = vld [vmem:[#allocation63_spill] sm:$0xff] }
 0x58d   : > { %4618 = vmatpush.bf16.msra.mxu2 %v4423_v2  ;;  %v11273_v3 = vpack.c.bf16 %v11271_v63, %v11272_v36  ;;  %v4224_v20 = vunpack.c.l.bf16 %v11279_v1  ;;  %v4225_v44 = vunpack.c.h.bf16 %v11279_v1 }
 0x58e   : > { %11253 = vst [vmem:[#allocation71_spill] sm:$0xff] %v9368_v6  ;;  %v4088_v62 = vunpack.c.l.bf16 %v3984_v23  ;;  %v4089_v5 = vunpack.c.h.bf16 %v3984_v23  ;;  %v11280_v23 = vld [vmem:[#allocation78_spill] sm:$0xff] }
 0x58f   : > { %11254 = vst [vmem:[#allocation40_spill] sm:$0xff] %v9370_v42  ;;  %v9383_v52 = vpop.f32.mrf.mxu3  ;;  %v11322_v42 = vld [vmem:[#allocation44_spill] sm:$0xff] }
 0x590   : > { %4581 = vmatpush.bf16.msra.mxu0 %v4418_v16  ;;  %11256 = vst [vmem:[#allocation34_spill] sm:$0xff] %v9383_v52  ;;  %v9385_v14 = vmul.f32 %v4216_v25, %v4088_v62  ;;  %v9387_v18 = vmul.f32 %v4217_v39, %v4089_v5  ;;  %v3820_v13 = vpop.f32.mrf.mxu2  ;;  %v11258_v16 = vld [vmem:[#allocation46_spill] sm:$0xff]  ;;  %v11282_v25 = vpack.c.bf16 %v11280_v23, %v11281_v32 }
 0x591   : > { %4619 = vmatpush.bf16.msra.mxu2 %v4419_v17  ;;  %v11259_v10 = vpack.c.bf16 %v9261_v58, %v11258_v16  ;;  %v11260_v17 = vld [vmem:[#allocation85_spill] sm:$0xff] }
 0x592   : > { %v11262_v7 = vpack.c.bf16 %v11260_v17, %v11261_v19  ;;  %v11289_v17 = vpack.c.bf16 %v11287_v27, %v11288_v24 }
 0x593   : > { %v9395_v34 = vpop.f32.mrf.mxu1 }
 0x594   : > { %4582 = vmatpush.bf16.msra.mxu0 %v11257_v45  ;;  %v3652_v12 = vpop.f32.mrf.mxu0  ;;  %v11284_v45 = vld [vmem:[#allocation48_spill] sm:$0xff] }
 0x595   : > { %4620 = vmatpush.bf16.msra.mxu2 %v11259_v10 }
 0x597   : > { %v3909_v58 = vpop.f32.mrf.mxu3 }
 0x598   : > { %4583 = vmatpush.bf16.msra.mxu0 %v11262_v7  ;;  %v3981_v41 = vpack.c.bf16 %v3909_v58, %v3820_v13  ;;  %v9414_v33 = vpop.f32.mrf.mxu2  ;;  %v11285_v13 = vld [vmem:[#allocation35_spill] sm:$0xff]  ;;  %v11290_v7 = vld [vmem:[#allocation33_spill] sm:$0xff]  ;;  %v11294_v58 = vld [vmem:[#allocation6_spill] sm:$0xff] }
 0x599   : > { %4621 = vmatpush.bf16.msra.mxu2 %v11265_v28  ;;  %11269 = vst [vmem:[#allocation21_spill] sm:$0xff] %v9414_v33  ;;  %v11286_v16 = vpack.c.bf16 %v11284_v45, %v11285_v13  ;;  %v11293_v28 = vld [vmem:[#allocation37_spill] sm:$0xff] }
 0x59a   : > { %v4082_v26 = vunpack.c.l.bf16 %v3981_v41  ;;  %v4083_v53 = vunpack.c.h.bf16 %v3981_v41  ;;  %v11295_v41 = vpack.c.bf16 %v11293_v28, %v11294_v58 }
 0x59b   : > { %v3741_v2 = vpop.f32.mrf.mxu1  ;;  %4517 = vmatmul.bf16.gmra.mxu0 %v9409_v29 }
 0x59c   : > { %4584 = vmatpush.bf16.msra.mxu0 %v11268_v8  ;;  %v9422_v60 = vmul.f32 %v4210_v61, %v4082_v26  ;;  %v9424_v56 = vmul.f32 %v4211_v22, %v4083_v53  ;;  %v3988_v49 = vpack.c.bf16 %v3741_v2, %v3652_v12  ;;  %4555 = vmatmul.bf16.gmra.mxu2 %v9409_v29  ;;  %v9430_v48 = vpop.f32.mrf.mxu0  ;;  %v11291_v12 = vld [vmem:[#allocation7_spill] sm:$0xff]  ;;  %v4218_v61 = vunpack.c.l.bf16 %v11297_v54 }
 0x59d   : > { %4622 = vmatpush.bf16.msra.mxu2 %v11273_v3  ;;  %v11292_v40 = vpack.c.bf16 %v11290_v7, %v11291_v12  ;;  %v4219_v22 = vunpack.c.h.bf16 %v11297_v54 }
 0x59e   : > { %11274 = vst [vmem:[#allocation60_spill] sm:$0xff] %v9422_v60  ;;  %v4096_v38 = vunpack.c.l.bf16 %v3988_v49  ;;  %v4097_v46 = vunpack.c.h.bf16 %v3988_v49 }
 0x59f   : > { %11275 = vst [vmem:[#allocation46_spill] sm:$0xff] %v9424_v56  ;;  %v9437_v39 = vpop.f32.mrf.mxu3  ;;  %v11323_v56 = vld [vmem:[#allocation39_spill] sm:$0xff] }
 0x5a0   : > { %4585 = vmatpush.bf16.msra.mxu0 %v11278_v15  ;;  %11283 = vst [vmem:[#allocation85_spill] sm:$0xff] %v9437_v39  ;;  %v9439_v62 = vmul.f32 %v4224_v20, %v4096_v38  ;;  %v9441_v5 = vmul.f32 %v4225_v44, %v4097_v46  ;;  %v3825_v10 = vpop.f32.mrf.mxu2  ;;  %v4233_v15 = vunpack.c.h.bf16 %v11300_v11 }
 0x5a1   : > { %4623 = vmatpush.bf16.msra.mxu2 %v11282_v25 }
 0x5a3   : > { %v9449_v19 = vpop.f32.mrf.mxu1 }
 0x5a4   : > { %4586 = vmatpush.bf16.msra.mxu0 %v11286_v16  ;;  %v3657_v51 = vpop.f32.mrf.mxu0  ;;  %v11303_v16 = vld [vmem:[#allocation66_spill] sm:$0xff] }
 0x5a5   : > { %4624 = vmatpush.bf16.msra.mxu2 %v11289_v17  ;;  %v4227_v27 = vunpack.c.h.bf16 %v11303_v16 }
 0x5a7   : > { %v3914_v37 = vpop.f32.mrf.mxu3 }
 0x5a8   : > { %4587 = vmatpush.bf16.msra.mxu0 %v11292_v40  ;;  %v3985_v0 = vpack.c.bf16 %v3914_v37, %v3825_v10  ;;  %v9457_v8 = vpop.f32.mrf.mxu2  ;;  %v4226_v10 = vunpack.c.l.bf16 %v11303_v16 }
 0x5a9   : > { %4625 = vmatpush.bf16.msra.mxu2 %v11295_v41  ;;  %11296 = vst [vmem:[#allocation49_spill] sm:$0xff] %v9457_v8 }
 0x5aa   : > { %v4090_v26 = vunpack.c.l.bf16 %v3985_v0  ;;  %v4091_v53 = vunpack.c.h.bf16 %v3985_v0 }
 0x5ab   : > { %v3746_v63 = vpop.f32.mrf.mxu1  ;;  %4588 = vmatmul.bf16.vlgmr.msra.gmra.mxu0 %v9355_v47 }
 0x5ac   : > { %v9462_v36 = vmul.f32 %v4218_v61, %v4090_v26  ;;  %v9464_v3 = vmul.f32 %v4219_v22, %v4091_v53  ;;  %v3992_v2 = vpack.c.bf16 %v3746_v63, %v3657_v51  ;;  %4626 = vmatmul.bf16.vlgmr.msra.gmra.mxu2 %v9355_v47  ;;  %v9467_v49 = vpop.f32.mrf.mxu0  ;;  %v11308_v22 = vld [vmem:[#allocation70_spill] sm:$0xff] }
 0x5ad   : > { %v4234_v26 = vunpack.c.l.bf16 %v11308_v22  ;;  %v4235_v53 = vunpack.c.h.bf16 %v11308_v22  ;;  %v11319_v22 = vld [vmem:[#allocation72_spill] sm:$0xff] }
 0x5ae   : > { %11298 = vst [vmem:[#allocation86_spill] sm:$0xff] %v9462_v36  ;;  %v4104_v1 = vunpack.c.l.bf16 %v3992_v2  ;;  %v4105_v20 = vunpack.c.h.bf16 %v3992_v2 }
 0x5af   : > { %11299 = vst [vmem:[#allocation42_spill] sm:$0xff] %v9464_v3  ;;  %v9471_v44 = vpop.f32.mrf.mxu3  ;;  %v11324_v3 = vld [vmem:[#allocation17_spill] sm:$0xff] }
 0x5b0   : > { %11301 = vst [vmem:[#allocation11_spill] sm:$0xff] %v9471_v44  ;;  %v9473_v38 = vmul.f32 %v4232_v9, %v4104_v1  ;;  %v9475_v46 = vmul.f32 %v4233_v15, %v4105_v20  ;;  %v3830_v23 = vpop.f32.mrf.mxu2 }
 0x5b3   : > { %v9477_v32 = vpop.f32.mrf.mxu1 }
 0x5b4   : > { %v9479_v25 = vpop.f32.mrf.mxu0 }
 0x5b7   : > { %v3919_v47 = vpop.f32.mrf.mxu3 }
 0x5b8   : > { %v3989_v45 = vpack.c.bf16 %v3919_v47, %v3830_v23  ;;  %v9481_v13 = vpop.f32.mrf.mxu2 }
 0x5b9   : > { %11302 = vst [vmem:[#allocation80_spill] sm:$0xff] %v9481_v13 }
 0x5ba   : > { %v4098_v24 = vunpack.c.l.bf16 %v3989_v45  ;;  %v4099_v17 = vunpack.c.h.bf16 %v3989_v45 }
 0x5bb   : > { %v9485_v7 = vpop.f32.mrf.mxu1  ;;  %4593 = vmatmul.bf16.gmra.mxu0 %v9409_v29 }
 0x5bc   : > { %v9488_v12 = vmul.f32 %v4226_v10, %v4098_v24  ;;  %v9490_v40 = vmul.f32 %v4227_v27, %v4099_v17  ;;  %4631 = vmatmul.bf16.gmra.mxu2 %v9409_v29  ;;  %v3664_v51 = vpop.f32.mrf.mxu0  ;;  %v11315_v10 = vld [vmem:[#allocation31_spill] sm:$0xff]  ;;  %v11316_v27 = vld [vmem:[#allocation24_spill] sm:$0xff] }
 0x5bd   : > { %v1767_v24 = vadd.f32 %v11316_v27, %v11315_v10  ;;  %v11317_v17 = vld [vmem:[#allocation28_spill] sm:$0xff]  ;;  %v11325_v27 = vld [vmem:[#allocation82_spill] sm:$0xff] }
 0x5be   : > { %11304 = vst [vmem:[#allocation18_spill] sm:$0xff] %v9488_v12  ;;  %v1762_v36 = vadd.f32 %v11325_v27, %v11324_v3  ;;  %v11333_v27 = vld [vmem:[#allocation10_spill] sm:$0xff] }
 0x5bf   : > { %11305 = vst [vmem:[#allocation30_spill] sm:$0xff] %v9490_v40  ;;  %v9493_v28 = vpop.f32.mrf.mxu3 }
 0x5c0   : > { %11306 = vst [vmem:[#allocation76_spill] sm:$0xff] %v9493_v28  ;;  %v3835_v58 = vpop.f32.mrf.mxu2 }
 0x5c3   : > { %v3753_v41 = vpop.f32.mrf.mxu1 }
 0x5c4   : > { %v3667_v37 = vpop.f32.mrf.mxu0  ;;  %v3998_v30 = vpack.c.bf16 %v3753_v41, %v3664_v51  ;;  %v3994_v51 = vpack.c.bf16 %v9477_v32, %v9467_v49 }
 0x5c6   : > { %v4116_v41 = vunpack.c.l.bf16 %v3998_v30  ;;  %v4109_v32 = vunpack.c.h.bf16 %v3994_v51 }
 0x5c7   : > { %v3924_v0 = vpop.f32.mrf.mxu3 }
 0x5c8   : > { %v3993_v54 = vpack.c.bf16 %v3924_v0, %v3835_v58  ;;  %v9495_v61 = vpop.f32.mrf.mxu2  ;;  %v2016_v58 = vadd.f32 %v11317_v17, %v11315_v10  ;;  %v11326_v17 = vld [vmem:[#allocation50_spill] sm:$0xff] }
 0x5c9   : > { %11307 = vst [vmem:[#allocation29_spill] sm:$0xff] %v9495_v61  ;;  %v2011_v40 = vadd.f32 %v11326_v17, %v11324_v3 }
 0x5ca   : > { %v4106_v63 = vunpack.c.l.bf16 %v3993_v54  ;;  %v4107_v2 = vunpack.c.h.bf16 %v3993_v54  ;;  %v9515_v54 = vpop.permute.xlu2 %1067  ;;  %v2707_v12 = vpack.c.bf16 %v2016_v58, %v1767_v24  ;;  %v11334_v24 = vld [vmem:[#allocation36_spill] sm:$0xff]  ;;  %v11335_v58 = vld [vmem:[#allocation69_spill] sm:$0xff] }
 0x5cb   : > { %v3756_v11 = vpop.f32.mrf.mxu1  ;;  %11318 = vst [vmem:[#allocation12_spill] sm:$0xff] %v9515_v54  ;;  %v1757_v44 = vadd.f32 %v11335_v58, %v11334_v24 }
 0x5cc   : > { %v9499_v9 = vmul.f32 %v4234_v26, %v4106_v63  ;;  %v9501_v29 = vmul.f32 %v4235_v53, %v4107_v2  ;;  %v3669_v1 = vpop.f32.mrf.mxu0  ;;  %v1737_v26 = vadd.f32 %v11319_v22, %v9515_v54  ;;  %v11320_v53 = vld [vmem:[#allocation74_spill] sm:$0xff]  ;;  %v11321_v2 = vld [vmem:[#allocation27_spill] sm:$0xff]  ;;  %v4252_v28 = vunpack.c.l.bf16 %v2707_v12 }
 0x5cd   : > { %v1986_v63 = vadd.f32 %v11320_v53, %v9515_v54  ;;  %v1772_v6 = vadd.f32 %v11322_v42, %v11321_v2  ;;  %v2021_v60 = vadd.f32 %v11323_v56, %v11321_v2  ;;  %v11329_v53 = vld [vmem:[#allocation56_spill] sm:$0xff]  ;;  %v11330_v42 = vld [vmem:[#allocation51_spill] sm:$0xff]  ;;  %v4000_v13 = vpack.c.bf16 %v3756_v11, %v3667_v37 }
 0x5ce   : > { %11309 = vst [vmem:[#allocation83_spill] sm:$0xff] %v9499_v9  ;;  %v11331_v9 = vld [vmem:[#allocation65_spill] sm:$0xff]  ;;  %v2001_v17 = vadd.f32 %v11333_v27, %v11330_v42  ;;  %v3996_v37 = vpack.c.bf16 %v9485_v7, %v9479_v25  ;;  %v11340_v7 = vld [vmem:[#allocation84_spill] sm:$0xff] }
 0x5cf   : > { %11310 = vst [vmem:[#allocation63_spill] sm:$0xff] %v9501_v29  ;;  %v9503_v15 = vpop.f32.mrf.mxu3  ;;  %v9531_v22 = vpack.c.bf16 %v1986_v63, %v1737_v26  ;;  %v11328_v29 = vld [vmem:[#allocation52_spill] sm:$0xff]  ;;  %v9539_v39 = vadd.f32 %v11331_v9, %v11330_v42  ;;  %v2711_v56 = vpack.c.bf16 %v2021_v60, %v1772_v6  ;;  %v2703_v63 = vpack.c.bf16 %v2011_v40, %v1762_v36  ;;  %v11338_v6 = vld [vmem:[#allocation47_spill] sm:$0xff] }
 0x5d0   : > { %11311 = vst [vmem:[#allocation78_spill] sm:$0xff] %v9503_v15  ;;  %v9505_v20 = vpop.f32.mrf.mxu2  ;;  %v9535_v54 = vadd.f32 %v11329_v53, %v11328_v29  ;;  %v11337_v53 = vld [vmem:[#allocation16_spill] sm:$0xff]  ;;  %v4256_v60 = vunpack.c.l.bf16 %v11338_v6  ;;  %v4257_v27 = vunpack.c.h.bf16 %v11338_v6  ;;  %v4253_v40 = vunpack.c.h.bf16 %v2707_v12 }
 0x5d1   : > { %11312 = vst [vmem:[#allocation43_spill] sm:$0xff] %v9505_v20  ;;  %v4248_v8 = vunpack.c.l.bf16 %v11337_v53  ;;  %v4260_v20 = vunpack.c.l.bf16 %v2711_v56  ;;  %v4261_v58 = vunpack.c.h.bf16 %v2711_v56  ;;  %v4120_v11 = vunpack.c.l.bf16 %v4000_v13 }
 0x5d2   : > { %v4249_v6 = vunpack.c.h.bf16 %v11337_v53  ;;  %v4117_v56 = vunpack.c.h.bf16 %v3998_v30  ;;  %v4241_v49 = vunpack.c.h.bf16 %v11340_v7  ;;  %v3990_v30 = vpack.c.bf16 %v9449_v19, %v9430_v48 }
 0x5d3   : > { %v3758_v23 = vpop.f32.mrf.mxu1 }
 0x5d4   : > { %v3672_v45 = vpop.f32.mrf.mxu0  ;;  %v4002_v26 = vpack.c.bf16 %v3758_v23, %v3669_v1  ;;  %v4121_v23 = vunpack.c.h.bf16 %v4000_v13  ;;  %v4240_v13 = vunpack.c.l.bf16 %v11340_v7 }
 0x5d6   : > { %v4124_v4 = vunpack.c.l.bf16 %v4002_v26  ;;  %v4377_v53 = vmul.f32 %v4249_v6, %v4121_v23  ;;  %v4101_v23 = vunpack.c.h.bf16 %v3990_v30 }
 0x5d7   : > { %v9507_v47 = vpop.f32.mrf.mxu3 }
 0x5d8   : > { %11313 = vst [vmem:[#allocation48_spill] sm:$0xff] %v9507_v47  ;;  %v9509_v16 = vpop.f32.mrf.mxu2 }
 0x5d9   : > { %11314 = vst [vmem:[#allocation35_spill] sm:$0xff] %v9509_v16 }
 0x5db   : > { %v3761_v0 = vpop.f32.mrf.mxu1 }
 0x5dc   : > { %v4004_v59 = vpack.c.bf16 %v3761_v0, %v3672_v45  ;;  %v11336_v45 = vld [vmem:[#allocation68_spill] sm:$0xff]  ;;  %v3674_v9 = vpop.f32.mrf.mxu0 }
 0x5dd   : > { %v2006_v0 = vadd.f32 %v11336_v45, %v11334_v24  ;;  %v4125_v45 = vunpack.c.h.bf16 %v4002_v26 }
 0x5de   : > { %v4128_v61 = vunpack.c.l.bf16 %v4004_v59  ;;  %v4129_v21 = vunpack.c.h.bf16 %v4004_v59 }
 0x5df   : > { %v9529_v52 = vpop.f32.mrf.mxu3  ;;  %v4381_v12 = vmul.f32 %v4253_v40, %v4125_v45  ;;  %v2699_v25 = vpack.c.bf16 %v2006_v0, %v1757_v44  ;;  %v11343_v45 = vld [vmem:[#allocation59_spill] sm:$0xff] }
 0x5e0   : > { %11327 = vst [vmem:[#allocation81_spill] sm:$0xff] %v9529_v52  ;;  %v9541_v33 = vpop.f32.mrf.mxu2  ;;  %v4384_v16 = vmul.f32 %v4256_v60, %v4128_v61  ;;  %v4385_v59 = vmul.f32 %v4257_v27, %v4129_v21  ;;  %v4112_v21 = vunpack.c.l.bf16 %v3996_v37  ;;  %v4376_v60 = vmul.f32 %v4248_v8, %v4120_v11 }
 0x5e1   : > { %11332 = vst [vmem:[#allocation33_spill] sm:$0xff] %v9541_v33  ;;  %v4244_v33 = vunpack.c.l.bf16 %v2703_v63  ;;  %v4449_v0 = vpack.c.bf16 %v4381_v12, %v4377_v53  ;;  %v4236_v48 = vunpack.c.l.bf16 %v2699_v25  ;;  %v4237_v19 = vunpack.c.h.bf16 %v2699_v25  ;;  %v11345_v12 = vld [vmem:[#allocation26_spill] sm:$0xff] }
 0x5e2   : > { %v4100_v11 = vunpack.c.l.bf16 %v3990_v30  ;;  %v3982_v25 = vpack.c.bf16 %v9341_v43, %v9325_v57  ;;  %v11348_v57 = vld [vmem:[#allocation22_spill] sm:$0xff] }
 0x5e3   : > { %v3763_v15 = vpop.f32.mrf.mxu1  ;;  %v4372_v44 = vmul.f32 %v4244_v33, %v4116_v41  ;;  %v4205_v41 = vunpack.c.h.bf16 %v9531_v22  ;;  %v2509_v43 = vadd.f32 %v11348_v57, %v11324_v3 }
 0x5e4   : > { %v4006_v47 = vpack.c.bf16 %v3763_v15, %v3674_v9 }
 0x5e6   : > { %v4132_v1 = vunpack.c.l.bf16 %v4006_v47  ;;  %v4133_v36 = vunpack.c.h.bf16 %v4006_v47  ;;  %v4380_v47 = vmul.f32 %v4252_v28, %v4124_v4  ;;  %v4108_v4 = vunpack.c.l.bf16 %v3994_v51 }
 0x5e7   : > { %v9554_v52 = vpop.f32.mrf.mxu3  ;;  %v4204_v51 = vunpack.c.l.bf16 %v9531_v22 }
 0x5e8   : > { %11339 = vst [vmem:[#allocation7_spill] sm:$0xff] %v9554_v52  ;;  %v4388_v15 = vmul.f32 %v4260_v20, %v4132_v1  ;;  %v4389_v9 = vmul.f32 %v4261_v58, %v4133_v36  ;;  %v4245_v52 = vunpack.c.h.bf16 %v2703_v63  ;;  %v9560_v61 = vpop.f32.mrf.mxu2  ;;  %v4113_v20 = vunpack.c.h.bf16 %v3996_v37  ;;  %v11341_v63 = vld [vmem:[#allocation57_spill] sm:$0xff]  ;;  %v11342_v58 = vld [vmem:[#allocation75_spill] sm:$0xff] }
 0x5e9   : > { %v1991_v27 = vadd.f32 %v11341_v63, %v11328_v29  ;;  %v1747_v8 = vadd.f32 %v11343_v45, %v11342_v58  ;;  %v11344_v1 = vld [vmem:[#allocation61_spill] sm:$0xff]  ;;  %v2695_v36 = vpack.c.bf16 %v2001_v17, %v9539_v39  ;;  %v4368_v37 = vmul.f32 %v4240_v13, %v4112_v21 }
 0x5ea   : > { %v4452_v26 = vpack.c.bf16 %v4388_v15, %v4384_v16  ;;  %v4453_v55 = vpack.c.bf16 %v4389_v9, %v4385_v59  ;;  %v4373_v28 = vmul.f32 %v4245_v52, %v4117_v56  ;;  %v4448_v16 = vpack.c.bf16 %v4380_v47, %v4376_v60 }
 0x5eb   : > { %v4369_v33 = vmul.f32 %v4241_v49, %v4113_v20  ;;  %v3986_v52 = vpack.c.bf16 %v9395_v34, %v9376_v35  ;;  %v4364_v59 = vmul.f32 %v4236_v48, %v4108_v4  ;;  %v4365_v15 = vmul.f32 %v4237_v19, %v4109_v32  ;;  %v11346_v35 = vld [vmem:[#allocation13_spill] sm:$0xff] }
 0x5ec   : > { %4523 = vmatpush.bf16.msrb.mxu1 %v4452_v26  ;;  %4561 = vmatpush.bf16.msrb.mxu3 %v4453_v55  ;;  %v1996_v55 = vadd.f32 %v11344_v1, %v11342_v58  ;;  %v4444_v9 = vpack.c.bf16 %v4372_v44, %v4368_v37  ;;  %v2687_v39 = vpack.c.bf16 %v1991_v27, %v9535_v54  ;;  %v4228_v56 = vunpack.c.l.bf16 %v2695_v36  ;;  %v11347_v4 = vld [vmem:[#allocation25_spill] sm:$0xff] }
 0x5ed   : > { %v4445_v6 = vpack.c.bf16 %v4373_v28, %v4369_v33  ;;  %v4229_v47 = vunpack.c.h.bf16 %v2695_v36  ;;  %v2265_v26 = vadd.f32 %v11345_v12, %v11315_v10  ;;  %v2514_v34 = vadd.f32 %v11346_v35, %v11315_v10  ;;  %v11352_v36 = vld [vmem:[#allocation9_spill] sm:$0xff] }
 0x5ee   : > { %v2691_v17 = vpack.c.bf16 %v1996_v55, %v1747_v8  ;;  %v4092_v7 = vunpack.c.l.bf16 %v3986_v52  ;;  %v4093_v13 = vunpack.c.h.bf16 %v3986_v52  ;;  %v4356_v54 = vmul.f32 %v4228_v56, %v4100_v11  ;;  %v11354_v11 = vld [vmem:[#allocation79_spill] sm:$0xff]  ;;  %v11356_v12 = vld [vmem:[#allocation45_spill] sm:$0xff] }
 0x5ef   : > { %v9572_v40 = vpop.f32.mrf.mxu3  ;;  %v4357_v20 = vmul.f32 %v4229_v47, %v4101_v23  ;;  %v4440_v60 = vpack.c.bf16 %v4364_v59, %v9473_v38  ;;  %v4441_v53 = vpack.c.bf16 %v4365_v15, %v9475_v46  ;;  %v4212_v49 = vunpack.c.l.bf16 %v2687_v39  ;;  %v11350_v38 = vld [vmem:[#allocation41_spill] sm:$0xff]  ;;  %v11351_v46 = vld [vmem:[#allocation64_spill] sm:$0xff] }
 0x5f0   : > { %4524 = vmatpush.bf16.msrb.mxu1 %v4448_v16  ;;  %4562 = vmatpush.bf16.msrb.mxu3 %v4449_v0  ;;  %v3850_v21 = vpop.f32.mrf.mxu2  ;;  %v4220_v30 = vunpack.c.l.bf16 %v2691_v17  ;;  %v2260_v32 = vadd.f32 %v11347_v4, %v11324_v3  ;;  %v3978_v10 = vpack.c.bf16 %v9289_v31, %v9277_v50  ;;  %v4221_v28 = vunpack.c.h.bf16 %v2691_v17  ;;  %v11349_v16 = vld [vmem:[#allocation23_spill] sm:$0xff] }
 0x5f1   : > { %v2270_v0 = vadd.f32 %v11349_v16, %v11321_v2  ;;  %v2519_v63 = vadd.f32 %v11350_v38, %v11321_v2  ;;  %v9599_v27 = vadd.f32 %v11351_v46, %v11330_v42  ;;  %v9601_v45 = vpack.c.bf16 %v2514_v34, %v2265_v26  ;;  %v11353_v2 = vld [vmem:[#allocation77_spill] sm:$0xff] }
 0x5f2   : > { %v4084_v50 = vunpack.c.l.bf16 %v3982_v25  ;;  %v4085_v31 = vunpack.c.h.bf16 %v3982_v25  ;;  %v4348_v8 = vmul.f32 %v4220_v30, %v4092_v7  ;;  %v4349_v1 = vmul.f32 %v4221_v28, %v4093_v13 }
 0x5f3   : > { %v4436_v3 = vpack.c.bf16 %v4356_v54, %v9439_v62  ;;  %v4437_v55 = vpack.c.bf16 %v4357_v20, %v9441_v5  ;;  %v9607_v48 = vadd.f32 %v11352_v36, %v11330_v42  ;;  %v2255_v19 = vadd.f32 %v11353_v2, %v11334_v24  ;;  %v11355_v62 = vld [vmem:[#allocation32_spill] sm:$0xff]  ;;  %v11366_v2 = vld [vmem:[#allocation87_spill] sm:$0xff] }
 0x5f4   : > { %4525 = vmatpush.bf16.msrb.mxu1 %v4444_v9  ;;  %4563 = vmatpush.bf16.msrb.mxu3 %v4445_v6  ;;  %v4076_v37 = vunpack.c.l.bf16 %v3978_v10  ;;  %v4213_v52 = vunpack.c.h.bf16 %v2687_v39  ;;  %v2504_v23 = vadd.f32 %v11354_v11, %v11334_v24  ;;  %v9613_v59 = vpack.c.bf16 %v2509_v43, %v2260_v32 }
 0x5f5   : > { %v2712_v15 = vpack.c.bf16 %v2519_v63, %v2270_v0  ;;  %v4250_v5 = vunpack.c.l.bf16 %v11355_v62  ;;  %v4251_v9 = vunpack.c.h.bf16 %v11355_v62  ;;  %v4077_v42 = vunpack.c.h.bf16 %v3978_v10  ;;  %v11363_v0 = vld [vmem:[#allocation38_spill] sm:$0xff] }
 0x5f6   : > { %v4340_v6 = vmul.f32 %v4212_v49, %v4084_v50  ;;  %v4254_v17 = vunpack.c.l.bf16 %v9601_v45  ;;  %v4341_v56 = vmul.f32 %v4213_v52, %v4085_v31  ;;  %v4432_v47 = vpack.c.bf16 %v4348_v8, %v9385_v14  ;;  %v11359_v49 = vld [vmem:[#allocation73_spill] sm:$0xff]  ;;  %v6362_v50 = vld [vmem:[%s10601_s6 + $0x4] sm:$0xf]  ;;  %v6189_v31 = vld [vmem:[%s10601_s6 + $0x8] sm:$0xf0] }
 0x5f7   : > { %v3939_v44 = vpop.f32.mrf.mxu3  ;;  %v4433_v39 = vpack.c.bf16 %v4349_v1, %v9387_v18  ;;  %v4258_v24 = vunpack.c.l.bf16 %v11356_v12  ;;  %v4332_v26 = vmul.f32 %v4204_v51, %v4076_v37  ;;  %v4003_v35 = vpack.c.bf16 %v9572_v40, %v9560_v61  ;;  %v11357_v18 = vld [vmem:[#allocation33_spill] sm:$0xff]  ;;  %v11360_v61 = vld [vmem:[#allocation35_spill] sm:$0xff]  ;;  %v11365_v1 = vld [vmem:[#allocation48_spill] sm:$0xff] }
 0x5f8   : > { %4526 = vmatpush.bf16.msrb.mxu1 %v4440_v60  ;;  %4564 = vmatpush.bf16.msrb.mxu3 %v4441_v53  ;;  %v4005_v33 = vpack.c.bf16 %v3939_v44, %v3850_v21  ;;  %v3852_v25 = vpop.f32.mrf.mxu2  ;;  %v4259_v13 = vunpack.c.h.bf16 %v11356_v12  ;;  %v4262_v21 = vunpack.c.l.bf16 %v2712_v15  ;;  %v4263_v60 = vunpack.c.h.bf16 %v2712_v15  ;;  %v11358_v53 = vld [vmem:[#allocation7_spill] sm:$0xff]  ;;  %v11361_v40 = vld [vmem:[#allocation81_spill] sm:$0xff] }
 0x5f9   : > { %v4333_v14 = vmul.f32 %v4205_v41, %v4077_v42  ;;  %v4001_v51 = vpack.c.bf16 %v11358_v53, %v11357_v18  ;;  %v4428_v30 = vpack.c.bf16 %v4340_v6, %v11359_v49  ;;  %v3999_v4 = vpack.c.bf16 %v11361_v40, %v11360_v61  ;;  %v11362_v44 = vld [vmem:[#allocation53_spill] sm:$0xff]  ;;  %v11364_v8 = vld [vmem:[#allocation43_spill] sm:$0xff] }
 0x5fa   : > { %v4130_v34 = vunpack.c.l.bf16 %v4005_v33  ;;  %v4131_v54 = vunpack.c.h.bf16 %v4005_v33  ;;  %v4429_v28 = vpack.c.bf16 %v4341_v56, %v11362_v44  ;;  %v4126_v57 = vunpack.c.l.bf16 %v4003_v35  ;;  %v11367_v37 = vld [vmem:[#allocation29_spill] sm:$0xff]  ;;  %v11368_v33 = vld [vmem:[#allocation78_spill] sm:$0xff]  ;;  %v11369_v12 = vld [vmem:[#allocation19_spill] sm:$0xff] }
 0x5fb   : > { %v4127_v43 = vunpack.c.h.bf16 %v4003_v35  ;;  %v4424_v38 = vpack.c.bf16 %v4332_v26, %v11363_v0  ;;  %v4255_v22 = vunpack.c.h.bf16 %v9601_v45  ;;  %v4123_v36 = vunpack.c.h.bf16 %v4001_v51  ;;  %v11373_v53 = vld [vmem:[#allocation15_spill] sm:$0xff] }
 0x5fc   : > { %4527 = vmatpush.bf16.msrb.mxu1 %v4436_v3  ;;  %4565 = vmatpush.bf16.msrb.mxu3 %v4437_v55  ;;  %v4386_v16 = vmul.f32 %v4258_v24, %v4130_v34  ;;  %v4387_v41 = vmul.f32 %v4259_v13, %v4131_v54  ;;  %v3997_v3 = vpack.c.bf16 %v11365_v1, %v11364_v8  ;;  %v4122_v55 = vunpack.c.l.bf16 %v4001_v51  ;;  %v11371_v54 = vld [vmem:[#allocation76_spill] sm:$0xff] }
 0x5fd   : > { %v4425_v45 = vpack.c.bf16 %v4333_v14, %v11366_v2  ;;  %v3995_v52 = vpack.c.bf16 %v11368_v33, %v11367_v37  ;;  %v4118_v11 = vunpack.c.l.bf16 %v3999_v4  ;;  %v4119_v42 = vunpack.c.h.bf16 %v3999_v4  ;;  %v11380_v2 = vld [vmem:[#allocation83_spill] sm:$0xff] }
 0x5fe   : > { %v4382_v6 = vmul.f32 %v4254_v17, %v4126_v57  ;;  %v4383_v56 = vmul.f32 %v4255_v22, %v4127_v43  ;;  %v4242_v24 = vunpack.c.l.bf16 %v11369_v12  ;;  %v4246_v26 = vunpack.c.l.bf16 %v9613_v59  ;;  %v11381_v37 = vld [vmem:[#allocation63_spill] sm:$0xff] }
 0x5ff   : > { %v3941_v7 = vpop.f32.mrf.mxu3  ;;  %v4247_v35 = vunpack.c.h.bf16 %v9613_v59  ;;  %v4114_v34 = vunpack.c.l.bf16 %v3997_v3  ;;  %v4379_v13 = vmul.f32 %v4251_v9, %v4123_v36  ;;  %v4243_v17 = vunpack.c.h.bf16 %v11369_v12 }
 0x600   : > { %v4007_v20 = vpack.c.bf16 %v3941_v7, %v3852_v25  ;;  %4528 = vmatpush.bf16.msrb.mxu1 %v4432_v47  ;;  %4566 = vmatpush.bf16.msrb.mxu3 %v4433_v39  ;;  %v9645_v47 = vor.u32 %v6362_v50, %v6189_v31  ;;  %v2700_v39 = vpack.c.bf16 %v2504_v23, %v2255_v19  ;;  %v4115_v25 = vunpack.c.h.bf16 %v3997_v3  ;;  %v11378_v50 = vld [vmem:[#allocation21_spill] sm:$0xff] }
 0x601   : > { %v4378_v7 = vmul.f32 %v4250_v5, %v4122_v55  ;;  %v4110_v19 = vunpack.c.l.bf16 %v3995_v52  ;;  %v4374_v23 = vmul.f32 %v4246_v26, %v4118_v11  ;;  %v4375_v14 = vmul.f32 %v4247_v35, %v4119_v42  ;;  %v11372_v5 = vld [vmem:[#allocation62_spill] sm:$0xff]  ;;  %v11379_v31 = vld [vmem:[#allocation85_spill] sm:$0xff] }
 0x602   : > { %v4134_v32 = vunpack.c.l.bf16 %v4007_v20  ;;  %v4135_v10 = vunpack.c.h.bf16 %v4007_v20  ;;  %v4451_v18 = vpack.c.bf16 %v4383_v56, %v4379_v13  ;;  %v2245_v9 = vadd.f32 %v11372_v5, %v11342_v58  ;;  %v11383_v42 = vld [vmem:[#allocation54_spill] sm:$0xff]  ;;  %v11384_v56 = vld [vmem:[#allocation55_spill] sm:$0xff] }
 0x603   : > { %v4450_v59 = vpack.c.bf16 %v4382_v6, %v4378_v7  ;;  %v2494_v51 = vadd.f32 %v11373_v53, %v11342_v58  ;;  %v2696_v49 = vpack.c.bf16 %v9607_v48, %v9599_v27  ;;  %v4239_v61 = vunpack.c.h.bf16 %v2700_v39  ;;  %v11376_v58 = vld [vmem:[#allocation58_spill] sm:$0xff] }
 0x604   : > { %v4390_v63 = vmul.f32 %v4262_v21, %v4134_v32  ;;  %v4391_v46 = vmul.f32 %v4263_v60, %v4135_v10  ;;  %4529 = vmatpush.bf16.msrb.mxu1 %v4428_v30  ;;  %4567 = vmatpush.bf16.msrb.mxu3 %v4429_v28  ;;  %v11370_v21 = vld [vmem:[#allocation80_spill] sm:$0xff]  ;;  %v4111_v60 = vunpack.c.h.bf16 %v3995_v52  ;;  %v4238_v30 = vunpack.c.l.bf16 %v2700_v39  ;;  %v11374_v32 = vld [vmem:[#allocation49_spill] sm:$0xff]  ;;  %v11375_v10 = vld [vmem:[#allocation11_spill] sm:$0xff] }
 0x605   : > { %v3991_v20 = vpack.c.bf16 %v11371_v54, %v11370_v21  ;;  %v4370_v40 = vmul.f32 %v4242_v24, %v4114_v34  ;;  %v4371_v4 = vmul.f32 %v4243_v17, %v4115_v25  ;;  %v3987_v44 = vpack.c.bf16 %v11375_v10, %v11374_v32  ;;  %v11377_v27 = vld [vmem:[#allocation14_spill] sm:$0xff]  ;;  %v11385_v24 = vld [vmem:[#allocation20_spill] sm:$0xff] }
 0x606   : > { %v4454_v15 = vpack.c.bf16 %v4390_v63, %v4386_v16  ;;  %v4455_v62 = vpack.c.bf16 %v4391_v46, %v4387_v41  ;;  %v4366_v43 = vmul.f32 %v4238_v30, %v4110_v19  ;;  %v4367_v16 = vmul.f32 %v4239_v61, %v4111_v60  ;;  %v11386_v26 = vld [vmem:[#allocation34_spill] sm:$0xff]  ;;  %v11391_v10 = vld [vmem:[#allocation60_spill] sm:$0xff] }
 0x607   : > { %v4102_v28 = vunpack.c.l.bf16 %v3991_v20  ;;  %v4103_v57 = vunpack.c.h.bf16 %v3991_v20  ;;  %v4446_v0 = vpack.c.bf16 %v4374_v23, %v4370_v40  ;;  %v2240_v22 = vadd.f32 %v11376_v58, %v11328_v29  ;;  %v11387_v17 = vld [vmem:[#allocation18_spill] sm:$0xff] }
 0x608   : > { %4530 = vmatpush.bf16.msrb.mxu1 %v4424_v38  ;;  %4568 = vmatpush.bf16.msrb.mxu3 %v4425_v45  ;;  %v4447_v38 = vpack.c.bf16 %v4375_v14, %v4371_v4  ;;  %v2489_v48 = vadd.f32 %v11377_v27, %v11328_v29  ;;  %v2692_v41 = vpack.c.bf16 %v2494_v51, %v2245_v9  ;;  %v4230_v63 = vunpack.c.l.bf16 %v2696_v49  ;;  %v6364_v29 = vld [vmem:[%s10601_s6 + $0x14] sm:$0xf]  ;;  %v11388_v54 = vld [vmem:[#allocation30_spill] sm:$0xff]  ;;  %v4513_v58 = vpop.f32.mrf.mxu0 }
 0x609   : > { %v4231_v46 = vunpack.c.h.bf16 %v2696_v49  ;;  %v3983_v8 = vpack.c.bf16 %v11379_v31, %v11378_v50  ;;  %v4094_v1 = vunpack.c.l.bf16 %v3987_v44  ;;  %v4095_v3 = vunpack.c.h.bf16 %v3987_v44  ;;  %v11389_v53 = vld [vmem:[#allocation86_spill] sm:$0xff] }
 0x60a   : > { %v4358_v55 = vmul.f32 %v4230_v63, %v4102_v28  ;;  %v4442_v45 = vpack.c.bf16 %v4366_v43, %v11380_v2  ;;  %v4443_v33 = vpack.c.bf16 %v4367_v16, %v11381_v37  ;;  %v2688_v52 = vpack.c.bf16 %v2489_v48, %v2240_v22  ;;  %v11390_v49 = vld [vmem:[#allocation42_spill] sm:$0xff]  ;;  %v11393_v43 = vld [vmem:[#allocation71_spill] sm:$0xff] }
 0x60b   : > { %4531 = vmatmul.bf16.vlgmr.msrb.gmra.mxu1 %v9645_v47  ;;  %4569 = vmatmul.bf16.vlgmr.msrb.gmra.mxu3 %v9645_v47  ;;  %v4359_v36 = vmul.f32 %v4231_v46, %v4103_v57  ;;  %v4222_v11 = vunpack.c.l.bf16 %v2692_v41  ;;  %v4223_v12 = vunpack.c.h.bf16 %v2692_v41  ;;  %v3979_v35 = vpack.c.bf16 %v11386_v26, %v11385_v24  ;;  %v11392_v28 = vld [vmem:[#allocation46_spill] sm:$0xff] }
 0x60c   : > { %4599 = vmatpush.bf16.msra.mxu1 %v4454_v15  ;;  %4637 = vmatpush.bf16.msra.mxu3 %v4455_v62  ;;  %v6197_v15 = vld [vmem:[%s10601_s6 + $0x18] sm:$0xf0]  ;;  %v11382_v62 = vld [vmem:[#allocation12_spill] sm:$0xff]  ;;  %v4086_v34 = vunpack.c.l.bf16 %v3983_v8  ;;  %v4087_v25 = vunpack.c.h.bf16 %v3983_v8  ;;  %v4438_v21 = vpack.c.bf16 %v4358_v55, %v11387_v17  ;;  %v4214_v23 = vunpack.c.l.bf16 %v2688_v52  ;;  %v6534_v2 = vld [vmem:[%s6767_s29] sm:$0xff] }
 0x60d   : > { %v2235_v6 = vadd.f32 %v11383_v42, %v11382_v62  ;;  %v2484_v39 = vadd.f32 %v11384_v56, %v11382_v62  ;;  %v4350_v7 = vmul.f32 %v4222_v11, %v4094_v1  ;;  %v4351_v13 = vmul.f32 %v4223_v12, %v4095_v3  ;;  %v9695_v1 = vpop.permute.xlu0 %4476  ;;  %v9697_v3 = vpop.permute.xlu2 %4466  ;;  %v6535_v56 = vld [vmem:[%s6767_s29 + $0x8] sm:$0xff]  ;;  %v6536_v26 = vld [vmem:[%s6767_s29 + $0x20] sm:$0xff] }
 0x60e   : > { %v4439_v20 = vpack.c.bf16 %v4359_v36, %v11388_v54  ;;  %v6200_v19 = vor.u32 %v6364_v29, %v6197_v15  ;;  %v4215_v14 = vunpack.c.h.bf16 %v2688_v52  ;;  %v4079_v5 = vunpack.c.h.bf16 %v3979_v35 }
 0x60f   : > { %v2684_v60 = vpack.c.bf16 %v2484_v39, %v2235_v6  ;;  %v4434_v51 = vpack.c.bf16 %v4350_v7, %v11389_v53  ;;  %v4435_v30 = vpack.c.bf16 %v4351_v13, %v11390_v49  ;;  %v4551_v22 = vpop.f32.mrf.mxu2 }
 0x610   : > { %4600 = vmatpush.bf16.msra.mxu1 %v4450_v59  ;;  %4638 = vmatpush.bf16.msra.mxu3 %v4451_v18  ;;  %v4078_v59 = vunpack.c.l.bf16 %v3979_v35  ;;  %v4342_v18 = vmul.f32 %v4214_v23, %v4086_v34  ;;  %v4343_v9 = vmul.f32 %v4215_v14, %v4087_v25  ;;  %v4515_v27 = vpop.f32.mrf.mxu0  ;;  %v4552_v37 = vadd.f32 %v4551_v22, %v9697_v3  ;;  %v6539_v22 = vld [vmem:[%s6767_s29 + $0x48] sm:$0xff] }
 0x611   : > { %v4206_v61 = vunpack.c.l.bf16 %v2684_v60  ;;  %v4207_v40 = vunpack.c.h.bf16 %v2684_v60  ;;  %v6537_v60 = vld [vmem:[%s6767_s29 + $0x28] sm:$0xff] }
 0x612   : > { %v4430_v44 = vpack.c.bf16 %v4342_v18, %v11391_v10  ;;  %v4431_v57 = vpack.c.bf16 %v4343_v9, %v11392_v28  ;;  %v6538_v9 = vld [vmem:[%s6767_s29 + $0x40] sm:$0xff] }
 0x613   : > { %v4334_v4 = vmul.f32 %v4206_v61, %v4078_v59  ;;  %v4335_v32 = vmul.f32 %v4207_v40, %v4079_v5 }
 0x614   : > { %4601 = vmatpush.bf16.msra.mxu1 %v4446_v0  ;;  %4639 = vmatpush.bf16.msra.mxu3 %v4447_v38  ;;  %v11394_v0 = vld [vmem:[#allocation40_spill] sm:$0xff] }
 0x615   : > { %v4426_v16 = vpack.c.bf16 %v4334_v4, %v11393_v43  ;;  %v4427_v38 = vpack.c.bf16 %v4335_v32, %v11394_v0  ;;  %v4472_v29 = vpop.permute.xlu0 %4471  ;;  %v4482_v4 = vpop.permute.xlu1 %4481 }
 0x616   : > { %v4516_v62 = vadd.f32 %v4515_v27, %v4472_v29 }
 0x617   : > { %v4553_v48 = vpop.f32.mrf.mxu2 }
 0x618   : > { %4602 = vmatpush.bf16.msra.mxu1 %v4442_v45  ;;  %4640 = vmatpush.bf16.msra.mxu3 %v4443_v33  ;;  %v4518_v41 = vpop.f32.mrf.mxu0  ;;  %v4554_v25 = vadd.f32 %v4553_v48, %v4472_v29 }
 0x61b   : > { %4536 = vmatmul.bf16.gmra.mxu1 %v6200_v19  ;;  %4574 = vmatmul.bf16.gmra.mxu3 %v6200_v19 }
 0x61c   : > { %4603 = vmatpush.bf16.msra.mxu1 %v4438_v21  ;;  %4641 = vmatpush.bf16.msra.mxu3 %v4439_v20  ;;  %v4519_v21 = vadd.f32 %v4518_v41, %v9695_v1 }
 0x61f   : > { %v4556_v63 = vpop.f32.mrf.mxu2 }
 0x620   : > { %4604 = vmatpush.bf16.msra.mxu1 %v4434_v51  ;;  %4642 = vmatpush.bf16.msra.mxu3 %v4435_v30  ;;  %v4520_v46 = vpop.f32.mrf.mxu0  ;;  %v4557_v49 = vadd.f32 %v4556_v63, %v9695_v1 }
 0x624   : > { %4605 = vmatpush.bf16.msra.mxu1 %v4430_v44  ;;  %4643 = vmatpush.bf16.msra.mxu3 %v4431_v57  ;;  %v4521_v44 = vadd.f32 %v4520_v46, %v4482_v4 }
 0x627   : > { %v4558_v50 = vpop.f32.mrf.mxu2 }
 0x628   : > { %4606 = vmatpush.bf16.msra.mxu1 %v4426_v16  ;;  %4644 = vmatpush.bf16.msra.mxu3 %v4427_v38  ;;  %v4589_v31 = vpop.f32.mrf.mxu0  ;;  %v4559_v43 = vadd.f32 %v4558_v50, %v4482_v4 }
 0x629   : > { %v4590_v16 = vadd.f32 %v4589_v31, %v9697_v3 }
 0x62b   : > { %4607 = vmatmul.bf16.vlgmr.msra.gmra.mxu1 %v9645_v47  ;;  %4645 = vmatmul.bf16.vlgmr.msra.gmra.mxu3 %v9645_v47  ;;  %v4514_v47 = vadd.f32 %v4513_v58, %v9697_v3 }
 0x62f   : > { %v9693_v8 = vpop.f32.mrf.mxu2 }
 0x630   : > { %v4591_v33 = vpop.f32.mrf.mxu0  ;;  %v9742_v63 = vadd.f32 %v9693_v8, %v9697_v3 }
 0x631   : > { %v9744_v46 = vadd.f32 %v4591_v33, %v4472_v29 }
 0x637   : > { %v4629_v52 = vpop.f32.mrf.mxu2 }
 0x638   : > { %v4594_v54 = vpop.f32.mrf.mxu0  ;;  %v9746_v50 = vadd.f32 %v4629_v52, %v4472_v29 }
 0x639   : > { %v9749_v31 = vadd.f32 %v4594_v54, %v9695_v1 }
 0x63b   : > { %4612 = vmatmul.bf16.gmra.mxu1 %v6200_v19  ;;  %4650 = vmatmul.bf16.gmra.mxu3 %v6200_v19 }
 0x63f   : > { %v4632_v20 = vpop.f32.mrf.mxu2 }
 0x640   : > { %v4596_v38 = vpop.f32.mrf.mxu0  ;;  %v9758_v8 = vadd.f32 %v4632_v20, %v9695_v1  ;;  %v6541_v20 = vld [vmem:[%s6767_s29 + $0x68] sm:$0xff] }
 0x641   : > { %v9760_v3 = vadd.f32 %v4596_v38, %v4482_v4 }
 0x647   : > { %v4634_v58 = vpop.f32.mrf.mxu2 }
 0x648   : > { %v9762_v33 = vadd.f32 %v4634_v58, %v4482_v4 }
 0x688   : > { %v4532_v55 = vpop.f32.mrf.mxu1 }
 0x689   : > { %v4533_v36 = vadd.f32 %v4532_v55, %v4514_v47  ;;  %v6540_v55 = vld [vmem:[%s6767_s29 + $0x60] sm:$0xff] }
 0x68b   : > { %v9701_v45 = vadd.f32 %v6534_v2, %v4533_v36 }
 0x68d   : > { %11395 = vst [vmem:[#allocation37_spill] sm:$0xff] %v9701_v45  ;;  %v6201_v11 = vmul.f32 -1.442695, %v9701_v45 }
 0x68e   : > { %v4570_v15 = vpop.f32.mrf.mxu3 }
 0x68f   : > { %6470 = vpow2.f32 %v6201_v11  ;;  %v4571_v42 = vadd.f32 %v4570_v15, %v4552_v37 }
 0x690   : > { %v4534_v6 = vpop.f32.mrf.mxu1 }
 0x691   : > { %v9706_v39 = vadd.f32 %v6535_v56, %v4571_v42  ;;  %v4535_v12 = vadd.f32 %v4534_v6, %v4516_v62 }
 0x693   : > { %11396 = vst [vmem:[#allocation6_spill] sm:$0xff] %v9706_v39  ;;  %v6202_v24 = vmul.f32 -1.442695, %v9706_v39  ;;  %v9710_v35 = vadd.f32 %v6536_v26, %v4535_v12 }
 0x695   : > { %11397 = vst [vmem:[#allocation8_spill] sm:$0xff] %v9710_v35  ;;  %v6471_v34 = vpop.eup %6470  ;;  %6472 = vpow2.f32 %v6202_v24  ;;  %v6205_v7 = vmul.f32 -1.442695, %v9710_v35 }
 0x696   : > { %v9713_v13 = vadd.f32 1.0, %v6471_v34  ;;  %v4572_v17 = vpop.f32.mrf.mxu3 }
 0x697   : > { %6474 = vpow2.f32 %v6205_v7  ;;  %v4573_v19 = vadd.f32 %v4572_v17, %v4554_v25 }
 0x698   : > { %6476 = vrcp.f32 %v9713_v13  ;;  %v4537_v23 = vpop.f32.mrf.mxu1  ;;  %v4745_v37 = vand.u32 2147483647, %v9713_v13  ;;  %v4747_v52 = vand.u32 2147483648, %v9713_v13  ;;  %vm4741_vm2 = vweird.f32 %v9713_v13 }
 0x699   : > { %v9718_v14 = vadd.f32 %v6537_v60, %v4573_v19  ;;  %v4538_v59 = vadd.f32 %v4537_v23, %v4519_v21 }
 0x69a   : > { %vm9777_vm4 = vcmp.eq.f32.partialorder %v4745_v37, 8.507059e+37  ;;  %v4748_v21 = vor.u32 1.1754944e-38, %v4747_v52 }
 0x69b   : > { %11398 = vst [vmem:[#allocation67_spill] sm:$0xff] %v9718_v14  ;;  %v6473_v18 = vpop.eup %6472  ;;  %v6206_v5 = vmul.f32 -1.442695, %v9718_v14  ;;  %v9722_v53 = vadd.f32 %v6538_v9, %v4538_v59 }
 0x69c   : > { %v9725_v30 = vadd.f32 1.0, %v6473_v18 }
 0x69d   : > { %11399 = vst [vmem:[#allocation66_spill] sm:$0xff] %v9722_v53  ;;  %v6475_v51 = vpop.eup %6474  ;;  %v6209_v61 = vmul.f32 -1.442695, %v9722_v53  ;;  %6478 = vpow2.f32 %v6206_v5 }
 0x69e   : > { %v9728_v40 = vpop.eup %6476  ;;  %v9730_v32 = vadd.f32 1.0, %v6475_v51  ;;  %v4575_v10 = vpop.f32.mrf.mxu3  ;;  %v4760_v54 = vand.u32 2147483647, %v9725_v30  ;;  %vm4756_vm15 = vweird.f32 %v9725_v30 }
 0x69f   : > { %6480 = vpow2.f32 %v6209_v61  ;;  %v4576_v28 = vadd.f32 %v4575_v10, %v4557_v49  ;;  %v4737_v57 = vmul.f32 %v9728_v40, %v9713_v13  ;;  %vm4742_vm3 = vweird.f32 %v9728_v40  ;;  %v6542_v10 = vld [vmem:[%s6767_s29 + $0x10] sm:$0xff] }
 0x6a0   : > { %6482 = vrcp.f32 %v9730_v32  ;;  %v4539_v0 = vpop.f32.mrf.mxu1  ;;  %v4805_v56 = vand.u32 2147483647, %v9730_v32  ;;  %v4807_v12 = vand.u32 2147483648, %v9730_v32  ;;  %vm9794_vm5 = vmor %vm4741_vm2, %vm4742_vm3  ;;  %vm4801_vm6 = vweird.f32 %v9730_v32 }
 0x6a1   : > { %6484 = vrcp.f32 %v9725_v30  ;;  %v9738_v27 = vadd.f32 %v6539_v22, %v4576_v28  ;;  %v4540_v48 = vadd.f32 %v4539_v0, %v4521_v44  ;;  %v4738_v41 = vsub.f32 1.0, %v4737_v57 }
 0x6a2   : > { %vm9802_vm7 = vcmp.eq.f32.partialorder %v4805_v56, 8.507059e+37  ;;  %v4808_v9 = vor.u32 1.1754944e-38, %v4807_v12  ;;  %v4762_v13 = vand.u32 2147483648, %v9725_v30 }
 0x6a3   : > { %11400 = vst [vmem:[#allocation70_spill] sm:$0xff] %v9738_v27  ;;  %v6210_v47 = vmul.f32 -1.442695, %v9738_v27  ;;  %v9753_v36 = vadd.f32 %v6540_v55, %v4540_v48  ;;  %v4739_v2 = vmul.f32 %v9728_v40, %v4738_v41  ;;  %v6479_v11 = vpop.eup %6478 }
 0x6a4   : > { %v9783_v7 = vadd.f32 1.0, %v6479_v11  ;;  %v9828_v41 = vor.u32 1.1754944e-38, %v4762_v13 }
 0x6a5   : > { %11401 = vst [vmem:[#allocation31_spill] sm:$0xff] %v9753_v36  ;;  %v6481_v29 = vpop.eup %6480  ;;  %6486 = vpow2.f32 %v6210_v47  ;;  %v6213_v15 = vmul.f32 -1.442695, %v9753_v36  ;;  %v4740_v6 = vadd.f32 %v9728_v40, %v4739_v2 }
 0x6a6   : > { %v9768_v62 = vpop.eup %6482  ;;  %v9770_v42 = vadd.f32 1.0, %v6481_v29  ;;  %v4577_v1 = vpop.f32.mrf.mxu3 }
 0x6a7   : > { %v9775_v24 = vpop.eup %6484  ;;  %6488 = vpow2.f32 %v6213_v15  ;;  %v4578_v26 = vadd.f32 %v4577_v1, %v4559_v43  ;;  %v4797_v25 = vmul.f32 %v9768_v62, %v9730_v32  ;;  %v4744_v18 = vsel %vm9794_vm5, %v9728_v40, %v4740_v6 }
 0x6a8   : > { %6490 = vrcp.f32 %v9770_v42  ;;  %v4608_v17 = vpop.f32.mrf.mxu1  ;;  %v4752_v51 = vmul.f32 %v9775_v24, %v9725_v30  ;;  %v4867_v61 = vand.u32 2147483648, %v9770_v42  ;;  %v4865_v28 = vand.u32 2147483647, %v9770_v42 }
 0x6a9   : > { %v9788_v19 = vadd.f32 %v6541_v20, %v4578_v26  ;;  %v4609_v23 = vadd.f32 %v4608_v17, %v4590_v16  ;;  %v4798_v59 = vsub.f32 1.0, %v4797_v25  ;;  %6492 = vrcp.f32 %v9783_v7 }
 0x6aa   : > { %vm4802_vm8 = vweird.f32 %v9768_v62  ;;  %v4749_v0 = vsel %vm9777_vm4, %v4748_v21, %v4744_v18  ;;  %vm4861_vm9 = vweird.f32 %v9770_v42  ;;  %v4753_v48 = vsub.f32 1.0, %v4752_v51 }
 0x6ab   : > { %11404 = vst [vmem:[#allocation24_spill] sm:$0xff] %v9788_v19  ;;  %v6487_v49 = vpop.eup %6486  ;;  %v6214_v4 = vmul.f32 -1.442695, %v9788_v19  ;;  %v9812_v44 = vadd.f32 %v6542_v10, %v4609_v23  ;;  %v4799_v40 = vmul.f32 %v9768_v62, %v4798_v59  ;;  %v4868_v55 = vor.u32 1.1754944e-38, %v4867_v61  ;;  %vm9838_vm10 = vmor %vm4801_vm6, %vm4802_vm8  ;;  %v6544_v10 = vld [vmem:[%s6767_s29 + $0x30] sm:$0xff] }
 0x6ac   : > { %v9817_v57 = vadd.f32 1.0, %v6487_v49  ;;  %vm9842_vm11 = vcmp.eq.f32.partialorder %v4865_v28, 8.507059e+37  ;;  %v9851_v1 = vmul.f32 %v4749_v0, %v9701_v45  ;;  %v4820_v32 = vand.u32 2147483647, %v9783_v7 }
 0x6ad   : > { %11409 = vst [vmem:[#allocation28_spill] sm:$0xff] %v9812_v44  ;;  %v6489_v43 = vpop.eup %6488  ;;  %6494 = vpow2.f32 %v6214_v4  ;;  %v6203_v16 = vmul.f32 -1.442695, %v9812_v44  ;;  %v4800_v38 = vadd.f32 %v9768_v62, %v4799_v40  ;;  %vm4757_vm12 = vweird.f32 %v9775_v24 }
 0x6ae   : > { %v9824_v58 = vpop.eup %6490  ;;  %6496 = vrcp.f32 %v9817_v57  ;;  %v4646_v22 = vpop.f32.mrf.mxu3  ;;  %v9832_v2 = vadd.f32 1.0, %v6489_v43  ;;  %v4880_v56 = vand.u32 2147483647, %v9817_v57  ;;  %v4882_v12 = vand.u32 2147483648, %v9817_v57 }
 0x6af   : > { %v4857_v47 = vmul.f32 %v9824_v58, %v9770_v42  ;;  %6498 = vpow2.f32 %v6203_v16  ;;  %v4647_v52 = vadd.f32 %v4646_v22, %v9742_v63  ;;  %v4804_v15 = vsel %vm9838_vm10, %v9768_v62, %v4800_v38  ;;  %v9857_v26 = vpop.eup %6492  ;;  %v6543_v63 = vld [vmem:[%s6767_s29 + $0x18] sm:$0xff] }
 0x6b0   : > { %v4610_v29 = vpop.f32.mrf.mxu1  ;;  %6500 = vrcp.f32 %v9832_v2  ;;  %v4754_v62 = vmul.f32 %v9775_v24, %v4753_v48  ;;  %v4822_v17 = vand.u32 2147483648, %v9783_v7  ;;  %vm4862_vm13 = vweird.f32 %v9824_v58 }
 0x6b1   : > { %v4858_v6 = vsub.f32 1.0, %v4857_v47  ;;  %v9860_v34 = vadd.f32 %v6543_v63, %v4647_v52  ;;  %v4611_v25 = vadd.f32 %v4610_v29, %v9744_v46  ;;  %vm4876_vm14 = vweird.f32 %v9817_v57  ;;  %vm9885_vm2 = vmor %vm4861_vm9, %vm4862_vm13 }
 0x6b2   : > { %v4809_v23 = vsel %vm9802_vm7, %v4808_v9, %v4804_v15  ;;  %v4925_v46 = vand.u32 2147483647, %v9832_v2  ;;  %v4927_v59 = vand.u32 2147483648, %v9832_v2  ;;  %vm9879_vm1 = vcmp.eq.f32.partialorder %v4880_v56, 8.507059e+37 }
 0x6b3   : > { %11414 = vst [vmem:[#allocation72_spill] sm:$0xff] %v9860_v34  ;;  %v6495_v21 = vpop.eup %6494  ;;  %v4859_v20 = vmul.f32 %v9824_v58, %v4858_v6  ;;  %v6204_v51 = vmul.f32 -1.442695, %v9860_v34  ;;  %v4883_v9 = vor.u32 1.1754944e-38, %v4882_v12  ;;  %vm4921_vm3 = vweird.f32 %v9832_v2 }
 0x6b4   : > { %v6497_v60 = vpop.eup %6496  ;;  %v9873_v18 = vadd.f32 1.0, %v6495_v21  ;;  %v9892_v40 = vadd.f32 %v6544_v10, %v4611_v25  ;;  %v9895_v43 = vmul.f32 %v4809_v23, %v9710_v35  ;;  %vm9903_vm5 = vcmp.eq.f32.partialorder %v4925_v46, 8.507059e+37  ;;  %v6546_v23 = vld [vmem:[%s6767_s29 + $0x50] sm:$0xff] }
 0x6b5   : > { %v6499_v13 = vpop.eup %6498  ;;  %v4860_v49 = vadd.f32 %v9824_v58, %v4859_v20  ;;  %v4872_v61 = vmul.f32 %v6497_v60, %v9817_v57  ;;  %vm4877_vm4 = vweird.f32 %v6497_v60  ;;  %v4928_v47 = vor.u32 1.1754944e-38, %v4927_v59 }
 0x6b6   : > { %6502 = vrcp.f32 %v9873_v18  ;;  %11419 = vst [vmem:[#allocation74_spill] sm:$0xff] %v9892_v40  ;;  %v4648_v28 = vpop.f32.mrf.mxu3  ;;  %v6501_v16 = vpop.eup %6500  ;;  %v9900_v38 = vadd.f32 1.0, %v6499_v13  ;;  %v9908_v52 = vadd.f32 %v9775_v24, %v4754_v62  ;;  %v4940_v15 = vand.u32 2147483647, %v9873_v18  ;;  %vm9924_vm8 = vmor %vm4876_vm14, %vm4877_vm4 }
 0x6b7   : > { %v4864_v42 = vsel %vm9885_vm2, %v9824_v58, %v4860_v49  ;;  %v4873_v0 = vsub.f32 1.0, %v4872_v61  ;;  %6504 = vpow2.f32 %v6204_v51  ;;  %v4917_v22 = vmul.f32 %v6501_v16, %v9832_v2 }
 0x6b8   : > { %v4613_v37 = vpop.f32.mrf.mxu1  ;;  %v4869_v29 = vsel %vm9842_vm11, %v4868_v55, %v4864_v42  ;;  %v4942_v6 = vand.u32 2147483648, %v9873_v18  ;;  %v6207_v12 = vmul.f32 -1.442695, %v9892_v40  ;;  %v4649_v63 = vadd.f32 %v4648_v28, %v9746_v50  ;;  %vm9947_vm11 = vmor %vm4756_vm15, %vm4757_vm12 }
 0x6b9   : > { %v4874_v58 = vmul.f32 %v6497_v60, %v4873_v0  ;;  %v4918_v56 = vsub.f32 1.0, %v4917_v22  ;;  %v4614_v25 = vadd.f32 %v4613_v37, %v9749_v31  ;;  %vm4922_vm6 = vweird.f32 %v6501_v16  ;;  %v6545_v31 = vld [vmem:[%s6767_s29 + $0x38] sm:$0xff] }
 0x6ba   : > { %vm4936_vm7 = vweird.f32 %v9873_v18  ;;  %6506 = vrcp.f32 %v9900_v38  ;;  %v4812_v55 = vmul.f32 %v9857_v26, %v9783_v7  ;;  %v9929_v20 = vadd.f32 %v6545_v31, %v4649_v63  ;;  %vm4923_vm12 = vmor %vm4921_vm3, %vm4922_vm6 }
 0x6bb   : > { %v4875_v21 = vadd.f32 %v6497_v60, %v4874_v58  ;;  %v4919_v50 = vmul.f32 %v6501_v16, %v4918_v56  ;;  %6508 = vpow2.f32 %v6207_v12  ;;  %v9932_v46 = vadd.f32 %v6546_v23, %v4614_v25 }
 0x6bc   : > { %v6503_v11 = vpop.eup %6502  ;;  %11424 = vst [vmem:[#allocation27_spill] sm:$0xff] %v9929_v20  ;;  %vm4816_vm9 = vweird.f32 %v9783_v7  ;;  %v4984_v51 = vmul.f32 %v4869_v29, %v9722_v53  ;;  %vm9939_vm10 = vcmp.eq.f32.partialorder %v4940_v15, 8.507059e+37  ;;  %v4943_v61 = vor.u32 1.1754944e-38, %v4942_v6 }
 0x6bd   : > { %11425 = vst [vmem:[#allocation44_spill] sm:$0xff] %v9932_v46  ;;  %v6505_v59 = vpop.eup %6504  ;;  %v4879_v57 = vsel %vm9924_vm8, %v6497_v60, %v4875_v21  ;;  %v4932_v13 = vmul.f32 %v6503_v11, %v9873_v18  ;;  %v4920_v28 = vadd.f32 %v6501_v16, %v4919_v50  ;;  %v4759_v42 = vsel %vm9947_vm11, %v9775_v24, %v9908_v52 }
 0x6be   : > { %v4884_v10 = vsel %vm9879_vm1, %v4883_v9, %v4879_v57  ;;  %v4651_v60 = vpop.f32.mrf.mxu3  ;;  %vm4817_vm13 = vweird.f32 %v9857_v26  ;;  %vm4937_vm14 = vweird.f32 %v6503_v11  ;;  %v6211_v22 = vmul.f32 -1.442695, %v9932_v46 }
 0x6bf   : > { %v4933_v0 = vsub.f32 1.0, %v4932_v13  ;;  %v4652_v5 = vadd.f32 %v4651_v60, %v9758_v8  ;;  %vm9965_vm15 = vcmp.eq.f32.partialorder %v4760_v54, 8.507059e+37  ;;  %v4924_v24 = vsel %vm4923_vm12, %v6501_v16, %v4920_v28  ;;  %v6547_v54 = vld [vmem:[%s6767_s29 + $0x58] sm:$0xff]  ;;  %vm4938_vm2 = vmor %vm4936_vm7, %vm4937_vm14 }
 0x6c0   : > { %v9969_v37 = vadd.f32 1.0, %v6505_v59  ;;  %v6208_v52 = vmul.f32 -1.442695, %v9929_v20  ;;  %v4615_v2 = vpop.f32.mrf.mxu1  ;;  %v4813_v29 = vsub.f32 1.0, %v4812_v55  ;;  %v9972_v58 = vpop.eup %6506  ;;  %v4985_v15 = vmul.f32 %v4884_v10, %v9738_v27  ;;  %vm4818_vm3 = vmor %vm4816_vm9, %vm4817_vm13 }
 0x6c1   : > { %v4929_v8 = vsel %vm9903_vm5, %v4928_v47, %v4924_v24  ;;  %v4934_v30 = vmul.f32 %v6503_v11, %v4933_v0  ;;  %v9978_v6 = vadd.f32 %v6547_v54, %v4652_v5  ;;  %v6509_v56 = vpop.eup %6508  ;;  %6510 = vpow2.f32 %v6211_v22  ;;  %v6548_v47 = vld [vmem:[%s6767_s29 + $0x70] sm:$0xff] }
 0x6c2   : > { %v4988_v16 = vmul.f32 %v4929_v8, %v9753_v36  ;;  %v4616_v12 = vadd.f32 %v4615_v2, %v9760_v3  ;;  %v4814_v63 = vmul.f32 %v9857_v26, %v4813_v29  ;;  %v9983_v21 = vadd.f32 1.0, %v6509_v56 }
 0x6c3   : > { %11432 = vst [vmem:[#allocation39_spill] sm:$0xff] %v9978_v6  ;;  %v4935_v25 = vadd.f32 %v6503_v11, %v4934_v30  ;;  %v6212_v55 = vmul.f32 -1.442695, %v9978_v6  ;;  %vm9988_vm1 = vcmp.eq.f32.partialorder %v4820_v32, 8.507059e+37  ;;  %6512 = vpow2.f32 %v6208_v52 }
 0x6c4   : > { %v9996_v3 = vadd.f32 %v6548_v47, %v4616_v12  ;;  %v4996_v62 = vpack.c.bf16 %v4988_v16, %v4984_v51  ;;  %v4815_v50 = vadd.f32 %v9857_v26, %v4814_v63  ;;  %6514 = vrcp.f32 %v9983_v21 }
 0x6c5   : > { %v4939_v31 = vsel %vm4938_vm2, %v6503_v11, %v4935_v25  ;;  %v4823_v32 = vor.u32 1.1754944e-38, %v4822_v17  ;;  %v4767_v18 = vmul.f32 %v9972_v58, %v9900_v38  ;;  %6516 = vpow2.f32 %v6212_v55 }
 0x6c6   : > { %11435 = vst [vmem:[#allocation17_spill] sm:$0xff] %v9996_v3  ;;  %v4944_v23 = vsel %vm9939_vm10, %v4943_v61, %v4939_v31  ;;  %v6215_v11 = vmul.f32 -1.442695, %v9996_v3  ;;  %5182 = vmatpush.bf16.msrb.mxu0 %v4996_v62  ;;  %v4653_v59 = vpop.f32.mrf.mxu3  ;;  %v4819_v51 = vsel %vm4818_vm3, %v9857_v26, %v4815_v50  ;;  %v4992_v49 = vpack.c.bf16 %v9895_v43, %v9851_v1  ;;  %v6549_v26 = vld [vmem:[%s6767_s29 + $0x78] sm:$0xff]  ;;  %s10523_s29 = scalar_lea.vmem [#allocation2], %s5654_s28  ;;  %s6566_s28 = scalar_lea.hbm %s6565_s20, 128 }
 0x6c7   : > { %v4989_v57 = vmul.f32 %v4944_v23, %v9788_v19  ;;  %v4654_v13 = vadd.f32 %v4653_v59, %v9762_v33  ;;  %v4824_v7 = vsel %vm9988_vm1, %v4823_v32, %v4819_v51  ;;  %v4768_v17 = vsub.f32 1.0, %v4767_v18  ;;  %v6511_v4 = vpop.eup %6510  ;;  %v10029_v33 = vld [vmem:[%s10603_s8] sm:$0xff]  ;;  %s5567_s0 = sshll.u32 %s10523_s29, 4  ;;  %p6567_p12 = scmp.ne.s32.totalorder %s6565_s20, %s6566_s28  ;;  %s5568_s0 = int_to_ptr.vmem [resolvable:$true] %s5567_s0 }
 0x6c8   : > { %6518 = vpow2.f32 %v6215_v11  ;;  %v4764_v61 = vsel %vm9965_vm15, %v9828_v41, %v4759_v42  ;;  %v10021_v10 = vadd.f32 1.0, %v6511_v4  ;;  %v4981_v0 = vmul.f32 %v4824_v7, %v9718_v14  ;;  %p6572_p2 = scmp.lt.s32.totalorder %s6570_s17, %s6566_s28 }
 0x6c9   : > { %v10024_v28 = vadd.f32 %v6549_v26, %v4654_v13  ;;  %v4997_v60 = vpack.c.bf16 %v4989_v57, %v4985_v15  ;;  %v6513_v22 = vpop.eup %6512  ;;  %6520 = vrcp.f32 %v9969_v37  ;;  %v4977_v41 = vmul.f32 %v4764_v61, %v9706_v39  ;;  %p6568_p13 = pnand %p6567_p12, %p6738_p4 }
 0x6ca   : > { %5183 = vmatpush.bf16.msrb.mxu0 %v4992_v49  ;;  %v10033_v1 = vpop.eup %6514  ;;  %6522 = vrcp.f32 %v10021_v10  ;;  %v4769_v43 = vmul.f32 %v9972_v58, %v4768_v17  ;;  %v10039_v9 = vadd.f32 1.0, %v6513_v22  ;;  %vm4772_vm4 = vweird.f32 %v9972_v58  ;;  %p6573_p3 = por %p6572_p2, %p6571_p1 }
 0x6cb   : > { %11436 = vst [vmem:[#allocation82_spill] sm:$0xff] %v10024_v28  ;;  %5231 = vmatpush.bf16.msrb.mxu1 %v4997_v60  ;;  %v6517_v42 = vpop.eup %6516  ;;  %v6216_v5 = vmul.f32 -1.442695, %v10024_v28  ;;  %v4993_v52 = vpack.c.bf16 %v4981_v0, %v4977_v41  ;;  %v4827_v2 = vmul.f32 %v10033_v1, %v9983_v21  ;;  %v4775_v15 = vand.u32 2147483647, %v9900_v38  ;;  %p6569_p0 = pneg %p6568_p13 }
 0x6cc   : > { %v10041_v24 = vadd.f32 1.0, %v6517_v42  ;;  %v4897_v8 = vand.u32 2147483648, %v10021_v10  ;;  %v4770_v30 = vadd.f32 %v9972_v58, %v4769_v43  ;;  %v4777_v54 = vand.u32 2147483648, %v9900_v38 }
 0x6cd   : > { %6249 = vmatmul.msk.bf16.vlgmr.msrb.gmra.mxu0 %vm1380_vm0, %v10029_v33  ;;  %6524 = vpow2.f32 %v6216_v5  ;;  %v4895_v16 = vand.u32 2147483647, %v10021_v10  ;;  %v4828_v63 = vsub.f32 1.0, %v4827_v2  ;;  %vm4771_vm5 = vweird.f32 %v9900_v38  ;;  %v10115_v2 = vld [vmem:[%s10603_s8 + $0x8] sm:$0xff]  ;;  %p6574_p5 = pnand %p6573_p3, %p6569_p0 }
 0x6ce   : > { %v6519_v29 = vpop.eup %6518  ;;  %6526 = vrcp.f32 %v10041_v24  ;;  %vm4891_vm6 = vweird.f32 %v10021_v10  ;;  %vm10067_vm7 = vmor %vm4771_vm5, %vm4772_vm4  ;;  %v4898_v47 = vor.u32 1.1754944e-38, %v4897_v8  ;;  %vm10074_vm8 = vcmp.eq.f32.partialorder %v4775_v15, 8.507059e+37 }
 0x6cf   : > { %5232 = vmatpush.bf16.msrb.mxu1 %v4993_v52  ;;  %v10053_v56 = vpop.eup %6520  ;;  %v10056_v12 = vadd.f32 1.0, %v6519_v29  ;;  %6528 = vrcp.f32 %v10039_v9  ;;  %v4774_v38 = vsel %vm10067_vm7, %v9972_v58, %v4770_v30  ;;  %v4778_v50 = vor.u32 1.1754944e-38, %v4777_v54 }
 0x6d0   : > { %v6523_v25 = vpop.eup %6522  ;;  %vm10078_vm9 = vcmp.eq.f32.partialorder %v4895_v16, 8.507059e+37  ;;  %v4829_v23 = vmul.f32 %v10033_v1, %v4828_v63  ;;  %vm4831_vm10 = vweird.f32 %v9983_v21  ;;  %v4782_v11 = vmul.f32 %v10053_v56, %v9969_v37 }
 0x6d1   : > { %v4887_v55 = vmul.f32 %v6523_v25, %v10021_v10  ;;  %6530 = vrcp.f32 %v10056_v12  ;;  %v4912_v58 = vand.u32 2147483648, %v10041_v24  ;;  %vm4832_vm11 = vweird.f32 %v10033_v1 }
 0x6d2   : > { %6257 = vmatmul.msk.bf16.vlgmr.msrb.gmra.mxu1 %vm1380_vm0, %v10029_v33  ;;  %v4835_v57 = vand.u32 2147483647, %v9983_v21  ;;  %vm4892_vm13 = vweird.f32 %v6523_v25  ;;  %vm4906_vm12 = vweird.f32 %v10041_v24  ;;  %v4837_v17 = vand.u32 2147483648, %v9983_v21  ;;  %vm10136_vm3 = vmor %vm4831_vm10, %vm4832_vm11 }
 0x6d3   : > { %v6525_v31 = vpop.eup %6524  ;;  %v4888_v32 = vsub.f32 1.0, %v4887_v55  ;;  %v4910_v49 = vand.u32 2147483647, %v10041_v24  ;;  %v4955_v61 = vand.u32 2147483647, %v10056_v12  ;;  %v4783_v26 = vsub.f32 1.0, %v4782_v11  ;;  %vm10106_vm14 = vmor %vm4891_vm6, %vm4892_vm13 }
 0x6d4   : > { %v10086_v59 = vpop.eup %6526  ;;  %v10089_v51 = vadd.f32 1.0, %v6525_v31  ;;  %v4957_v41 = vand.u32 2147483648, %v10056_v12  ;;  %v4830_v43 = vadd.f32 %v10033_v1, %v4829_v23  ;;  %v4913_v5 = vor.u32 1.1754944e-38, %v4912_v58 }
 0x6d5   : > { %v4889_v13 = vmul.f32 %v6523_v25, %v4888_v32  ;;  %v4902_v7 = vmul.f32 %v10086_v59, %v10041_v24  ;;  %v10097_v4 = vpop.eup %6528  ;;  %vm4951_vm15 = vweird.f32 %v10056_v12  ;;  %v10119_v29 = vsel %vm10074_vm8, %v4778_v50, %v4774_v38 }
 0x6d6   : > { %6532 = vrcp.f32 %v10089_v51  ;;  %vm10124_vm1 = vcmp.eq.f32.partialorder %v4835_v57, 8.507059e+37  ;;  %v4838_v30 = vor.u32 1.1754944e-38, %v4837_v17  ;;  %vm10128_vm2 = vcmp.eq.f32.partialorder %v4955_v61, 8.507059e+37 }
 0x6d7   : > { %v6531_v60 = vpop.eup %6530  ;;  %v4890_v0 = vadd.f32 %v6523_v25, %v4889_v13  ;;  %v4903_v22 = vsub.f32 1.0, %v4902_v7  ;;  %vm4786_vm4 = vweird.f32 %v9969_v37  ;;  %vm4907_vm5 = vweird.f32 %v10086_v59 }
 0x6d8   : > { %v4947_v52 = vmul.f32 %v6531_v60, %v10056_v12  ;;  %vm10144_vm6 = vcmp.eq.f32.partialorder %v4910_v49, 8.507059e+37  ;;  %v4958_v38 = vor.u32 1.1754944e-38, %v4957_v41  ;;  %v4834_v21 = vsel %vm10136_vm3, %v10033_v1, %v4830_v43  ;;  %vm10163_vm10 = vmor %vm4906_vm12, %vm4907_vm5 }
 0x6d9   : > { %v4894_v10 = vsel %vm10106_vm14, %v6523_v25, %v4890_v0  ;;  %v4904_v15 = vmul.f32 %v10086_v59, %v4903_v22  ;;  %v4784_v25 = vmul.f32 %v10053_v56, %v4783_v26  ;;  %vm4952_vm7 = vweird.f32 %v6531_v60 }
 0x6da   : > { %v4948_v54 = vsub.f32 1.0, %v4947_v52  ;;  %v4899_v50 = vsel %vm10078_vm9, %v4898_v47, %v4894_v10  ;;  %v4842_v32 = vmul.f32 %v10097_v4, %v10039_v9  ;;  %vm4966_vm8 = vweird.f32 %v10089_v51  ;;  %vm4953_vm9 = vmor %vm4951_vm15, %vm4952_vm7 }
 0x6db   : > { %v4905_v55 = vadd.f32 %v10086_v59, %v4904_v15  ;;  %v4970_v11 = vand.u32 2147483647, %v10089_v51  ;;  %v4972_v1 = vand.u32 2147483648, %v10089_v51  ;;  %v4839_v58 = vsel %vm10124_vm1, %v4838_v30, %v4834_v21 }
 0x6dc   : > { %v6533_v62 = vpop.eup %6532  ;;  %v4949_v31 = vmul.f32 %v6531_v60, %v4948_v54  ;;  %v4785_v57 = vadd.f32 %v10053_v56, %v4784_v25  ;;  %v4843_v13 = vsub.f32 1.0, %v4842_v32  ;;  %v4986_v7 = vmul.f32 %v4899_v50, %v9932_v46  ;;  %v6370_v32 = vld [vmem:[%s10603_s8 + $0x20] sm:$0xff] }
 0x6dd   : > { %6250 = vmatmul.msk.bf16.gmra.mxu0 %vm1380_vm0, %v10115_v2  ;;  %v4962_v23 = vmul.f32 %v6533_v62, %v10089_v51  ;;  %v4909_v17 = vsel %vm10163_vm10, %v10086_v59, %v4905_v55  ;;  %vm4787_vm11 = vweird.f32 %v10053_v56  ;;  %vm4967_vm13 = vweird.f32 %v6533_v62 }
 0x6de   : > { %v4950_v18 = vadd.f32 %v6531_v60, %v4949_v31  ;;  %v4844_v61 = vmul.f32 %v10097_v4, %v4843_v13  ;;  %vm4847_vm12 = vweird.f32 %v10097_v4  ;;  %v4850_v59 = vand.u32 2147483647, %v10039_v9  ;;  %vm10188_vm14 = vmor %vm4786_vm4, %vm4787_vm11  ;;  %v6369_v31 = vld [vmem:[%s10603_s8 + $0x18] sm:$0xff] }
 0x6df   : > { %v4963_v24 = vsub.f32 1.0, %v4962_v23  ;;  %v4852_v12 = vand.u32 2147483648, %v10039_v9  ;;  %v4792_v41 = vand.u32 2147483648, %v9969_v37  ;;  %vm4846_vm15 = vweird.f32 %v10039_v9  ;;  %v10248_v23 = vpop.permute.xlu0 %5094 }
 0x6e0   : > { %v4954_v49 = vsel %vm4953_vm9, %v6531_v60, %v4950_v18  ;;  %v4845_v43 = vadd.f32 %v10097_v4, %v4844_v61  ;;  %v4973_v52 = vor.u32 1.1754944e-38, %v4972_v1  ;;  %v4982_v10 = vmul.f32 %v4839_v58, %v9892_v40  ;;  %vm4848_vm1 = vmor %vm4846_vm15, %vm4847_vm12  ;;  %v6373_v58 = vld [vmem:[%s10603_s8 + $0x38] sm:$0xff] }
 0x6e1   : > { %v4959_v26 = vsel %vm10128_vm2, %v4958_v38, %v4954_v49  ;;  %v4964_v0 = vmul.f32 %v6533_v62, %v4963_v24  ;;  %v4790_v15 = vand.u32 2147483647, %v9969_v37  ;;  %v4914_v8 = vsel %vm10144_vm6, %v4913_v5, %v4909_v17  ;;  %vm4968_vm2 = vmor %vm4966_vm8, %vm4967_vm13  ;;  %v6368_v38 = vld [vmem:[%s10603_s8 + $0x10] sm:$0xff] }
 0x6e2   : > { %6258 = vmatmul.msk.bf16.gmra.mxu1 %vm1380_vm0, %v10115_v2  ;;  %v4990_v22 = vmul.f32 %v4959_v26, %v9996_v3  ;;  %v4849_v54 = vsel %vm4848_vm1, %v10097_v4, %v4845_v43  ;;  %v4853_v9 = vor.u32 1.1754944e-38, %v4852_v12  ;;  %vm4971_vm3 = vcmp.eq.f32.partialorder %v4970_v11, 8.507059e+37  ;;  %v6372_v11 = vld [vmem:[%s10603_s8 + $0x30] sm:$0xff] }
 0x6e3   : > { %v4965_v42 = vadd.f32 %v6533_v62, %v4964_v0  ;;  %v4789_v37 = vsel %vm10188_vm14, %v10053_v56, %v4785_v57  ;;  %vm4851_vm4 = vcmp.eq.f32.partialorder %v4850_v59, 8.507059e+37  ;;  %v4978_v5 = vmul.f32 %v10119_v29, %v9812_v44  ;;  %v10266_v57 = vpop.permute.xlu2 %5109 }
 0x6e4   : > { %v4998_v30 = vpack.c.bf16 %v4990_v22, %v4986_v7  ;;  %v4793_v25 = vor.u32 1.1754944e-38, %v4792_v41  ;;  %v4854_v55 = vsel %vm4851_vm4, %v4853_v9, %v4849_v54  ;;  %v4987_v51 = vmul.f32 %v4914_v8, %v9978_v6 }
 0x6e5   : > { %v4969_v16 = vsel %vm4968_vm2, %v6533_v62, %v4965_v42  ;;  %vm4791_vm5 = vcmp.eq.f32.partialorder %v4790_v15, 8.507059e+37  ;;  %v4994_v4 = vpack.c.bf16 %v4982_v10, %v4978_v5  ;;  %v4983_v62 = vmul.f32 %v4854_v55, %v9929_v20 }
 0x6e6   : > { %v4974_v63 = vsel %vm4971_vm3, %v4973_v52, %v4969_v16  ;;  %5280 = vmatpush.bf16.msrb.mxu2 %v4998_v30  ;;  %v4794_v21 = vsel %vm4791_vm5, %v4793_v25, %v4789_v37 }
 0x6e7   : > { %v4991_v48 = vmul.f32 %v4974_v63, %v10024_v28  ;;  %v4979_v29 = vmul.f32 %v4794_v21, %v9860_v34  ;;  %v10258_v47 = vpop.permute.xlu0 %5089 }
 0x6e9   : > { %v4999_v56 = vpack.c.bf16 %v4991_v48, %v4987_v51  ;;  %v4995_v50 = vpack.c.bf16 %v4983_v62, %v4979_v29 }
 0x6ea   : > { %5281 = vmatpush.bf16.msrb.mxu2 %v4994_v4 }
 0x6eb   : > { %5329 = vmatpush.bf16.msrb.mxu3 %v4999_v56  ;;  %v10276_v17 = vpop.permute.xlu2 %5084 }
 0x6ed   : > { %6251 = vmatmul.msk.bf16.gmra.mxu0 %vm1380_vm0, %v6368_v38  ;;  %6265 = vmatmul.msk.bf16.vlgmr.msrb.gmra.mxu2 %vm1380_vm0, %v10029_v33 }
 0x6ef   : > { %5330 = vmatpush.bf16.msrb.mxu3 %v4995_v50  ;;  %v10268_v13 = vpop.permute.xlu0 %5064 }
 0x6f2   : > { %6259 = vmatmul.msk.bf16.gmra.mxu1 %vm1380_vm0, %v6368_v38  ;;  %6273 = vmatmul.msk.bf16.vlgmr.msrb.gmra.mxu3 %vm1380_vm0, %v10029_v33  ;;  %v6371_v33 = vld [vmem:[%s10603_s8 + $0x28] sm:$0xff] }
 0x6f3   : > { %v10282_v26 = vpop.permute.xlu2 %5079 }
 0x6f7   : > { %v10278_v24 = vpop.permute.xlu0 %5059 }
 0x6fb   : > { %v10292_v52 = vpop.permute.xlu2 %5054 }
 0x6fd   : > { %6252 = vmatmul.msk.bf16.gmra.mxu0 %vm1380_vm0, %v6369_v31  ;;  %6266 = vmatmul.msk.bf16.gmra.mxu2 %vm1380_vm0, %v10115_v2 }
 0x6ff   : > { %v5035_v59 = vpop.permute.xlu0 %5034 }
 0x702   : > { %6260 = vmatmul.msk.bf16.gmra.mxu1 %vm1380_vm0, %v6369_v31  ;;  %6274 = vmatmul.msk.bf16.gmra.mxu3 %vm1380_vm0, %v10115_v2  ;;  %v10244_v2 = vpop.permute.xlu1 %5104 }
 0x703   : > { %v5050_v9 = vpop.permute.xlu2 %5049 }
 0x70a   : > { %v10253_v1 = vpop.permute.xlu1 %5099 }
 0x70d   : > { %6253 = vmatmul.msk.bf16.gmra.mxu0 %vm1380_vm0, %v6370_v32  ;;  %6267 = vmatmul.msk.bf16.gmra.mxu2 %vm1380_vm0, %v6368_v38 }
 0x712   : > { %6261 = vmatmul.msk.bf16.gmra.mxu1 %vm1380_vm0, %v6370_v32  ;;  %6275 = vmatmul.msk.bf16.gmra.mxu3 %vm1380_vm0, %v6368_v38  ;;  %v10261_v18 = vpop.permute.xlu1 %5074 }
 0x71a   : > { %v10271_v7 = vpop.permute.xlu1 %5069 }
 0x71d   : > { %6254 = vmatmul.msk.bf16.gmra.mxu0 %vm1380_vm0, %v6371_v33  ;;  %6268 = vmatmul.msk.bf16.gmra.mxu2 %vm1380_vm0, %v6369_v31 }
 0x722   : > { %6262 = vmatmul.msk.bf16.gmra.mxu1 %vm1380_vm0, %v6371_v33  ;;  %6276 = vmatmul.msk.bf16.gmra.mxu3 %vm1380_vm0, %v6369_v31  ;;  %v10280_v49 = vpop.permute.xlu1 %5044 }
 0x72a   : > { %v5040_v12 = vpop.permute.xlu1 %5039 }
 0x72d   : > { %6255 = vmatmul.msk.bf16.gmra.mxu0 %vm1380_vm0, %v6372_v11  ;;  %6269 = vmatmul.msk.bf16.gmra.mxu2 %vm1380_vm0, %v6370_v32 }
 0x732   : > { %6263 = vmatmul.msk.bf16.gmra.mxu1 %vm1380_vm0, %v6372_v11  ;;  %6277 = vmatmul.msk.bf16.gmra.mxu3 %vm1380_vm0, %v6370_v32 }
 0x73d   : > { %6256 = vmatmul.msk.bf16.gmra.mxu0 %vm1380_vm0, %v6373_v58  ;;  %6270 = vmatmul.msk.bf16.gmra.mxu2 %vm1380_vm0, %v6371_v33 }
 0x742   : > { %6264 = vmatmul.msk.bf16.gmra.mxu1 %vm1380_vm0, %v6373_v58  ;;  %6278 = vmatmul.msk.bf16.gmra.mxu3 %vm1380_vm0, %v6371_v33 }
 0x74a   : > { %v5185_v61 = vpop.f32.mrf.mxu0 }
 0x74b   : > { %v10285_v60 = vadd.f32 %v5185_v61, %v5035_v59 }
 0x74d   : > { %6271 = vmatmul.msk.bf16.gmra.mxu2 %vm1380_vm0, %v6372_v11 }
 0x74f   : > { %v5234_v0 = vpop.f32.mrf.mxu1 }
 0x750   : > { %v10294_v10 = vadd.f32 %v5234_v0, %v5035_v59 }
 0x752   : > { %v5187_v22 = vpop.f32.mrf.mxu0  ;;  %6279 = vmatmul.msk.bf16.gmra.mxu3 %vm1380_vm0, %v6372_v11 }
 0x753   : > { %v10287_v41 = vadd.f32 %v5187_v22, %v5040_v12 }
 0x757   : > { %v5236_v42 = vpop.f32.mrf.mxu1 }
 0x758   : > { %v10296_v15 = vadd.f32 %v5236_v42, %v5040_v12 }
 0x75a   : > { %v5190_v30 = vpop.f32.mrf.mxu0 }
 0x75b   : > { %v10302_v37 = vadd.f32 %v5190_v30, %v10280_v49 }
 0x75d   : > { %6272 = vmatmul.msk.bf16.gmra.mxu2 %vm1380_vm0, %v6373_v58 }
 0x75f   : > { %v5239_v54 = vpop.f32.mrf.mxu1 }
 0x760   : > { %v10310_v55 = vadd.f32 %v5239_v54, %v10280_v49 }
 0x762   : > { %v5192_v16 = vpop.f32.mrf.mxu0  ;;  %6280 = vmatmul.msk.bf16.gmra.mxu3 %vm1380_vm0, %v6373_v58 }
 0x763   : > { %v10304_v63 = vadd.f32 %v5192_v16, %v5050_v9 }
 0x767   : > { %v5241_v25 = vpop.f32.mrf.mxu1 }
 0x768   : > { %v10312_v51 = vadd.f32 %v5241_v25, %v5050_v9 }
 0x76a   : > { %v5195_v4 = vpop.f32.mrf.mxu0 }
 0x76b   : > { %v10317_v62 = vadd.f32 %v5195_v4, %v10292_v52 }
 0x76f   : > { %v5244_v38 = vpop.f32.mrf.mxu1 }
 0x770   : > { %v5283_v21 = vpop.f32.mrf.mxu2  ;;  %v10325_v33 = vadd.f32 %v5244_v38, %v10292_v52 }
 0x771   : > { %v10330_v61 = vadd.f32 %v5283_v21, %v5035_v59 }
 0x772   : > { %v5197_v56 = vpop.f32.mrf.mxu0 }
 0x773   : > { %v10320_v29 = vadd.f32 %v5197_v56, %v10278_v24  ;;  %11457 = vst [vmem:[#allocation50_spill] sm:$0xff] %v10330_v61 }
 0x775   : > { %v5332_v31 = vpop.f32.mrf.mxu3 }
 0x776   : > { %v10338_v16 = vadd.f32 %v5332_v31, %v5035_v59 }
 0x777   : > { %v5246_v32 = vpop.f32.mrf.mxu1 }
 0x778   : > { %v10328_v11 = vadd.f32 %v5246_v32, %v10278_v24  ;;  %v5285_v58 = vpop.f32.mrf.mxu2  ;;  %11459 = vst [vmem:[#allocation56_spill] sm:$0xff] %v10338_v16 }
 0x779   : > { %v10334_v22 = vadd.f32 %v5285_v58, %v5040_v12 }
 0x77a   : > { %v5200_v42 = vpop.f32.mrf.mxu0 }
 0x77b   : > { %11458 = vst [vmem:[#allocation52_spill] sm:$0xff] %v10334_v22  ;;  %v10345_v32 = vadd.f32 %v5200_v42, %v10268_v13 }
 0x77d   : > { %v5334_v54 = vpop.f32.mrf.mxu3 }
 0x77e   : > { %v10340_v25 = vadd.f32 %v5334_v54, %v5040_v12 }
 0x77f   : > { %v5249_v4 = vpop.f32.mrf.mxu1 }
 0x780   : > { %11460 = vst [vmem:[#allocation51_spill] sm:$0xff] %v10340_v25  ;;  %v5288_v21 = vpop.f32.mrf.mxu2  ;;  %v10353_v12 = vadd.f32 %v5249_v4, %v10268_v13 }
 0x781   : > { %v10359_v38 = vadd.f32 %v5288_v21, %v10280_v49 }
 0x782   : > { %v5202_v56 = vpop.f32.mrf.mxu0 }
 0x783   : > { %v10348_v58 = vadd.f32 %v5202_v56, %v10271_v7 }
 0x785   : > { %v5337_v8 = vpop.f32.mrf.mxu3 }
 0x786   : > { %v10370_v4 = vadd.f32 %v5337_v8, %v10280_v49 }
 0x787   : > { %v5251_v59 = vpop.f32.mrf.mxu1 }
 0x788   : > { %v10356_v31 = vadd.f32 %v5251_v59, %v10271_v7  ;;  %v5290_v54 = vpop.f32.mrf.mxu2  ;;  %11461 = vst [vmem:[#allocation65_spill] sm:$0xff] %v10370_v4 }
 0x789   : > { %v10363_v56 = vadd.f32 %v5290_v54, %v5050_v9 }
 0x78a   : > { %v10365_v48 = vpop.f32.mrf.mxu0 }
 0x78d   : > { %v5339_v0 = vpop.f32.mrf.mxu3 }
 0x78e   : > { %v10372_v59 = vadd.f32 %v5339_v0, %v5050_v9 }
 0x78f   : > { %v10374_v5 = vpop.f32.mrf.mxu1 }
 0x790   : > { %11462 = vst [vmem:[#allocation10_spill] sm:$0xff] %v10372_v59  ;;  %v5293_v50 = vpop.f32.mrf.mxu2 }
 0x791   : > { %v10381_v3 = vadd.f32 %v5293_v50, %v10292_v52 }
 0x792   : > { %v5207_v42 = vpop.f32.mrf.mxu0 }
 0x795   : > { %v5342_v54 = vpop.f32.mrf.mxu3 }
 0x796   : > { %v10389_v0 = vadd.f32 %v5342_v54, %v10292_v52 }
 0x797   : > { %v10378_v30 = vpop.f32.mrf.mxu1 }
 0x798   : > { %v5295_v28 = vpop.f32.mrf.mxu2  ;;  %11463 = vst [vmem:[#allocation36_spill] sm:$0xff] %v10389_v0 }
 0x799   : > { %v10384_v43 = vadd.f32 %v5295_v28, %v10278_v24 }
 0x79a   : > { %v5210_v49 = vpop.f32.mrf.mxu0 }
 0x79d   : > { %v5344_v9 = vpop.f32.mrf.mxu3 }
 0x79e   : > { %v10392_v21 = vadd.f32 %v5344_v9, %v10278_v24 }
 0x79f   : > { %v5259_v6 = vpop.f32.mrf.mxu1 }
 0x7a0   : > { %11464 = vst [vmem:[#allocation69_spill] sm:$0xff] %v10392_v21  ;;  %v5298_v50 = vpop.f32.mrf.mxu2 }
 0x7a1   : > { %v10397_v44 = vadd.f32 %v5298_v50, %v10268_v13 }
 0x7a2   : > { %v5212_v20 = vpop.f32.mrf.mxu0 }
 0x7a3   : > { %v5213_v22 = vadd.f32 %v5212_v20, %v10258_v47 }
 0x7a5   : > { %v5347_v40 = vpop.f32.mrf.mxu3 }
 0x7a6   : > { %v10405_v9 = vadd.f32 %v5347_v40, %v10268_v13 }
 0x7a7   : > { %v5261_v28 = vpop.f32.mrf.mxu1 }
 0x7a8   : > { %v5300_v34 = vpop.f32.mrf.mxu2 }
 0x7a9   : > { %v10400_v8 = vadd.f32 %v5300_v34, %v10271_v7 }
 0x7aa   : > { %v5215_v52 = vpop.f32.mrf.mxu0 }
 0x7ab   : > { %v5216_v25 = vadd.f32 %v5215_v52, %v10248_v23 }
 0x7ad   : > { %v5349_v54 = vpop.f32.mrf.mxu3 }
 0x7ae   : > { %v10408_v46 = vadd.f32 %v5349_v54, %v10271_v7 }
 0x7af   : > { %v5264_v19 = vpop.f32.mrf.mxu1 }
 0x7b0   : > { %v10412_v50 = vpop.f32.mrf.mxu2 }
 0x7b2   : > { %v5217_v27 = vpop.f32.mrf.mxu0 }
 0x7b3   : > { %v5218_v36 = vadd.f32 %v5217_v27, %v10253_v1  ;;  %v5211_v27 = vadd.f32 %v5210_v49, %v10276_v17  ;;  %v11466_v49 = vpack.c.bf16 %v10320_v29, %v10317_v62  ;;  %v11470_v62 = vpack.c.bf16 %v10287_v41, %v10285_v60 }
 0x7b4   : > { %v11471_v29 = vpack.c.bf16 %v10312_v51, %v10310_v55 }
 0x7b5   : > { %v10414_v34 = vpop.f32.mrf.mxu3  ;;  %v5400_v0 = vpack.c.bf16 %v5218_v36, %v5216_v25  ;;  %v5396_v52 = vpack.c.bf16 %v5213_v22, %v5211_v27  ;;  %v5206_v36 = vadd.f32 %v10365_v48, %v10261_v18  ;;  %v5255_v22 = vadd.f32 %v10374_v5, %v10261_v18 }
 0x7b6   : > { %v11465_v48 = vpack.c.bf16 %v10348_v58, %v10345_v32  ;;  %v11468_v5 = vpack.c.bf16 %v10304_v63, %v10302_v37  ;;  %v6374_v58 = vld [vmem:[%s10605_s10] sm:$0xff]  ;;  %v11472_v37 = vpack.c.bf16 %v10296_v15, %v10294_v10 }
 0x7b7   : > { %v5266_v53 = vpop.f32.mrf.mxu1 }
 0x7b8   : > { %v10416_v14 = vpop.f32.mrf.mxu2 }
 0x7ba   : > { %v5220_v24 = vpop.f32.mrf.mxu0 }
 0x7bb   : > { %v5221_v54 = vadd.f32 %v5220_v24, %v10244_v2  ;;  %v5267_v24 = vadd.f32 %v5266_v53, %v10253_v1  ;;  %v5260_v53 = vadd.f32 %v5259_v6, %v10276_v17 }
 0x7bd   : > { %v10418_v35 = vpop.f32.mrf.mxu3 }
 0x7bf   : > { %v5269_v40 = vpop.f32.mrf.mxu1 }
 0x7c0   : > { %v10420_v13 = vpop.f32.mrf.mxu2  ;;  %v5270_v59 = vadd.f32 %v5269_v40, %v10244_v2  ;;  %v5262_v40 = vadd.f32 %v5261_v28, %v10258_v47  ;;  %v11469_v28 = vpack.c.bf16 %v10328_v11, %v10325_v33 }
 0x7c2   : > { %v5222_v7 = vpop.f32.mrf.mxu0  ;;  %v5397_v25 = vpack.c.bf16 %v5262_v40, %v5260_v53  ;;  %v11483_v53 = vld [vmem:[#allocation10_spill] sm:$0xff] }
 0x7c3   : > { %v5223_v39 = vadd.f32 %v5222_v7, %v10266_v57 }
 0x7c5   : > { %v5404_v45 = vpack.c.bf16 %v5223_v39, %v5221_v54  ;;  %v10425_v16 = vpop.f32.mrf.mxu3  ;;  %v5265_v39 = vadd.f32 %v5264_v19, %v10248_v23  ;;  %v5257_v19 = vadd.f32 %v10378_v30, %v10282_v26  ;;  %v11467_v30 = vpack.c.bf16 %v10356_v31, %v10353_v12 }
 0x7c7   : > { %5444 = vmatpush.bf16.msra.mxu0 %v5404_v45  ;;  %v5271_v4 = vpop.f32.mrf.mxu1  ;;  %v5208_v45 = vadd.f32 %v5207_v42, %v10282_v26  ;;  %v5401_v54 = vpack.c.bf16 %v5267_v24, %v5265_v39  ;;  %v5393_v42 = vpack.c.bf16 %v5257_v19, %v5255_v22  ;;  %v5309_v39 = vadd.f32 %v10420_v13, %v10276_v17  ;;  %v11489_v19 = vld [vmem:[#allocation37_spill] sm:$0xff] }
 0x7c8   : > { %v5272_v61 = vadd.f32 %v5271_v4, %v10266_v57  ;;  %v5310_v21 = vpop.f32.mrf.mxu2  ;;  %v5358_v13 = vadd.f32 %v10425_v16, %v10276_v17  ;;  %v11474_v17 = vpack.c.bf16 %v10384_v43, %v10381_v3  ;;  %v11478_v16 = vld [vmem:[#allocation36_spill] sm:$0xff]  ;;  %v11486_v43 = vld [vmem:[#allocation51_spill] sm:$0xff] }
 0x7c9   : > { %v5392_v20 = vpack.c.bf16 %v5208_v45, %v5206_v36  ;;  %v5311_v10 = vadd.f32 %v5310_v21, %v10258_v47  ;;  %v6375_v45 = vld [vmem:[%s10605_s10 + $0x8] sm:$0xff] }
 0x7ca   : > { %v5405_v7 = vpack.c.bf16 %v5272_v61, %v5270_v59 }
 0x7cb   : > { %5445 = vmatpush.bf16.msra.mxu0 %v5400_v0 }
 0x7cc   : > { %5463 = vmatpush.bf16.msra.mxu1 %v5405_v7 }
 0x7cd   : > { %v5359_v4 = vpop.f32.mrf.mxu3 }
 0x7ce   : > { %v5360_v21 = vadd.f32 %v5359_v4, %v10258_v47  ;;  %v11480_v4 = vld [vmem:[#allocation52_spill] sm:$0xff] }
 0x7cf   : > { %5446 = vmatpush.bf16.msra.mxu0 %v5396_v52 }
 0x7d0   : > { %5464 = vmatpush.bf16.msra.mxu1 %v5401_v54  ;;  %v5313_v61 = vpop.f32.mrf.mxu2  ;;  %v5399_v36 = vpack.c.bf16 %v5360_v21, %v5358_v13  ;;  %v11498_v13 = vld [vmem:[#allocation72_spill] sm:$0xff] }
 0x7d1   : > { %v5314_v41 = vadd.f32 %v5313_v61, %v10248_v23 }
 0x7d3   : > { %5447 = vmatpush.bf16.msra.mxu0 %v5392_v20  ;;  %v11484_v20 = vld [vmem:[#allocation65_spill] sm:$0xff] }
 0x7d4   : > { %5465 = vmatpush.bf16.msra.mxu1 %v5397_v25  ;;  %v11485_v3 = vpack.c.bf16 %v11483_v53, %v11484_v20  ;;  %v11502_v53 = vld [vmem:[#allocation39_spill] sm:$0xff] }
 0x7d5   : > { %v5362_v59 = vpop.f32.mrf.mxu3 }
 0x7d6   : > { %v5363_v52 = vadd.f32 %v5362_v59, %v10248_v23  ;;  %v5355_v23 = vadd.f32 %v10418_v35, %v10282_v26  ;;  %v11475_v35 = vpack.c.bf16 %v10408_v46, %v10405_v9  ;;  %v11487_v46 = vld [vmem:[#allocation56_spill] sm:$0xff]  ;;  %v5420_v59 = vpop.permute.xlu0 %5419 }
 0x7d7   : > { %5448 = vmatpush.bf16.msra.mxu0 %v11465_v48  ;;  %v11488_v9 = vpack.c.bf16 %v11486_v43, %v11487_v46  ;;  %v11490_v48 = vld [vmem:[#allocation6_spill] sm:$0xff]  ;;  %v11503_v46 = vld [vmem:[#allocation17_spill] sm:$0xff] }
 0x7d8   : > { %5466 = vmatpush.bf16.msra.mxu1 %v5393_v42  ;;  %v5315_v6 = vpop.f32.mrf.mxu2 }
 0x7d9   : > { %v5316_v31 = vadd.f32 %v5315_v6, %v10253_v1 }
 0x7db   : > { %5449 = vmatpush.bf16.msra.mxu0 %v11466_v49  ;;  %v5402_v15 = vpack.c.bf16 %v5316_v31, %v5314_v41  ;;  %v11494_v41 = vld [vmem:[#allocation70_spill] sm:$0xff] }
 0x7dc   : > { %5467 = vmatpush.bf16.msra.mxu1 %v11467_v30 }
 0x7dd   : > { %v5364_v0 = vpop.f32.mrf.mxu3 }
 0x7de   : > { %v5365_v7 = vadd.f32 %v5364_v0, %v10253_v1  ;;  %v5304_v1 = vadd.f32 %v10412_v50, %v10261_v18  ;;  %v11473_v50 = vpack.c.bf16 %v10400_v8, %v10397_v44  ;;  %v11481_v44 = vld [vmem:[#allocation50_spill] sm:$0xff]  ;;  %v11491_v0 = vld [vmem:[#allocation8_spill] sm:$0xff] }
 0x7df   : > { %5450 = vmatpush.bf16.msra.mxu0 %v11468_v5  ;;  %v11482_v8 = vpack.c.bf16 %v11480_v4, %v11481_v44 }
 0x7e0   : > { %5468 = vmatpush.bf16.msra.mxu1 %v11469_v28  ;;  %v5318_v32 = vpop.f32.mrf.mxu2  ;;  %v5403_v40 = vpack.c.bf16 %v5365_v7, %v5363_v52 }
 0x7e1   : > { %v5319_v33 = vadd.f32 %v5318_v32, %v10244_v2 }
 0x7e3   : > { %5451 = vmatpush.bf16.msra.mxu0 %v11470_v62  ;;  %v11492_v62 = vld [vmem:[#allocation67_spill] sm:$0xff] }
 0x7e4   : > { %5469 = vmatpush.bf16.msra.mxu1 %v11471_v29 }
 0x7e5   : > { %v5367_v12 = vpop.f32.mrf.mxu3 }
 0x7e6   : > { %5452 = vmatmul.bf16.vlgmr.msra.gmra.mxu0 %v6374_v58  ;;  %v5368_v51 = vadd.f32 %v5367_v12, %v10244_v2  ;;  %v5306_v2 = vadd.f32 %v10416_v14, %v10282_v26  ;;  %v5353_v14 = vadd.f32 %v10414_v34, %v10261_v18  ;;  %v11476_v18 = vpack.c.bf16 %v10363_v56, %v10359_v38  ;;  %v11477_v26 = vld [vmem:[#allocation69_spill] sm:$0xff]  ;;  %v5415_v38 = vpop.permute.xlu2 %5414 }
 0x7e7   : > { %v11479_v34 = vpack.c.bf16 %v11477_v26, %v11478_v16 }
 0x7e8   : > { %5470 = vmatpush.bf16.msra.mxu1 %v11472_v37  ;;  %v5320_v63 = vpop.f32.mrf.mxu2  ;;  %v5394_v54 = vpack.c.bf16 %v5306_v2, %v5304_v1  ;;  %v5395_v47 = vpack.c.bf16 %v5355_v23, %v5353_v14  ;;  %v11499_v14 = vld [vmem:[#allocation74_spill] sm:$0xff] }
 0x7e9   : > { %v5321_v11 = vadd.f32 %v5320_v63, %v10266_v57  ;;  %v11493_v63 = vld [vmem:[#allocation66_spill] sm:$0xff] }
 0x7eb   : > { %5471 = vmatmul.bf16.vlgmr.msra.gmra.mxu1 %v6374_v58  ;;  %v5406_v60 = vpack.c.bf16 %v5321_v11, %v5319_v33 }
 0x7ed   : > { %5482 = vmatpush.bf16.msra.mxu2 %v5406_v60  ;;  %v5369_v55 = vpop.f32.mrf.mxu3 }
 0x7ee   : > { %v5370_v24 = vadd.f32 %v5369_v55, %v10266_v57  ;;  %v5398_v57 = vpack.c.bf16 %v5311_v10, %v5309_v39  ;;  %v5430_v60 = vpop.permute.xlu2 %5429  ;;  %v11495_v10 = vld [vmem:[#allocation31_spill] sm:$0xff]  ;;  %v11496_v39 = vld [vmem:[#allocation24_spill] sm:$0xff] }
 0x7f0   : > { %v5407_v27 = vpack.c.bf16 %v5370_v24, %v5368_v51 }
 0x7f1   : > { %5483 = vmatpush.bf16.msra.mxu2 %v5402_v15 }
 0x7f2   : > { %5501 = vmatpush.bf16.msra.mxu3 %v5407_v27 }
 0x7f5   : > { %5484 = vmatpush.bf16.msra.mxu2 %v5398_v57  ;;  %v11497_v57 = vld [vmem:[#allocation28_spill] sm:$0xff] }
 0x7f6   : > { %5457 = vmatmul.bf16.gmra.mxu0 %v6375_v45  ;;  %5502 = vmatpush.bf16.msra.mxu3 %v5403_v40 }
 0x7f9   : > { %5485 = vmatpush.bf16.msra.mxu2 %v5394_v54 }
 0x7fa   : > { %5503 = vmatpush.bf16.msra.mxu3 %v5399_v36 }
 0x7fb   : > { %5476 = vmatmul.bf16.gmra.mxu1 %v6375_v45 }
 0x7fd   : > { %5486 = vmatpush.bf16.msra.mxu2 %v11473_v50 }
 0x7fe   : > { %5504 = vmatpush.bf16.msra.mxu3 %v5395_v47 }
 0x801   : > { %5487 = vmatpush.bf16.msra.mxu2 %v11474_v17 }
 0x802   : > { %5505 = vmatpush.bf16.msra.mxu3 %v11475_v35  ;;  %v11500_v35 = vld [vmem:[#allocation27_spill] sm:$0xff] }
 0x805   : > { %5488 = vmatpush.bf16.msra.mxu2 %v11476_v18 }
 0x806   : > { %5506 = vmatpush.bf16.msra.mxu3 %v11479_v34  ;;  %v11501_v34 = vld [vmem:[#allocation44_spill] sm:$0xff] }
 0x809   : > { %5489 = vmatpush.bf16.msra.mxu2 %v11482_v8 }
 0x80a   : > { %5507 = vmatpush.bf16.msra.mxu3 %v11485_v3 }
 0x80c   : > { %5490 = vmatmul.bf16.vlgmr.msra.gmra.mxu2 %v6374_v58 }
 0x80e   : > { %5508 = vmatpush.bf16.msra.mxu3 %v11488_v9 }
 0x811   : > { %5509 = vmatmul.bf16.vlgmr.msra.gmra.mxu3 %v6374_v58  ;;  %v5425_v58 = vpop.permute.xlu1 %5424 }
 0x81c   : > { %5495 = vmatmul.bf16.gmra.mxu2 %v6375_v45 }
 0x821   : > { %5514 = vmatmul.bf16.gmra.mxu3 %v6375_v45 }
 0x863   : > { %v5453_v56 = vpop.f32.mrf.mxu0 }
 0x864   : > { %v5454_v61 = vadd.f32 %v5453_v56, %v5415_v38 }
 0x866   : > { %v5520_v25 = vadd.f32 %v5454_v61, %v11489_v19  ;;  %v11504_v61 = vld [vmem:[#allocation82_spill] sm:$0xff] }
 0x868   : > { %5536 = vst [vmem:[%s10523_s29] sm:$0xff] %v5520_v25  ;;  %v5472_v22 = vpop.f32.mrf.mxu1 }
 0x869   : > { %v5473_v42 = vadd.f32 %v5472_v22, %v5415_v38 }
 0x86b   : > { %v5521_v6 = vadd.f32 %v5473_v42, %v11490_v48  ;;  %v5455_v49 = vpop.f32.mrf.mxu0 }
 0x86c   : > { %v5456_v30 = vadd.f32 %v5455_v49, %v5420_v59 }
 0x86d   : > { %5537 = vst [vmem:[%s10523_s29 + $0x8] sm:$0xff] %v5521_v6 }
 0x86e   : > { %v5524_v5 = vadd.f32 %v5456_v30, %v11491_v0 }
 0x870   : > { %5540 = vst [vmem:[%s10523_s29 + $0x20] sm:$0xff] %v5524_v5  ;;  %v5474_v28 = vpop.f32.mrf.mxu1 }
 0x871   : > { %v5475_v32 = vadd.f32 %v5474_v28, %v5420_v59 }
 0x873   : > { %v5525_v29 = vadd.f32 %v5475_v32, %v11492_v62  ;;  %v5458_v12 = vpop.f32.mrf.mxu0 }
 0x874   : > { %v5459_v37 = vadd.f32 %v5458_v12, %v5425_v58 }
 0x875   : > { %5541 = vst [vmem:[%s10523_s29 + $0x28] sm:$0xff] %v5525_v29 }
 0x876   : > { %v5528_v33 = vadd.f32 %v5459_v37, %v11493_v63 }
 0x878   : > { %5544 = vst [vmem:[%s10523_s29 + $0x40] sm:$0xff] %v5528_v33  ;;  %v5477_v11 = vpop.f32.mrf.mxu1 }
 0x879   : > { %v5478_v31 = vadd.f32 %v5477_v11, %v5425_v58 }
 0x87b   : > { %v5529_v55 = vadd.f32 %v5478_v31, %v11494_v41  ;;  %v5460_v51 = vpop.f32.mrf.mxu0 }
 0x87c   : > { %v5461_v24 = vadd.f32 %v5460_v51, %v5430_v60 }
 0x87d   : > { %5545 = vst [vmem:[%s10523_s29 + $0x48] sm:$0xff] %v5529_v55 }
 0x87e   : > { %v5532_v15 = vadd.f32 %v5461_v24, %v11495_v10 }
 0x880   : > { %5548 = vst [vmem:[%s10523_s29 + $0x60] sm:$0xff] %v5532_v15  ;;  %v5479_v7 = vpop.f32.mrf.mxu1 }
 0x881   : > { %v5480_v27 = vadd.f32 %v5479_v7, %v5430_v60 }
 0x883   : > { %v5533_v45 = vadd.f32 %v5480_v27, %v11496_v39 }
 0x885   : > { %5549 = vst [vmem:[%s10523_s29 + $0x68] sm:$0xff] %v5533_v45 }
 0x88f   : > { %v5491_v52 = vpop.f32.mrf.mxu2 }
 0x890   : > { %v5492_v2 = vadd.f32 %v5491_v52, %v5415_v38 }
 0x892   : > { %v5522_v21 = vadd.f32 %v5492_v2, %v11497_v57 }
 0x894   : > { %5538 = vst [vmem:[%s10523_s29 + $0x10] sm:$0xff] %v5522_v21  ;;  %v5510_v40 = vpop.f32.mrf.mxu3 }
 0x895   : > { %v5511_v1 = vadd.f32 %v5510_v40, %v5415_v38 }
 0x897   : > { %v5523_v54 = vadd.f32 %v5511_v1, %v11498_v13  ;;  %v5493_v23 = vpop.f32.mrf.mxu2 }
 0x898   : > { %v5494_v36 = vadd.f32 %v5493_v23, %v5420_v59 }
 0x899   : > { %5539 = vst [vmem:[%s10523_s29 + $0x18] sm:$0xff] %v5523_v54 }
 0x89a   : > { %v5526_v47 = vadd.f32 %v5494_v36, %v11499_v14 }
 0x89c   : > { %5542 = vst [vmem:[%s10523_s29 + $0x30] sm:$0xff] %v5526_v47  ;;  %v5512_v50 = vpop.f32.mrf.mxu3 }
 0x89d   : > { %v5513_v17 = vadd.f32 %v5512_v50, %v5420_v59 }
 0x89f   : > { %v5527_v18 = vadd.f32 %v5513_v17, %v11500_v35  ;;  %v5496_v26 = vpop.f32.mrf.mxu2 }
 0x8a0   : > { %v5497_v16 = vadd.f32 %v5496_v26, %v5425_v58 }
 0x8a1   : > { %5543 = vst [vmem:[%s10523_s29 + $0x38] sm:$0xff] %v5527_v18 }
 0x8a2   : > { %v5530_v4 = vadd.f32 %v5497_v16, %v11501_v34 }
 0x8a4   : > { %5546 = vst [vmem:[%s10523_s29 + $0x50] sm:$0xff] %v5530_v4  ;;  %v5515_v44 = vpop.f32.mrf.mxu3 }
 0x8a5   : > { %v5516_v8 = vadd.f32 %v5515_v44, %v5425_v58 }
 0x8a7   : > { %v5531_v20 = vadd.f32 %v5516_v8, %v11502_v53  ;;  %v5498_v3 = vpop.f32.mrf.mxu2 }
 0x8a8   : > { %v5499_v43 = vadd.f32 %v5498_v3, %v5430_v60 }
 0x8a9   : > { %5547 = vst [vmem:[%s10523_s29 + $0x58] sm:$0xff] %v5531_v20 }
 0x8aa   : > { %v5534_v9 = vadd.f32 %v5499_v43, %v11503_v46 }
 0x8ac   : > { %5550 = vst [vmem:[%s10523_s29 + $0x70] sm:$0xff] %v5534_v9  ;;  %v5517_v38 = vpop.f32.mrf.mxu3 }
 0x8ad   : > { %v5518_v56 = vadd.f32 %v5517_v38, %v5430_v60 }
 0x8af   : > { %v5535_v19 = vadd.f32 %v5518_v56, %v11504_v61 }
 0x8b1   : > { %5551 = vst [vmem:[%s10523_s29 + $0x78] sm:$0xff] %v5535_v19 }
 0x8b2   : > { %6577 = shalt.err (!%p6574_p5)
}
 0x8b3   : > { %s6631_s27 = smov 512   ;;  %s6632_s29 = smov 32  }
 0x8b4   : > { %6377 = dma.vmem_to_hbm [thread:$0]  (%p6738_p4), %s5568_s0, 2048, %s5570_s19, %s5553_s24, %s6631_s27, %s6631_s27, %s6632_s29  }
 0x8b5 PF: > { %p6383_p6 = scmp.ge.s32.totalorder %s6628_s26, 2  ;;  %s5584_s30 = sand.u32 1, %s6608_s21  }
 0x8b6   : > { %s5585_s1 = scalar_lea.sflag [#allocation3], %s5584_s30 }
 0x8b7   : > { %p6380_p7 = pnand %p6383_p6, %p6745_p8 }
 0x8b9   : > { %p6381_p9 = pneg %p6380_p7 }
 0x8bb   : > { %6603 = dma.done.wait (%p6381_p9), %s5585_s1, 2048  }
 0x8bc   : > { %6605 = vsyncadd (%p6381_p9), %s5585_s1, 4294965248  ;;  %s25_s26 = sadd.s32 1, %s6628_s26   ;;  %s11505_s13 = sld [smem:[#allocation5_spill]] }
 0x8bd   : > { %p22_p10 = scmp.ge.s32.totalorder %s25_s26, 4   ;;  %s11506_s21 = smov %s6612_s22 }
 0x8be   : > { %s11507_s22 = smov %s6616_s23  ;;  %s11508_s23 = smov %s6751_s16 }
 0x8bf   : > { %s11509_s24 = smov %s6624_s25  ;;  %24 = sbr.rel (!%p22_p10) target bundleno = 7 (0x7), region = 103 }
 0x8c2   : > { %s11510_s25 = smov %s11505_s13 }
 0x8c4   :  { %5591 = vsyncpa [#allocation3], 1 }
 0x8c5   :  { %5593 = vsyncpa [#allocation3 + $0x1], 1 }

</bundles_post_ra>
